<compile_context>
chip_gen: v5e
topology: v5e:2x2
jax: 0.10.0
libtpu: 0.0.40
codegen_flags: <defaults>
</compile_context>

<pallas_src>
import functools

import numpy as np
import jax
import jax.numpy as jnp
from jax.experimental import pallas as pl
from jax.experimental.pallas import tpu as pltpu


# ----------------------------- reference glue (plain JAX) -------------------

def positional_encoding(positions, freqs):
    """Matches the torch reference: (..., C) -> (..., 2*freqs*C)."""
    freq_bands = 2.0 ** jnp.arange(freqs, dtype=jnp.float32)          # (F,)
    pts = positions[..., None] * freq_bands                            # (..., C, F)
    pts = pts.reshape(positions.shape[:-1] + (freqs * positions.shape[-1],))
    return jnp.concatenate([jnp.sin(pts), jnp.cos(pts)], axis=-1)


# ----------------------------- Pallas kernel --------------------------------

def _mlp_kernel(xy_ref, w1_ref, w2_ref, b2_ref, w3_ref, b3_ref, o_ref, *, fmax):
    """Channels-first fused PE + 3-layer MLP + sigmoid.

    xy_ref : (CH, T)  f32  raw [features ; viewdirs ; 0-pad ; ones], rays on lanes
    w1_ref : (D, K)   bf16 fused layer-1 weight, K = CH*(1+2*fmax); bias folded
                      into the ones-row column
    w2_ref : (D, D)   bf16 ; b2_ref : (D, 1) f32
    w3_ref : (8, D)   bf16 (rows 3..7 zero) ; b3_ref : (8, 1) f32
    o_ref  : (3, T)   f32
    """
    f32 = jnp.float32
    bf16 = jnp.bfloat16

    xy = xy_ref[...]                                       # (CH, T) f32

    pieces = [xy]
    if fmax > 0:
        # Base frequency on the EUP, higher frequencies via the exact
        # double-angle recurrence on the VPU (sin2x = 2sc, cos2x = 1 - 2s^2).
        s = jnp.sin(xy)
        c = jnp.cos(xy)
        sins, coss = [s], [c]
        for _ in range(fmax - 1):
            s2 = s + s
            s, c = s2 * c, 1.0 - s2 * s                    # uses old (s, c) on RHS
            sins.append(s)
            coss.append(c)
        pieces = pieces + sins + coss

    # One K-wide layer-1 operand: 8-row-aligned pieces -> clean sublane concat.
    x_in = jnp.concatenate(pieces, axis=0).astype(bf16)    # (K, T)

    # Layer 1 (bias folded into the constant-1 row of xy / w1 column).
    h1 = jnp.dot(w1_ref[...], x_in, preferred_element_type=f32)       # (D, T)
    h1 = jnp.maximum(h1, 0.0).astype(bf16)

    # Layer 2
    h2 = jnp.dot(w2_ref[...], h1, preferred_element_type=f32) + b2_ref[...]
    h2 = jnp.maximum(h2, 0.0).astype(bf16)

    # Layer 3 (output rows padded to 8) + sigmoid on the 3 real rows only.
    rgb = jnp.dot(w3_ref[...], h2, preferred_element_type=f32) + b3_ref[...]  # (8, T)
    o_ref[...] = jax.nn.sigmoid(rgb[:3, :]).astype(o_ref.dtype)


@functools.partial(jax.jit, static_argnames=("ch_pad", "fmax", "tile_n"))
def mlp_render_fea_pallas(features, viewdirs, kparams, *, ch_pad, fmax, tile_n=8192):
    """Fused PE + MLP + sigmoid on (N, C) features and (N, 3) viewdirs."""
    assert tile_n % 128 == 0
    w1k, w2t, b2, w3t, b3 = kparams

    n, c_in = features.shape
    f32 = jnp.float32

    # Build the (ch_pad, N) channels-first view: [features ; viewdirs ; zeros ; ones].
    cols = [features.astype(f32), viewdirs.astype(f32)]
    spare = ch_pad - (c_in + 3) - 1
    if spare > 0:
        cols.append(jnp.zeros((n, spare), f32))
    cols.append(jnp.ones((n, 1), f32))                      # bias-folding row
    xyT = jnp.concatenate(cols, axis=-1).T                  # (ch_pad, n)

    # Tile selection: as large as possible, but always >= 2 grid steps so the
    # "parallel" axis can feed both TensorCores on v7x.
    half = ((n + 1) // 2 + 127) // 128 * 128
    tile = max(128, min(tile_n, half))
    pad = (-n) % tile
    if pad:
        xyT = jnp.pad(xyT, ((0, 0), (0, pad)))
    n_tot = n + pad
    grid = (n_tot // tile,)

    def resident(a):  # whole array, constant block -> stays in VMEM
        return pl.BlockSpec(a.shape, lambda i, _nd=a.ndim: (0,) * _nd)

    out = pl.pallas_call(
        functools.partial(_mlp_kernel, fmax=fmax),
        out_shape=jax.ShapeDtypeStruct((3, n_tot), jnp.float32),
        grid=grid,
        in_specs=[
            pl.BlockSpec((ch_pad, tile), lambda i: (0, i)),  # ray tile (lane-dense)
            resident(w1k), resident(w2t), resident(b2),
            resident(w3t), resident(b3),
        ],
        out_specs=pl.BlockSpec((3, tile), lambda i: (0, i)),
        compiler_params=pltpu.CompilerParams(
            dimension_semantics=("parallel",),              # megacore-shardable
            vmem_limit_bytes=48 * 1024 * 1024,              # < 64 MiB v7x VMEM
        ),
    )(xyT, w1k, w2t, b2, w3t, b3)

    # Module semantics: (N, 3).  (3, N) lane-dense output is available pre-.T.
    return out[:, :n].T


# ----------------------------- module wrapper --------------------------------

class MLPRenderFea:
    """JAX port of MLPRender_Fea; parameters initialized deterministically."""

    def __init__(self, in_chanel, viewpe=6, feape=6, feature_c=128, key=None):
        self.in_chanel = in_chanel
        self.viewpe = viewpe
        self.feape = feape
        self.feature_c = feature_c
        self.in_mlpC = 2 * viewpe * 3 + 2 * feape * in_chanel + 3 + in_chanel

        self.fmax = max(viewpe, feape)
        # raw channels + >= 1 spare row for the constant-1 (bias) row, 8-aligned
        self.ch_pad = ((in_chanel + 4 + 7) // 8) * 8

        if key is None:
            key = jax.random.PRNGKey(0)
        ks = jax.random.split(key, 6)

        def linear_init(kw, kb, fan_in, fan_out, zero_bias=False):
            bound = 1.0 / (fan_in ** 0.5)
            # stored as (in, out) so the reference does x @ W
            w = jax.random.uniform(kw, (fan_in, fan_out), jnp.float32, -bound, bound)
            if zero_bias:
                b = jnp.zeros((1, fan_out), jnp.float32)
            else:
                b = jax.random.uniform(kb, (1, fan_out), jnp.float32, -bound, bound)
            return w, b

        w1, b1 = linear_init(ks[0], ks[1], self.in_mlpC, feature_c)
        w2, b2 = linear_init(ks[2], ks[3], feature_c, feature_c)
        w3, b3 = linear_init(ks[4], ks[5], feature_c, 3, zero_bias=True)  # bias = 0
        self.params = (w1, b1, w2, b2, w3, b3)
        self.kernel_params = self._prepare_kernel_params()

    def _prepare_kernel_params(self):
        """Repack f32 (in, out) weights into the fused channels-first layout."""
        w1, b1, w2, b2, w3, b3 = (np.asarray(p, np.float32) for p in self.params)
        C, Fe, Fv, D = self.in_chanel, self.feape, self.viewpe, self.feature_c
        fmax, ch = self.fmax, self.ch_pad
        K = ch * (1 + 2 * fmax) if fmax > 0 else ch

        w1k = np.zeros((D, K), np.float32)
        # raw passthrough: reference rows [features(C), viewdirs(3)] -> cols 0..C+2
        w1k[:, :C + 3] = w1[:C + 3].T
        # layer-1 bias folded into the constant-1 row's column
        w1k[:, ch - 1] = b1.reshape(-1)

        o = C + 3
        if Fe > 0:
            sinF = w1[o:o + C * Fe]; o += C * Fe
            cosF = w1[o:o + C * Fe]; o += C * Fe
            for c in range(C):
                for f in range(Fe):
                    w1k[:, ch * (1 + f) + c] = sinF[c * Fe + f]
                    w1k[:, ch * (1 + fmax + f) + c] = cosF[c * Fe + f]
        if Fv > 0:
            sinV = w1[o:o + 3 * Fv]; o += 3 * Fv
            cosV = w1[o:o + 3 * Fv]; o += 3 * Fv
            for c in range(3):
                for f in range(Fv):
                    w1k[:, ch * (1 + f) + C + c] = sinV[c * Fv + f]
                    w1k[:, ch * (1 + fmax + f) + C + c] = cosV[c * Fv + f]
        assert o == self.in_mlpC

        w3k = np.zeros((8, D), np.float32)
        w3k[:3] = w3.T
        b3k = np.zeros((8, 1), np.float32)
        b3k[:3, 0] = b3.reshape(-1)

        bf = jnp.bfloat16
        return (
            jnp.asarray(w1k, dtype=bf),                    # (D, K)  bf16
            jnp.asarray(w2.T, dtype=bf),                   # (D, D)  bf16
            jnp.asarray(b2.reshape(D, 1)),                 # (D, 1)  f32
            jnp.asarray(w3k, dtype=bf),                    # (8, D)  bf16
            jnp.asarray(b3k),                              # (8, 1)  f32
        )

    def __call__(self, pts, viewdirs, features):
        # pts is unused by the reference forward pass as well.
        return mlp_render_fea_pallas(features, viewdirs, self.kernel_params,
                                     ch_pad=self.ch_pad, fmax=self.fmax)

    # pure-f32 JAX reference (mirrors the torch forward) for correctness checks
    def reference(self, pts, viewdirs, features):
        indata = [features, viewdirs]
        if self.feape > 0:
            indata.append(positional_encoding(features, self.feape))
        if self.viewpe > 0:
            indata.append(positional_encoding(viewdirs, self.viewpe))
        x = jnp.concatenate(indata, axis=-1)
        w1, b1, w2, b2, w3, b3 = self.params
        h1 = jnp.maximum(x @ w1 + b1, 0.0)
        h2 = jnp.maximum(h1 @ w2 + b2, 0.0)
        return jax.nn.sigmoid(h2 @ w3 + b3)


# ----------------------------------- main ------------------------------------

if __name__ == "__main__":
    key = jax.random.PRNGKey(0)
    k_feat, k_view, k_param = jax.random.split(key, 3)

    N = 4000          # rays -> tile 2048, grid of 2 parallel steps, 96 pad rays
    IN_CHANEL = 4     # appearance feature channels

    features = jax.random.normal(k_feat, (N, IN_CHANEL), jnp.float32)
    viewdirs = jax.random.normal(k_view, (N, 3), jnp.float32)
    viewdirs = viewdirs / jnp.linalg.norm(viewdirs, axis=-1, keepdims=True)
    pts = jnp.zeros((N, 3), jnp.float32)   # unused, as in torch

    model = MLPRenderFea(IN_CHANEL, viewpe=6, feape=6, feature_c=128, key=k_param)

    rgb = jax.block_until_ready(model(pts, viewdirs, features))
    rgb_ref = jax.block_until_ready(model.reference(pts, viewdirs, features))

    assert rgb.shape == (N, 3)
    err = float(jnp.max(jnp.abs(rgb - rgb_ref)))
    # bf16-MXU kernel vs f32 reference: tolerance loosened as expected.
    assert err < 2e-2, f"mismatch vs reference: max abs err {err}"
    print("KERNEL_OK")
</pallas_src>

<mosaic_0001>
module attributes {stable_mosaic.version = 11 : i64} {
  func.func @_mlp_kernel(%arg0: i32, %arg1: memref<8x2048xf32, #tpu.memory_space<vmem>>, %arg2: memref<128x104xbf16, #tpu.memory_space<vmem>>, %arg3: memref<128x128xbf16, #tpu.memory_space<vmem>>, %arg4: memref<128x1xf32, #tpu.memory_space<vmem>>, %arg5: memref<8x128xbf16, #tpu.memory_space<vmem>>, %arg6: memref<8x1xf32, #tpu.memory_space<vmem>>, %arg7: memref<3x2048xf32, #tpu.memory_space<vmem>>) attributes {dimension_semantics = [#tpu.dimension_semantics<parallel>], iteration_bounds = array<i64: 2>, scalar_prefetch = 0 : i64, scratch_operands = 0 : i64, tpu.core_type = #tpu.core_type<tc>, window_params = [{transform_indices = @transform_0, window_bounds = array<i64: 8, 2048>}, {pipeline_mode = #tpu.pipeline_mode<synchronous>, transform_indices = @transform_1, window_bounds = array<i64: 128, 104>}, {pipeline_mode = #tpu.pipeline_mode<synchronous>, transform_indices = @transform_2, window_bounds = array<i64: 128, 128>}, {pipeline_mode = #tpu.pipeline_mode<synchronous>, transform_indices = @transform_3, window_bounds = array<i64: 128, 1>}, {pipeline_mode = #tpu.pipeline_mode<synchronous>, transform_indices = @transform_4, window_bounds = array<i64: 8, 128>}, {pipeline_mode = #tpu.pipeline_mode<synchronous>, transform_indices = @transform_5, window_bounds = array<i64: 8, 1>}, {transform_indices = @transform_6, window_bounds = array<i64: 3, 2048>}]} {
    %c0 = arith.constant 0 : index
    %c0_0 = arith.constant 0 : index
    %0 = vector.load %arg1[%c0, %c0_0] : memref<8x2048xf32, #tpu.memory_space<vmem>>, vector<8x2048xf32>
    %1 = math.sin %0 : vector<8x2048xf32>
    %2 = math.cos %0 : vector<8x2048xf32>
    %3 = arith.addf %1, %1 : vector<8x2048xf32>
    %4 = arith.mulf %3, %2 : vector<8x2048xf32>
    %5 = arith.mulf %3, %1 : vector<8x2048xf32>
    %cst = arith.constant 1.000000e+00 : f32
    %6 = vector.broadcast %cst : f32 to vector<8x2048xf32>
    %7 = arith.subf %6, %5 : vector<8x2048xf32>
    %8 = arith.addf %4, %4 : vector<8x2048xf32>
    %9 = arith.mulf %8, %7 : vector<8x2048xf32>
    %10 = arith.mulf %8, %4 : vector<8x2048xf32>
    %cst_1 = arith.constant 1.000000e+00 : f32
    %11 = vector.broadcast %cst_1 : f32 to vector<8x2048xf32>
    %12 = arith.subf %11, %10 : vector<8x2048xf32>
    %13 = arith.addf %9, %9 : vector<8x2048xf32>
    %14 = arith.mulf %13, %12 : vector<8x2048xf32>
    %15 = arith.mulf %13, %9 : vector<8x2048xf32>
    %cst_2 = arith.constant 1.000000e+00 : f32
    %16 = vector.broadcast %cst_2 : f32 to vector<8x2048xf32>
    %17 = arith.subf %16, %15 : vector<8x2048xf32>
    %18 = arith.addf %14, %14 : vector<8x2048xf32>
    %19 = arith.mulf %18, %17 : vector<8x2048xf32>
    %20 = arith.mulf %18, %14 : vector<8x2048xf32>
    %cst_3 = arith.constant 1.000000e+00 : f32
    %21 = vector.broadcast %cst_3 : f32 to vector<8x2048xf32>
    %22 = arith.subf %21, %20 : vector<8x2048xf32>
    %23 = arith.addf %19, %19 : vector<8x2048xf32>
    %24 = arith.mulf %23, %22 : vector<8x2048xf32>
    %25 = arith.mulf %23, %19 : vector<8x2048xf32>
    %cst_4 = arith.constant 1.000000e+00 : f32
    %26 = vector.broadcast %cst_4 : f32 to vector<8x2048xf32>
    %27 = arith.subf %26, %25 : vector<8x2048xf32>
    %28 = tpu.concatenate %0, %1, %4, %9, %14, %19, %24, %2, %7, %12, %17, %22, %27 in 0 : vector<8x2048xf32>, vector<8x2048xf32>, vector<8x2048xf32>, vector<8x2048xf32>, vector<8x2048xf32>, vector<8x2048xf32>, vector<8x2048xf32>, vector<8x2048xf32>, vector<8x2048xf32>, vector<8x2048xf32>, vector<8x2048xf32>, vector<8x2048xf32>, vector<8x2048xf32> -> vector<104x2048xf32>
    %29 = arith.truncf %28 : vector<104x2048xf32> to vector<104x2048xbf16>
    %c0_5 = arith.constant 0 : index
    %c0_6 = arith.constant 0 : index
    %30 = vector.load %arg2[%c0_5, %c0_6] : memref<128x104xbf16, #tpu.memory_space<vmem>>, vector<128x104xbf16>
    %cst_7 = arith.constant dense<0.000000e+00> : vector<128x2048xf32>
    %31 = tpu.matmul %30, %29, %cst_7 {dimension_numbers = #tpu.dot_dimension_numbers<[1], [0], [0], [1], [0, 0, 1, 1], [], []>} : vector<128x104xbf16>, vector<104x2048xbf16>, vector<128x2048xf32> -> vector<128x2048xf32>
    %cst_8 = arith.constant 0.000000e+00 : f32
    %32 = vector.broadcast %cst_8 : f32 to vector<128x2048xf32>
    %33 = arith.maximumf %31, %32 : vector<128x2048xf32>
    %34 = arith.truncf %33 : vector<128x2048xf32> to vector<128x2048xbf16>
    %c0_9 = arith.constant 0 : index
    %c0_10 = arith.constant 0 : index
    %35 = vector.load %arg3[%c0_9, %c0_10] : memref<128x128xbf16, #tpu.memory_space<vmem>>, vector<128x128xbf16>
    %cst_11 = arith.constant dense<0.000000e+00> : vector<128x2048xf32>
    %36 = tpu.matmul %35, %34, %cst_11 {dimension_numbers = #tpu.dot_dimension_numbers<[1], [0], [0], [1], [0, 0, 1, 1], [], []>} : vector<128x128xbf16>, vector<128x2048xbf16>, vector<128x2048xf32> -> vector<128x2048xf32>
    %c0_12 = arith.constant 0 : index
    %c0_13 = arith.constant 0 : index
    %37 = vector.load %arg4[%c0_12, %c0_13] : memref<128x1xf32, #tpu.memory_space<vmem>>, vector<128x1xf32>
    %38 = vector.broadcast %37 : vector<128x1xf32> to vector<128x2048xf32>
    %39 = arith.addf %36, %38 : vector<128x2048xf32>
    %cst_14 = arith.constant 0.000000e+00 : f32
    %40 = vector.broadcast %cst_14 : f32 to vector<128x2048xf32>
    %41 = arith.maximumf %39, %40 : vector<128x2048xf32>
    %42 = arith.truncf %41 : vector<128x2048xf32> to vector<128x2048xbf16>
    %c0_15 = arith.constant 0 : index
    %c0_16 = arith.constant 0 : index
    %43 = vector.load %arg5[%c0_15, %c0_16] : memref<8x128xbf16, #tpu.memory_space<vmem>>, vector<8x128xbf16>
    %cst_17 = arith.constant dense<0.000000e+00> : vector<8x2048xf32>
    %44 = tpu.matmul %43, %42, %cst_17 {dimension_numbers = #tpu.dot_dimension_numbers<[1], [0], [0], [1], [0, 0, 1, 1], [], []>} : vector<8x128xbf16>, vector<128x2048xbf16>, vector<8x2048xf32> -> vector<8x2048xf32>
    %c0_18 = arith.constant 0 : index
    %c0_19 = arith.constant 0 : index
    %45 = vector.load %arg6[%c0_18, %c0_19] : memref<8x1xf32, #tpu.memory_space<vmem>>, vector<8x1xf32>
    %46 = vector.broadcast %45 : vector<8x1xf32> to vector<8x2048xf32>
    %47 = arith.addf %44, %46 : vector<8x2048xf32>
    %48 = vector.extract_strided_slice %47 {offsets = [0, 0], sizes = [3, 2048], strides = [1, 1]} : vector<8x2048xf32> to vector<3x2048xf32>
    %49 = arith.negf %48 : vector<3x2048xf32>
    %50 = math.exp %49 : vector<3x2048xf32>
    %cst_20 = arith.constant 1.000000e+00 : f32
    %51 = vector.broadcast %cst_20 : f32 to vector<3x2048xf32>
    %52 = arith.addf %51, %50 : vector<3x2048xf32>
    %53 = arith.divf %51, %52 : vector<3x2048xf32>
    %c0_21 = arith.constant 0 : index
    %c0_22 = arith.constant 0 : index
    %54 = vector.load %arg7[%c0_21, %c0_22] : memref<3x2048xf32, #tpu.memory_space<vmem>>, vector<3x2048xf32>
    tpu.vector_store %arg7[%c0_21, %c0_22], %53 {strides = array<i32>} : memref<3x2048xf32, #tpu.memory_space<vmem>>, vector<3x2048xf32>,
    return
  }
  func.func @transform_0(%arg0: i32) -> (i32, i32) {
    %c0_i32 = arith.constant 0 : i32
    %c0_i32_0 = arith.constant 0 : i32
    return %c0_i32, %arg0 : i32, i32
  }
  func.func @transform_1(%arg0: i32) -> (i32, i32) {
    %c0_i32 = arith.constant 0 : i32
    %c0_i32_0 = arith.constant 0 : i32
    %c0_i32_1 = arith.constant 0 : i32
    return %c0_i32, %c0_i32_0 : i32, i32
  }
  func.func @transform_2(%arg0: i32) -> (i32, i32) {
    %c0_i32 = arith.constant 0 : i32
    %c0_i32_0 = arith.constant 0 : i32
    %c0_i32_1 = arith.constant 0 : i32
    return %c0_i32, %c0_i32_0 : i32, i32
  }
  func.func @transform_3(%arg0: i32) -> (i32, i32) {
    %c0_i32 = arith.constant 0 : i32
    %c0_i32_0 = arith.constant 0 : i32
    %c0_i32_1 = arith.constant 0 : i32
    return %c0_i32, %c0_i32_0 : i32, i32
  }
  func.func @transform_4(%arg0: i32) -> (i32, i32) {
    %c0_i32 = arith.constant 0 : i32
    %c0_i32_0 = arith.constant 0 : i32
    %c0_i32_1 = arith.constant 0 : i32
    return %c0_i32, %c0_i32_0 : i32, i32
  }
  func.func @transform_5(%arg0: i32) -> (i32, i32) {
    %c0_i32 = arith.constant 0 : i32
    %c0_i32_0 = arith.constant 0 : i32
    %c0_i32_1 = arith.constant 0 : i32
    return %c0_i32, %c0_i32_0 : i32, i32
  }
  func.func @transform_6(%arg0: i32) -> (i32, i32) {
    %c0_i32 = arith.constant 0 : i32
    %c0_i32_0 = arith.constant 0 : i32
    return %c0_i32, %arg0 : i32, i32
  }
}

</mosaic_0001>

<bundles_post_ra>
// kernel: mlp_render_fea_pallas.1
= control target key start
LH: loop header
LB: loop body
LE: loop exit
PB: predicated region body
PF: predicated region fallthrough
CT: control target
= control target key end

     0   :  { %s9406_s21 = smov 0   ;;  %s14433_s0 = inlined_call_operand.vmem [shape: f32[8,4096], index: 0, kind: input, shape index: {}]   ;;  %s14434_s1 = inlined_call_operand.vmem [shape: bf16[128,104], index: 1, kind: input, shape index: {}]   ;;  %s14435_s2 = inlined_call_operand.vmem [shape: bf16[128,128], index: 2, kind: input, shape index: {}]   ;;  %s14436_s3 = inlined_call_operand.vmem [shape: f32[128,1], index: 3, kind: input, shape index: {}]   ;;  %s14437_s4 = inlined_call_operand.vmem [shape: bf16[8,128], index: 4, kind: input, shape index: {}]   ;;  %s14438_s5 = inlined_call_operand.vmem [shape: f32[8,1], index: 5, kind: input, shape index: {}]   ;;  %s14439_s6 = inlined_call_operand.vmem [shape: f32[3,4096], index: 6, kind: output, shape index: {}]  }
   0x1 LB: > { %s8897_s22 = sadd.s32 4294967295, %s9362_s21   ;;  %p8901_p0 = scmp.ge.s32.totalorder %s9362_s21, 1  ;;  %s9362_s21 = sphi %s9406_s21, %s16_s21  }
   0x2   : > { %p213_p1 = scmp.lt.s32.totalorder %s9362_s21, 3 }
   0x4   : > { %p214_p2 = pnand %p8901_p0, %p213_p1 }
   0x6   : > { %217 = sbr.rel (%p214_p2) target bundleno = 1962 (0x7aa), region = 44 }
   0xb   : > { %s8902_s23 = sshll.u32 %s8897_s22, 4  ;;  %v14463_v0 = vmov 0   ;;  %v14450_v29 = vmov 683565275   ;;  %v14448_v31 = vmov 2475754826  }
   0xc   : > { %p244_p3 = scmp.lt.s32.totalorder %s8902_s23, 31  ;;  %9243 = vset.pattern.permute.xlu0 %v14463_v0  ;;  %9244 = vset.pattern.permute.xlu1 %v14463_v0  ;;  %v14446_v33 = vmov 2131351028   ;;  %v14444_v35 = vmov 2102212464  }
   0xd   : > { %9245 = vset.pattern.permute.xlu2 %v14463_v0  ;;  %v14442_v37 = vmov 920167782   ;;  %v14440_v46 = vmov 1326507024  }
   0xe   : > { %s14880_s23 = smov (!%p244_p3, %s8902_s23), 31 }
   0xf   : > { %s8903_s24 = sshll.u32 %s14880_s23, 3  ;;  %s8905_s17 = sshll.u32 %s14880_s23, 2 }
  0x10   : > { %s9422_s27 = scalar_lea.vmem %s14433_s0, %s8903_s24  ;;  %s14283_s19 = scalar_lea.vmem %s14439_s6, %s8905_s17 }
  0x11   : > { %v9426_v1 = vld [vmem:[%s9422_s27] sm:$0xff]  ;;  %v9429_v2 = vld [vmem:[%s9422_s27 + $0x8] sm:$0xff]  ;;  %v9432_v3 = vld [vmem:[%s9422_s27 + $0x10] sm:$0xff] }
  0x12   : > { %v272_v4 = vand.u32 2147483647, %v9426_v1  ;;  %v275_v5 = vand.u32 2139095040, %v9426_v1  ;;  %v427_v6 = vand.u32 2147483647, %v9429_v2  ;;  %v430_v7 = vand.u32 2139095040, %v9429_v2 }
  0x13   : > { %v585_v8 = vand.u32 2139095040, %v9432_v3 }
  0x14   : > { %v276_v9 = vshrl.u32 %v275_v5, 23  ;;  %v279_v10 = vand.u32 8388607, %v272_v4  ;;  %v431_v11 = vshrl.u32 %v430_v7, 23  ;;  %v434_v12 = vand.u32 8388607, %v427_v6 }
  0x15   : > { %v586_v16 = vshrl.u32 %v585_v8, 23 }
  0x16   : > { %v8906_v13 = vadd.s32 4294967169, %v276_v9  ;;  %v280_v14 = vor.u32 8388608, %v279_v10  ;;  %v8909_v15 = vadd.s32 4294967169, %v431_v11  ;;  %v435_v18 = vor.u32 8388608, %v434_v12 }
  0x17   : > { %v8912_v22 = vadd.s32 4294967169, %v586_v16 }
  0x18   : > { %v282_v17 = vadd.s32 1, %v8906_v13  ;;  %v437_v19 = vadd.s32 1, %v8909_v15  ;;  %v9443_v21 = vshll.u32 %v280_v14, 8  ;;  %v9449_v27 = vshll.u32 %v435_v18, 8 }
  0x19   : > { %v9457_v40 = vadd.s32 1, %v8912_v22 }
  0x1a   : > { %vm283_vm0 = vcmp.gt.s32.totalorder %v282_v17, 0  ;;  %vm438_vm1 = vcmp.gt.s32.totalorder %v437_v19, 0  ;;  %v321_v39 = vand.u32 65535, %v9443_v21  ;;  %v322_v44 = vshrl.u32 %v9443_v21, 16 }
  0x1b   : > { %v284_v20 = vsel %vm283_vm0, %v282_v17, 0  ;;  %v439_v24 = vsel %vm438_vm1, %v437_v19, 0  ;;  %vm593_vm15 = vcmp.gt.s32.totalorder %v9457_v40, 0 }
  0x1c   : > { %v286_v23 = vand.u32 31, %v284_v20  ;;  %v9445_v25 = vshrl.u32 %v284_v20, 5  ;;  %v9447_v26 = vand.u32 31, %v439_v24  ;;  %v9477_v57 = vshrl.u32 %v439_v24, 5 }
  0x1e   : > { %v287_v28 = vsub.s32 32, %v286_v23  ;;  %v289_v30 = vshll.u32 %v14450_v29, %v286_v23  ;;  %v292_v32 = vshll.u32 %v14448_v31, %v286_v23  ;;  %v295_v34 = vshll.u32 %v14446_v33, %v286_v23 }
  0x1f   : > { %v298_v36 = vshll.u32 %v14444_v35, %v286_v23  ;;  %v301_v38 = vshll.u32 %v14442_v37, %v286_v23  ;;  %vm304_vm2 = vcmp.lt.s32.totalorder %v9445_v25, 1  ;;  %vm307_vm3 = vcmp.lt.s32.totalorder %v9445_v25, 4 }
  0x20   : > { %v290_v41 = vshrl.u32 %v14448_v31, %v287_v28  ;;  %v293_v42 = vshrl.u32 %v14446_v33, %v287_v28  ;;  %v296_v43 = vshrl.u32 %v14444_v35, %v287_v28  ;;  %v299_v45 = vshrl.u32 %v14442_v37, %v287_v28 }
  0x21   : > { %v302_v47 = vshrl.u32 %v14440_v46, %v287_v28  ;;  %v9468_v51 = vsub.s32 32, %v9447_v26  ;;  %v288_v52 = vshrl.u32 %v14450_v29, %v287_v28  ;;  %vm306_vm4 = vcmp.lt.s32.totalorder %v9445_v25, 3 }
  0x22   : > { %v291_v48 = vor.u32 %v290_v41, %v289_v30  ;;  %v294_v49 = vor.u32 %v293_v42, %v292_v32  ;;  %v297_v50 = vor.u32 %v296_v43, %v295_v34  ;;  %v300_v53 = vor.u32 %v299_v45, %v298_v36 }
  0x23   : > { %v303_v54 = vor.u32 %v302_v47, %v301_v38  ;;  %vm305_vm5 = vcmp.lt.s32.totalorder %v9445_v25, 2  ;;  %v444_v60 = vshll.u32 %v14450_v29, %v9447_v26  ;;  %v447_v61 = vshll.u32 %v14448_v31, %v9447_v26 }
  0x24   : > { %v312_v55 = vsel %vm304_vm2, %v291_v48, %v294_v49  ;;  %v316_v56 = vsel %vm304_vm2, %v294_v49, %v297_v50  ;;  %v313_v58 = vsel %vm307_vm3, %v300_v53, 920167782  ;;  %v309_v62 = vsel %vm307_vm3, %v297_v50, 2102212464 }
  0x25   : > { %v317_v59 = vsel %vm307_vm3, %v303_v54, 1326507024  ;;  %v314_v63 = vsel %vm306_vm4, %v297_v50, %v313_v58  ;;  %v445_v7 = vshrl.u32 %v14448_v31, %v9468_v51  ;;  %v308_v8 = vsel %vm304_vm2, %v288_v52, %v291_v48 }
  0x26   : > { %v318_v5 = vsel %vm306_vm4, %v300_v53, %v317_v59  ;;  %v315_v9 = vsel %vm305_vm5, %v312_v55, %v314_v63  ;;  %v448_v11 = vshrl.u32 %v14446_v33, %v9468_v51  ;;  %v310_v16 = vsel %vm306_vm4, %v294_v49, %v309_v62 }
  0x27   : > { %v319_v10 = vsel %vm305_vm5, %v316_v56, %v318_v5  ;;  %v345_v14 = vand.u32 65535, %v315_v9  ;;  %v346_v15 = vshrl.u32 %v315_v9, 16  ;;  %v9505_v17 = vor.u32 %v445_v7, %v444_v60 }
  0x28   : > { %v323_v12 = vand.u32 65535, %v319_v10  ;;  %v324_v13 = vshrl.u32 %v319_v10, 16  ;;  %v9507_v18 = vor.u32 %v448_v11, %v447_v61  ;;  %v450_v19 = vshll.u32 %v14446_v33, %v9447_v26 }
  0x29   : > { %v451_v24 = vshrl.u32 %v14444_v35, %v9468_v51  ;;  %v347_v30 = vmul.u32 %v345_v14, %v321_v39  ;;  %v348_v32 = vmul.u32 %v346_v15, %v321_v39  ;;  %v349_v34 = vmul.u32 %v345_v14, %v322_v44 }
  0x2a   : > { %v325_v20 = vmul.u32 %v323_v12, %v321_v39  ;;  %v326_v22 = vmul.u32 %v324_v13, %v321_v39  ;;  %v327_v23 = vmul.u32 %v323_v12, %v322_v44  ;;  %v328_v28 = vmul.u32 %v324_v13, %v322_v44 }
  0x2b   : > { %v350_v42 = vmul.u32 %v346_v15, %v322_v44  ;;  %v351_v45 = vshll.u32 %v348_v32, 16  ;;  %v352_v47 = vshrl.u32 %v348_v32, 16  ;;  %v353_v48 = vshll.u32 %v349_v34, 16 }
  0x2c   : > { %v329_v36 = vshll.u32 %v326_v22, 16  ;;  %v330_v38 = vshrl.u32 %v326_v22, 16  ;;  %v331_v41 = vshll.u32 %v327_v23, 16  ;;  %v332_v43 = vshrl.u32 %v327_v23, 16 }
  0x2d   : > { %v354_v50 = vshrl.u32 %v349_v34, 16  ;;  %v453_v52 = vshll.u32 %v14444_v35, %v9447_v26  ;;  %vm355_vm7 = vc.u32 %v347_v30, %v351_v45  ;;  %v357_v54 = vadd.s32 %v351_v45, %v347_v30 }
  0x2e   : > { %vm333_vm6 = vc.u32 %v325_v20, %v329_v36  ;;  %v335_v49 = vadd.s32 %v329_v36, %v325_v20  ;;  %v454_v39 = vshrl.u32 %v14442_v37, %v9468_v51  ;;  %v356_v44 = vsel %vm355_vm7, 1, %v14463_v0 }
  0x2f   : > { %v334_v53 = vsel %vm333_vm6, 1, %v14463_v0  ;;  %v456_v56 = vshll.u32 %v14442_v37, %v9447_v26  ;;  %v358_v59 = vadd.s32 %v356_v44, %v350_v42  ;;  %vm359_vm9 = vc.u32 %v357_v54, %v353_v48 }
  0x30   : > { %v336_v55 = vadd.s32 %v334_v53, %v328_v28  ;;  %vm337_vm8 = vc.u32 %v335_v49, %v331_v41  ;;  %v452_v60 = vor.u32 %v451_v24, %v450_v19  ;;  %v360_v62 = vsel %vm359_vm9, 1, %v14463_v0 }
  0x31   : > { %v338_v58 = vsel %vm337_vm8, 1, %v14463_v0  ;;  %v455_v63 = vor.u32 %v454_v39, %v453_v52  ;;  %v457_v5 = vshrl.u32 %v14440_v46, %v9468_v51  ;;  %v9525_v7 = vadd.s32 %v357_v54, %v353_v48 }
  0x32   : > { %v340_v61 = vadd.s32 %v338_v58, %v336_v55  ;;  %v362_v9 = vadd.s32 %v360_v62, %v358_v59  ;;  %vm459_vm10 = vcmp.lt.s32.totalorder %v9477_v57, 1  ;;  %vm461_vm11 = vcmp.lt.s32.totalorder %v9477_v57, 3 }
  0x33   : > { %v458_v10 = vor.u32 %v457_v5, %v456_v56  ;;  %vm460_vm12 = vcmp.lt.s32.totalorder %v9477_v57, 2  ;;  %vm462_vm13 = vcmp.lt.s32.totalorder %v9477_v57, 4  ;;  %v311_v11 = vsel %vm305_vm5, %v308_v8, %v310_v16 }
  0x34   : > { %v341_v26 = vadd.s32 %v340_v61, %v330_v38  ;;  %v363_v12 = vadd.s32 %v362_v9, %v352_v47  ;;  %v467_v13 = vsel %vm459_vm10, %v9505_v17, %v9507_v18  ;;  %v468_v14 = vsel %vm462_vm13, %v455_v63, 920167782 }
  0x35   : > { %v469_v19 = vsel %vm461_vm11, %v452_v60, %v468_v14  ;;  %v471_v20 = vsel %vm459_vm10, %v9507_v18, %v452_v60  ;;  %v476_v25 = vand.u32 65535, %v9449_v27  ;;  %v472_v22 = vsel %vm462_vm13, %v458_v10, 1326507024 }
  0x36   : > { %v9539_v15 = vadd.s32 %v341_v26, %v332_v43  ;;  %v364_v8 = vadd.s32 %v363_v12, %v354_v50  ;;  %v470_v16 = vsel %vm460_vm12, %v467_v13, %v469_v19  ;;  %v477_v23 = vshrl.u32 %v9449_v27, 16 }
  0x37   : > { %v365_v24 = vmul.u32 %v9443_v21, %v311_v11  ;;  %v473_v28 = vsel %vm461_vm11, %v455_v63, %v472_v22  ;;  %v500_v30 = vand.u32 65535, %v470_v16  ;;  %v501_v36 = vshrl.u32 %v470_v16, 16 }
  0x38   : > { %vm367_vm14 = vc.u32 %v9539_v15, %v9525_v7  ;;  %v368_v32 = vadd.s32 1, %v364_v8  ;;  %v474_v34 = vsel %vm460_vm12, %v471_v20, %v473_v28  ;;  %v443_v38 = vshrl.u32 %v14450_v29, %v9468_v51 }
  0x39   : > { %v478_v41 = vand.u32 65535, %v474_v34  ;;  %v479_v42 = vshrl.u32 %v474_v34, 16  ;;  %v464_v43 = vsel %vm462_vm13, %v452_v60, 2102212464  ;;  %v503_v45 = vmul.u32 %v501_v36, %v476_v25 }
  0x3a   : > { %v369_v21 = vsel %vm367_vm14, %v368_v32, %v364_v8  ;;  %v504_v47 = vmul.u32 %v500_v30, %v477_v23  ;;  %v502_v52 = vmul.u32 %v500_v30, %v476_v25  ;;  %v594_v39 = vsel %vm593_vm15, %v9457_v40, 0 }
  0x3b   : > { %v370_v48 = vadd.s32 %v369_v21, %v365_v24  ;;  %v480_v49 = vmul.u32 %v478_v41, %v476_v25  ;;  %v481_v50 = vmul.u32 %v479_v42, %v476_v25  ;;  %v482_v53 = vmul.u32 %v478_v41, %v477_v23 }
  0x3c   : > { %v506_v54 = vshll.u32 %v503_v45, 16  ;;  %v463_v51 = vsel %vm459_vm10, %v443_v38, %v9505_v17  ;;  %v483_v44 = vmul.u32 %v479_v42, %v477_v23  ;;  %v465_v58 = vsel %vm461_vm11, %v9507_v18, %v464_v43 }
  0x3d   : > { %v371_v55 = vadd.s32 536870912, %v370_v48  ;;  %v484_v56 = vshll.u32 %v481_v50, 16  ;;  %v486_v59 = vshll.u32 %v482_v53, 16  ;;  %v505_v60 = vmul.u32 %v501_v36, %v477_v23 }
  0x3e   : > { %v508_v61 = vshll.u32 %v504_v47, 16  ;;  %vm510_vm1 = vc.u32 %v502_v52, %v506_v54  ;;  %v485_v5 = vshrl.u32 %v481_v50, 16  ;;  %v512_v26 = vadd.s32 %v506_v54, %v502_v52 }
  0x3f   : > { %v372_v62 = vshrl.u32 %v371_v55, 30  ;;  %vm488_vm0 = vc.u32 %v480_v49, %v484_v56  ;;  %v490_v63 = vadd.s32 %v484_v56, %v480_v49  ;;  %v511_v9 = vsel %vm510_vm1, 1, %v14463_v0 }
  0x40   : > { %v489_v40 = vsel %vm488_vm0, 1, %v14463_v0  ;;  %v507_v11 = vshrl.u32 %v503_v45, 16  ;;  %v487_v12 = vshrl.u32 %v482_v53, 16  ;;  %v513_v13 = vadd.s32 %v511_v9, %v505_v60 }
  0x41   : > { %v373_v17 = vshll.u32 %v372_v62, 30  ;;  %v491_v10 = vadd.s32 %v489_v40, %v483_v44  ;;  %vm492_vm2 = vc.u32 %v490_v63, %v486_v59  ;;  %vm514_vm3 = vc.u32 %v512_v26, %v508_v61 }
  0x42   : > { %v493_v18 = vsel %vm492_vm2, 1, %v14463_v0  ;;  %v515_v20 = vsel %vm514_vm3, 1, %v14463_v0  ;;  %v596_v25 = vand.u32 31, %v594_v39  ;;  %v509_v8 = vshrl.u32 %v504_v47, 16 }
  0x43   : > { %v374_v14 = vsub.s32 %v370_v48, %v373_v17  ;;  %v495_v19 = vadd.s32 %v493_v18, %v491_v10  ;;  %v517_v16 = vadd.s32 %v515_v20, %v513_v13  ;;  %v9575_v24 = vadd.s32 %v512_v26, %v508_v61 }
  0x44   : > { %v466_v28 = vsel %vm460_vm12, %v463_v51, %v465_v58  ;;  %v9581_v36 = vsub.s32 32, %v596_v25  ;;  %vm274_vm5 = vcmp.lt.s32.totalorder %v9426_v1, 0  ;;  %vm9589_vm7 = vcmp.le.f32.partialorder %v272_v4, 0.7853982 }
  0x45   : > { %vm375_vm4 = vcmp.lt.s32.totalorder %v374_v14, 0  ;;  %v376_v22 = vsub.s32 0, %v374_v14  ;;  %v496_v23 = vadd.s32 %v495_v19, %v485_v5  ;;  %v518_v30 = vadd.s32 %v517_v16, %v507_v11 }
  0x46   : > { %v520_v42 = vmul.u32 %v9449_v27, %v466_v28  ;;  %v366_v21 = vadd.s32 %v9525_v7, %v9539_v15  ;;  %v582_v47 = vand.u32 2147483647, %v9432_v3  ;;  %v396_v48 = vsub.s32 4, %v372_v62 }
  0x47   : > { %v377_v32 = vsel %vm375_vm4, %v376_v22, %v374_v14  ;;  %v9579_v34 = vadd.s32 %v496_v23, %v487_v12  ;;  %v519_v41 = vadd.s32 %v518_v30, %v509_v8  ;;  %v9596_v49 = vshrl.u32 %v594_v39, 5 }
  0x48   : > { %v378_v38 = vclz %v377_v32  ;;  %v602_v27 = vshll.u32 %v14448_v31, %v596_v25  ;;  %v603_v50 = vshrl.u32 %v14446_v33, %v9581_v36  ;;  %v605_v52 = vshll.u32 %v14446_v33, %v596_v25 }
  0x49   : > { %vm522_vm6 = vc.u32 %v9579_v34, %v9575_v24  ;;  %v523_v45 = vadd.s32 1, %v519_v41  ;;  %v606_v53 = vshrl.u32 %v14444_v35, %v9581_v36  ;;  %v611_v54 = vshll.u32 %v14442_v37, %v596_v25 }
  0x4a   : > { %v8907_v43 = vadd.s32 4294967294, %v378_v38  ;;  %v612_v39 = vshrl.u32 %v14440_v46, %v9581_v36  ;;  %v589_v56 = vand.u32 8388607, %v582_v47  ;;  %v397_v58 = vsel %vm274_vm5, %v396_v48, %v372_v62 }
  0x4b   : > { %v524_v4 = vsel %vm522_vm6, %v523_v45, %v519_v41  ;;  %v599_v59 = vshll.u32 %v14450_v29, %v596_v25  ;;  %v608_v60 = vshll.u32 %v14444_v35, %v596_v25  ;;  %v609_v61 = vshrl.u32 %v14442_v37, %v9581_v36 }
  0x4c   : > { %vm8908_vm8 = vcmp.lt.s32.totalorder %v8907_v43, 0  ;;  %v525_v15 = vadd.s32 %v524_v4, %v520_v42  ;;  %v600_v9 = vshrl.u32 %v14448_v31, %v9581_v36  ;;  %v9617_v26 = vor.u32 %v603_v50, %v602_v27 }
  0x4d   : > { %v381_v7 = vsel %vm8908_vm8, 0, %v8907_v43  ;;  %v607_v17 = vor.u32 %v606_v53, %v605_v52  ;;  %v613_v10 = vor.u32 %v612_v39, %v611_v54  ;;  %vm614_vm9 = vcmp.lt.s32.totalorder %v9596_v49, 1 }
  0x4e   : > { %v382_v55 = vsub.s32 32, %v381_v7  ;;  %v383_v51 = vshll.u32 %v374_v14, %v381_v7  ;;  %v386_v44 = vsub.s32 4294967266, %v381_v7  ;;  %v526_v40 = vadd.s32 536870912, %v525_v15 }
  0x4f   : > { %vm617_vm10 = vcmp.lt.s32.totalorder %v9596_v49, 4  ;;  %v399_v18 = vsel %vm9589_vm7, 0, %v397_v58  ;;  %v590_v13 = vor.u32 8388608, %v589_v56  ;;  %v610_v14 = vor.u32 %v609_v61, %v608_v60 }
  0x50   : > { %v384_v63 = vshrl.u32 %v366_v21, %v382_v55  ;;  %v387_v5 = vadd.s32 127, %v386_v44  ;;  %v9620_v12 = vshrl.u32 %v526_v40, 30  ;;  %vm616_vm11 = vcmp.lt.s32.totalorder %v9596_v49, 3 }
  0x51   : > { %vm615_vm12 = vcmp.lt.s32.totalorder %v9596_v49, 2  ;;  %v626_v8 = vsel %vm614_vm9, %v9617_v26, %v607_v17  ;;  %v627_v16 = vsel %vm617_vm10, %v613_v10, 1326507024  ;;  %v601_v28 = vor.u32 %v600_v9, %v599_v59 }
  0x52   : > { %v385_v62 = vor.u32 %v384_v63, %v383_v51  ;;  %v388_v11 = vshll.u32 %v387_v5, 23  ;;  %v528_v25 = vshll.u32 %v9620_v12, 30  ;;  %v628_v30 = vsel %vm616_vm11, %v610_v14, %v627_v16 }
  0x53   : > { %v416_v32 = vadd.s32 3, %v399_v18  ;;  %v623_v38 = vsel %vm617_vm10, %v610_v14, 920167782  ;;  %v629_v41 = vsel %vm615_vm12, %v626_v8, %v628_v30  ;;  %v9641_v42 = vshll.u32 %v590_v13, 8 }
  0x54   : > { %v389_v19 = vor.u32 4788187, %v388_v11  ;;  %v392_v20 = vcvt.s32.f32 %v385_v62  ;;  %v9633_v23 = vsub.s32 %v525_v15, %v528_v25  ;;  %v633_v45 = vand.u32 65535, %v629_v41 }
  0x55   : > { %v9646_v48 = vand.u32 65535, %v9641_v42  ;;  %v634_v27 = vshrl.u32 %v629_v41, 16  ;;  %v622_v52 = vsel %vm614_vm9, %v601_v28, %v9617_v26  ;;  %v9653_v53 = vshrl.u32 %v9641_v42, 16 }
  0x56   : > { %v390_v22 = vand.u32 2147483647, %v389_v19  ;;  %vm530_vm13 = vcmp.lt.s32.totalorder %v9633_v23, 0  ;;  %v531_v43 = vsub.s32 0, %v9633_v23  ;;  %v624_v15 = vsel %vm616_vm11, %v607_v17, %v623_v38 }
  0x57   : > { %v635_v54 = vmul.u32 %v633_v45, %v9646_v48  ;;  %v9659_v39 = vmul.u32 %v634_v27, %v9646_v48  ;;  %v9663_v51 = vand.u32 3, %v416_v32  ;;  %vm429_vm14 = vcmp.lt.s32.totalorder %v9429_v2, 0 }
  0x58   : > { %v393_v21 = vmul.f32 %v392_v20, %v390_v22  ;;  %v532_v4 = vsel %vm530_vm13, %v531_v43, %v9633_v23  ;;  %v521_v44 = vadd.s32 %v9575_v24, %v9579_v34  ;;  %v598_v56 = vshrl.u32 %v14450_v29, %v9581_v36 }
  0x59   : > { %v533_v7 = vclz %v532_v4  ;;  %v9675_v59 = vand.u32 3, %v399_v18  ;;  %v639_v61 = vshll.u32 %v9659_v39, 16  ;;  %v619_v5 = vsel %vm617_vm10, %v607_v17, 2102212464 }
  0x5a   : > { %v394_v50 = vxor.u32 2147483648, %v393_v21  ;;  %v625_v24 = vsel %vm615_vm12, %v622_v52, %v624_v15  ;;  %v9685_v34 = vmul.u32 %v633_v45, %v9653_v53  ;;  %v551_v36 = vsub.s32 4, %v9620_v12 }
  0x5b   : > { %v8910_v60 = vadd.s32 4294967294, %v533_v7  ;;  %vm643_vm0 = vc.u32 %v635_v54, %v639_v61  ;;  %v655_v57 = vand.u32 65535, %v625_v24  ;;  %v638_v62 = vmul.u32 %v634_v27, %v9653_v53 }
  0x5c   : > { %v395_v55 = vsel %vm274_vm5, %v394_v50, %v393_v21  ;;  %vm9691_vm1 = vcmp.le.f32.partialorder %v427_v6, 0.7853982  ;;  %v644_v14 = vsel %vm643_vm0, 1, %v14463_v0  ;;  %v641_v25 = vshll.u32 %v9685_v34, 16 }
  0x5d   : > { %v9673_v58 = vsel %vm9589_vm7, %v9426_v1, %v395_v55  ;;  %vm8911_vm15 = vcmp.lt.s32.totalorder %v8910_v60, 0  ;;  %v645_v8 = vadd.s32 %v639_v61, %v635_v54  ;;  %vm422_vm2 = vcmp.eq.s32.totalorder %v9663_v51, 2 }
  0x5e   : > { %v400_v63 = vmul.f32 %v9673_v58, %v9673_v58  ;;  %v536_v10 = vsel %vm8911_vm15, 0, %v8910_v60  ;;  %vm2901_vm3 = vcmp.eq.s32.totalorder %v9675_v59, 2  ;;  %v618_v22 = vsel %vm614_vm9, %v598_v56, %v601_v28 }
  0x5f   : > { %v537_v11 = vsub.s32 32, %v536_v10  ;;  %v538_v18 = vshll.u32 %v9633_v23, %v536_v10  ;;  %v541_v13 = vsub.s32 4294967266, %v536_v10  ;;  %v656_v30 = vshrl.u32 %v625_v24, 16 }
  0x60   : > { %v401_v40 = vmul.f32 -0.001358992, %v400_v63  ;;  %v408_v9 = vmul.f32 -0.00019511016, %v400_v63  ;;  %v620_v38 = vsel %vm616_vm11, %v9617_v26, %v619_v5  ;;  %v646_v41 = vadd.s32 %v644_v14, %v638_v62 }
  0x61   : > { %v539_v16 = vshrl.u32 %v521_v44, %v537_v11  ;;  %v542_v6 = vadd.s32 127, %v541_v13  ;;  %vm419_vm4 = vcmp.eq.s32.totalorder %v9663_v51, 0  ;;  %vm2898_vm5 = vcmp.eq.s32.totalorder %v9675_v59, 0 }
  0x62   : > { %v402_v19 = vadd.f32 0.041655596, %v401_v40  ;;  %v409_v20 = vadd.f32 0.008332121, %v408_v9  ;;  %v552_v45 = vsel %vm429_vm14, %v551_v36, %v9620_v12  ;;  %v657_v28 = vmul.u32 %v655_v57, %v9646_v48 }
  0x63   : > { %v540_v21 = vor.u32 %v539_v16, %v538_v18  ;;  %v543_v43 = vshll.u32 %v542_v6, 23  ;;  %vm418_vm6 = vcmp.lt.s32.totalorder %v9663_v51, 2  ;;  %v640_v4 = vshrl.u32 %v9659_v39, 16 }
  0x64   : > { %v403_v32 = vmul.f32 %v402_v19, %v400_v63  ;;  %v410_v23 = vmul.f32 %v409_v20, %v400_v63  ;;  %vm647_vm7 = vc.u32 %v645_v8, %v641_v25  ;;  %vm415_vm8 = vweird.f32 %v9426_v1 }
  0x65   : > { %v544_v26 = vor.u32 4788187, %v543_v43  ;;  %v547_v52 = vcvt.s32.f32 %v540_v21  ;;  %v648_v7 = vsel %vm647_vm7, 1, %v14463_v0  ;;  %v658_v15 = vmul.u32 %v656_v30, %v9646_v48  ;;  %v9726_v48 = vld [vmem:[%s9422_s27 + $0x18] sm:$0xff] }
  0x66   : > { %v404_v27 = vadd.f32 -0.4999988, %v403_v32  ;;  %v411_v50 = vadd.f32 -0.16666654, %v410_v23  ;;  %v650_v55 = vadd.s32 %v648_v7, %v646_v41  ;;  %v659_v44 = vmul.u32 %v655_v57, %v9653_v53 }
  0x67   : > { %vm2897_vm9 = vcmp.lt.s32.totalorder %v9675_v59, 2  ;;  %v545_v56 = vand.u32 2147483647, %v544_v26  ;;  %v660_v39 = vmul.u32 %v656_v30, %v9653_v53  ;;  %v661_v60 = vshll.u32 %v658_v15, 16 }
  0x68   : > { %v405_v54 = vmul.f32 %v404_v27, %v400_v63  ;;  %v412_v12 = vmul.f32 %v411_v50, %v400_v63  ;;  %v554_v24 = vsel %vm9691_vm1, 0, %v552_v45  ;;  %v9723_v36 = vsel %vm615_vm12, %v618_v22, %v620_v38 }
  0x69   : > { %v548_v63 = vmul.f32 %v547_v52, %v545_v56  ;;  %v642_v57 = vshrl.u32 %v9685_v34, 16  ;;  %v663_v40 = vshll.u32 %v659_v44, 16  ;;  %vm665_vm10 = vc.u32 %v657_v28, %v661_v60 }
  0x6a   : > { %v406_v61 = vadd.f32 1.0, %v405_v54  ;;  %v413_v5 = vadd.f32 1.0, %v412_v12  ;;  %v651_v10 = vadd.s32 %v650_v55, %v640_v4  ;;  %v666_v62 = vsel %vm665_vm10, 1, %v14463_v0 }
  0x6b   : > { %v549_v11 = vxor.u32 2147483648, %v548_v63  ;;  %v667_v18 = vadd.s32 %v661_v60, %v657_v28  ;;  %v668_v13 = vadd.s32 %v666_v62, %v660_v39  ;;  %v740_v49 = vand.u32 2139095040, %v9726_v48 }
  0x6c   : > { %v414_v9 = vmul.f32 %v413_v5, %v9673_v58  ;;  %v423_v53 = vxor.u32 2147483648, %v406_v61  ;;  %v662_v20 = vshrl.u32 %v658_v15, 16  ;;  %v664_v25 = vshrl.u32 %v659_v44, 16 }
  0x6d   : > { %v550_v58 = vsel %vm429_vm14, %v549_v11, %v548_v63  ;;  %vm669_vm11 = vc.u32 %v667_v18, %v663_v40  ;;  %v741_v8 = vshrl.u32 %v740_v49, 23  ;;  %v9758_v17 = vadd.s32 %v651_v10, %v642_v57 }
  0x6e   : > { %v420_v14 = vxor.u32 2147483648, %v414_v9  ;;  %v424_v19 = vsel %vm422_vm2, %v423_v53, %v414_v9  ;;  %v2903_v34 = vsel %vm2901_vm3, %v423_v53, %v414_v9  ;;  %v553_v22 = vsel %vm9691_vm1, %v9429_v2, %v550_v58 }
  0x6f   : > { %v670_v30 = vsel %vm669_vm11, 1, %v14463_v0  ;;  %v555_v38 = vmul.f32 %v553_v22, %v553_v22  ;;  %v9760_v45 = vadd.s32 %v667_v18, %v663_v40  ;;  %v571_v50 = vadd.s32 3, %v554_v24 }
  0x70   : > { %v421_v16 = vsel %vm419_vm4, %v406_v61, %v420_v14  ;;  %v2900_v6 = vsel %vm2898_vm5, %v406_v61, %v420_v14  ;;  %v672_v41 = vadd.s32 %v670_v30, %v668_v13  ;;  %v8915_v4 = vadd.s32 4294967169, %v741_v8 }
  0x71   : > { %v425_v32 = vsel %vm418_vm6, %v421_v16, %v424_v19  ;;  %v2904_v23 = vsel %vm2897_vm9, %v2900_v6, %v2903_v34  ;;  %v556_v28 = vmul.f32 -0.001358992, %v555_v38  ;;  %v563_v59 = vmul.f32 -0.00019511016, %v555_v38 }
  0x72   : > { %v9752_v21 = vsel %vm415_vm8, nan, %v425_v32  ;;  %v9756_v43 = vsel %vm415_vm8, nan, %v2904_v23  ;;  %v673_v27 = vadd.s32 %v672_v41, %v662_v20  ;;  %v675_v54 = vmul.u32 %v9641_v42, %v9723_v36 }
  0x73   : > { %v5216_v51 = vadd.f32 %v9752_v21, %v9752_v21  ;;  %v557_v1 = vadd.f32 0.041655596, %v556_v28  ;;  %v564_v7 = vadd.f32 0.008332121, %v563_v59  ;;  %vm677_vm12 = vc.u32 %v9758_v17, %v9760_v45 }
  0x74   : > { %v674_v15 = vadd.s32 %v673_v27, %v664_v25  ;;  %v747_v12 = vadd.s32 1, %v8915_v4  ;;  %v572_v60 = vand.u32 3, %v571_v50  ;;  %v737_v5 = vand.u32 2147483647, %v9726_v48 }
  0x75   : > { %v9765_v26 = vmul.f32 %v5216_v51, %v9756_v43  ;;  %v9768_v52 = vmul.f32 %v5216_v51, %v9752_v21  ;;  %v558_v56 = vmul.f32 %v557_v1, %v555_v38  ;;  %v565_v39 = vmul.f32 %v564_v7, %v555_v38 }
  0x76   : > { %v678_v61 = vadd.s32 1, %v674_v15  ;;  %vm748_vm13 = vcmp.gt.s32.totalorder %v747_v12, 0  ;;  %v3050_v40 = vand.u32 3, %v554_v24  ;;  %vm574_vm14 = vcmp.eq.s32.totalorder %v572_v60, 0 }
  0x77   : > { %v14455_v55 = vsub.f32 1.0, %v9768_v52  ;;  %v5280_v44 = vadd.f32 %v9765_v26, %v9765_v26  ;;  %v559_v36 = vadd.f32 -0.4999988, %v558_v56  ;;  %v566_v57 = vadd.f32 -0.16666654, %v565_v39 }
  0x78   : > { %v679_v9 = vsel %vm677_vm12, %v678_v61, %v674_v15  ;;  %v749_v53 = vsel %vm748_vm13, %v747_v12, 0  ;;  %vm577_vm15 = vcmp.eq.s32.totalorder %v572_v60, 2  ;;  %v744_v49 = vand.u32 8388607, %v737_v5 }
  0x79   : > { %v9780_v63 = vmul.f32 %v5280_v44, %v14455_v55  ;;  %v9783_v42 = vmul.f32 %v5280_v44, %v9765_v26  ;;  %v560_v11 = vmul.f32 %v559_v36, %v555_v38  ;;  %v567_v18 = vmul.f32 %v566_v57, %v555_v38 }
  0x7a   : > { %v680_v13 = vadd.s32 %v679_v9, %v675_v54  ;;  %vm573_vm0 = vcmp.lt.s32.totalorder %v572_v60, 2  ;;  %vm3055_vm1 = vcmp.eq.s32.totalorder %v3050_v40, 2  ;;  %v751_v58 = vand.u32 31, %v749_v53 }
  0x7b   : > { %v14454_v10 = vsub.f32 1.0, %v9783_v42  ;;  %v5344_v62 = vadd.f32 %v9780_v63, %v9780_v63  ;;  %v561_v19 = vadd.f32 1.0, %v560_v11  ;;  %v568_v34 = vadd.f32 1.0, %v567_v18 }
  0x7c   : > { %v681_v20 = vadd.s32 536870912, %v680_v13  ;;  %vm3051_vm2 = vcmp.lt.s32.totalorder %v3050_v40, 2  ;;  %vm3052_vm3 = vcmp.eq.s32.totalorder %v3050_v40, 0  ;;  %v745_v32 = vor.u32 8388608, %v744_v49 }
  0x7d   : > { %v9792_v14 = vmul.f32 %v5344_v62, %v14454_v10  ;;  %v9795_v24 = vmul.f32 %v5344_v62, %v9780_v63  ;;  %v569_v16 = vmul.f32 %v568_v34, %v553_v22  ;;  %v578_v6 = vxor.u32 2147483648, %v561_v19 }
  0x7e   : > { %v9802_v30 = vshrl.u32 %v681_v20, 30  ;;  %vm570_vm4 = vweird.f32 %v9429_v2  ;;  %v9817_v50 = vsub.s32 32, %v751_v58  ;;  %v9826_v12 = vshll.u32 %v745_v32, 8 }
  0x7f   : > { %v5392_v25 = vsub.f32 1.0, %v9795_v24  ;;  %v9800_v8 = vadd.f32 %v9792_v14, %v9792_v14  ;;  %v575_v38 = vxor.u32 2147483648, %v569_v16  ;;  %v579_v41 = vsel %vm577_vm15, %v578_v6, %v569_v16 }
  0x80   : > { %v3057_v51 = vsel %vm3055_vm1, %v578_v6, %v569_v16  ;;  %v683_v28 = vshll.u32 %v9802_v30, 30  ;;  %vm5729_vm6 = vcmask 1043456   ;;  %v754_v60 = vshll.u32 %v14450_v29, %v751_v58 }
  0x81   : > { %v9807_v23 = vmul.f32 %v9800_v8, %v5392_v25  ;;  %v576_v59 = vsel %vm574_vm14, %v561_v19, %v575_v38  ;;  %v3054_v27 = vsel %vm3052_vm3, %v561_v19, %v575_v38  ;;  %v755_v61 = vshrl.u32 %v14448_v31, %v9817_v50 }
  0x82   : > { %v580_v4 = vsel %vm573_vm0, %v576_v59, %v579_v41  ;;  %v3058_v1 = vsel %vm3051_vm2, %v3054_v27, %v3057_v51  ;;  %v684_v7 = vsub.s32 %v680_v13, %v683_v28  ;;  %v676_v40 = vadd.s32 %v9760_v45, %v9758_v17 }
  0x83   : > { %v9814_v22 = vadd.f32 %v9807_v23, %v9807_v23  ;;  %v9822_v54 = vsel %vm570_vm4, nan, %v580_v4  ;;  %v9824_v2 = vsel %vm570_vm4, nan, %v3058_v1  ;;  %v9841_v18 = vshrl.u32 %v749_v53, 5 }
  0x84   : > { %v5217_v44 = vadd.f32 %v9822_v54, %v9822_v54  ;;  %vm685_vm5 = vcmp.lt.s32.totalorder %v684_v7, 0  ;;  %v686_v56 = vsub.s32 0, %v684_v7  ;;  %v9844_v13 = vand.u32 65535, %v9826_v12 }
  0x85   : > { %v5504_v15 = vmul.f32 %v9814_v22, %v9807_v23  ;;  %v706_v34 = vsub.s32 4, %v9802_v30  ;;  %v757_v20 = vshll.u32 %v14448_v31, %v751_v58  ;;  %vm584_vm7 = vcmp.lt.s32.totalorder %v9432_v3, 0  ;;  %v9945_v31 = vld [vmem:[%s9422_s27 + $0x10] sm:$0xff] }
  0x86   : > { %v9834_v36 = vmul.f32 %v5217_v44, %v9824_v2  ;;  %v9837_v57 = vmul.f32 %v5217_v44, %v9822_v54  ;;  %v687_v9 = vsel %vm685_vm5, %v686_v56, %v684_v7  ;;  %v756_v45 = vor.u32 %v755_v61, %v754_v60 }
  0x87   : > { %v5520_v39 = vsub.f32 1.0, %v5504_v15  ;;  %v688_v11 = vclz %v687_v9  ;;  %v758_v53 = vshrl.u32 %v14446_v33, %v9817_v50  ;;  %v763_v38 = vshll.u32 %v14444_v35, %v751_v58 }
  0x88   : > { %v14453_v49 = vsub.f32 1.0, %v9837_v57  ;;  %v5281_v19 = vadd.f32 %v9834_v36, %v9834_v36  ;;  %v764_v41 = vshrl.u32 %v14442_v37, %v9817_v50  ;;  %v760_v51 = vshll.u32 %v14446_v33, %v751_v58 }
  0x89   : > { %v5632_v62 = vpack.c.bf16 %v5520_v39, %v5520_v39  ;;  %v8913_v17 = vadd.s32 4294967294, %v688_v11  ;;  %v761_v28 = vshrl.u32 %v14444_v35, %v9817_v50  ;;  %v766_v59 = vshll.u32 %v14442_v37, %v751_v58 }
  0x8a   : > { %v9857_v6 = vmul.f32 %v5281_v19, %v14453_v49  ;;  %v9860_v32 = vmul.f32 %v5281_v19, %v9834_v36  ;;  %v767_v15 = vshrl.u32 %v14440_v46, %v9817_v50  ;;  %vm9876_vm9 = vcmp.le.f32.partialorder %v582_v47, 0.7853982 }
  0x8b   : > { %v5731_v16 = vsel %vm5729_vm6, %v5632_v62, 0  ;;  %vm8914_vm8 = vcmp.lt.s32.totalorder %v8913_v17, 0  ;;  %v759_v61 = vor.u32 %v758_v53, %v757_v20  ;;  %v765_v62 = vor.u32 %v764_v41, %v763_v38 }
  0x8c   : > { %5779 = vmatpush.bf16.msra.mxu0 %v5731_v16  ;;  %v14452_v27 = vsub.f32 1.0, %v9860_v32  ;;  %v5345_v4 = vadd.f32 %v9857_v6, %v9857_v6  ;;  %v691_v1 = vsel %vm8914_vm8, 0, %v8913_v17  ;;  %vm769_vm10 = vcmp.lt.s32.totalorder %v9841_v18, 1 }
  0x8d   : > { %v692_v56 = vsub.s32 32, %v691_v1  ;;  %v693_v39 = vshll.u32 %v684_v7, %v691_v1  ;;  %v696_v60 = vsub.s32 4294967266, %v691_v1  ;;  %v762_v47 = vor.u32 %v761_v28, %v760_v51 }
  0x8e   : > { %v9882_v58 = vmul.f32 %v5345_v4, %v14452_v27  ;;  %v9885_v9 = vmul.f32 %v5345_v4, %v9857_v6  ;;  %vm772_vm11 = vcmp.lt.s32.totalorder %v9841_v18, 4  ;;  %v768_v20 = vor.u32 %v767_v15, %v766_v59 }
  0x8f   : > { %v694_v11 = vshrl.u32 %v676_v40, %v692_v56  ;;  %v697_v19 = vadd.s32 127, %v696_v60  ;;  %vm771_vm12 = vcmp.lt.s32.totalorder %v9841_v18, 3  ;;  %vm770_vm13 = vcmp.lt.s32.totalorder %v9841_v18, 2 }
  0x90   : > { %v5393_v16 = vsub.f32 1.0, %v9885_v9  ;;  %v9892_v7 = vadd.f32 %v9882_v58, %v9882_v58  ;;  %v777_v40 = vsel %vm769_vm10, %v756_v45, %v759_v61  ;;  %v707_v41 = vsel %vm584_vm7, %v706_v34, %v9802_v30 }
  0x91   : > { %v695_v17 = vor.u32 %v694_v11, %v693_v39  ;;  %v698_v53 = vshll.u32 %v697_v19, 23  ;;  %v778_v51 = vsel %vm772_vm11, %v765_v62, 920167782  ;;  %v787_v28 = vshrl.u32 %v9826_v12, 16 }
  0x92   : > { %v9901_v38 = vmul.f32 %v9892_v7, %v5393_v16  ;;  %v779_v1 = vsel %vm771_vm12, %v762_v47, %v778_v51  ;;  %v781_v15 = vsel %vm769_vm10, %v759_v61, %v762_v47  ;;  %v753_v30 = vshrl.u32 %v14450_v29, %v9817_v50 }
  0x93   : > { %v699_v59 = vor.u32 4788187, %v698_v53  ;;  %v702_v4 = vcvt.s32.f32 %v695_v17  ;;  %v780_v34 = vsel %vm770_vm13, %v777_v40, %v779_v1  ;;  %v782_v39 = vsel %vm772_vm11, %v768_v20, 1326507024 }
  0x94   : > { %v9915_v56 = vadd.f32 %v9901_v38, %v9901_v38  ;;  %v783_v11 = vsel %vm771_vm12, %v765_v62, %v782_v39  ;;  %v810_v19 = vand.u32 65535, %v780_v34  ;;  %v811_v17 = vshrl.u32 %v780_v34, 16 }
  0x95   : > { %v700_v60 = vand.u32 2147483647, %v699_v59  ;;  %v709_v51 = vsel %vm9876_vm9, 0, %v707_v41  ;;  %v784_v50 = vsel %vm770_vm13, %v781_v15, %v783_v11  ;;  %v774_v40 = vsel %vm772_vm11, %v762_v47, 2102212464 }
  0x96   : > { %v5505_v53 = vmul.f32 %v9915_v56, %v9901_v38  ;;  %v788_v20 = vand.u32 65535, %v784_v50  ;;  %v789_v59 = vshrl.u32 %v784_v50, 16  ;;  %v773_v62 = vsel %vm769_vm10, %v753_v30, %v756_v45 }
  0x97   : > { %v703_v46 = vmul.f32 %v702_v4, %v700_v60  ;;  %v813_v34 = vmul.u32 %v811_v17, %v9844_v13  ;;  %v814_v39 = vmul.u32 %v810_v19, %v787_v28  ;;  %v775_v47 = vsel %vm771_vm12, %v759_v61, %v774_v40 }
  0x98   : > { %v5521_v1 = vsub.f32 1.0, %v5505_v53  ;;  %v790_v41 = vmul.u32 %v788_v20, %v9844_v13  ;;  %v791_v35 = vmul.u32 %v789_v59, %v9844_v13  ;;  %v792_v15 = vmul.u32 %v788_v20, %v787_v28 }
  0x99   : > { %v704_v37 = vxor.u32 2147483648, %v703_v46  ;;  %v812_v60 = vmul.u32 %v810_v19, %v9844_v13  ;;  %v816_v11 = vshll.u32 %v813_v34, 16  ;;  %v793_v30 = vmul.u32 %v789_v59, %v787_v28 }
  0x9a   : > { %v5633_v4 = vpack.c.bf16 %v5521_v1, %v5521_v1  ;;  %v794_v53 = vshll.u32 %v791_v35, 16  ;;  %v796_v50 = vshll.u32 %v792_v15, 16  ;;  %v815_v1 = vmul.u32 %v811_v17, %v787_v28 }
  0x9b   : > { %v705_v45 = vsel %vm584_vm7, %v704_v37, %v703_v46  ;;  %v818_v29 = vshll.u32 %v814_v39, 16  ;;  %v817_v19 = vshrl.u32 %v813_v34, 16  ;;  %v795_v3 = vshrl.u32 %v791_v35, 16 }
  0x9c   : > { %v5734_v33 = vsel %vm5729_vm6, %v5633_v4, 0  ;;  %v708_v20 = vsel %vm9876_vm9, %v9945_v31, %v705_v45  ;;  %vm798_vm14 = vc.u32 %v790_v41, %v794_v53  ;;  %v800_v13 = vadd.s32 %v794_v53, %v790_v41 }
  0x9d   : > { %5828 = vmatpush.bf16.msra.mxu1 %v5734_v33  ;;  %v710_v61 = vmul.f32 %v708_v20, %v708_v20  ;;  %v799_v37 = vsel %vm798_vm14, 1, %v14463_v0  ;;  %vm820_vm15 = vc.u32 %v812_v60, %v816_v11  ;;  %v822_v46 = vadd.s32 %v816_v11, %v812_v60 }
  0x9e   : > { %v801_v4 = vadd.s32 %v799_v37, %v793_v30  ;;  %vm802_vm0 = vc.u32 %v800_v13, %v796_v50  ;;  %v797_v27 = vshrl.u32 %v792_v15, 16  ;;  %v821_v28 = vsel %vm820_vm15, 1, %v14463_v0 }
  0x9f   : > { %v711_v40 = vmul.f32 -0.001358992, %v710_v61  ;;  %v718_v59 = vmul.f32 -0.00019511016, %v710_v61  ;;  %v803_v44 = vsel %vm802_vm0, 1, %v14463_v0  ;;  %vm824_vm1 = vc.u32 %v822_v46, %v818_v29 }
  0xa0   : > { %v805_v45 = vadd.s32 %v803_v44, %v801_v4  ;;  %v823_v41 = vadd.s32 %v821_v28, %v815_v1  ;;  %v726_v34 = vadd.s32 3, %v709_v51  ;;  %v819_v35 = vshrl.u32 %v814_v39, 16 }
  0xa1   : > { %v712_v33 = vadd.f32 0.041655596, %v711_v40  ;;  %v719_v17 = vadd.f32 0.008332121, %v718_v59  ;;  %v825_v53 = vsel %vm824_vm1, 1, %v14463_v0  ;;  %v776_v15 = vsel %vm770_vm13, %v773_v62, %v775_v47 }
  0xa2   : > { %v806_v11 = vadd.s32 %v805_v45, %v795_v3  ;;  %v827_v10 = vadd.s32 %v825_v53, %v823_v41  ;;  %v826_v30 = vadd.s32 %v822_v46, %v818_v29  ;;  %v727_v40 = vand.u32 3, %v726_v34 }
  0xa3   : > { %v713_v49 = vmul.f32 %v712_v33, %v710_v61  ;;  %v720_v60 = vmul.f32 %v719_v17, %v710_v61  ;;  %v3204_v59 = vand.u32 3, %v709_v51  ;;  %v830_v39 = vmul.u32 %v9826_v12, %v776_v15 }
  0xa4   : > { %v807_v37 = vadd.s32 %v806_v11, %v797_v27  ;;  %v828_v55 = vadd.s32 %v827_v10, %v817_v19  ;;  %vm732_vm3 = vcmp.eq.s32.totalorder %v727_v40, 2  ;;  %vm728_vm5 = vcmp.lt.s32.totalorder %v727_v40, 2 }
  0xa5   : > { %v714_v50 = vadd.f32 -0.4999988, %v713_v49  ;;  %v721_v13 = vadd.f32 -0.16666654, %v720_v60  ;;  %vm3209_vm4 = vcmp.eq.s32.totalorder %v3204_v59, 2  ;;  %vm729_vm7 = vcmp.eq.s32.totalorder %v727_v40, 0 }
  0xa6   : > { %v829_v44 = vadd.s32 %v828_v55, %v819_v35  ;;  %vm832_vm2 = vc.u32 %v807_v37, %v826_v30  ;;  %vm3206_vm8 = vcmp.eq.s32.totalorder %v3204_v59, 0  ;;  %vm3205_vm9 = vcmp.lt.s32.totalorder %v3204_v59, 2 }
  0xa7   : > { %v715_v4 = vmul.f32 %v714_v50, %v710_v61  ;;  %v722_v1 = vmul.f32 %v721_v13, %v710_v61  ;;  %vm725_vm10 = vweird.f32 %v9945_v31  ;;  %vm739_vm13 = vcmp.lt.s32.totalorder %v9726_v48, 0 }
  0xa8   : > { %v833_v3 = vadd.s32 1, %v829_v44  ;;  %vm738_vm14 = vcmp.le.f32.partialorder %v737_v5, 0.7853982  ;;  %v14583_v24 = vsub.f32 1.0, %v9837_v57  ;;  %v10042_v57 = vld [vmem:[%s9422_s27 + $0x30] sm:$0xff] }
  0xa9   : > { %v716_v28 = vadd.f32 1.0, %v715_v4  ;;  %v723_v33 = vadd.f32 1.0, %v722_v1 }
  0xaa   : > { %v834_v29 = vsel %vm832_vm2, %v833_v3, %v829_v44 }
  0xab   : > { %v724_v18 = vmul.f32 %v723_v33, %v708_v20  ;;  %v733_v62 = vxor.u32 2147483648, %v716_v28  ;;  %v835_v10 = vadd.s32 %v834_v29, %v830_v39  ;;  %v831_v33 = vadd.s32 %v826_v30, %v807_v37 }
  0xad   : > { %v730_v49 = vxor.u32 2147483648, %v724_v18  ;;  %v734_v27 = vsel %vm732_vm3, %v733_v62, %v724_v18  ;;  %v3211_v51 = vsel %vm3209_vm4, %v733_v62, %v724_v18  ;;  %v836_v55 = vadd.s32 536870912, %v835_v10 }
  0xaf   : > { %v731_v12 = vsel %vm729_vm7, %v716_v28, %v730_v49  ;;  %v3208_v47 = vsel %vm3206_vm8, %v716_v28, %v730_v49  ;;  %v837_v46 = vshrl.u32 %v836_v55, 30 }
  0xb0   : > { %v735_v61 = vsel %vm728_vm5, %v731_v12, %v734_v27  ;;  %v3212_v19 = vsel %vm3205_vm9, %v3208_v47, %v3211_v51  ;;  %vm880_vm5 = vweird.f32 %v9726_v48  ;;  %vm5704_vm9 = vcmask 850944  }
  0xb1   : > { %v9958_v17 = vsel %vm725_vm10, nan, %v735_v61  ;;  %v9960_v20 = vsel %vm725_vm10, nan, %v3212_v19  ;;  %v838_v41 = vshll.u32 %v837_v46, 30 }
  0xb2   : > { %v5218_v45 = vadd.f32 %v9958_v17, %v9958_v17 }
  0xb3   : > { %v839_v53 = vsub.s32 %v835_v10, %v838_v41 }
  0xb4   : > { %v9965_v34 = vmul.f32 %v5218_v45, %v9960_v20  ;;  %v9968_v35 = vmul.f32 %v5218_v45, %v9958_v17 }
  0xb5   : > { %vm840_vm11 = vcmp.lt.s32.totalorder %v839_v53, 0  ;;  %v841_v15 = vsub.s32 0, %v839_v53 }
  0xb6   : > { %v5266_v60 = vsub.f32 1.0, %v9968_v35  ;;  %v5282_v11 = vadd.f32 %v9965_v34, %v9965_v34 }
  0xb7   : > { %v842_v40 = vsel %vm840_vm11, %v841_v15, %v839_v53 }
  0xb8   : > { %v9975_v50 = vmul.f32 %v5282_v11, %v5266_v60  ;;  %v9978_v13 = vmul.f32 %v5282_v11, %v9965_v34  ;;  %v843_v59 = vclz %v842_v40  ;;  %v861_v40 = vsub.s32 4, %v837_v46 }
  0xba   : > { %v5330_v4 = vsub.f32 1.0, %v9978_v13  ;;  %v5346_v1 = vadd.f32 %v9975_v50, %v9975_v50  ;;  %v8916_v44 = vadd.s32 4294967294, %v843_v59 }
  0xbc   : > { %v9985_v39 = vmul.f32 %v5346_v1, %v5330_v4  ;;  %v9988_v28 = vmul.f32 %v5346_v1, %v9975_v50  ;;  %vm8917_vm12 = vcmp.lt.s32.totalorder %v8916_v44, 0 }
  0xbd   : > { %v846_v62 = vsel %vm8917_vm12, 0, %v8916_v44  ;;  %v862_v44 = vsel %vm739_vm13, %v861_v40, %v837_v46  ;;  %v5440_v46 = vmul.f32 %v9800_v8, %v9792_v14  ;;  %v5441_v40 = vmul.f32 %v9892_v7, %v9882_v58 }
  0xbe   : > { %v5394_v3 = vsub.f32 1.0, %v9988_v28  ;;  %v5410_v18 = vadd.f32 %v9985_v39, %v9985_v39  ;;  %v847_v29 = vsub.s32 32, %v846_v62  ;;  %v848_v10 = vshll.u32 %v839_v53, %v846_v62 }
  0xbf   : > { %v851_v49 = vsub.s32 4294967266, %v846_v62  ;;  %v5602_v28 = vpack.c.bf16 %v5330_v4, %v5266_v60 }
  0xc0   : > { %v9995_v27 = vmul.f32 %v5410_v18, %v5394_v3  ;;  %v849_v51 = vshrl.u32 %v831_v33, %v847_v29  ;;  %v864_v29 = vsel %vm738_vm14, 0, %v862_v44 }
  0xc1   : > { %v852_v55 = vadd.s32 127, %v851_v49 }
  0xc2   : > { %v9999_v12 = vadd.f32 %v9995_v27, %v9995_v27  ;;  %v850_v30 = vor.u32 %v849_v51, %v848_v10 }
  0xc3   : > { %v853_v37 = vshll.u32 %v852_v55, 23 }
  0xc4   : > { %v5506_v47 = vmul.f32 %v9999_v12, %v9995_v27  ;;  %v857_v19 = vcvt.s32.f32 %v850_v30  ;;  %v881_v30 = vadd.s32 3, %v864_v29 }
  0xc5   : > { %v854_v61 = vor.u32 4788187, %v853_v37 }
  0xc6   : > { %v5522_v45 = vsub.f32 1.0, %v5506_v47 }
  0xc7   : > { %v855_v41 = vand.u32 2147483647, %v854_v61 }
  0xc8   : > { %v5634_v53 = vpack.c.bf16 %v5522_v45, %v5522_v45  ;;  %v882_v45 = vand.u32 3, %v881_v30 }
  0xc9   : > { %v858_v11 = vmul.f32 %v857_v19, %v855_v41  ;;  %v3358_v41 = vand.u32 3, %v864_v29 }
  0xca   : > { %v5737_v15 = vsel %vm5729_vm6, %v5634_v53, 0  ;;  %vm883_vm15 = vcmp.lt.s32.totalorder %v882_v45, 2  ;;  %vm887_vm0 = vcmp.eq.s32.totalorder %v882_v45, 2  ;;  %vm884_vm2 = vcmp.eq.s32.totalorder %v882_v45, 0 }
  0xcb   : > { %5877 = vmatpush.bf16.msra.mxu2 %v5737_v15  ;;  %v859_v59 = vxor.u32 2147483648, %v858_v11  ;;  %vm3363_vm1 = vcmp.eq.s32.totalorder %v3358_v41, 2  ;;  %vm3359_vm3 = vcmp.lt.s32.totalorder %v3358_v41, 2  ;;  %vm3360_vm4 = vcmp.eq.s32.totalorder %v3358_v41, 0 }
  0xcc   : > { %v1205_v45 = vand.u32 2139095040, %v10042_v57 }
  0xcd   : > { %v860_v1 = vsel %vm739_vm13, %v859_v59, %v858_v11  ;;  %v5442_v59 = vmul.f32 %v5410_v18, %v9985_v39 }
  0xce   : > { %v863_v33 = vsel %vm738_vm14, %v9726_v48, %v860_v1 }
  0xcf   : > { %v865_v62 = vmul.f32 %v863_v33, %v863_v33 }
  0xd1   : > { %v866_v10 = vmul.f32 -0.001358992, %v865_v62  ;;  %v873_v49 = vmul.f32 -0.00019511016, %v865_v62 }
  0xd3   : > { %v867_v51 = vadd.f32 0.041655596, %v866_v10  ;;  %v874_v55 = vadd.f32 0.008332121, %v873_v49  ;;  %v5456_v10 = vsub.f32 1.0, %v5440_v46  ;;  %v5457_v49 = vsub.f32 1.0, %v5441_v40 }
  0xd5   : > { %v868_v37 = vmul.f32 %v867_v51, %v865_v62  ;;  %v875_v47 = vmul.f32 %v874_v55, %v865_v62  ;;  %v5616_v8 = vpack.c.bf16 %v5456_v10, %v5392_v25  ;;  %v5617_v7 = vpack.c.bf16 %v5457_v49, %v5393_v16 }
  0xd6   : > { %v14584_v25 = vsub.f32 1.0, %v9860_v32  ;;  %v5488_v35 = vmul.f32 %v9814_v22, %v5456_v10  ;;  %v5489_v60 = vmul.f32 %v9915_v56, %v5457_v49 }
  0xd7   : > { %v869_v61 = vadd.f32 -0.4999988, %v868_v37  ;;  %v876_v19 = vadd.f32 -0.16666654, %v875_v47  ;;  %5780 = vmatpush.bf16.msra.mxu0 %v5616_v8  ;;  %v14581_v37 = vsub.f32 1.0, %v9768_v52  ;;  %v14582_v47 = vsub.f32 1.0, %v9783_v42  ;;  %5829 = vmatpush.bf16.msra.mxu1 %v5617_v7 }
  0xd8   : > { %v5601_v48 = vpack.c.bf16 %v14584_v25, %v14583_v24  ;;  %v5538_v8 = vpack.c.bf16 %v9958_v17, %v9945_v31  ;;  %v14587_v24 = vmov 2131351028  }
  0xd9   : > { %v870_v53 = vmul.f32 %v869_v61, %v865_v62  ;;  %v877_v5 = vmul.f32 %v876_v19, %v865_v62  ;;  %v5458_v62 = vsub.f32 1.0, %v5442_v59  ;;  %v5600_v61 = vpack.c.bf16 %v14582_v47, %v14581_v37 }
  0xda   : > { %v5568_v59 = vpack.c.bf16 %v9807_v23, %v9792_v14  ;;  %v5552_v23 = vpack.c.bf16 %v9780_v63, %v9765_v26  ;;  %v9311_v26 = vld [vmem:[%s9422_s27] sm:$0xff] }
  0xdb   : > { %v871_v15 = vadd.f32 1.0, %v870_v53  ;;  %v878_v11 = vadd.f32 1.0, %v877_v5  ;;  %v5618_v18 = vpack.c.bf16 %v5458_v62, %v5394_v3  ;;  %v10039_v3 = vld [vmem:[%s9422_s27 + $0x38] sm:$0xff]  ;;  %5781 = vmatpush.bf16.msra.mxu0 %v5600_v61  ;;  %v5490_v13 = vmul.f32 %v9999_v12, %v5458_v62  ;;  %5830 = vmatpush.bf16.msra.mxu1 %v5601_v48  ;;  %v10110_v48 = vld [vmem:[%s14434_s1] sm:$0xff] }
  0xdc   : > { %v1360_v19 = vand.u32 2139095040, %v10039_v3  ;;  %v1206_v5 = vshrl.u32 %v1205_v45, 23  ;;  %v5536_v63 = vpack.c.bf16 %v9752_v21, %v9311_v26  ;;  %v14586_v21 = vmov 2475754826  }
  0xdd   : > { %v879_v1 = vmul.f32 %v878_v11, %v863_v33  ;;  %v888_v44 = vxor.u32 2147483648, %v871_v15  ;;  %5878 = vmatpush.bf16.msra.mxu2 %v5618_v18  ;;  %v5585_v11 = vpack.c.bf16 %v9824_v2, %v5489_v60  ;;  %v5586_v22 = vpack.c.bf16 %v9960_v20, %v5490_v13 }
  0xde   : > { %v1361_v53 = vshrl.u32 %v1360_v19, 23  ;;  %v8924_v40 = vadd.s32 4294967169, %v1206_v5  ;;  %v5570_v2 = vpack.c.bf16 %v9995_v27, %v9985_v39  ;;  %v5554_v27 = vpack.c.bf16 %v9975_v50, %v9965_v34 }
  0xdf   : > { %v885_v29 = vxor.u32 2147483648, %v879_v1  ;;  %v889_v51 = vsel %vm887_vm0, %v888_v44, %v879_v1  ;;  %v3365_v55 = vsel %vm3363_vm1, %v888_v44, %v879_v1  ;;  %v5569_v1 = vpack.c.bf16 %v9901_v38, %v9882_v58  ;;  %5831 = vmatpush.bf16.msra.mxu1 %v5585_v11 }
  0xe0   : > { %v8927_v46 = vadd.s32 4294967169, %v1361_v53  ;;  %v1212_v14 = vadd.s32 1, %v8924_v40  ;;  %v5553_v58 = vpack.c.bf16 %v9857_v6, %v9834_v36  ;;  %v9312_v36 = vld [vmem:[%s9422_s27 + $0x8] sm:$0xff]  ;;  %v1357_v50 = vand.u32 2147483647, %v10039_v3 }
  0xe1   : > { %v886_v33 = vsel %vm884_vm2, %v871_v15, %v885_v29  ;;  %v3362_v30 = vsel %vm3360_vm4, %v871_v15, %v885_v29  ;;  %5879 = vmatpush.bf16.msra.mxu2 %v5602_v28  ;;  %v5584_v15 = vpack.c.bf16 %v9756_v43, %v5488_v35  ;;  %v5537_v6 = vpack.c.bf16 %v9822_v54, %v9312_v36 }
  0xe2   : > { %v890_v9 = vsel %vm883_vm15, %v886_v33, %v889_v51  ;;  %v3366_v16 = vsel %vm3359_vm3, %v3362_v30, %v3365_v55  ;;  %v1367_v20 = vadd.s32 1, %v8927_v46  ;;  %vm1213_vm8 = vcmp.gt.s32.totalorder %v1212_v14, 0 }
  0xe3   : > { %v10034_v52 = vsel %vm880_vm5, nan, %v890_v9  ;;  %v10036_v42 = vsel %vm880_vm5, nan, %v3366_v16  ;;  %5782 = vmatpush.bf16.msra.mxu0 %v5584_v15  ;;  %5832 = vmatpush.bf16.msra.mxu1 %v5569_v1  ;;  %v14585_v30 = vmov 683565275   ;;  %v10100_v54 = vsel %vm1213_vm8, %v1212_v14, 0 }
  0xe4   : > { %v5219_v32 = vadd.f32 %v10034_v52, %v10034_v52  ;;  %vm1368_vm7 = vcmp.gt.s32.totalorder %v1367_v20, 0  ;;  %v1364_v61 = vand.u32 8388607, %v1357_v50  ;;  %v14588_v28 = vmov 2102212464  }
  0xe5   : > { %5880 = vmatpush.bf16.msra.mxu2 %v5586_v22  ;;  %v1369_v62 = vsel %vm1368_vm7, %v1367_v20, 0  ;;  %v10121_v60 = vand.u32 31, %v10100_v54  ;;  %v14589_v46 = vmov 920167782   ;;  %v1202_v36 = vand.u32 2147483647, %v10042_v57 }
  0xe6   : > { %v10052_v4 = vmul.f32 %v5219_v32, %v10036_v42  ;;  %v10055_v41 = vmul.f32 %v5219_v32, %v10034_v52  ;;  %v1371_v29 = vand.u32 31, %v1369_v62  ;;  %v10095_v33 = vshrl.u32 %v1369_v62, 5 }
  0xe7   : > { %5783 = vmatpush.bf16.msra.mxu0 %v5568_v59  ;;  %5833 = vmatpush.bf16.msra.mxu1 %v5553_v58  ;;  %v1365_v53 = vor.u32 8388608, %v1364_v61 }
  0xe8   : > { %v5267_v56 = vsub.f32 1.0, %v10055_v41  ;;  %v5283_v12 = vadd.f32 %v10052_v4, %v10052_v4  ;;  %v1372_v18 = vsub.s32 32, %v1371_v29  ;;  %v1374_v37 = vshll.u32 %v14585_v30, %v1371_v29 }
  0xe9   : > { %5881 = vmatpush.bf16.msra.mxu2 %v5570_v2  ;;  %v1377_v47 = vshll.u32 %v14586_v21, %v1371_v29  ;;  %v1380_v25 = vshll.u32 %v14587_v24, %v1371_v29  ;;  %v1383_v5 = vshll.u32 %v14588_v28, %v1371_v29  ;;  %v1386_v59 = vshll.u32 %v14589_v46, %v1371_v29 }
  0xea   : > { %v10067_v44 = vmul.f32 %v5283_v12, %v5267_v56  ;;  %v5315_v43 = vmul.f32 %v5283_v12, %v10052_v4  ;;  %v1375_v9 = vshrl.u32 %v14586_v21, %v1372_v18  ;;  %v1378_v16 = vshrl.u32 %v14587_v24, %v1372_v18 }
  0xeb   : > { %5784 = vmatpush.bf16.msra.mxu0 %v5552_v23  ;;  %v1381_v32 = vshrl.u32 %v14588_v28, %v1372_v18  ;;  %5834 = vmatpush.bf16.msra.mxu1 %v5537_v6  ;;  %v1373_v12 = vshrl.u32 %v14585_v30, %v1372_v18  ;;  %v1384_v40 = vshrl.u32 %v14589_v46, %v1372_v18  ;;  %vm1389_vm10 = vcmp.lt.s32.totalorder %v10095_v33, 1 }
  0xec   : > { %v5331_v10 = vsub.f32 1.0, %v5315_v43  ;;  %v5347_v49 = vadd.f32 %v10067_v44, %v10067_v44  ;;  %v5555_v35 = vpack.c.bf16 %v10067_v44, %v10052_v4  ;;  %v1376_v11 = vor.u32 %v1375_v9, %v1374_v37 }
  0xed   : > { %5882 = vmatpush.bf16.msra.mxu2 %v5554_v27  ;;  %v1379_v22 = vor.u32 %v1378_v16, %v1377_v47  ;;  %v14590_v2 = vmov 1326507024   ;;  %vm1390_vm11 = vcmp.lt.s32.totalorder %v10095_v33, 2  ;;  %vm1391_vm12 = vcmp.lt.s32.totalorder %v10095_v33, 3 }
  0xee   : > { %v10078_v38 = vmul.f32 %v5347_v49, %v5331_v10  ;;  %v5379_v39 = vmul.f32 %v5347_v49, %v10067_v44  ;;  %v10116_v45 = vpack.c.bf16 %v5331_v10, %v5267_v56  ;;  %v1382_v56 = vor.u32 %v1381_v32, %v1380_v25  ;;  %9042 = vmatmul.msk.bf16.vlgmr.msra.gmra.mxu1 %vm5704_vm9, %v10110_v48 }
  0xef   : > { %5785 = vmatpush.bf16.msra.mxu0 %v5536_v63  ;;  %v1387_v20 = vshrl.u32 %v14590_v2, %v1372_v18  ;;  %v1385_v10 = vor.u32 %v1384_v40, %v1383_v5  ;;  %vm1392_vm13 = vcmp.lt.s32.totalorder %v10095_v33, 4  ;;  %v1393_v49 = vsel %vm1389_vm10, %v1373_v12, %v1376_v11 }
  0xf0   : > { %v5395_v51 = vsub.f32 1.0, %v5379_v39  ;;  %v5411_v55 = vadd.f32 %v10078_v38, %v10078_v38  ;;  %v1394_v58 = vsel %vm1392_vm13, %v1382_v56, 2102212464  ;;  %v1397_v39 = vsel %vm1389_vm10, %v1376_v11, %v1379_v22 }
  0xf1   : > { %5883 = vmatpush.bf16.msra.mxu2 %v5538_v8  ;;  %v1388_v23 = vor.u32 %v1387_v20, %v1386_v59  ;;  %v1395_v27 = vsel %vm1391_vm12, %v1379_v22, %v1394_v58  ;;  %v1398_v62 = vsel %vm1392_vm13, %v1385_v10, 920167782  ;;  %v1401_v29 = vsel %vm1389_vm10, %v1379_v22, %v1382_v56 }
  0xf2   : > { %v10091_v7 = vmul.f32 %v5411_v55, %v5395_v51  ;;  %v5443_v34 = vmul.f32 %v5411_v55, %v10078_v38  ;;  %9034 = vmatmul.msk.bf16.vlgmr.msra.gmra.mxu0 %vm5704_vm9, %v10110_v48  ;;  %v10153_v55 = vsel %vm1390_vm11, %v1393_v49, %v1395_v27  ;;  %v1399_v26 = vsel %vm1391_vm12, %v1382_v56, %v1398_v62 }
  0xf3   : > { %v1402_v63 = vsel %vm1392_vm13, %v1388_v23, 1326507024  ;;  %v1400_v6 = vsel %vm1390_vm11, %v1397_v39, %v1399_v26  ;;  %v10170_v16 = vshrl.u32 %v10100_v54, 5  ;;  %v1219_v23 = vshll.u32 %v14585_v30, %v10121_v60 }
  0xf4   : > { %v5475_v31 = vadd.f32 %v10091_v7, %v10091_v7  ;;  %v5459_v17 = vsub.f32 1.0, %v5443_v34  ;;  %v5571_v41 = vpack.c.bf16 %v10091_v7, %v10078_v38  ;;  %9050 = vmatmul.msk.bf16.vlgmr.msra.gmra.mxu2 %vm5704_vm9, %v10110_v48  ;;  %v1403_v8 = vsel %vm1391_vm12, %v1385_v10, %v1402_v63  ;;  %v10220_v38 = vld [vmem:[%s9422_s27 + $0x28] sm:$0xff] }
  0xf5   : > { %v1404_v47 = vsel %vm1390_vm11, %v1401_v29, %v1403_v8  ;;  %vm1234_vm2 = vcmp.lt.s32.totalorder %v10170_v16, 1  ;;  %vm1236_vm3 = vcmp.lt.s32.totalorder %v10170_v16, 3  ;;  %vm1237_vm4 = vcmp.lt.s32.totalorder %v10170_v16, 4 }
  0xf6   : > { %v5507_v19 = vmul.f32 %v5475_v31, %v10091_v7  ;;  %v5619_v13 = vpack.c.bf16 %v5459_v17, %v5395_v51  ;;  %v5491_v43 = vmul.f32 %v5475_v31, %v5459_v17  ;;  %v10149_v51 = vshll.u32 %v1365_v53, 8 }
  0xf7   : > { %v1430_v31 = vand.u32 65535, %v1400_v6  ;;  %v1431_v17 = vshrl.u32 %v1400_v6, 16  ;;  %v1408_v61 = vand.u32 65535, %v1404_v47  ;;  %v1409_v25 = vshrl.u32 %v1404_v47, 16 }
  0xf8   : > { %v5523_v15 = vsub.f32 1.0, %v5507_v19  ;;  %v1406_v34 = vand.u32 65535, %v10149_v51  ;;  %v1407_v18 = vshrl.u32 %v10149_v51, 16  ;;  %v5587_v37 = vpack.c.bf16 %v10036_v42, %v5491_v43 }
  0xf9   : > { %v1450_v9 = vmul.u32 %v10149_v51, %v10153_v55  ;;  %v10174_v42 = vand.u32 8388607, %v1202_v36  ;;  %v1222_v6 = vshll.u32 %v14586_v21, %v10121_v60  ;;  %vm1235_vm5 = vcmp.lt.s32.totalorder %v10170_v16, 2 }
  0xfa   : > { %v5635_v1 = vpack.c.bf16 %v5523_v15, %v5523_v15  ;;  %v1432_v32 = vmul.u32 %v1430_v31, %v1406_v34  ;;  %v1433_v19 = vmul.u32 %v1431_v17, %v1406_v34  ;;  %v1434_v53 = vmul.u32 %v1430_v31, %v1407_v18 }
  0xfb   : > { %v1410_v33 = vmul.u32 %v1408_v61, %v1406_v34  ;;  %v1411_v5 = vmul.u32 %v1409_v25, %v1406_v34  ;;  %v1412_v15 = vmul.u32 %v1408_v61, %v1407_v18  ;;  %v1413_v11 = vmul.u32 %v1409_v25, %v1407_v18 }
  0xfc   : > { %v5740_v14 = vsel %vm5729_vm6, %v5635_v1, 0  ;;  %v1435_v22 = vmul.u32 %v1431_v17, %v1407_v18  ;;  %v1436_v56 = vshll.u32 %v1433_v19, 16  ;;  %v1438_v12 = vshll.u32 %v1434_v53, 16 }
  0xfd   : > { %5926 = vmatpush.bf16.msra.mxu3 %v5740_v14  ;;  %v1414_v54 = vshll.u32 %v1411_v5, 16  ;;  %v1416_v40 = vshll.u32 %v1412_v15, 16  ;;  %v1437_v59 = vshrl.u32 %v1433_v19, 16  ;;  %v1439_v1 = vshrl.u32 %v1434_v53, 16 }
  0xfe   : > { %v1415_v43 = vshrl.u32 %v1411_v5, 16  ;;  %v1417_v20 = vshrl.u32 %v1412_v15, 16  ;;  %vm1440_vm14 = vc.u32 %v1432_v32, %v1436_v56  ;;  %v1442_v10 = vadd.s32 %v1436_v56, %v1432_v32 }
  0xff   : > { %vm1418_vm15 = vc.u32 %v1410_v33, %v1414_v54  ;;  %v1420_v49 = vadd.s32 %v1414_v54, %v1410_v33  ;;  %v1441_v14 = vsel %vm1440_vm14, 1, %v14463_v0  ;;  %v1228_v61 = vshll.u32 %v14588_v28, %v10121_v60 }
 0x100   : > { %v1419_v58 = vsel %vm1418_vm15, 1, %v14463_v0  ;;  %v1443_v39 = vadd.s32 %v1441_v14, %v1435_v22  ;;  %vm1444_vm0 = vc.u32 %v1442_v10, %v1438_v12  ;;  %v10208_v19 = vadd.s32 %v1442_v10, %v1438_v12 }
 0x101   : > { %5927 = vmatpush.bf16.msra.mxu3 %v5619_v13  ;;  %v10177_v13 = vsub.s32 32, %v10121_v60  ;;  %v1421_v27 = vadd.s32 %v1419_v58, %v1413_v11  ;;  %vm1422_vm1 = vc.u32 %v1420_v49, %v1416_v40  ;;  %v1445_v62 = vsel %vm1444_vm0, 1, %v14463_v0 }
 0x102   : > { %v1423_v26 = vsel %vm1422_vm1, 1, %v14463_v0  ;;  %v1447_v63 = vadd.s32 %v1445_v62, %v1443_v39  ;;  %v1231_v53 = vshll.u32 %v14589_v46, %v10121_v60  ;;  %v1050_v4 = vand.u32 2139095040, %v10220_v38 }
 0x103   : > { %v1220_v29 = vshrl.u32 %v14586_v21, %v10177_v13  ;;  %v1223_v8 = vshrl.u32 %v14587_v24, %v10177_v13  ;;  %v1425_v34 = vadd.s32 %v1423_v26, %v1421_v27  ;;  %v1226_v47 = vshrl.u32 %v14588_v28, %v10177_v13 }
 0x104   : > { %v1448_v31 = vadd.s32 %v1447_v63, %v1437_v59  ;;  %v1229_v25 = vshrl.u32 %v14589_v46, %v10177_v13  ;;  %v1051_v58 = vshrl.u32 %v1050_v4, 23  ;;  %vm1359_vm1 = vcmp.lt.s32.totalorder %v10039_v3, 0 }
 0x105   : > { %5928 = vmatpush.bf16.msra.mxu3 %v10116_v45  ;;  %v1210_v45 = vor.u32 8388608, %v10174_v42  ;;  %v10193_v18 = vor.u32 %v1220_v29, %v1219_v23  ;;  %v10199_v17 = vor.u32 %v1223_v8, %v1222_v6  ;;  %v1426_v32 = vadd.s32 %v1425_v34, %v1415_v43 }
 0x106   : > { %v1232_v42 = vshrl.u32 %v14590_v2, %v10177_v13  ;;  %v1449_v33 = vadd.s32 %v1448_v31, %v1439_v1  ;;  %v1230_v15 = vor.u32 %v1229_v25, %v1228_v61  ;;  %v8921_v61 = vadd.s32 4294967169, %v1051_v58 }
 0x107   : > { %v10215_v11 = vadd.s32 %v1426_v32, %v1417_v20  ;;  %v10249_v1 = vshll.u32 %v1210_v45, 8  ;;  %v1218_v45 = vshrl.u32 %v14585_v30, %v10177_v13 }
 0x108   : > { %v1233_v22 = vor.u32 %v1232_v42, %v1231_v53  ;;  %v1453_v7 = vadd.s32 1, %v1449_v33  ;;  %v1243_v12 = vsel %vm1237_vm4, %v1230_v15, 920167782 }
 0x109   : > { %5929 = vmatpush.bf16.msra.mxu3 %v5587_v37  ;;  %v1225_v37 = vshll.u32 %v14587_v24, %v10121_v60  ;;  %v1242_v60 = vsel %vm1234_vm2, %v10193_v18, %v10199_v17  ;;  %vm1452_vm7 = vc.u32 %v10215_v11, %v10208_v19  ;;  %v1251_v51 = vand.u32 65535, %v10249_v1 }
 0x10a   : > { %v1454_v54 = vsel %vm1452_vm7, %v1453_v7, %v1449_v33  ;;  %v1252_v55 = vshrl.u32 %v10249_v1, 16  ;;  %v1238_v13 = vsel %vm1234_vm2, %v1218_v45, %v10193_v18 }
 0x10b   : > { %v1227_v5 = vor.u32 %v1226_v47, %v1225_v37 }
 0x10d   : > { %5930 = vmatpush.bf16.msra.mxu3 %v5571_v41  ;;  %v9313_v41 = vld [vmem:[%s9422_s27 + $0x18] sm:$0xff]  ;;  %v1244_v40 = vsel %vm1236_vm3, %v1227_v5, %v1243_v12  ;;  %v1246_v59 = vsel %vm1234_vm2, %v10199_v17, %v1227_v5  ;;  %vm10299_vm2 = vcmp.le.f32.partialorder %v1357_v50, 0.7853982 }
 0x10e   : > { %v5539_v56 = vpack.c.bf16 %v10034_v52, %v9313_v41  ;;  %v1455_v52 = vadd.s32 %v1454_v54, %v1450_v9  ;;  %v1245_v44 = vsel %vm1235_vm5, %v1242_v60, %v1244_v40 }
 0x10f   : > { %v1275_v20 = vand.u32 65535, %v1245_v44  ;;  %v1276_v10 = vshrl.u32 %v1245_v44, 16  ;;  %v1047_v44 = vand.u32 2147483647, %v10220_v38 }
 0x110   : > { %v1456_v49 = vadd.s32 536870912, %v1455_v52 }
 0x111   : > { %5931 = vmatpush.bf16.msra.mxu3 %v5555_v35  ;;  %v1247_v35 = vsel %vm1237_vm4, %v1233_v22, 1326507024  ;;  %v1278_v27 = vmul.u32 %v1276_v10, %v1251_v51  ;;  %v1279_v63 = vmul.u32 %v1275_v20, %v1252_v55  ;;  %v1277_v8 = vmul.u32 %v1275_v20, %v1251_v51 }
 0x112   : > { %v1248_v43 = vsel %vm1236_vm3, %v1230_v15, %v1247_v35  ;;  %v10257_v39 = vshrl.u32 %v1456_v49, 30  ;;  %v1280_v32 = vmul.u32 %v1276_v10, %v1252_v55  ;;  %v1057_v35 = vadd.s32 1, %v8921_v61 }
 0x113   : > { %v1249_v14 = vsel %vm1235_vm5, %v1246_v59, %v1248_v43  ;;  %v1281_v34 = vshll.u32 %v1278_v27, 16  ;;  %v1283_v33 = vshll.u32 %v1279_v63, 16  ;;  %v1282_v4 = vshrl.u32 %v1278_v27, 16 }
 0x114   : > { %v1253_v9 = vand.u32 65535, %v1249_v14  ;;  %v1254_v23 = vshrl.u32 %v1249_v14, 16  ;;  %v1458_v6 = vshll.u32 %v10257_v39, 30  ;;  %v1451_v49 = vadd.s32 %v10208_v19, %v10215_v11 }
 0x115   : > { %5932 = vmatpush.bf16.msra.mxu3 %v5539_v56  ;;  %vm1285_vm11 = vc.u32 %v1277_v8, %v1281_v34  ;;  %v1287_v41 = vadd.s32 %v1281_v34, %v1277_v8  ;;  %vm1058_vm14 = vcmp.gt.s32.totalorder %v1057_v35, 0  ;;  %v1054_v45 = vand.u32 8388607, %v1047_v44 }
 0x116   : > { %v1255_v62 = vmul.u32 %v1253_v9, %v1251_v51  ;;  %v1256_v29 = vmul.u32 %v1254_v23, %v1251_v51  ;;  %v1257_v26 = vmul.u32 %v1253_v9, %v1252_v55  ;;  %v1258_v37 = vmul.u32 %v1254_v23, %v1252_v55 }
 0x117   : > { %v1459_v25 = vsub.s32 %v1455_v52, %v1458_v6  ;;  %v1286_v60 = vsel %vm1285_vm11, 1, %v14463_v0  ;;  %vm1289_vm13 = vc.u32 %v1287_v41, %v1283_v33  ;;  %v10283_v55 = vadd.s32 %v1287_v41, %v1283_v33 }
 0x118   : > { %9058 = vmatmul.msk.bf16.vlgmr.msra.gmra.mxu3 %vm5704_vm9, %v10110_v48  ;;  %v1259_v47 = vshll.u32 %v1256_v29, 16  ;;  %v1261_v31 = vshll.u32 %v1257_v26, 16  ;;  %v1239_v48 = vsel %vm1237_vm4, %v1227_v5, 2102212464  ;;  %v1260_v53 = vshrl.u32 %v1256_v29, 16 }
 0x119   : > { %vm1460_vm10 = vcmp.lt.s32.totalorder %v1459_v25, 0  ;;  %v1461_v15 = vsub.s32 0, %v1459_v25  ;;  %v1240_v18 = vsel %vm1236_vm3, %v10199_v17, %v1239_v48  ;;  %v1288_v12 = vadd.s32 %v1286_v60, %v1280_v32 }
 0x11a   : > { %vm1263_vm8 = vc.u32 %v1255_v62, %v1259_v47  ;;  %v1265_v42 = vadd.s32 %v1259_v47, %v1255_v62  ;;  %v1262_v40 = vshrl.u32 %v1257_v26, 16  ;;  %v1290_v52 = vsel %vm1289_vm13, 1, %v14463_v0 }
 0x11b   : > { %v1264_v22 = vsel %vm1263_vm8, 1, %v14463_v0  ;;  %v1462_v56 = vsel %vm1460_vm10, %v1461_v15, %v1459_v25  ;;  %v1292_v10 = vadd.s32 %v1290_v52, %v1288_v12  ;;  %v1284_v17 = vshrl.u32 %v1279_v63, 16 }
 0x11c   : > { %v1266_v7 = vadd.s32 %v1264_v22, %v1258_v37  ;;  %vm1267_vm12 = vc.u32 %v1265_v42, %v1261_v31  ;;  %v1463_v54 = vclz %v1462_v56  ;;  %v1241_v14 = vsel %vm1235_vm5, %v1238_v13, %v1240_v18 }
 0x11d   : > { %v1268_v5 = vsel %vm1267_vm12, 1, %v14463_v0  ;;  %v1481_v23 = vsub.s32 4, %v10257_v39  ;;  %v1293_v58 = vadd.s32 %v1292_v10, %v1282_v4  ;;  %v1059_v11 = vsel %vm1058_vm14, %v1057_v35, 0  ;;  %v10326_v4 = vld [vmem:[%s9422_s27 + $0x20] sm:$0xff] }
 0x11e   : > { %v1270_v59 = vadd.s32 %v1268_v5, %v1266_v7  ;;  %v8928_v43 = vadd.s32 4294967294, %v1463_v54  ;;  %v1295_v16 = vmul.u32 %v10249_v1, %v1241_v14  ;;  %v1061_v8 = vand.u32 31, %v1059_v11 }
 0x11f   : > { %v1294_v29 = vadd.s32 %v1293_v58, %v1284_v17  ;;  %v1482_v47 = vsel %vm1359_vm1, %v1481_v23, %v10257_v39  ;;  %v1055_v31 = vor.u32 8388608, %v1054_v45  ;;  %v10310_v50 = vshrl.u32 %v1059_v11, 5 }
 0x120   : > { %v1271_v20 = vadd.s32 %v1270_v59, %v1260_v53  ;;  %vm8929_vm15 = vcmp.lt.s32.totalorder %v8928_v43, 0  ;;  %v1484_v32 = vsel %vm10299_vm2, 0, %v1482_v47  ;;  %v1067_v42 = vshll.u32 %v14586_v21, %v1061_v8 }
 0x121   : > { %v1466_v9 = vsel %vm8929_vm15, 0, %v8928_v43  ;;  %v1298_v6 = vadd.s32 1, %v1294_v29  ;;  %v10308_v15 = vshll.u32 %v1055_v31, 8  ;;  %v1070_v7 = vshll.u32 %v14587_v24, %v1061_v8 }
 0x122   : > { %v10281_v51 = vadd.s32 %v1271_v20, %v1262_v40  ;;  %v1467_v27 = vsub.s32 32, %v1466_v9  ;;  %v1468_v62 = vshll.u32 %v1459_v25, %v1466_v9  ;;  %v1471_v19 = vsub.s32 4294967266, %v1466_v9 }
 0x123   : > { %v10295_v25 = vsub.s32 32, %v1061_v8  ;;  %v1501_v56 = vadd.s32 3, %v1484_v32  ;;  %v1064_v18 = vshll.u32 %v14585_v30, %v1061_v8  ;;  %v1073_v40 = vshll.u32 %v14588_v28, %v1061_v8 }
 0x124   : > { %v1469_v26 = vshrl.u32 %v1451_v49, %v1467_v27  ;;  %v1472_v63 = vadd.s32 127, %v1471_v19  ;;  %vm1297_vm0 = vc.u32 %v10281_v51, %v10283_v55  ;;  %v1076_v43 = vshll.u32 %v14589_v46, %v1061_v8 }
 0x125   : > { %v1299_v61 = vsel %vm1297_vm0, %v1298_v6, %v1294_v29  ;;  %v1068_v33 = vshrl.u32 %v14587_v24, %v10295_v25  ;;  %v1071_v60 = vshrl.u32 %v14588_v28, %v10295_v25  ;;  %v1065_v5 = vshrl.u32 %v14586_v21, %v10295_v25 }
 0x126   : > { %v1470_v34 = vor.u32 %v1469_v26, %v1468_v62  ;;  %v1473_v37 = vshll.u32 %v1472_v63, 23  ;;  %v1300_v53 = vadd.s32 %v1299_v61, %v1295_v16  ;;  %v1074_v59 = vshrl.u32 %v14589_v46, %v10295_v25 }
 0x127   : > { %v10320_v54 = vor.u32 %v1068_v33, %v1067_v42  ;;  %v1072_v35 = vor.u32 %v1071_v60, %v1070_v7  ;;  %v1077_v20 = vshrl.u32 %v14590_v2, %v10295_v25  ;;  %vm1079_vm3 = vcmp.lt.s32.totalorder %v10310_v50, 1 }
 0x128   : > { %v1474_v48 = vor.u32 4788187, %v1473_v37  ;;  %v1477_v1 = vcvt.s32.f32 %v1470_v34  ;;  %v1301_v22 = vadd.s32 536870912, %v1300_v53  ;;  %v1075_v49 = vor.u32 %v1074_v59, %v1073_v40 }
 0x129   : > { %vm1082_vm4 = vcmp.lt.s32.totalorder %v10310_v50, 4  ;;  %v1078_v14 = vor.u32 %v1077_v20, %v1076_v43  ;;  %v10337_v9 = vand.u32 65535, %v10308_v15  ;;  %v895_v23 = vand.u32 2139095040, %v10326_v4 }
 0x12a   : > { %v1475_v39 = vand.u32 2147483647, %v1474_v48  ;;  %v10318_v12 = vshrl.u32 %v1301_v22, 30  ;;  %v1066_v27 = vor.u32 %v1065_v5, %v1064_v18  ;;  %vm1081_vm5 = vcmp.lt.s32.totalorder %v10310_v50, 3 }
 0x12b   : > { %vm1080_vm7 = vcmp.lt.s32.totalorder %v10310_v50, 2  ;;  %v1088_v19 = vsel %vm1082_vm4, %v1075_v49, 920167782  ;;  %v1091_v11 = vsel %vm1079_vm3, %v10320_v54, %v1072_v35  ;;  %v10356_v29 = vand.u32 3, %v1501_v56 }
 0x12c   : > { %v1478_v41 = vmul.f32 %v1477_v1, %v1475_v39  ;;  %v1303_v10 = vshll.u32 %v10318_v12, 30  ;;  %v1092_v63 = vsel %vm1082_vm4, %v1078_v14, 1326507024  ;;  %v10362_v8 = vand.u32 3, %v1484_v32 }
 0x12d   : > { %v1093_v34 = vsel %vm1081_vm5, %v1075_v49, %v1092_v63  ;;  %v1087_v47 = vsel %vm1079_vm3, %v1066_v27, %v10320_v54  ;;  %v1089_v31 = vsel %vm1081_vm5, %v1072_v35, %v1088_v19  ;;  %v1097_v32 = vshrl.u32 %v10308_v15, 16 }
 0x12e   : > { %v1479_v52 = vxor.u32 2147483648, %v1478_v41  ;;  %v10345_v45 = vsub.s32 %v1300_v53, %v1303_v10  ;;  %v1094_v61 = vsel %vm1080_vm7, %v1091_v11, %v1093_v34  ;;  %vm1507_vm10 = vcmp.eq.s32.totalorder %v10356_v29, 2 }
 0x12f   : > { %v1296_v53 = vadd.s32 %v10283_v55, %v10281_v51  ;;  %v1099_v42 = vshrl.u32 %v1094_v61, 16  ;;  %v10378_v39 = vshrl.u32 %v895_v23, 23  ;;  %v1090_v60 = vsel %vm1080_vm7, %v1087_v47, %v1089_v31 }
 0x130   : > { %v1480_v17 = vsel %vm1359_vm1, %v1479_v52, %v1478_v41  ;;  %vm1305_vm8 = vcmp.lt.s32.totalorder %v10345_v45, 0  ;;  %v1306_v26 = vsub.s32 0, %v10345_v45  ;;  %vm1504_vm11 = vcmp.eq.s32.totalorder %v10356_v29, 0 }
 0x131   : > { %v10343_v58 = vsel %vm10299_vm2, %v10039_v3, %v1480_v17  ;;  %vm3976_vm12 = vcmp.eq.s32.totalorder %v10362_v8, 0  ;;  %v1063_v41 = vshrl.u32 %v14585_v30, %v10295_v25  ;;  %v1084_v56 = vsel %vm1082_vm4, %v1072_v35, 2102212464 }
 0x132   : > { %v1485_v62 = vmul.f32 %v10343_v58, %v10343_v58  ;;  %v1307_v37 = vsel %vm1305_vm8, %v1306_v26, %v10345_v45  ;;  %v1098_v51 = vand.u32 65535, %v1094_v61  ;;  %vm1503_vm13 = vcmp.lt.s32.totalorder %v10356_v29, 2 }
 0x133   : > { %v1308_v1 = vclz %v1307_v37  ;;  %vm3975_vm14 = vcmp.lt.s32.totalorder %v10362_v8, 2  ;;  %vm3979_vm15 = vcmp.eq.s32.totalorder %v10362_v8, 2  ;;  %vm1500_vm1 = vweird.f32 %v10039_v3 }
 0x134   : > { %v1486_v16 = vmul.f32 -0.001358992, %v1485_v62  ;;  %v1493_v6 = vmul.f32 -0.00019511016, %v1485_v62  ;;  %v10393_v40 = vmul.u32 %v1099_v42, %v10337_v9  ;;  %v1120_v25 = vand.u32 65535, %v1090_v60 }
 0x135   : > { %v8925_v7 = vadd.s32 4294967294, %v1308_v1  ;;  %v1121_v59 = vshrl.u32 %v1090_v60, 16  ;;  %v1083_v49 = vsel %vm1079_vm3, %v1063_v41, %v1066_v27  ;;  %v1085_v17 = vsel %vm1081_vm5, %v10320_v54, %v1084_v56 }
 0x136   : > { %v1487_v13 = vadd.f32 0.041655596, %v1486_v16  ;;  %v1494_v48 = vadd.f32 0.008332121, %v1493_v6  ;;  %v10401_v14 = vmul.u32 %v1098_v51, %v1097_v32  ;;  %v1326_v26 = vsub.s32 4, %v10318_v12 }
 0x137   : > { %vm8926_vm0 = vcmp.lt.s32.totalorder %v8925_v7, 0  ;;  %vm1204_vm2 = vcmp.lt.s32.totalorder %v10042_v57, 0  ;;  %v1104_v63 = vshll.u32 %v10393_v40, 16  ;;  %v1122_v27 = vmul.u32 %v1120_v25, %v10337_v9 }
 0x138   : > { %v1488_v33 = vmul.f32 %v1487_v13, %v1485_v62  ;;  %v1495_v22 = vmul.f32 %v1494_v48, %v1485_v62  ;;  %v1311_v5 = vsel %vm8926_vm0, 0, %v8925_v7  ;;  %v10410_v34 = vmul.u32 %v1121_v59, %v10337_v9 }
 0x139   : > { %v1312_v43 = vsub.s32 32, %v1311_v5  ;;  %v1313_v20 = vshll.u32 %v10345_v45, %v1311_v5  ;;  %v1316_v10 = vsub.s32 4294967266, %v1311_v5  ;;  %v1100_v45 = vmul.u32 %v1098_v51, %v10337_v9 }
 0x13a   : > { %v1489_v55 = vadd.f32 -0.4999988, %v1488_v33  ;;  %v1496_v18 = vadd.f32 -0.16666654, %v1495_v22  ;;  %vm10414_vm3 = vcmp.le.f32.partialorder %v1202_v36, 0.7853982  ;;  %v1103_v31 = vmul.u32 %v1099_v42, %v1097_v32 }
 0x13b   : > { %v1314_v11 = vshrl.u32 %v1296_v53, %v1312_v43  ;;  %v1105_v61 = vshrl.u32 %v10393_v40, 16  ;;  %v1106_v13 = vshll.u32 %v10401_v14, 16  ;;  %vm1108_vm4 = vc.u32 %v1100_v45, %v1104_v63 }
 0x13c   : > { %v1490_v52 = vmul.f32 %v1489_v55, %v1485_v62  ;;  %v1497_v35 = vmul.f32 %v1496_v18, %v1485_v62  ;;  %v1317_v62 = vadd.s32 127, %v1316_v10  ;;  %v1110_v36 = vadd.s32 %v1104_v63, %v1100_v45 }
 0x13d   : > { %v1315_v54 = vor.u32 %v1314_v11, %v1313_v20  ;;  %v1124_v33 = vmul.u32 %v1120_v25, %v1097_v32  ;;  %v1109_v7 = vsel %vm1108_vm4, 1, %v14463_v0  ;;  %v1125_v60 = vmul.u32 %v1121_v59, %v1097_v32 }
 0x13e   : > { %v1491_v23 = vadd.f32 1.0, %v1490_v52  ;;  %v1498_v19 = vadd.f32 1.0, %v1497_v35  ;;  %v1318_v47 = vshll.u32 %v1317_v62, 23  ;;  %v1111_v55 = vadd.s32 %v1109_v7, %v1103_v31 }
 0x13f   : > { %v1322_v1 = vcvt.s32.f32 %v1315_v54  ;;  %vm1112_vm5 = vc.u32 %v1110_v36, %v1106_v13  ;;  %v1126_v40 = vshll.u32 %v10410_v34, 16  ;;  %v1086_v8 = vsel %vm1080_vm7, %v1083_v49, %v1085_v17 }
 0x140   : > { %v1499_v16 = vmul.f32 %v1498_v19, %v10343_v58  ;;  %v1508_v6 = vxor.u32 2147483648, %v1491_v23  ;;  %v1319_v53 = vor.u32 4788187, %v1318_v47  ;;  %v1113_v25 = vsel %vm1112_vm5, 1, %v14463_v0 }
 0x141   : > { %v1327_v59 = vsel %vm1204_vm2, %v1326_v26, %v10318_v12  ;;  %v1115_v52 = vadd.s32 %v1113_v25, %v1111_v55  ;;  %v1128_v3 = vshll.u32 %v1124_v33, 16  ;;  %vm1130_vm8 = vc.u32 %v1122_v27, %v1126_v40 }
 0x142   : > { %v1505_v48 = vxor.u32 2147483648, %v1499_v16  ;;  %v1509_v58 = vsel %vm1507_vm10, %v1508_v6, %v1499_v16  ;;  %v3981_v9 = vsel %vm3979_vm15, %v1508_v6, %v1499_v16  ;;  %v1320_v51 = vand.u32 2147483647, %v1319_v53 }
 0x143   : > { %v1131_v10 = vsel %vm1130_vm8, 1, %v14463_v0  ;;  %v1107_v50 = vshrl.u32 %v10401_v14, 16  ;;  %v1116_v49 = vadd.s32 %v1115_v52, %v1105_v61  ;;  %v1132_v17 = vadd.s32 %v1126_v40, %v1122_v27 }
 0x144   : > { %v1506_v22 = vsel %vm1504_vm11, %v1491_v23, %v1505_v48  ;;  %v3978_v42 = vsel %vm3976_vm12, %v1491_v23, %v1505_v48  ;;  %v1323_v32 = vmul.f32 %v1322_v1, %v1320_v51  ;;  %v1133_v23 = vadd.s32 %v1131_v10, %v1125_v60 }
 0x145   : > { %v1510_v41 = vsel %vm1503_vm13, %v1506_v22, %v1509_v58  ;;  %v3982_v56 = vsel %vm3975_vm14, %v3978_v42, %v3981_v9  ;;  %v1329_v26 = vsel %vm10414_vm3, 0, %v1327_v59  ;;  %v1127_v14 = vshrl.u32 %v10410_v34, 16 }
 0x146   : > { %v10435_v18 = vsel %vm1500_vm1, nan, %v1510_v41  ;;  %v10439_v5 = vsel %vm1500_vm1, nan, %v3982_v56  ;;  %v1324_v20 = vxor.u32 2147483648, %v1323_v32  ;;  %vm1134_vm7 = vc.u32 %v1132_v17, %v1128_v3 }
 0x147   : > { %14595 = vst [vmem:[#allocation2_spill] sm:$0xff] %v10435_v18  ;;  %v5223_v29 = vadd.f32 %v10435_v18, %v10435_v18  ;;  %v8918_v45 = vadd.s32 4294967169, %v10378_v39  ;;  %v1135_v6 = vsel %vm1134_vm7, 1, %v14463_v0  ;;  %v10478_v54 = vadd.s32 %v1116_v49, %v1107_v50 }
 0x148   : > { %v1325_v11 = vsel %vm1204_vm2, %v1324_v20, %v1323_v32  ;;  %v1129_v47 = vshrl.u32 %v1124_v33, 16  ;;  %v10480_v37 = vadd.s32 %v1132_v17, %v1128_v3  ;;  %v1137_v31 = vadd.s32 %v1135_v6, %v1133_v23 }
 0x149   : > { %v10451_v35 = vmul.f32 %v5223_v29, %v10439_v5  ;;  %v10454_v43 = vmul.f32 %v5223_v29, %v10435_v18  ;;  %v1328_v62 = vsel %vm10414_vm3, %v10042_v57, %v1325_v11  ;;  %v1346_v48 = vadd.s32 3, %v1329_v26 }
 0x14a   : > { %v1330_v16 = vmul.f32 %v1328_v62, %v1328_v62  ;;  %v1138_v58 = vadd.s32 %v1137_v31, %v1127_v14  ;;  %v902_v9 = vadd.s32 1, %v8918_v45  ;;  %v1140_v42 = vmul.u32 %v10308_v15, %v1086_v8 }
 0x14b   : > { %v14459_v19 = vsub.f32 1.0, %v10454_v43  ;;  %v5287_v12 = vadd.f32 %v10451_v35, %v10451_v35  ;;  %vm1142_vm10 = vc.u32 %v10478_v54, %v10480_v37  ;;  %v1347_v51 = vand.u32 3, %v1346_v48 }
 0x14c   : > { %v1331_v61 = vmul.f32 -0.001358992, %v1330_v16  ;;  %v1338_v13 = vmul.f32 -0.00019511016, %v1330_v16  ;;  %v1139_v22 = vadd.s32 %v1138_v58, %v1129_v47  ;;  %vm903_vm11 = vcmp.gt.s32.totalorder %v902_v9, 0 }
 0x14d   : > { %v10472_v63 = vmul.f32 %v5287_v12, %v14459_v19  ;;  %v10475_v27 = vmul.f32 %v5287_v12, %v10451_v35  ;;  %v904_v40 = vsel %vm903_vm11, %v902_v9, 0  ;;  %v3820_v8 = vand.u32 3, %v1329_v26 }
 0x14e   : > { %v1332_v36 = vadd.f32 0.041655596, %v1331_v61  ;;  %v1339_v33 = vadd.f32 0.008332121, %v1338_v13  ;;  %v1143_v55 = vadd.s32 1, %v1139_v22  ;;  %v906_v59 = vand.u32 31, %v904_v40 }
 0x14f   : > { %v14458_v34 = vsub.f32 1.0, %v10475_v27  ;;  %v5351_v39 = vadd.f32 %v10472_v63, %v10472_v63  ;;  %vm1348_vm12 = vcmp.lt.s32.totalorder %v1347_v51, 2  ;;  %vm1349_vm13 = vcmp.eq.s32.totalorder %v1347_v51, 0 }
 0x150   : > { %v1333_v41 = vmul.f32 %v1332_v36, %v1330_v16  ;;  %v1340_v56 = vmul.f32 %v1339_v33, %v1330_v16  ;;  %v1144_v25 = vsel %vm1142_vm10, %v1143_v55, %v1139_v22  ;;  %vm1352_vm14 = vcmp.eq.s32.totalorder %v1347_v51, 2 }
 0x151   : > { %v10487_v1 = vmul.f32 %v5351_v39, %v14458_v34  ;;  %v10490_v53 = vmul.f32 %v5351_v39, %v10472_v63  ;;  %v1145_v10 = vadd.s32 %v1144_v25, %v1140_v42  ;;  %v14462_v50 = vand.u32 2147483647, %v10326_v4 }
 0x152   : > { %v1334_v15 = vadd.f32 -0.4999988, %v1333_v41  ;;  %v1341_v32 = vadd.f32 -0.16666654, %v1340_v56  ;;  %vm1345_vm15 = vweird.f32 %v10042_v57  ;;  %vm3821_vm0 = vcmp.lt.s32.totalorder %v3820_v8, 2 }
 0x153   : > { %v14461_v7 = vsub.f32 1.0, %v10490_v53  ;;  %v10498_v60 = vadd.f32 %v10487_v1, %v10487_v1  ;;  %v1146_v12 = vadd.s32 536870912, %v1145_v10  ;;  %vm3825_vm1 = vcmp.eq.s32.totalorder %v3820_v8, 2 }
 0x154   : > { %v1335_v3 = vmul.f32 %v1334_v15, %v1330_v16  ;;  %v1342_v20 = vmul.f32 %v1341_v32, %v1330_v16  ;;  %v10513_v11 = vsub.s32 32, %v906_v59  ;;  %vm3822_vm2 = vcmp.eq.s32.totalorder %v3820_v8, 0  ;;  %v10541_v32 = vld [vmem:[%s14434_s1 + $0x8] sm:$0xff] }
 0x155   : > { %v10503_v29 = vmul.f32 %v10498_v60, %v14461_v7  ;;  %v10515_v16 = vshrl.u32 %v1146_v12, 30  ;;  %v899_v6 = vand.u32 8388607, %v14462_v50  ;;  %v10519_v47 = vshrl.u32 %v904_v40, 5  ;;  %14596 = vst [vmem:[#allocation3_spill] sm:$0xff] %v10541_v32  ;;  %9035 = vmatmul.msk.bf16.gmra.mxu0 %vm5704_vm9, %v10541_v32  ;;  %9043 = vmatmul.msk.bf16.gmra.mxu1 %vm5704_vm9, %v10541_v32 }
 0x156   : > { %v1336_v17 = vadd.f32 1.0, %v1335_v3  ;;  %v1343_v23 = vadd.f32 1.0, %v1342_v20  ;;  %v909_v31 = vshll.u32 %v14585_v30, %v906_v59  ;;  %v912_v9 = vshll.u32 %v14586_v21, %v906_v59  ;;  %9051 = vmatmul.msk.bf16.gmra.mxu2 %vm5704_vm9, %v10541_v32  ;;  %9059 = vmatmul.msk.bf16.gmra.mxu3 %vm5704_vm9, %v10541_v32 }
 0x157   : > { %v10507_v52 = vadd.f32 %v10503_v29, %v10503_v29  ;;  %v1148_v58 = vshll.u32 %v10515_v16, 30  ;;  %v918_v36 = vshll.u32 %v14588_v28, %v906_v59  ;;  %v919_v41 = vshrl.u32 %v14589_v46, %v10513_v11 }
 0x158   : > { %v1344_v14 = vmul.f32 %v1343_v23, %v1328_v62  ;;  %v1353_v45 = vxor.u32 2147483648, %v1336_v17  ;;  %v910_v62 = vshrl.u32 %v14586_v21, %v10513_v11  ;;  %v913_v15 = vshrl.u32 %v14587_v24, %v10513_v11 }
 0x159   : > { %v5511_v49 = vmul.f32 %v10507_v52, %v10503_v29  ;;  %v10534_v40 = vsub.s32 %v1145_v10, %v1148_v58  ;;  %v915_v8 = vshll.u32 %v14587_v24, %v906_v59  ;;  %v916_v3 = vshrl.u32 %v14588_v28, %v10513_v11 }
 0x15a   : > { %v1350_v61 = vxor.u32 2147483648, %v1344_v14  ;;  %v1354_v13 = vsel %vm1352_vm14, %v1353_v45, %v1344_v14  ;;  %v3827_v48 = vsel %vm3825_vm1, %v1353_v45, %v1344_v14  ;;  %v900_v57 = vor.u32 8388608, %v899_v6 }
 0x15b   : > { %v5527_v26 = vsub.f32 1.0, %v5511_v49  ;;  %vm1150_vm3 = vcmp.lt.s32.totalorder %v10534_v40, 0  ;;  %v1151_v10 = vsub.s32 0, %v10534_v40  ;;  %v921_v49 = vshll.u32 %v14589_v46, %v906_v59 }
 0x15c   : > { %v1351_v22 = vsel %vm1349_vm13, %v1336_v17, %v1350_v61  ;;  %v3824_v42 = vsel %vm3822_vm2, %v1336_v17, %v1350_v61  ;;  %v10563_v17 = vor.u32 %v910_v62, %v909_v31  ;;  %v920_v23 = vor.u32 %v919_v41, %v918_v36 }
 0x15d   : > { %v5639_v39 = vpack.c.bf16 %v5527_v26, %v5527_v26  ;;  %v1355_v56 = vsel %vm1348_vm12, %v1351_v22, %v1354_v13  ;;  %v3828_v55 = vsel %vm3821_vm0, %v3824_v42, %v3827_v48  ;;  %v922_v12 = vshrl.u32 %v14590_v2, %v10513_v11 }
 0x15e   : > { %v10545_v25 = vsel %vm1345_vm15, nan, %v1355_v56  ;;  %v10549_v51 = vsel %vm1345_vm15, nan, %v3828_v55  ;;  %v1152_v14 = vsel %vm1150_vm3, %v1151_v10, %v10534_v40  ;;  %vm927_vm4 = vcmp.lt.s32.totalorder %v10519_v47, 4 }
 0x15f   : > { %v5752_v33 = vsel %vm5729_vm6, %v5639_v39, 0  ;;  %14597 = vst [vmem:[#allocation4_spill] sm:$0xff] %v10545_v25  ;;  %v5222_v20 = vadd.f32 %v10545_v25, %v10545_v25  ;;  %v1153_v45 = vclz %v1152_v14  ;;  %v10579_v6 = vor.u32 %v913_v15, %v912_v9 }
 0x160   : > { %6122 = vmatpush.bf16.msrb.mxu3 %v5752_v33  ;;  %v10581_v31 = vor.u32 %v916_v3, %v915_v8  ;;  %v923_v39 = vor.u32 %v922_v12, %v921_v49  ;;  %vm924_vm5 = vcmp.lt.s32.totalorder %v10519_v47, 1  ;;  %v1141_v48 = vadd.s32 %v10480_v37, %v10478_v54 }
 0x161   : > { %v10572_v59 = vmul.f32 %v5222_v20, %v10549_v51  ;;  %v10575_v26 = vmul.f32 %v5222_v20, %v10545_v25  ;;  %v8922_v58 = vadd.s32 4294967294, %v1153_v45  ;;  %vm926_vm8 = vcmp.lt.s32.totalorder %v10519_v47, 3 }
 0x162   : > { %v933_v62 = vsel %vm927_vm4, %v920_v23, 920167782  ;;  %vm925_vm7 = vcmp.lt.s32.totalorder %v10519_v47, 2  ;;  %v10600_v33 = vshll.u32 %v900_v57, 8  ;;  %v932_v54 = vsel %vm924_vm5, %v10563_v17, %v10579_v6 }
 0x163   : > { %v14457_v61 = vsub.f32 1.0, %v10575_v26  ;;  %v5286_v13 = vadd.f32 %v10572_v59, %v10572_v59  ;;  %vm8923_vm10 = vcmp.lt.s32.totalorder %v8922_v58, 0  ;;  %v936_v37 = vsel %vm924_vm5, %v10579_v6, %v10581_v31 }
 0x164   : > { %v937_v22 = vsel %vm927_vm4, %v923_v39, 1326507024  ;;  %v1156_v56 = vsel %vm8923_vm10, 0, %v8922_v58  ;;  %v934_v55 = vsel %vm926_vm8, %v10581_v31, %v933_v62  ;;  %vm1049_vm11 = vcmp.lt.s32.totalorder %v10220_v38, 0 }
 0x165   : > { %v10594_v9 = vmul.f32 %v5286_v13, %v14457_v61  ;;  %v10597_v36 = vmul.f32 %v5286_v13, %v10572_v59  ;;  %v1157_v15 = vsub.s32 32, %v1156_v56  ;;  %v1158_v8 = vshll.u32 %v10534_v40, %v1156_v56 }
 0x166   : > { %v1161_v3 = vsub.s32 4294967266, %v1156_v56  ;;  %v938_v20 = vsel %vm926_vm8, %v920_v23, %v937_v22  ;;  %v941_v57 = vand.u32 65535, %v10600_v33  ;;  %v1171_v45 = vsub.s32 4, %v10515_v16 }
 0x167   : > { %14598 = vst [vmem:[#allocation5_spill] sm:$0xff] %v10594_v9  ;;  %v14456_v42 = vsub.f32 1.0, %v10597_v36  ;;  %v5350_v41 = vadd.f32 %v10594_v9, %v10594_v9  ;;  %v1159_v12 = vshrl.u32 %v1141_v48, %v1157_v15  ;;  %v942_v40 = vshrl.u32 %v10600_v33, 16 }
 0x168   : > { %v1162_v14 = vadd.s32 127, %v1161_v3  ;;  %v935_v13 = vsel %vm925_vm7, %v932_v54, %v934_v55  ;;  %v939_v58 = vsel %vm925_vm7, %v936_v37, %v938_v20  ;;  %vm10643_vm12 = vcmp.le.f32.partialorder %v1047_v44, 0.7853982  ;;  %v10657_v44 = vld [vmem:[%s14434_s1 + $0x10] sm:$0xff] }
 0x169   : > { %v10623_v10 = vmul.f32 %v5350_v41, %v14456_v42  ;;  %v10626_v49 = vmul.f32 %v5350_v41, %v10594_v9  ;;  %v1160_v62 = vor.u32 %v1159_v12, %v1158_v8  ;;  %v965_v41 = vand.u32 65535, %v935_v13  ;;  %14601 = vst [vmem:[#allocation6_spill] sm:$0xff] %v10657_v44  ;;  %9036 = vmatmul.msk.bf16.gmra.mxu0 %vm5704_vm9, %v10657_v44 }
 0x16a   : > { %v1163_v22 = vshll.u32 %v1162_v14, 23  ;;  %v908_v54 = vshrl.u32 %v14585_v30, %v10513_v11  ;;  %v943_v55 = vand.u32 65535, %v939_v58  ;;  %v944_v15 = vshrl.u32 %v939_v58, 16  ;;  %9044 = vmatmul.msk.bf16.gmra.mxu1 %vm5704_vm9, %v10657_v44  ;;  %9052 = vmatmul.msk.bf16.gmra.mxu2 %vm5704_vm9, %v10657_v44 }
 0x16b   : > { %v14460_v39 = vsub.f32 1.0, %v10626_v49  ;;  %v10635_v23 = vadd.f32 %v10623_v10, %v10623_v10  ;;  %v1167_v3 = vcvt.s32.f32 %v1160_v62  ;;  %v1172_v8 = vsel %vm1049_vm11, %v1171_v45, %v10515_v16  ;;  %9060 = vmatmul.msk.bf16.gmra.mxu3 %vm5704_vm9, %v10657_v44 }
 0x16c   : > { %v1164_v37 = vor.u32 4788187, %v1163_v22  ;;  %v966_v20 = vshrl.u32 %v935_v13, 16  ;;  %v945_v14 = vmul.u32 %v943_v55, %v941_v57  ;;  %v946_v11 = vmul.u32 %v944_v15, %v941_v57 }
 0x16d   : > { %v10650_v56 = vmul.f32 %v10635_v23, %v14460_v39  ;;  %v947_v42 = vmul.u32 %v943_v55, %v942_v40  ;;  %v967_v61 = vmul.u32 %v965_v41, %v941_v57  ;;  %v969_v22 = vmul.u32 %v965_v41, %v942_v40 }
 0x16e   : > { %v1165_v58 = vand.u32 2147483647, %v1164_v37  ;;  %v968_v34 = vmul.u32 %v966_v20, %v941_v57  ;;  %v948_v45 = vmul.u32 %v944_v15, %v942_v40  ;;  %v949_v13 = vshll.u32 %v946_v11, 16 }
 0x16f   : > { %v10664_v12 = vadd.f32 %v10650_v56, %v10650_v56  ;;  %v951_v62 = vshll.u32 %v947_v42, 16  ;;  %v929_v57 = vsel %vm927_vm4, %v10581_v31, 2102212464  ;;  %v950_v41 = vshrl.u32 %v946_v11, 16 }
 0x170   : > { %v1168_v55 = vmul.f32 %v1167_v3, %v1165_v58  ;;  %v971_v37 = vshll.u32 %v968_v34, 16  ;;  %vm953_vm13 = vc.u32 %v945_v14, %v949_v13  ;;  %v955_v39 = vadd.s32 %v949_v13, %v945_v14 }
 0x171   : > { %v5510_v16 = vmul.f32 %v10664_v12, %v10650_v56  ;;  %v970_v7 = vmul.u32 %v966_v20, %v942_v40  ;;  %v952_v0 = vshrl.u32 %v947_v42, 16  ;;  %v14602_v32 = vmov 0  }
 0x172   : > { %v1169_v50 = vxor.u32 2147483648, %v1168_v55  ;;  %v954_v15 = vsel %vm953_vm13, 1, %v14602_v32  ;;  %v973_v25 = vshll.u32 %v969_v22, 16  ;;  %vm957_vm14 = vc.u32 %v955_v39, %v951_v62 }
 0x173   : > { %v5526_v19 = vsub.f32 1.0, %v5510_v16  ;;  %v956_v9 = vadd.s32 %v954_v15, %v948_v45  ;;  %vm975_vm15 = vc.u32 %v967_v61, %v971_v37  ;;  %v958_v31 = vsel %vm957_vm14, 1, %v14602_v32 }
 0x174   : > { %v1170_v3 = vsel %vm1049_vm11, %v1169_v50, %v1168_v55  ;;  %v976_v11 = vsel %vm975_vm15, 1, %v14602_v32  ;;  %v977_v58 = vadd.s32 %v971_v37, %v967_v61  ;;  %v972_v16 = vshrl.u32 %v968_v34, 16 }
 0x175   : > { %v5638_v18 = vpack.c.bf16 %v5526_v19, %v5526_v19  ;;  %v1173_v42 = vsel %vm10643_vm12, %v10220_v38, %v1170_v3  ;;  %v960_v40 = vadd.s32 %v958_v31, %v956_v9  ;;  %v978_v20 = vadd.s32 %v976_v11, %v970_v7 }
 0x176   : > { %v1174_v19 = vsel %vm10643_vm12, 0, %v1172_v8  ;;  %v1175_v39 = vmul.f32 %v1173_v42, %v1173_v42  ;;  %vm979_vm0 = vc.u32 %v977_v58, %v973_v25  ;;  %v928_v50 = vsel %vm924_vm5, %v908_v54, %v10563_v17 }
 0x177   : > { %v5749_v14 = vsel %vm5729_vm6, %v5638_v18, 0  ;;  %v930_v18 = vsel %vm926_vm8, %v10579_v6, %v929_v57  ;;  %v961_v61 = vadd.s32 %v960_v40, %v950_v41  ;;  %v980_v45 = vsel %vm979_vm0, 1, %v14602_v32  ;;  %v10706_v6 = vld [vmem:[%s14434_s1 + $0x18] sm:$0xff] }
 0x178   : > { %6073 = vmatpush.bf16.msrb.mxu2 %v5749_v14  ;;  %v1176_v9 = vmul.f32 -0.001358992, %v1175_v39  ;;  %v1183_v7 = vmul.f32 -0.00019511016, %v1175_v39  ;;  %v974_v13 = vshrl.u32 %v969_v22, 16  ;;  %v982_v62 = vadd.s32 %v980_v45, %v978_v20  ;;  %14603 = vst [vmem:[#allocation7_spill] sm:$0xff] %v10706_v6 }
 0x179   : > { %v10697_v48 = vadd.s32 %v961_v61, %v952_v0  ;;  %v10699_v8 = vadd.s32 %v977_v58, %v973_v25  ;;  %v931_v17 = vsel %vm925_vm7, %v928_v50, %v930_v18  ;;  %v1191_v37 = vadd.s32 3, %v1174_v19  ;;  %9037 = vmatmul.msk.bf16.gmra.mxu0 %vm5704_vm9, %v10706_v6 }
 0x17a   : > { %v1177_v34 = vadd.f32 0.041655596, %v1176_v9  ;;  %v1184_v55 = vadd.f32 0.008332121, %v1183_v7  ;;  %v983_v54 = vadd.s32 %v982_v62, %v972_v16  ;;  %v985_v0 = vmul.u32 %v10600_v33, %v931_v17  ;;  %9045 = vmatmul.msk.bf16.gmra.mxu1 %vm5704_vm9, %v10706_v6  ;;  %9053 = vmatmul.msk.bf16.gmra.mxu2 %vm5704_vm9, %v10706_v6 }
 0x17b   : > { %vm987_vm1 = vc.u32 %v10697_v48, %v10699_v8  ;;  %v1192_v3 = vand.u32 3, %v1191_v37  ;;  %v3666_v31 = vand.u32 3, %v1174_v19  ;;  %9061 = vmatmul.msk.bf16.gmra.mxu3 %vm5704_vm9, %v10706_v6  ;;  %vm1190_vm10 = vweird.f32 %v10220_v38 }
 0x17c   : > { %v1178_v57 = vmul.f32 %v1177_v34, %v1175_v39  ;;  %v1185_v41 = vmul.f32 %v1184_v55, %v1175_v39  ;;  %v984_v22 = vadd.s32 %v983_v54, %v974_v13  ;;  %vm894_vm13 = vcmp.lt.s32.totalorder %v10326_v4, 0 }
 0x17d   : > { %vm1197_vm2 = vcmp.eq.s32.totalorder %v1192_v3, 2  ;;  %vm3671_vm3 = vcmp.eq.s32.totalorder %v3666_v31, 2  ;;  %vm1193_vm4 = vcmp.lt.s32.totalorder %v1192_v3, 2  ;;  %vm1194_vm5 = vcmp.eq.s32.totalorder %v1192_v3, 0 }
 0x17e   : > { %v1179_v47 = vadd.f32 -0.4999988, %v1178_v57  ;;  %v1186_v25 = vadd.f32 -0.16666654, %v1185_v41  ;;  %v988_v15 = vadd.s32 1, %v984_v22  ;;  %vm3668_vm8 = vcmp.eq.s32.totalorder %v3666_v31, 0 }
 0x17f   : > { %vm3667_vm7 = vcmp.lt.s32.totalorder %v3666_v31, 2  ;;  %v10729_v57 = vld [vmem:[%s14434_s1 + $0x20] sm:$0xff]  ;;  %vm1035_vm0 = vweird.f32 %v10326_v4 }
 0x180   : > { %v1180_v33 = vmul.f32 %v1179_v47, %v1175_v39  ;;  %v1187_v11 = vmul.f32 %v1186_v25, %v1175_v39  ;;  %v989_v58 = vsel %vm987_vm1, %v988_v15, %v984_v22  ;;  %14604 = vst [vmem:[#allocation8_spill] sm:$0xff] %v10729_v57 }
 0x181   : > { %v990_v14 = vadd.s32 %v989_v58, %v985_v0 }
 0x182   : > { %v1181_v40 = vadd.f32 1.0, %v1180_v33  ;;  %v1188_v20 = vadd.f32 1.0, %v1187_v11  ;;  %v986_v33 = vadd.s32 %v10699_v8, %v10697_v48 }
 0x183   : > { %v991_v16 = vadd.s32 536870912, %v990_v14 }
 0x184   : > { %v1189_v50 = vmul.f32 %v1188_v20, %v1173_v42  ;;  %v1198_v18 = vxor.u32 2147483648, %v1181_v40 }
 0x185   : > { %v992_v61 = vshrl.u32 %v991_v16, 30 }
 0x186   : > { %v1195_v45 = vxor.u32 2147483648, %v1189_v50  ;;  %v1199_v19 = vsel %vm1197_vm2, %v1198_v18, %v1189_v50  ;;  %v3673_v9 = vsel %vm3671_vm3, %v1198_v18, %v1189_v50 }
 0x187   : > { %v993_v39 = vshll.u32 %v992_v61, 30 }
 0x188   : > { %v1196_v7 = vsel %vm1194_vm5, %v1181_v40, %v1195_v45  ;;  %v3670_v13 = vsel %vm3668_vm8, %v1181_v40, %v1195_v45 }
 0x189   : > { %v1200_v62 = vsel %vm1193_vm4, %v1196_v7, %v1199_v19  ;;  %v3674_v34 = vsel %vm3667_vm7, %v3670_v13, %v3673_v9  ;;  %v994_v55 = vsub.s32 %v990_v14, %v993_v39  ;;  %9038 = vmatmul.msk.bf16.gmra.mxu0 %vm5704_vm9, %v10729_v57 }
 0x18a   : > { %v10720_v17 = vsel %vm1190_vm10, nan, %v1200_v62  ;;  %v10722_v42 = vsel %vm1190_vm10, nan, %v3674_v34  ;;  %9046 = vmatmul.msk.bf16.gmra.mxu1 %vm5704_vm9, %v10729_v57  ;;  %9054 = vmatmul.msk.bf16.gmra.mxu2 %vm5704_vm9, %v10729_v57 }
 0x18b   : > { %v5221_v54 = vadd.f32 %v10720_v17, %v10720_v17  ;;  %vm995_vm11 = vcmp.lt.s32.totalorder %v994_v55, 0  ;;  %v996_v37 = vsub.s32 0, %v994_v55  ;;  %9062 = vmatmul.msk.bf16.gmra.mxu3 %vm5704_vm9, %v10729_v57 }
 0x18d   : > { %v10732_v38 = vmul.f32 %v5221_v54, %v10722_v42  ;;  %v10735_v41 = vmul.f32 %v5221_v54, %v10720_v17  ;;  %v997_v22 = vsel %vm995_vm11, %v996_v37, %v994_v55  ;;  %v9217_v54 = vld [vmem:[%s14434_s1 + $0x28] sm:$0xff] }
 0x18e   : > { %v998_v0 = vclz %v997_v22 }
 0x18f   : > { %v14471_v47 = vsub.f32 1.0, %v10735_v41  ;;  %v5285_v25 = vadd.f32 %v10732_v38, %v10732_v38 }
 0x190   : > { %v8919_v15 = vadd.s32 4294967294, %v998_v0 }
 0x191   : > { %v10750_v3 = vmul.f32 %v5285_v25, %v14471_v47  ;;  %v10753_v31 = vmul.f32 %v5285_v25, %v10732_v38 }
 0x192   : > { %vm8920_vm12 = vcmp.lt.s32.totalorder %v8919_v15, 0 }
 0x193   : > { %v14470_v11 = vsub.f32 1.0, %v10753_v31  ;;  %v5349_v58 = vadd.f32 %v10750_v3, %v10750_v3  ;;  %v1001_v14 = vsel %vm8920_vm12, 0, %v8919_v15 }
 0x194   : > { %v1002_v40 = vsub.s32 32, %v1001_v14  ;;  %v1003_v20 = vshll.u32 %v994_v55, %v1001_v14  ;;  %v1006_v16 = vsub.s32 4294967266, %v1001_v14  ;;  %v1016_v55 = vsub.s32 4, %v992_v61 }
 0x195   : > { %v10762_v50 = vmul.f32 %v5349_v58, %v14470_v11  ;;  %v10765_v18 = vmul.f32 %v5349_v58, %v10750_v3 }
 0x196   : > { %v1004_v45 = vshrl.u32 %v986_v33, %v1002_v40  ;;  %v1007_v19 = vadd.s32 127, %v1006_v16  ;;  %v1017_v15 = vsel %vm894_vm13, %v1016_v55, %v992_v61  ;;  %v14605_v33 = vand.u32 2147483647, %v10326_v4  ;;  %v10794_v40 = vld [vmem:[%s9422_s27 + $0x58] sm:$0xff] }
 0x197   : > { %v14472_v48 = vsub.f32 1.0, %v10765_v18  ;;  %v10770_v8 = vadd.f32 %v10762_v50, %v10762_v50  ;;  %14606 = vst [vmem:[#allocation9_spill] sm:$0xff] %v10794_v40 }
 0x198   : > { %v1005_v9 = vor.u32 %v1004_v45, %v1003_v20  ;;  %v1008_v39 = vshll.u32 %v1007_v19, 23  ;;  %vm893_vm14 = vcmp.le.f32.partialorder %v14605_v33, 0.7853982  ;;  %v1980_v45 = vand.u32 2139095040, %v10794_v40 }
 0x199   : > { %v10775_v7 = vmul.f32 %v10770_v8, %v14472_v48  ;;  %9039 = vmatmul.msk.bf16.gmra.mxu0 %vm5704_vm9, %v9217_v54  ;;  %v1019_v16 = vsel %vm893_vm14, 0, %v1017_v15 }
 0x19a   : > { %v1009_v13 = vor.u32 4788187, %v1008_v39  ;;  %v1012_v62 = vcvt.s32.f32 %v1005_v9  ;;  %9047 = vmatmul.msk.bf16.gmra.mxu1 %vm5704_vm9, %v9217_v54  ;;  %9055 = vmatmul.msk.bf16.gmra.mxu2 %vm5704_vm9, %v9217_v54  ;;  %v1981_v39 = vshrl.u32 %v1980_v45, 23 }
 0x19b   : > { %v10779_v34 = vadd.f32 %v10775_v7, %v10775_v7  ;;  %9063 = vmatmul.msk.bf16.gmra.mxu3 %vm5704_vm9, %v9217_v54 }
 0x19c   : > { %v1010_v37 = vand.u32 2147483647, %v1009_v13  ;;  %v1036_v13 = vadd.s32 3, %v1019_v16  ;;  %v8939_v54 = vadd.s32 4294967169, %v1981_v39 }
 0x19d   : > { %v5509_v22 = vmul.f32 %v10779_v34, %v10775_v7 }
 0x19e   : > { %v1013_v0 = vmul.f32 %v1012_v62, %v1010_v37  ;;  %v10800_v37 = vld [vmem:[%s9422_s27 + $0x50] sm:$0xff]  ;;  %v1987_v33 = vadd.s32 1, %v8939_v54 }
 0x19f   : > { %v5525_v25 = vsub.f32 1.0, %v5509_v22  ;;  %v1825_v15 = vand.u32 2139095040, %v10800_v37 }
 0x1a0   : > { %v1014_v58 = vxor.u32 2147483648, %v1013_v0  ;;  %vm1988_vm15 = vcmp.gt.s32.totalorder %v1987_v33, 0 }
 0x1a1   : > { %v5637_v14 = vpack.c.bf16 %v5525_v25, %v5525_v25  ;;  %v1989_v45 = vsel %vm1988_vm15, %v1987_v33, 0 }
 0x1a2   : > { %v1015_v20 = vsel %vm894_vm13, %v1014_v58, %v1013_v0  ;;  %v1037_v0 = vand.u32 3, %v1036_v13  ;;  %v10806_v39 = vand.u32 31, %v1989_v45  ;;  %v1826_v13 = vshrl.u32 %v1825_v15, 23 }
 0x1a3   : > { %v5746_v19 = vsel %vm5729_vm6, %v5637_v14, 0  ;;  %v1018_v9 = vsel %vm893_vm14, %v10326_v4, %v1015_v20  ;;  %v3512_v14 = vand.u32 3, %v1019_v16  ;;  %v9218_v20 = vld [vmem:[%s14434_s1 + $0x30] sm:$0xff]  ;;  %v10831_v48 = vshrl.u32 %v1989_v45, 5 }
 0x1a4   : > { %6024 = vmatpush.bf16.msrb.mxu1 %v5746_v19  ;;  %v1020_v61 = vmul.f32 %v1018_v9, %v1018_v9  ;;  %vm1038_vm1 = vcmp.lt.s32.totalorder %v1037_v0, 2  ;;  %vm1039_vm2 = vcmp.eq.s32.totalorder %v1037_v0, 0  ;;  %vm1042_vm3 = vcmp.eq.s32.totalorder %v1037_v0, 2 }
 0x1a5   : > { %vm3513_vm4 = vcmp.lt.s32.totalorder %v3512_v14, 2  ;;  %vm3514_vm5 = vcmp.eq.s32.totalorder %v3512_v14, 0  ;;  %vm3517_vm8 = vcmp.eq.s32.totalorder %v3512_v14, 2  ;;  %v10815_v16 = vsub.s32 32, %v10806_v39 }
 0x1a6   : > { %v1021_v62 = vmul.f32 -0.001358992, %v1020_v61  ;;  %v1028_v55 = vmul.f32 -0.00019511016, %v1020_v61  ;;  %v1994_v15 = vshll.u32 %v14585_v30, %v10806_v39  ;;  %v14609_v45 = vsub.f32 1.0, %v10765_v18 }
 0x1a7   : > { %v14613_v18 = vsub.f32 1.0, %v10597_v36  ;;  %v2006_v0 = vshll.u32 %v14589_v46, %v10806_v39  ;;  %vm2009_vm7 = vcmp.lt.s32.totalorder %v10831_v48, 1  ;;  %vm2011_vm10 = vcmp.lt.s32.totalorder %v10831_v48, 3 }
 0x1a8   : > { %v1022_v22 = vadd.f32 0.041655596, %v1021_v62  ;;  %v1029_v25 = vadd.f32 0.008332121, %v1028_v55  ;;  %vm2012_vm11 = vcmp.lt.s32.totalorder %v10831_v48, 4  ;;  %vm2010_vm12 = vcmp.lt.s32.totalorder %v10831_v48, 2 }
 0x1a9   : > { %9040 = vmatmul.msk.bf16.gmra.mxu0 %vm5704_vm9, %v9218_v20 }
 0x1aa   : > { %v1023_v58 = vmul.f32 %v1022_v22, %v1020_v61  ;;  %v1030_v11 = vmul.f32 %v1029_v25, %v1020_v61  ;;  %9048 = vmatmul.msk.bf16.gmra.mxu1 %vm5704_vm9, %v9218_v20  ;;  %9056 = vmatmul.msk.bf16.gmra.mxu2 %vm5704_vm9, %v9218_v20  ;;  %v5445_v25 = vmul.f32 %v10770_v8, %v10762_v50 }
 0x1ab   : > { %9064 = vmatmul.msk.bf16.gmra.mxu3 %vm5704_vm9, %v9218_v20  ;;  %v1997_v8 = vshll.u32 %v14586_v21, %v10806_v39 }
 0x1ac   : > { %v1024_v19 = vadd.f32 -0.4999988, %v1023_v58  ;;  %v1031_v47 = vadd.f32 -0.16666654, %v1030_v11  ;;  %v14473_v11 = vand.u32 2147483647, %v10794_v40  ;;  %v1998_v40 = vshrl.u32 %v14587_v24, %v10815_v16 }
 0x1ad   : > { %v10829_v58 = vadd.s32 4294967169, %v1826_v13  ;;  %v14607_v13 = vsub.f32 1.0, %v10490_v53  ;;  %v14611_v53 = vsub.f32 1.0, %v10475_v27 }
 0x1ae   : > { %v1025_v62 = vmul.f32 %v1024_v19, %v1020_v61  ;;  %v1032_v55 = vmul.f32 %v1031_v47, %v1020_v61  ;;  %v5447_v47 = vmul.f32 %v10498_v60, %v10487_v1  ;;  %v5446_v61 = vmul.f32 %v10635_v23, %v10623_v10 }
 0x1af   : > { %v10825_v33 = vand.u32 8388607, %v14473_v11  ;;  %v5461_v60 = vsub.f32 1.0, %v5445_v25  ;;  %v1995_v23 = vshrl.u32 %v14586_v21, %v10815_v16  ;;  %v10874_v36 = vor.u32 %v1998_v40, %v1997_v8  ;;  %v9219_v8 = vld [vmem:[%s14434_s1 + $0x38] sm:$0xff] }
 0x1b0   : > { %v1026_v54 = vadd.f32 1.0, %v1025_v62  ;;  %v1033_v22 = vadd.f32 1.0, %v1032_v55  ;;  %v5463_v62 = vsub.f32 1.0, %v5447_v47  ;;  %v5462_v55 = vsub.f32 1.0, %v5446_v61 }
 0x1b1   : > { %v5621_v61 = vpack.c.bf16 %v5461_v60, %v14609_v45  ;;  %v10845_v25 = vor.u32 %v1995_v23, %v1994_v15  ;;  %v5493_v40 = vmul.f32 %v10779_v34, %v5461_v60 }
 0x1b2   : > { %v1034_v20 = vmul.f32 %v1033_v22, %v1018_v9  ;;  %v1043_v19 = vxor.u32 2147483648, %v1026_v54  ;;  %v5623_v9 = vpack.c.bf16 %v5463_v62, %v14607_v13  ;;  %v14608_v22 = vsub.f32 1.0, %v10626_v49 }
 0x1b3   : > { %v14612_v49 = vsub.f32 1.0, %v10575_v26  ;;  %6025 = vmatpush.bf16.msrb.mxu1 %v5621_v61  ;;  %v5495_v4 = vmul.f32 %v10507_v52, %v5463_v62 }
 0x1b4   : > { %v1040_v11 = vxor.u32 2147483648, %v1034_v20  ;;  %v1044_v57 = vsel %vm1042_vm3, %v1043_v19, %v1034_v20  ;;  %v3519_v6 = vsel %vm3517_vm8, %v1043_v19, %v1034_v20  ;;  %v5622_v47 = vpack.c.bf16 %v5462_v55, %v14608_v22  ;;  %6123 = vmatpush.bf16.msrb.mxu3 %v5623_v9 }
 0x1b5   : > { %v14610_v20 = vsub.f32 1.0, %v10454_v43  ;;  %v5606_v13 = vpack.c.bf16 %v14613_v18, %v14612_v49  ;;  %v14614_v22 = vsub.f32 1.0, %v10735_v41  ;;  %v1985_v43 = vor.u32 8388608, %v10825_v33  ;;  %v14616_v49 = vld [vmem:[#allocation5_spill] sm:$0xff] }
 0x1b6   : > { %v1041_v44 = vsel %vm1039_vm2, %v1026_v54, %v1040_v11  ;;  %v3516_v21 = vsel %vm3514_vm5, %v1026_v54, %v1040_v11  ;;  %6074 = vmatpush.bf16.msrb.mxu2 %v5622_v47  ;;  %v14615_v11 = vsub.f32 1.0, %v10753_v31  ;;  %v2004_v41 = vshrl.u32 %v14589_v46, %v10815_v16 }
 0x1b7   : > { %v5607_v19 = vpack.c.bf16 %v14611_v53, %v14610_v20  ;;  %v1045_v15 = vsel %vm1038_vm1, %v1041_v44, %v1044_v57  ;;  %v3520_v23 = vsel %vm3513_vm4, %v3516_v21, %v3519_v6  ;;  %v2000_v21 = vshll.u32 %v14587_v24, %v10806_v39 }
 0x1b8   : > { %v5605_v54 = vpack.c.bf16 %v14615_v11, %v14614_v22  ;;  %v10868_v27 = vsel %vm1035_vm0, nan, %v1045_v15  ;;  %v10872_v26 = vsel %vm1035_vm0, nan, %v3520_v23  ;;  %v2001_v6 = vshrl.u32 %v14588_v28, %v10815_v16 }
 0x1b9   : > { %v5220_v44 = vadd.f32 %v10868_v27, %v10868_v27  ;;  %v2003_v57 = vshll.u32 %v14588_v28, %v10806_v39  ;;  %6124 = vmatpush.bf16.msrb.mxu3 %v5607_v19  ;;  %v5494_v31 = vmul.f32 %v10664_v12, %v5462_v55  ;;  %v5591_v12 = vpack.c.bf16 %v10439_v5, %v5495_v4 }
 0x1ba   : > { %6075 = vmatpush.bf16.msrb.mxu2 %v5606_v13  ;;  %6026 = vmatpush.bf16.msrb.mxu1 %v5605_v54  ;;  %v2002_v52 = vor.u32 %v2001_v6, %v2000_v21  ;;  %v5589_v39 = vpack.c.bf16 %v10722_v42, %v5493_v40  ;;  %v2007_v9 = vshrl.u32 %v14590_v2, %v10815_v16  ;;  %v14618_v6 = vld [vmem:[#allocation4_spill] sm:$0xff] }
 0x1bb   : > { %v10892_v14 = vmul.f32 %v5220_v44, %v10872_v26  ;;  %v10895_v33 = vmul.f32 %v5220_v44, %v10868_v27  ;;  %v5590_v34 = vpack.c.bf16 %v10549_v51, %v5494_v31  ;;  %v2005_v62 = vor.u32 %v2004_v41, %v2003_v57  ;;  %9041 = vmatmul.msk.bf16.gmra.mxu0 %vm5704_vm9, %v9219_v8  ;;  %v9315_v44 = vld [vmem:[%s9422_s27 + $0x30] sm:$0xff] }
 0x1bc   : > { %v5575_v5 = vpack.c.bf16 %v10503_v29, %v10487_v1  ;;  %v5574_v51 = vpack.c.bf16 %v10650_v56, %v10623_v10  ;;  %v5573_v42 = vpack.c.bf16 %v10775_v7, %v10762_v50  ;;  %9049 = vmatmul.msk.bf16.gmra.mxu1 %vm5704_vm9, %v9219_v8  ;;  %v2008_v1 = vor.u32 %v2007_v9, %v2006_v0 }
 0x1bd   : > { %v5268_v55 = vsub.f32 1.0, %v10895_v33  ;;  %v5284_v60 = vadd.f32 %v10892_v14, %v10892_v14  ;;  %6125 = vmatpush.bf16.msrb.mxu3 %v5591_v12  ;;  %v2018_v29 = vsel %vm2012_vm11, %v2005_v62, 920167782  ;;  %9057 = vmatmul.msk.bf16.gmra.mxu2 %vm5704_vm9, %v9219_v8  ;;  %v2017_v10 = vsel %vm2009_vm7, %v10845_v25, %v10874_v36 }
 0x1be   : > { %6076 = vmatpush.bf16.msrb.mxu2 %v5590_v34  ;;  %6027 = vmatpush.bf16.msrb.mxu1 %v5589_v39  ;;  %v10935_v56 = vshll.u32 %v1985_v43, 8  ;;  %v1832_v50 = vadd.s32 1, %v10829_v58  ;;  %v2019_v20 = vsel %vm2011_vm10, %v2002_v52, %v2018_v29  ;;  %v2022_v53 = vsel %vm2012_vm11, %v2008_v1, 1326507024  ;;  %v14617_v43 = vld [vmem:[#allocation2_spill] sm:$0xff] }
 0x1bf   : > { %v10921_v47 = vmul.f32 %v5284_v60, %v5268_v55  ;;  %v10924_v45 = vmul.f32 %v5284_v60, %v10892_v14  ;;  %9065 = vmatmul.msk.bf16.gmra.mxu3 %vm5704_vm9, %v9219_v8  ;;  %v5559_v19 = vpack.c.bf16 %v10472_v63, %v10451_v35  ;;  %v5558_v18 = vpack.c.bf16 %v14616_v49, %v10572_v59  ;;  %v11000_v49 = vld [vmem:[%s14434_s1] sm:$0xff] }
 0x1c0   : > { %v2021_v58 = vsel %vm2009_vm7, %v10874_v36, %v2002_v52  ;;  %v5557_v23 = vpack.c.bf16 %v10750_v3, %v10732_v38  ;;  %v2020_v35 = vsel %vm2010_vm12, %v2017_v10, %v2019_v20  ;;  %v2023_v63 = vsel %vm2011_vm10, %v2005_v62, %v2022_v53  ;;  %v9314_v3 = vld [vmem:[%s9422_s27 + $0x38] sm:$0xff] }
 0x1c1   : > { %v5332_v7 = vsub.f32 1.0, %v10924_v45  ;;  %v5348_v61 = vadd.f32 %v10921_v47, %v10921_v47  ;;  %6126 = vmatpush.bf16.msrb.mxu3 %v5575_v5  ;;  %v2026_v59 = vand.u32 65535, %v10935_v56  ;;  %vm1833_vm13 = vcmp.gt.s32.totalorder %v1832_v50, 0 }
 0x1c2   : > { %6077 = vmatpush.bf16.msrb.mxu2 %v5574_v51  ;;  %6028 = vmatpush.bf16.msrb.mxu1 %v5573_v42  ;;  %v1993_v54 = vshrl.u32 %v14585_v30, %v10815_v16  ;;  %v2024_v38 = vsel %vm2010_vm12, %v2021_v58, %v2023_v63  ;;  %v5543_v21 = vpack.c.bf16 %v14617_v43, %v9314_v3  ;;  %v2014_v41 = vsel %vm2012_vm11, %v2002_v52, 2102212464  ;;  %v9316_v16 = vld [vmem:[%s9422_s27 + $0x28] sm:$0xff] }
 0x1c3   : > { %v10952_v13 = vmul.f32 %v5348_v61, %v5332_v7  ;;  %v5380_v15 = vmul.f32 %v5348_v61, %v10921_v47  ;;  %v5542_v57 = vpack.c.bf16 %v14618_v6, %v9315_v44  ;;  %v2027_v4 = vshrl.u32 %v10935_v56, 16 }
 0x1c4   : > { %v5541_v0 = vpack.c.bf16 %v10720_v17, %v9316_v16  ;;  %v2028_v8 = vand.u32 65535, %v2024_v38  ;;  %v2029_v12 = vshrl.u32 %v2024_v38, 16  ;;  %v2050_v34 = vand.u32 65535, %v2020_v35 }
 0x1c5   : > { %v5396_v22 = vsub.f32 1.0, %v5380_v15  ;;  %v5412_v11 = vadd.f32 %v10952_v13, %v10952_v13  ;;  %6127 = vmatpush.bf16.msrb.mxu3 %v5559_v19  ;;  %v1834_v39 = vsel %vm1833_vm13, %v1832_v50, 0  ;;  %v2013_v52 = vsel %vm2009_vm7, %v1993_v54, %v10845_v25 }
 0x1c6   : > { %6078 = vmatpush.bf16.msrb.mxu2 %v5558_v18  ;;  %6029 = vmatpush.bf16.msrb.mxu1 %v5557_v23  ;;  %v2015_v60 = vsel %vm2011_vm10, %v10874_v36, %v2014_v41  ;;  %v2051_v9 = vshrl.u32 %v2020_v35, 16  ;;  %v2030_v17 = vmul.u32 %v2028_v8, %v2026_v59  ;;  %v2031_v51 = vmul.u32 %v2029_v12, %v2026_v59 }
 0x1c7   : > { %v10975_v31 = vmul.f32 %v5412_v11, %v5396_v22  ;;  %v5444_v40 = vmul.f32 %v5412_v11, %v10952_v13  ;;  %v2032_v42 = vmul.u32 %v2028_v8, %v2027_v4  ;;  %v1836_v1 = vand.u32 31, %v1834_v39 }
 0x1c8   : > { %v2033_v29 = vmul.u32 %v2029_v12, %v2027_v4  ;;  %v2034_v10 = vshll.u32 %v2031_v51, 16  ;;  %v1822_v25 = vand.u32 2147483647, %v10800_v37  ;;  %v5604_v36 = vpack.c.bf16 %v5332_v7, %v5268_v55 }
 0x1c9   : > { %v5476_v62 = vadd.f32 %v10975_v31, %v10975_v31  ;;  %v5460_v5 = vsub.f32 1.0, %v5444_v40  ;;  %6128 = vmatpush.bf16.msrb.mxu3 %v5543_v21  ;;  %v2036_v50 = vshll.u32 %v2032_v42, 16  ;;  %v10995_v20 = vsel %vm2010_vm12, %v2013_v52, %v2015_v60 }
 0x1ca   : > { %6079 = vmatpush.bf16.msrb.mxu2 %v5542_v57  ;;  %6030 = vmatpush.bf16.msrb.mxu1 %v5541_v0  ;;  %v2052_v53 = vmul.u32 %v2050_v34, %v2026_v59  ;;  %vm2038_vm14 = vc.u32 %v2030_v17, %v2034_v10  ;;  %v2040_v18 = vadd.s32 %v2034_v10, %v2030_v17  ;;  %v2035_v33 = vshrl.u32 %v2031_v51, 16 }
 0x1cb   : > { %v5508_v45 = vmul.f32 %v5476_v62, %v10975_v31  ;;  %v5620_v19 = vpack.c.bf16 %v5460_v5, %v5396_v22  ;;  %v2053_v58 = vmul.u32 %v2051_v9, %v2026_v59  ;;  %v2039_v55 = vsel %vm2038_vm14, 1, %v14602_v32 }
 0x1cc   : > { %v2054_v48 = vmul.u32 %v2050_v34, %v2027_v4  ;;  %v2041_v7 = vadd.s32 %v2039_v55, %v2033_v29  ;;  %vm2042_vm15 = vc.u32 %v2040_v18, %v2036_v50  ;;  %v2055_v23 = vmul.u32 %v2051_v9, %v2027_v4 }
 0x1cd   : > { %v5524_v61 = vsub.f32 1.0, %v5508_v45  ;;  %9074 = vmatmul.msk.bf16.vlgmr.msrb.gmra.mxu1 %vm5704_vm9, %v11000_v49  ;;  %9082 = vmatmul.msk.bf16.vlgmr.msrb.gmra.mxu2 %vm5704_vm9, %v11000_v49  ;;  %v2056_v35 = vshll.u32 %v2053_v58, 16  ;;  %v5492_v22 = vmul.f32 %v5476_v62, %v5460_v5  ;;  %v2043_v59 = vsel %vm2042_vm15, 1, %v14602_v32 }
 0x1ce   : > { %v2058_v11 = vshll.u32 %v2054_v48, 16  ;;  %v2037_v54 = vshrl.u32 %v2032_v42, 16  ;;  %v2045_v38 = vadd.s32 %v2043_v59, %v2041_v7  ;;  %v2057_v43 = vshrl.u32 %v2053_v58, 16 }
 0x1cf   : > { %v5636_v15 = vpack.c.bf16 %v5524_v61, %v5524_v61  ;;  %9090 = vmatmul.msk.bf16.vlgmr.msrb.gmra.mxu3 %vm5704_vm9, %v11000_v49  ;;  %vm2060_vm0 = vc.u32 %v2052_v53, %v2056_v35  ;;  %v2062_v3 = vadd.s32 %v2056_v35, %v2052_v53  ;;  %v2059_v21 = vshrl.u32 %v2054_v48, 16 }
 0x1d0   : > { %v2061_v44 = vsel %vm2060_vm0, 1, %v14602_v32  ;;  %v1837_v6 = vsub.s32 32, %v1836_v1  ;;  %v2046_v57 = vadd.s32 %v2045_v38, %v2035_v33  ;;  %v1829_v4 = vand.u32 8388607, %v1822_v25 }
 0x1d1   : > { %v5743_v63 = vsel %vm5729_vm6, %v5636_v15, 0  ;;  %v2063_v41 = vadd.s32 %v2061_v44, %v2055_v23  ;;  %vm2064_vm1 = vc.u32 %v2062_v3, %v2058_v11  ;;  %v11015_v16 = vadd.s32 %v2062_v3, %v2058_v11  ;;  %v9318_v44 = vld [vmem:[%s9422_s27 + $0x20] sm:$0xff] }
 0x1d2   : > { %5975 = vmatpush.bf16.msrb.mxu0 %v5743_v63  ;;  %v2065_v40 = vsel %vm2064_vm1, 1, %v14602_v32  ;;  %v11017_v0 = vshrl.u32 %v1834_v39, 5  ;;  %v1839_v8 = vshll.u32 %v14585_v30, %v1836_v1  ;;  %v11020_v12 = vadd.s32 %v2046_v57, %v2037_v54 }
 0x1d3   : > { %v2067_v34 = vadd.s32 %v2065_v40, %v2063_v41  ;;  %v14619_v62 = vmov 2475754826   ;;  %v1843_v9 = vshrl.u32 %v14587_v24, %v1837_v6  ;;  %v1845_v5 = vshll.u32 %v14587_v24, %v1836_v1  ;;  %v5787_v41 = vpop.f32.mrf.mxu0 }
 0x1d4   : > { %v1840_v52 = vshrl.u32 %v14619_v62, %v1837_v6  ;;  %v1842_v60 = vshll.u32 %v14619_v62, %v1836_v1  ;;  %v1846_v17 = vshrl.u32 %v14588_v28, %v1837_v6  ;;  %v1848_v51 = vshll.u32 %v14588_v28, %v1836_v1 }
 0x1d5   : > { %v5588_v39 = vpack.c.bf16 %v10872_v26, %v5492_v22  ;;  %v2068_v42 = vadd.s32 %v2067_v34, %v2057_v43  ;;  %v1830_v45 = vor.u32 8388608, %v1829_v4  ;;  %v1849_v61 = vshrl.u32 %v14589_v46, %v1837_v6  ;;  %v5836_v4 = vpop.f32.mrf.mxu1 }
 0x1d6   : > { %5976 = vmatpush.bf16.msrb.mxu0 %v5620_v19  ;;  %v1841_v29 = vor.u32 %v1840_v52, %v1839_v8  ;;  %v11029_v10 = vor.u32 %v1843_v9, %v1842_v60  ;;  %v1847_v50 = vor.u32 %v1846_v17, %v1845_v5  ;;  %v1851_v53 = vshll.u32 %v14589_v46, %v1836_v1 }
 0x1d7   : > { %v2069_v19 = vadd.s32 %v2068_v42, %v2059_v21  ;;  %v2070_v18 = vmul.u32 %v10935_v56, %v10995_v20  ;;  %v1852_v58 = vshrl.u32 %v14590_v2, %v1837_v6  ;;  %vm1854_vm2 = vcmp.lt.s32.totalorder %v11017_v0, 1 }
 0x1d8   : > { %vm2072_vm3 = vc.u32 %v11020_v12, %v11015_v16  ;;  %v1850_v26 = vor.u32 %v1849_v61, %v1848_v51  ;;  %vm1856_vm4 = vcmp.lt.s32.totalorder %v11017_v0, 3  ;;  %vm1857_vm5 = vcmp.lt.s32.totalorder %v11017_v0, 4 }
 0x1d9   : > { %v2073_v15 = vadd.s32 1, %v2069_v19  ;;  %v1853_v33 = vor.u32 %v1852_v58, %v1851_v53  ;;  %vm1855_vm8 = vcmp.lt.s32.totalorder %v11017_v0, 2  ;;  %v1862_v56 = vsel %vm1854_vm2, %v1841_v29, %v11029_v10 }
 0x1da   : > { %5977 = vmatpush.bf16.msrb.mxu0 %v5604_v36  ;;  %v5556_v1 = vpack.c.bf16 %v10921_v47, %v10892_v14  ;;  %v1863_v36 = vsel %vm1857_vm5, %v1850_v26, 920167782  ;;  %v1866_v20 = vsel %vm1854_vm2, %v11029_v10, %v1847_v50  ;;  %v11052_v55 = vshll.u32 %v1830_v45, 8  ;;  %v14620_v47 = vld [vmem:[#allocation3_spill] sm:$0xff] }
 0x1db   : > { %v5572_v48 = vpack.c.bf16 %v10975_v31, %v10952_v13  ;;  %v2074_v7 = vsel %vm2072_vm3, %v2073_v15, %v2069_v19  ;;  %v1864_v23 = vsel %vm1856_vm4, %v1847_v50, %v1863_v36  ;;  %v1867_v14 = vsel %vm1857_vm5, %v1853_v33, 1326507024 }
 0x1dc   : > { %v2075_v35 = vadd.s32 %v2074_v7, %v2070_v18  ;;  %v1865_v63 = vsel %vm1855_vm8, %v1862_v56, %v1864_v23  ;;  %v1868_v22 = vsel %vm1856_vm4, %v1850_v26, %v1867_v14  ;;  %v1871_v13 = vand.u32 65535, %v11052_v55 }
 0x1dd   : > { %9075 = vmatmul.msk.bf16.gmra.mxu1 %vm5704_vm9, %v14620_v47  ;;  %v1869_v31 = vsel %vm1855_vm8, %v1866_v20, %v1868_v22  ;;  %v1872_v59 = vshrl.u32 %v11052_v55, 16  ;;  %v1895_v11 = vand.u32 65535, %v1865_v63  ;;  %v1896_v54 = vshrl.u32 %v1865_v63, 16  ;;  %9083 = vmatmul.msk.bf16.gmra.mxu2 %vm5704_vm9, %v14620_v47 }
 0x1de   : > { %5978 = vmatpush.bf16.msrb.mxu0 %v5588_v39  ;;  %v2076_v38 = vadd.s32 536870912, %v2075_v35  ;;  %v1838_v3 = vshrl.u32 %v14585_v30, %v1837_v6  ;;  %v1873_v43 = vand.u32 65535, %v1869_v31  ;;  %v1874_v21 = vshrl.u32 %v1869_v31, 16  ;;  %v5838_v31 = vpop.f32.mrf.mxu1 }
 0x1df   : > { %9091 = vmatmul.msk.bf16.gmra.mxu3 %vm5704_vm9, %v14620_v47  ;;  %v5540_v57 = vpack.c.bf16 %v10868_v27, %v9318_v44  ;;  %v1897_v40 = vmul.u32 %v1895_v11, %v1871_v13  ;;  %v1898_v8 = vmul.u32 %v1896_v54, %v1871_v13  ;;  %v1899_v34 = vmul.u32 %v1895_v11, %v1872_v59  ;;  %v14621_v44 = vld [vmem:[#allocation6_spill] sm:$0xff] }
 0x1e0   : > { %v11077_v52 = vshrl.u32 %v2076_v38, 30  ;;  %v1875_v60 = vmul.u32 %v1873_v43, %v1871_v13  ;;  %v1876_v9 = vmul.u32 %v1874_v21, %v1871_v13  ;;  %v1877_v5 = vmul.u32 %v1873_v43, %v1872_v59  ;;  %v5789_v13 = vpop.f32.mrf.mxu0 }
 0x1e1   : > { %v6562_v17 = vmax.f32 %v5787_v41, 0.0  ;;  %v6563_v51 = vmax.f32 %v5836_v4, 0.0  ;;  %v1859_v6 = vsel %vm1857_vm5, %v1847_v50, 2102212464  ;;  %v1901_v39 = vshll.u32 %v1898_v8, 16 }
 0x1e2   : > { %5979 = vmatpush.bf16.msrb.mxu0 %v5572_v48  ;;  %v2078_v42 = vshll.u32 %v11077_v52, 30  ;;  %v1858_v27 = vsel %vm1854_vm2, %v1838_v3, %v1841_v29  ;;  %v1878_v45 = vmul.u32 %v1874_v21, %v1872_v59  ;;  %v1879_v61 = vshll.u32 %v1876_v9, 16 }
 0x1e3   : > { %v1881_v53 = vshll.u32 %v1877_v5, 16  ;;  %v1900_v19 = vmul.u32 %v1896_v54, %v1872_v59  ;;  %v1903_v18 = vshll.u32 %v1899_v34, 16  ;;  %vm1905_vm7 = vc.u32 %v1897_v40, %v1901_v39 }
 0x1e4   : > { %v2079_v58 = vsub.s32 %v2075_v35, %v2078_v42  ;;  %v1860_v26 = vsel %vm1856_vm4, %v11029_v10, %v1859_v6  ;;  %vm1883_vm10 = vc.u32 %v1875_v60, %v1879_v61  ;;  %v1885_v50 = vadd.s32 %v1879_v61, %v1875_v60  ;;  %v14624_v6 = vld [vmem:[#allocation9_spill] sm:$0xff] }
 0x1e5   : > { %v1880_v15 = vshrl.u32 %v1876_v9, 16  ;;  %v1884_v33 = vsel %vm1883_vm10, 1, %v14602_v32  ;;  %v1906_v56 = vsel %vm1905_vm7, 1, %v14602_v32  ;;  %v1907_v29 = vadd.s32 %v1901_v39, %v1897_v40 }
 0x1e6   : > { %5980 = vmatpush.bf16.msrb.mxu0 %v5556_v1  ;;  %vm2080_vm11 = vcmp.lt.s32.totalorder %v2079_v58, 0  ;;  %v2081_v36 = vsub.s32 0, %v2079_v58  ;;  %v1886_v1 = vadd.s32 %v1884_v33, %v1878_v45  ;;  %vm1887_vm12 = vc.u32 %v1885_v50, %v1881_v53 }
 0x1e7   : > { %v1888_v20 = vsel %vm1887_vm12, 1, %v14602_v32  ;;  %v1902_v48 = vshrl.u32 %v1898_v8, 16  ;;  %v1908_v7 = vadd.s32 %v1906_v56, %v1900_v19  ;;  %vm1909_vm13 = vc.u32 %v1907_v29, %v1903_v18  ;;  %v11104_v8 = vld [vmem:[%s9422_s27 + $0x48] sm:$0xff] }
 0x1e8   : > { %v2082_v23 = vsel %vm2080_vm11, %v2081_v36, %v2079_v58  ;;  %v1882_v10 = vshrl.u32 %v1877_v5, 16  ;;  %v1890_v14 = vadd.s32 %v1888_v20, %v1886_v1  ;;  %v1910_v47 = vsel %vm1909_vm13, 1, %v14602_v32 }
 0x1e9   : > { %v2083_v35 = vclz %v2082_v23  ;;  %v1904_v63 = vshrl.u32 %v1899_v34, 16  ;;  %v1912_v22 = vadd.s32 %v1910_v47, %v1908_v7  ;;  %v6578_v11 = vmax.f32 %v5789_v13, 0.0 }
 0x1ea   : > { %5981 = vmatpush.bf16.msrb.mxu0 %v5540_v57  ;;  %v1891_v59 = vadd.s32 %v1890_v14, %v1880_v15  ;;  %v6579_v54 = vmax.f32 %v5838_v31, 0.0  ;;  %v1861_v3 = vsel %vm1855_vm8, %v1858_v27, %v1860_v26  ;;  %v1911_v43 = vadd.s32 %v1907_v29, %v1903_v18  ;;  %v14628_v31 = vld [vmem:[#allocation7_spill] sm:$0xff] }
 0x1eb   : > { %v8940_v38 = vadd.s32 4294967294, %v2083_v35  ;;  %v1913_v21 = vadd.s32 %v1912_v22, %v1902_v48  ;;  %v11097_v41 = vpack.c.bf16 %v6578_v11, %v6562_v17  ;;  %v2101_v34 = vsub.s32 4, %v11077_v52 }
 0x1ec   : > { %v1892_v57 = vadd.s32 %v1891_v59, %v1882_v10  ;;  %v11099_v4 = vpack.c.bf16 %v6579_v54, %v6563_v51  ;;  %v1915_v60 = vmul.u32 %v11052_v55, %v1861_v3  ;;  %v14489_v9 = vand.u32 2147483647, %v11104_v8 }
 0x1ed   : > { %9066 = vmatmul.msk.bf16.vlgmr.msrb.gmra.mxu0 %vm5704_vm9, %v11000_v49  ;;  %9076 = vmatmul.msk.bf16.gmra.mxu1 %vm5704_vm9, %v14621_v44  ;;  %14622 = vst [vmem:[#allocation5_spill] sm:$0xff] %v11097_v41  ;;  %v2071_v49 = vadd.s32 %v11015_v16, %v11020_v12  ;;  %vm8941_vm14 = vcmp.lt.s32.totalorder %v8940_v38, 0  ;;  %v1914_v40 = vadd.s32 %v1913_v21, %v1904_v63  ;;  %v1670_v51 = vand.u32 2139095040, %v11104_v8  ;;  %v9319_v63 = vld [vmem:[%s14434_s1 + $0x8] sm:$0xff] }
 0x1ee   : > { %14623 = vst [vmem:[#allocation2_spill] sm:$0xff] %v11099_v4  ;;  %9084 = vmatmul.msk.bf16.gmra.mxu2 %vm5704_vm9, %v14621_v44  ;;  %v2086_v0 = vsel %vm8941_vm14, 0, %v8940_v38  ;;  %vm1917_vm15 = vc.u32 %v1892_v57, %v1911_v43  ;;  %vm1979_vm0 = vcmp.lt.s32.totalorder %v14624_v6, 0  ;;  %v1674_v18 = vand.u32 8388607, %v14489_v9 }
 0x1ef   : > { %9092 = vmatmul.msk.bf16.gmra.mxu3 %vm5704_vm9, %v14621_v44  ;;  %v2087_v5 = vsub.s32 32, %v2086_v0  ;;  %v2088_v16 = vshll.u32 %v2079_v58, %v2086_v0  ;;  %v2091_v12 = vsub.s32 4294967266, %v2086_v0  ;;  %v1918_v17 = vadd.s32 1, %v1914_v40  ;;  %v11121_v58 = vld [vmem:[%s9422_s27 + $0x40] sm:$0xff] }
 0x1f0   : > { %v2102_v27 = vsel %vm1979_vm0, %v2101_v34, %v11077_v52  ;;  %v1671_v55 = vshrl.u32 %v1670_v51, 23  ;;  %v14625_v50 = vand.u32 2147483647, %v14624_v6  ;;  %v1515_v1 = vand.u32 2139095040, %v11121_v58 }
 0x1f1   : > { %v2089_v39 = vshrl.u32 %v2071_v49, %v2087_v5  ;;  %v2092_v42 = vadd.s32 127, %v2091_v12  ;;  %v1919_v45 = vsel %vm1917_vm15, %v1918_v17, %v1914_v40  ;;  %v1675_v48 = vor.u32 8388608, %v1674_v18 }
 0x1f2   : > { %v1920_v19 = vadd.s32 %v1919_v45, %v1915_v60  ;;  %v8933_v26 = vadd.s32 4294967169, %v1671_v55  ;;  %vm11125_vm1 = vcmp.le.f32.partialorder %v14625_v50, 0.7853982  ;;  %v1516_v35 = vshrl.u32 %v1515_v1, 23  ;;  %v11189_v50 = vpop.f32.mrf.mxu3 }
 0x1f3   : > { %v2090_v61 = vor.u32 %v2089_v39, %v2088_v16  ;;  %v2093_v53 = vshll.u32 %v2092_v42, 23  ;;  %v2104_v52 = vsel %vm11125_vm1, 0, %v2102_v27  ;;  %v11136_v13 = vshll.u32 %v1675_v48, 8  ;;  %14632 = vst [vmem:[#allocation3_spill] sm:$0xff] %v11189_v50 }
 0x1f4   : > { %v1921_v29 = vadd.s32 536870912, %v1920_v19  ;;  %v1677_v36 = vadd.s32 1, %v8933_v26  ;;  %v2121_v10 = vadd.s32 3, %v2104_v52  ;;  %vm1824_vm3 = vcmp.lt.s32.totalorder %v10800_v37, 0  ;;  %v11185_v26 = vpop.f32.mrf.mxu2 }
 0x1f5   : > { %v2094_v33 = vor.u32 4788187, %v2093_v53  ;;  %v2097_v56 = vcvt.s32.f32 %v2090_v61  ;;  %vm11149_vm4 = vcmp.le.f32.partialorder %v1822_v25, 0.7853982  ;;  %v1916_v21 = vadd.s32 %v1911_v43, %v1892_v57  ;;  %14631 = vst [vmem:[#allocation4_spill] sm:$0xff] %v11185_v26 }
 0x1f6   : > { %v1922_v7 = vshrl.u32 %v1921_v29, 30  ;;  %vm1678_vm2 = vcmp.gt.s32.totalorder %v1677_v36, 0  ;;  %v11145_v38 = vand.u32 3, %v2121_v10  ;;  %v8930_v40 = vadd.s32 4294967169, %v1516_v35 }
 0x1f7   : > { %v2095_v20 = vand.u32 2147483647, %v2094_v33  ;;  %v1679_v14 = vsel %vm1678_vm2, %v1677_v36, 0  ;;  %v11166_v43 = vand.u32 3, %v2104_v52  ;;  %v11169_v57 = vand.u32 65535, %v11136_v13 }
 0x1f8   : > { %v1923_v47 = vshll.u32 %v1922_v7, 30  ;;  %v1681_v11 = vand.u32 31, %v1679_v14  ;;  %v14488_v0 = vand.u32 2147483647, %v11121_v58  ;;  %v11173_v60 = vshrl.u32 %v1679_v14, 5 }
 0x1f9   : > { %v2098_v23 = vmul.f32 %v2097_v56, %v2095_v20  ;;  %v11176_v16 = vshrl.u32 %v11136_v13, 16  ;;  %v1946_v39 = vsub.s32 4, %v1922_v7  ;;  %v11181_v55 = vadd.s32 1, %v8930_v40 }
 0x1fa   : > { %v11141_v59 = vsub.s32 %v1920_v19, %v1923_v47  ;;  %v1682_v5 = vsub.s32 32, %v1681_v11  ;;  %v1684_v42 = vshll.u32 %v14585_v30, %v1681_v11  ;;  %v1687_v27 = vshll.u32 %v14619_v62, %v1681_v11 }
 0x1fb   : > { %v2099_v22 = vxor.u32 2147483648, %v2098_v23  ;;  %v1690_v45 = vshll.u32 %v14587_v24, %v1681_v11  ;;  %v1947_v18 = vsel %vm1824_vm3, %v1946_v39, %v1922_v7  ;;  %vm2127_vm8 = vcmp.eq.s32.totalorder %v11145_v38, 2 }
 0x1fc   : > { %vm1925_vm5 = vcmp.lt.s32.totalorder %v11141_v59, 0  ;;  %v1926_v49 = vsub.s32 0, %v11141_v59  ;;  %vm4595_vm7 = vcmp.eq.s32.totalorder %v11166_v43, 2  ;;  %v1683_v15 = vshrl.u32 %v14585_v30, %v1682_v5 }
 0x1fd   : > { %9067 = vmatmul.msk.bf16.gmra.mxu0 %vm5704_vm9, %v9319_v63  ;;  %9077 = vmatmul.msk.bf16.gmra.mxu1 %vm5704_vm9, %v14628_v31  ;;  %v2100_v54 = vsel %vm1979_vm0, %v2099_v22, %v2098_v23  ;;  %v1685_v33 = vshrl.u32 %v14619_v62, %v1682_v5  ;;  %v1693_v56 = vshll.u32 %v14588_v28, %v1681_v11  ;;  %vm2124_vm11 = vcmp.eq.s32.totalorder %v11145_v38, 0 }
 0x1fe   : > { %9085 = vmatmul.msk.bf16.gmra.mxu2 %vm5704_vm9, %v14628_v31  ;;  %v11158_v44 = vsel %vm11125_vm1, %v14624_v6, %v2100_v54  ;;  %v1927_v34 = vsel %vm1925_vm5, %v1926_v49, %v11141_v59  ;;  %v1696_v52 = vshll.u32 %v14589_v46, %v1681_v11  ;;  %v1688_v1 = vshrl.u32 %v14587_v24, %v1682_v5 }
 0x1ff   : > { %9093 = vmatmul.msk.bf16.gmra.mxu3 %vm5704_vm9, %v14628_v31  ;;  %v2105_v25 = vmul.f32 %v11158_v44, %v11158_v44  ;;  %v1928_v51 = vclz %v1927_v34  ;;  %vm4592_vm12 = vcmp.eq.s32.totalorder %v11166_v43, 0  ;;  %v11200_v48 = vsel %vm11149_vm4, 0, %v1947_v18 }
 0x200   : > { %v1691_v7 = vshrl.u32 %v14588_v28, %v1682_v5  ;;  %v1694_v23 = vshrl.u32 %v14589_v46, %v1682_v5  ;;  %vm2123_vm13 = vcmp.lt.s32.totalorder %v11145_v38, 2  ;;  %vm4591_vm14 = vcmp.lt.s32.totalorder %v11166_v43, 2 }
 0x201   : > { %v2106_v12 = vmul.f32 -0.001358992, %v2105_v25  ;;  %v2113_v17 = vmul.f32 -0.00019511016, %v2105_v25  ;;  %v8937_v19 = vadd.s32 4294967294, %v1928_v51  ;;  %vm2120_vm15 = vweird.f32 %v14624_v6 }
 0x202   : > { %v1686_v22 = vor.u32 %v1685_v33, %v1684_v42  ;;  %v1697_v31 = vshrl.u32 %v14590_v2, %v1682_v5  ;;  %vm1699_vm0 = vcmp.lt.s32.totalorder %v11173_v60, 1  ;;  %v1689_v40 = vor.u32 %v1688_v1, %v1687_v27  ;;  %v11232_v33 = vld [vmem:[%s14434_s1 + $0x20] sm:$0xff] }
 0x203   : > { %v2107_v61 = vadd.f32 0.041655596, %v2106_v12  ;;  %v2114_v53 = vadd.f32 0.008332121, %v2113_v17  ;;  %vm8938_vm10 = vcmp.lt.s32.totalorder %v8937_v19, 0  ;;  %v1966_v12 = vadd.s32 3, %v11200_v48 }
 0x204   : > { %v1931_v20 = vsel %vm8938_vm10, 0, %v8937_v19  ;;  %v1692_v17 = vor.u32 %v1691_v7, %v1690_v45  ;;  %v1695_v51 = vor.u32 %v1694_v23, %v1693_v56  ;;  %vm1702_vm1 = vcmp.lt.s32.totalorder %v11173_v60, 4 }
 0x205   : > { %v2108_v29 = vmul.f32 %v2107_v61, %v2105_v25  ;;  %v2115_v36 = vmul.f32 %v2114_v53, %v2105_v25  ;;  %v1932_v47 = vsub.s32 32, %v1931_v20  ;;  %v1933_v35 = vshll.u32 %v11141_v59, %v1931_v20  ;;  %v9320_v59 = vld [vmem:[%s14434_s1 + $0x10] sm:$0xff]  ;;  %v11221_v53 = vpop.f32.mrf.mxu2 }
 0x206   : > { %v1936_v63 = vsub.s32 4294967266, %v1931_v20  ;;  %v14633_v61 = vld [vmem:[#allocation8_spill] sm:$0xff]  ;;  %vm1700_vm2 = vcmp.lt.s32.totalorder %v11173_v60, 2  ;;  %vm1701_vm5 = vcmp.lt.s32.totalorder %v11173_v60, 3  ;;  %14634 = vst [vmem:[#allocation6_spill] sm:$0xff] %v11221_v53  ;;  %v11225_v19 = vsel %vm1699_vm0, %v1683_v15, %v1686_v22 }
 0x207   : > { %v2109_v10 = vadd.f32 -0.4999988, %v2108_v29  ;;  %v2116_v14 = vadd.f32 -0.16666654, %v2115_v36  ;;  %v1934_v49 = vshrl.u32 %v1916_v21, %v1932_v47  ;;  %v1707_v18 = vsel %vm1699_vm0, %v1686_v22, %v1689_v40  ;;  %v11238_v29 = vpop.f32.mrf.mxu3 }
 0x208   : > { %v1937_v34 = vadd.s32 127, %v1936_v63  ;;  %14635 = vst [vmem:[#allocation9_spill] sm:$0xff] %v11238_v29  ;;  %v1708_v15 = vsel %vm1702_vm1, %v1695_v51, 920167782  ;;  %v1711_v7 = vsel %vm1699_vm0, %v1689_v40, %v1692_v17  ;;  %v11281_v43 = vand.u32 3, %v11200_v48 }
 0x209   : > { %v2110_v11 = vmul.f32 %v2109_v10, %v2105_v25  ;;  %v2117_v54 = vmul.f32 %v2116_v14, %v2105_v25  ;;  %v1935_v5 = vor.u32 %v1934_v49, %v1933_v35  ;;  %v1698_v25 = vor.u32 %v1697_v31, %v1696_v52 }
 0x20a   : > { %v1938_v21 = vshll.u32 %v1937_v34, 23  ;;  %v11236_v52 = vand.u32 3, %v1966_v12  ;;  %v1704_v10 = vsel %vm1702_vm1, %v1692_v17, 2102212464  ;;  %v1709_v14 = vsel %vm1701_vm5, %v1692_v17, %v1708_v15 }
 0x20b   : > { %v2111_v39 = vadd.f32 1.0, %v2110_v11  ;;  %v2118_v42 = vadd.f32 1.0, %v2117_v54  ;;  %v1712_v47 = vsel %vm1702_vm1, %v1698_v25, 1326507024  ;;  %v1710_v22 = vsel %vm1700_vm2, %v1707_v18, %v1709_v14 }
 0x20c   : > { %v1939_v56 = vor.u32 4788187, %v1938_v21  ;;  %v1713_v31 = vsel %vm1701_vm5, %v1695_v51, %v1712_v47  ;;  %v1741_v6 = vshrl.u32 %v1710_v22, 16  ;;  %v1705_v48 = vsel %vm1701_vm5, %v1689_v40, %v1704_v10 }
 0x20d   : > { %9068 = vmatmul.msk.bf16.gmra.mxu0 %vm5704_vm9, %v9320_v59  ;;  %9078 = vmatmul.msk.bf16.gmra.mxu1 %vm5704_vm9, %v14633_v61  ;;  %v2119_v27 = vmul.f32 %v2118_v42, %v11158_v44  ;;  %v2128_v45 = vxor.u32 2147483648, %v2111_v39  ;;  %v1942_v44 = vcvt.s32.f32 %v1935_v5  ;;  %v1714_v34 = vsel %vm1700_vm2, %v1711_v7, %v1713_v31 }
 0x20e   : > { %9086 = vmatmul.msk.bf16.gmra.mxu2 %vm5704_vm9, %v11232_v33  ;;  %v1940_v23 = vand.u32 2147483647, %v1939_v56  ;;  %v1718_v59 = vand.u32 65535, %v1714_v34  ;;  %v1719_v51 = vshrl.u32 %v1714_v34, 16  ;;  %v1740_v42 = vand.u32 65535, %v1710_v22 }
 0x20f   : > { %9094 = vmatmul.msk.bf16.gmra.mxu3 %vm5704_vm9, %v11232_v33  ;;  %v2125_v36 = vxor.u32 2147483648, %v2119_v27  ;;  %v2129_v1 = vsel %vm2127_vm8, %v2128_v45, %v2119_v27  ;;  %v4597_v20 = vsel %vm4595_vm7, %v2128_v45, %v2119_v27  ;;  %vm1972_vm8 = vcmp.eq.s32.totalorder %v11236_v52, 2 }
 0x210   : > { %v1943_v49 = vmul.f32 %v1942_v44, %v1940_v23  ;;  %v1720_v5 = vmul.u32 %v1718_v59, %v11169_v57  ;;  %v1721_v61 = vmul.u32 %v1719_v51, %v11169_v57  ;;  %v11286_v21 = vmul.u32 %v1718_v59, %v11176_v16 }
 0x211   : > { %v2126_v35 = vsel %vm2124_vm11, %v2111_v39, %v2125_v36  ;;  %v4594_v63 = vsel %vm4592_vm12, %v2111_v39, %v2125_v36  ;;  %v1723_v56 = vmul.u32 %v1719_v51, %v11176_v16  ;;  %v1742_v40 = vmul.u32 %v1740_v42, %v11169_v57 }
 0x212   : > { %v2130_v11 = vsel %vm2123_vm13, %v2126_v35, %v2129_v1  ;;  %v4598_v54 = vsel %vm4591_vm14, %v4594_v63, %v4597_v20  ;;  %v1944_v39 = vxor.u32 2147483648, %v1943_v49  ;;  %v1724_v44 = vshll.u32 %v1721_v61, 16  ;;  %v9322_v35 = vld [vmem:[%s14434_s1 + $0x18] sm:$0xff] }
 0x213   : > { %v11272_v12 = vsel %vm2120_vm15, nan, %v2130_v11  ;;  %v11276_v17 = vsel %vm2120_vm15, nan, %v4598_v54  ;;  %v1726_v15 = vshll.u32 %v11286_v21, 16  ;;  %v11313_v3 = vmul.u32 %v1740_v42, %v11176_v16 }
 0x214   : > { %14636 = vst [vmem:[#allocation7_spill] sm:$0xff] %v11272_v12  ;;  %v5227_v38 = vadd.f32 %v11272_v12, %v11272_v12  ;;  %v1945_v45 = vsel %vm1824_vm3, %v1944_v39, %v1943_v49  ;;  %vm1728_vm3 = vc.u32 %v1720_v5, %v1724_v44  ;;  %v1730_v7 = vadd.s32 %v1724_v44, %v1720_v5 }
 0x215   : > { %v11301_v18 = vsel %vm11149_vm4, %v10800_v37, %v1945_v45  ;;  %v1743_v37 = vmul.u32 %v1741_v6, %v11169_v57  ;;  %v1725_v63 = vshrl.u32 %v1721_v61, 16  ;;  %v1729_v57 = vsel %vm1728_vm3, 1, %v14602_v32 }
 0x216   : > { %v11289_v25 = vmul.f32 %v5227_v38, %v11276_v17  ;;  %v11292_v27 = vmul.f32 %v5227_v38, %v11272_v12  ;;  %v1950_v20 = vmul.f32 %v11301_v18, %v11301_v18  ;;  %vm1732_vm4 = vc.u32 %v1730_v7, %v1726_v15  ;;  %v11522_v12 = vld [vmem:[%s9422_s27 + $0x60] sm:$0xff] }
 0x217   : > { %v1746_v22 = vshll.u32 %v1743_v37, 16  ;;  %v1731_v34 = vadd.s32 %v1729_v57, %v1723_v56  ;;  %v1733_v59 = vsel %vm1732_vm4, 1, %v14602_v32  ;;  %v1745_v51 = vmul.u32 %v1741_v6, %v11176_v16  ;;  %14644 = vst [vmem:[#allocation13_spill] sm:$0xff] %v11522_v12 }
 0x218   : > { %v14485_v36 = vsub.f32 1.0, %v11292_v27  ;;  %v5291_v1 = vadd.f32 %v11289_v25, %v11289_v25  ;;  %v1951_v14 = vmul.f32 -0.001358992, %v1950_v20  ;;  %v1958_v47 = vmul.f32 -0.00019511016, %v1950_v20 }
 0x219   : > { %v1748_v38 = vshll.u32 %v11313_v3, 16  ;;  %v1727_v45 = vshrl.u32 %v11286_v21, 16  ;;  %v1735_v44 = vadd.s32 %v1733_v59, %v1731_v34  ;;  %vm1750_vm7 = vc.u32 %v1742_v40, %v1746_v22 }
 0x21a   : > { %v11317_v23 = vmul.f32 %v5291_v1, %v14485_v36  ;;  %v11320_v10 = vmul.f32 %v5291_v1, %v11289_v25  ;;  %v1952_v54 = vadd.f32 0.041655596, %v1951_v14  ;;  %v1959_v49 = vadd.f32 0.008332121, %v1958_v47 }
 0x21b   : > { %v1752_v56 = vadd.s32 %v1746_v22, %v1742_v40  ;;  %vm1968_vm10 = vcmp.lt.s32.totalorder %v11236_v52, 2  ;;  %v1736_v7 = vadd.s32 %v1735_v44, %v1725_v63  ;;  %v1747_v14 = vshrl.u32 %v1743_v37, 16  ;;  %v9323_v44 = vld [vmem:[%s9422_s27 + $0x50] sm:$0xff] }
 0x21c   : > { %14637 = vst [vmem:[#allocation8_spill] sm:$0xff] %v11317_v23  ;;  %v14484_v31 = vsub.f32 1.0, %v11320_v10  ;;  %v5355_v11 = vadd.f32 %v11317_v23, %v11317_v23  ;;  %v1953_v5 = vmul.f32 %v1952_v54, %v1950_v20  ;;  %v1960_v61 = vmul.f32 %v1959_v49, %v1950_v20 }
 0x21d   : > { %9069 = vmatmul.msk.bf16.gmra.mxu0 %vm5704_vm9, %v9322_v35  ;;  %v1751_v47 = vsel %vm1750_vm7, 1, %v14602_v32  ;;  %vm1754_vm11 = vc.u32 %v1752_v56, %v1748_v38  ;;  %vm4441_vm12 = vcmp.eq.s32.totalorder %v11281_v43, 2  ;;  %v1706_v22 = vsel %vm1700_vm2, %v11225_v19, %v1705_v48 }
 0x21e   : > { %v11336_v39 = vmul.f32 %v5355_v11, %v14484_v31  ;;  %v11339_v42 = vmul.f32 %v5355_v11, %v11317_v23  ;;  %v1954_v6 = vadd.f32 -0.4999988, %v1953_v5  ;;  %v1961_v1 = vadd.f32 -0.16666654, %v1960_v61 }
 0x21f   : > { %v1753_v57 = vadd.s32 %v1751_v47, %v1745_v51  ;;  %v1755_v63 = vsel %vm1754_vm11, 1, %v14602_v32  ;;  %vm1523_vm13 = vcmp.gt.s32.totalorder %v11181_v55, 0  ;;  %v11364_v34 = vadd.s32 %v1736_v7, %v1727_v45 }
 0x220   : > { %v14487_v15 = vsub.f32 1.0, %v11339_v42  ;;  %v11345_v16 = vadd.f32 %v11336_v39, %v11336_v39  ;;  %v1955_v40 = vmul.f32 %v1954_v6, %v1950_v20  ;;  %v1962_v35 = vmul.f32 %v1961_v1, %v1950_v20 }
 0x221   : > { %v1757_v49 = vadd.s32 %v1755_v63, %v1753_v57  ;;  %v1749_v20 = vshrl.u32 %v11313_v3, 16  ;;  %v11367_v59 = vadd.s32 %v1752_v56, %v1748_v38  ;;  %v1524_v60 = vsel %vm1523_vm13, %v11181_v55, 0 }
 0x222   : > { %v11352_v21 = vmul.f32 %v11345_v16, %v14487_v15  ;;  %v1956_v11 = vadd.f32 1.0, %v1955_v40  ;;  %v1963_v54 = vadd.f32 1.0, %v1962_v35  ;;  %vm1969_vm14 = vcmp.eq.s32.totalorder %v11236_v52, 0 }
 0x223   : > { %v1758_v5 = vadd.s32 %v1757_v49, %v1747_v14  ;;  %vm4437_vm15 = vcmp.lt.s32.totalorder %v11281_v43, 2  ;;  %vm4438_vm0 = vcmp.eq.s32.totalorder %v11281_v43, 0  ;;  %v1526_v61 = vand.u32 31, %v1524_v60 }
 0x224   : > { %v11362_v37 = vadd.f32 %v11352_v21, %v11352_v21  ;;  %v1964_v48 = vmul.f32 %v1963_v54, %v11301_v18  ;;  %v1973_v51 = vxor.u32 2147483648, %v1956_v11  ;;  %vm1965_vm1 = vweird.f32 %v9323_v44 }
 0x225   : > { %v1759_v18 = vadd.s32 %v1758_v5, %v1749_v20  ;;  %v1760_v56 = vmul.u32 %v11136_v13, %v1706_v22  ;;  %v1519_v6 = vand.u32 8388607, %v14488_v0  ;;  %vm1762_vm2 = vc.u32 %v11364_v34, %v11367_v59 }
 0x226   : > { %v5515_v19 = vmul.f32 %v11362_v37, %v11352_v21  ;;  %v1970_v3 = vxor.u32 2147483648, %v1964_v48  ;;  %v1974_v38 = vsel %vm1972_vm8, %v1973_v51, %v1964_v48  ;;  %v4443_v55 = vsel %vm4441_vm12, %v1973_v51, %v1964_v48 }
 0x227   : > { %v1763_v35 = vadd.s32 1, %v1759_v18  ;;  %v11392_v13 = vsub.s32 32, %v1526_v61  ;;  %v1520_v52 = vor.u32 8388608, %v1519_v6  ;;  %v11401_v49 = vshrl.u32 %v1524_v60, 5 }
 0x228   : > { %v5531_v45 = vsub.f32 1.0, %v5515_v19  ;;  %v1971_v7 = vsel %vm1969_vm14, %v1956_v11, %v1970_v3  ;;  %v4440_v14 = vsel %vm4438_vm0, %v1956_v11, %v1970_v3  ;;  %v1532_v19 = vshll.u32 %v14619_v62, %v1526_v61 }
 0x229   : > { %v1975_v47 = vsel %vm1968_vm10, %v1971_v7, %v1974_v38  ;;  %v4444_v40 = vsel %vm4437_vm15, %v4440_v14, %v4443_v55  ;;  %v1533_v48 = vshrl.u32 %v14587_v24, %v11392_v13  ;;  %v1535_v5 = vshll.u32 %v14587_v24, %v1526_v61 }
 0x22a   : > { %v5643_v1 = vpack.c.bf16 %v5531_v45, %v5531_v45  ;;  %v11395_v22 = vsel %vm1965_vm1, nan, %v1975_v47  ;;  %v11397_v63 = vsel %vm1965_vm1, nan, %v4444_v40  ;;  %v1536_v45 = vshrl.u32 %v14588_v28, %v11392_v13 }
 0x22b   : > { %14638 = vst [vmem:[#allocation10_spill] sm:$0xff] %v11395_v22  ;;  %v5226_v11 = vadd.f32 %v11395_v22, %v11395_v22  ;;  %v1538_v60 = vshll.u32 %v14588_v28, %v1526_v61  ;;  %v1539_v55 = vshrl.u32 %v14589_v46, %v11392_v13  ;;  %v1541_v44 = vshll.u32 %v14589_v46, %v1526_v61 }
 0x22c   : > { %v5764_v57 = vsel %vm5729_vm6, %v5643_v1, 0  ;;  %v1530_v6 = vshrl.u32 %v14619_v62, %v11392_v13  ;;  %v1542_v1 = vshrl.u32 %v14590_v2, %v11392_v13  ;;  %v11436_v47 = vor.u32 %v1533_v48, %v1532_v19 }
 0x22d   : > { %9070 = vmatmul.msk.bf16.gmra.mxu0 %vm5704_vm9, %v11232_v33  ;;  %6318 = vmatpush.bf16.msra.mxu3 %v5764_v57  ;;  %v1764_v33 = vsel %vm1762_vm2, %v1763_v35, %v1759_v18  ;;  %v11404_v43 = vmul.f32 %v5226_v11, %v11397_v63  ;;  %v11407_v20 = vmul.f32 %v5226_v11, %v11395_v22  ;;  %vm1544_vm5 = vcmp.lt.s32.totalorder %v11401_v49, 1 }
 0x22e   : > { %v1765_v54 = vadd.s32 %v1764_v33, %v1760_v56  ;;  %v1529_v56 = vshll.u32 %v14585_v30, %v1526_v61  ;;  %v11439_v35 = vor.u32 %v1536_v45, %v1535_v5  ;;  %v1540_v61 = vor.u32 %v1539_v55, %v1538_v60 }
 0x22f   : > { %14639 = vst [vmem:[#allocation11_spill] sm:$0xff] %v11404_v43  ;;  %v14482_v3 = vsub.f32 1.0, %v11407_v20  ;;  %v5290_v38 = vadd.f32 %v11404_v43, %v11404_v43  ;;  %v1543_v33 = vor.u32 %v1542_v1, %v1541_v44  ;;  %vm1547_vm3 = vcmp.lt.s32.totalorder %v11401_v49, 4 }
 0x230   : > { %v1766_v51 = vadd.s32 536870912, %v1765_v54  ;;  %vm1545_vm4 = vcmp.lt.s32.totalorder %v11401_v49, 2  ;;  %vm1546_vm8 = vcmp.lt.s32.totalorder %v11401_v49, 3  ;;  %v1553_v45 = vsel %vm1547_vm3, %v1540_v61, 920167782 }
 0x231   : > { %v11431_v7 = vmul.f32 %v5290_v38, %v14482_v3  ;;  %v11434_v14 = vmul.f32 %v5290_v38, %v11404_v43  ;;  %v1531_v38 = vor.u32 %v1530_v6, %v1529_v56  ;;  %v11446_v3 = vshll.u32 %v1520_v52, 8 }
 0x232   : > { %v11422_v18 = vshrl.u32 %v1766_v51, 30  ;;  %v1557_v55 = vsel %vm1547_vm3, %v1543_v33, 1326507024  ;;  %v1554_v33 = vsel %vm1546_vm8, %v11439_v35, %v1553_v45  ;;  %vm1669_vm11 = vcmp.lt.s32.totalorder %v11104_v8, 0 }
 0x233   : > { %14640 = vst [vmem:[#allocation12_spill] sm:$0xff] %v11431_v7  ;;  %v14483_v57 = vsub.f32 1.0, %v11434_v14  ;;  %v5354_v11 = vadd.f32 %v11431_v7, %v11431_v7  ;;  %v1552_v56 = vsel %vm1544_vm5, %v1531_v38, %v11436_v47  ;;  %v1558_v6 = vsel %vm1546_vm8, %v1540_v61, %v1557_v55 }
 0x234   : > { %v1768_v40 = vshll.u32 %v11422_v18, 30  ;;  %v1561_v1 = vand.u32 65535, %v11446_v3 }
 0x235   : > { %v11450_v19 = vmul.f32 %v5354_v11, %v14483_v57  ;;  %v11453_v48 = vmul.f32 %v5354_v11, %v11431_v7  ;;  %v1562_v57 = vshrl.u32 %v11446_v3, 16 }
 0x236   : > { %v1769_v51 = vsub.s32 %v1765_v54, %v1768_v40  ;;  %v1556_v54 = vsel %vm1544_vm5, %v11436_v47, %v11439_v35 }
 0x237   : > { %v14486_v52 = vsub.f32 1.0, %v11453_v48  ;;  %v11466_v60 = vadd.f32 %v11450_v19, %v11450_v19 }
 0x238   : > { %vm1770_vm7 = vcmp.lt.s32.totalorder %v1769_v51, 0  ;;  %v1771_v5 = vsub.s32 0, %v1769_v51 }
 0x239   : > { %v11479_v40 = vmul.f32 %v11466_v60, %v14486_v52  ;;  %v1761_v52 = vadd.s32 %v11367_v59, %v11364_v34 }
 0x23a   : > { %v1772_v44 = vsel %vm1770_vm7, %v1771_v5, %v1769_v51  ;;  %v1559_v5 = vsel %vm1545_vm4, %v1556_v54, %v1558_v6  ;;  %v1528_v54 = vshrl.u32 %v14585_v30, %v11392_v13  ;;  %v14641_v13 = vand.u32 2147483647, %v11104_v8 }
 0x23b   : > { %v1773_v11 = vclz %v1772_v44  ;;  %v1563_v31 = vand.u32 65535, %v1559_v5  ;;  %v1564_v36 = vshrl.u32 %v1559_v5, 16  ;;  %v11489_v61 = vadd.f32 %v11479_v40, %v11479_v40 }
 0x23c   : > { %v1555_v44 = vsel %vm1545_vm4, %v1552_v56, %v1554_v33  ;;  %v1791_v56 = vsub.s32 4, %v11422_v18  ;;  %vm11505_vm12 = vcmp.le.f32.partialorder %v14641_v13, 0.7853982 }
 0x23d   : > { %v8934_v55 = vadd.s32 4294967294, %v1773_v11  ;;  %v1566_v15 = vmul.u32 %v1564_v36, %v1561_v1  ;;  %v5514_v45 = vmul.f32 %v11489_v61, %v11479_v40  ;;  %v1585_v6 = vand.u32 65535, %v1555_v44 }
 0x23e   : > { %v1565_v0 = vmul.u32 %v1563_v31, %v1561_v1  ;;  %v11499_v9 = vmul.u32 %v1563_v31, %v1562_v57  ;;  %v1586_v33 = vshrl.u32 %v1555_v44, 16  ;;  %v1568_v53 = vmul.u32 %v1564_v36, %v1562_v57 }
 0x23f   : > { %vm8935_vm10 = vcmp.lt.s32.totalorder %v8934_v55, 0  ;;  %v1569_v11 = vshll.u32 %v1566_v15, 16  ;;  %v5530_v50 = vsub.f32 1.0, %v5514_v45  ;;  %v1548_v31 = vsel %vm1544_vm5, %v1528_v54, %v1531_v38 }
 0x240   : > { %v1776_v5 = vsel %vm8935_vm10, 0, %v8934_v55  ;;  %v1589_v45 = vmul.u32 %v1585_v6, %v1562_v57  ;;  %v1549_v36 = vsel %vm1547_vm3, %v11439_v35, 2102212464  ;;  %v1587_v54 = vmul.u32 %v1585_v6, %v1561_v1 }
 0x241   : > { %v1777_v29 = vsub.s32 32, %v1776_v5  ;;  %v1778_v34 = vshll.u32 %v1769_v51, %v1776_v5  ;;  %v1781_v59 = vsub.s32 4294967266, %v1776_v5  ;;  %v5642_v4 = vpack.c.bf16 %v5530_v50, %v5530_v50  ;;  %v11518_v5 = vpop.f32.mrf.mxu1 }
 0x242   : > { %v1571_v51 = vshll.u32 %v11499_v9, 16  ;;  %vm1573_vm13 = vc.u32 %v1565_v0, %v1569_v11  ;;  %v1575_v38 = vadd.s32 %v1569_v11, %v1565_v0  ;;  %v1588_v13 = vmul.u32 %v1586_v33, %v1561_v1 }
 0x243   : > { %v1779_v41 = vshrl.u32 %v1761_v52, %v1777_v29  ;;  %v1782_v26 = vadd.s32 127, %v1781_v59  ;;  %v5761_v44 = vsel %vm5729_vm6, %v5642_v4, 0  ;;  %v11516_v52 = vpop.f32.mrf.mxu0  ;;  %v1574_v59 = vsel %vm1573_vm13, 1, %v14602_v32 }
 0x244   : > { %6269 = vmatpush.bf16.msra.mxu2 %v5761_v44  ;;  %vm1577_vm14 = vc.u32 %v1575_v38, %v1571_v51  ;;  %v1591_v7 = vshll.u32 %v1588_v13, 16  ;;  %v1593_v35 = vshll.u32 %v1589_v45, 16  ;;  %v1792_v43 = vsel %vm1669_vm11, %v1791_v56, %v11422_v18 }
 0x245   : > { %v1780_v50 = vor.u32 %v1779_v41, %v1778_v34  ;;  %v1783_v29 = vshll.u32 %v1782_v26, 23  ;;  %v1570_v41 = vshrl.u32 %v1566_v15, 16  ;;  %v1576_v26 = vadd.s32 %v1574_v59, %v1568_v53  ;;  %v5939_v59 = vpop.f32.mrf.mxu3 }
 0x246   : > { %v1590_v34 = vmul.u32 %v1586_v33, %v1562_v57  ;;  %v1578_v23 = vsel %vm1577_vm14, 1, %v14602_v32  ;;  %v2135_v0 = vand.u32 2139095040, %v11522_v12  ;;  %v1550_v1 = vsel %vm1546_vm8, %v11436_v47, %v1549_v36 }
 0x247   : > { %v1784_v22 = vor.u32 4788187, %v1783_v29  ;;  %v1787_v4 = vcvt.s32.f32 %v1780_v50  ;;  %v1580_v6 = vadd.s32 %v1578_v23, %v1576_v26  ;;  %vm1595_vm15 = vc.u32 %v1587_v54, %v1591_v7  ;;  %v9324_v26 = vld [vmem:[%s14434_s1 + $0x28] sm:$0xff] }
 0x248   : > { %v1597_v53 = vadd.s32 %v1591_v7, %v1587_v54  ;;  %v1572_v57 = vshrl.u32 %v11499_v9, 16  ;;  %v2136_v11 = vshrl.u32 %v2135_v0, 23  ;;  %v1592_v51 = vshrl.u32 %v1588_v13, 16  ;;  %v5890_v9 = vpop.f32.mrf.mxu2 }
 0x249   : > { %v1785_v44 = vand.u32 2147483647, %v1784_v22  ;;  %v1596_v22 = vsel %vm1595_vm15, 1, %v14602_v32  ;;  %v1581_v33 = vadd.s32 %v1580_v6, %v1570_v41  ;;  %v1794_v50 = vsel %vm11505_vm12, 0, %v1792_v43 }
 0x24a   : > { %v1598_v18 = vadd.s32 %v1596_v22, %v1590_v34  ;;  %vm1599_vm0 = vc.u32 %v1597_v53, %v1593_v35  ;;  %v8942_v47 = vadd.s32 4294967169, %v2136_v11  ;;  %v1551_v23 = vsel %vm1545_vm4, %v1548_v31, %v1550_v1 }
 0x24b   : > { %v1788_v15 = vmul.f32 %v1787_v4, %v1785_v44  ;;  %v1600_v29 = vsel %vm1599_vm0, 1, %v14602_v32  ;;  %v1594_v7 = vshrl.u32 %v1589_v45, 16  ;;  %v11541_v54 = vadd.s32 %v1581_v33, %v1572_v57  ;;  %v5794_v31 = vpop.f32.mrf.mxu0  ;;  %v5843_v45 = vpop.f32.mrf.mxu1  ;;  %9071 = vmatmul.msk.bf16.gmra.mxu0 %vm5704_vm9, %v9324_v26  ;;  %9079 = vmatmul.msk.bf16.gmra.mxu1 %vm5704_vm9, %v9324_v26 }
 0x24c   : > { %v1602_v36 = vadd.s32 %v1600_v29, %v1598_v18  ;;  %v11543_v13 = vadd.s32 %v1597_v53, %v1593_v35  ;;  %v2142_v4 = vadd.s32 1, %v8942_v47  ;;  %v1811_v41 = vadd.s32 3, %v1794_v50 }
 0x24d   : > { %v1789_v56 = vxor.u32 2147483648, %v1788_v15  ;;  %v1605_v55 = vmul.u32 %v11446_v3, %v1551_v23  ;;  %v14495_v44 = vand.u32 2147483647, %v11522_v12  ;;  %v6595_v57 = vmax.f32 %v11518_v5, 0.0  ;;  %v5941_v47 = vpop.f32.mrf.mxu3  ;;  %9095 = vmatmul.msk.bf16.gmra.mxu3 %vm5704_vm9, %v9324_v26 }
 0x24e   : > { %v1603_v49 = vadd.s32 %v1602_v36, %v1592_v51  ;;  %vm2143_vm1 = vcmp.gt.s32.totalorder %v2142_v4, 0  ;;  %vm1607_vm2 = vc.u32 %v11541_v54, %v11543_v13  ;;  %v11561_v53 = vand.u32 3, %v1811_v41 }
 0x24f   : > { %v1790_v38 = vsel %vm1669_vm11, %v1789_v56, %v1788_v15  ;;  %v2144_v6 = vsel %vm2143_vm1, %v2142_v4, 0  ;;  %v6594_v15 = vmax.f32 %v11516_v52, 0.0  ;;  %v11565_v51 = vand.u32 3, %v1794_v50 }
 0x250   : > { %v11548_v43 = vsel %vm11505_vm12, %v11104_v8, %v1790_v38  ;;  %v1604_v35 = vadd.s32 %v1603_v49, %v1594_v7  ;;  %v6611_v3 = vmax.f32 %v5843_v45, 0.0  ;;  %v6597_v56 = vmax.f32 %v5939_v59, 0.0  ;;  %v5892_v29 = vpop.f32.mrf.mxu2  ;;  %9087 = vmatmul.msk.bf16.gmra.mxu2 %vm5704_vm9, %v9324_v26 }
 0x251   : > { %v1795_v34 = vmul.f32 %v11548_v43, %v11548_v43  ;;  %v2139_v23 = vand.u32 8388607, %v14495_v44  ;;  %v11571_v52 = vand.u32 31, %v2144_v6  ;;  %v6610_v38 = vmax.f32 %v5794_v31, 0.0 }
 0x252   : > { %v1608_v22 = vadd.s32 1, %v1604_v35  ;;  %v6596_v50 = vmax.f32 %v5890_v9, 0.0  ;;  %v11573_v4 = vpack.c.bf16 %v6611_v3, %v6595_v57  ;;  %v6612_v41 = vmax.f32 %v5892_v29, 0.0 }
 0x253   : > { %v1796_v0 = vmul.f32 -0.001358992, %v1795_v34  ;;  %v1803_v1 = vmul.f32 -0.00019511016, %v1795_v34  ;;  %v6613_v59 = vmax.f32 %v5941_v47, 0.0  ;;  %v11575_v49 = vpop.f32.mrf.mxu0  ;;  %v11577_v45 = vpop.f32.mrf.mxu1  ;;  %vm1813_vm5 = vcmp.lt.s32.totalorder %v11561_v53, 2 }
 0x254   : > { %v1609_v18 = vsel %vm1607_vm2, %v1608_v22, %v1604_v35  ;;  %14645 = vst [vmem:[#allocation14_spill] sm:$0xff] %v11573_v4  ;;  %vm1810_vm3 = vweird.f32 %v11104_v8  ;;  %vm1814_vm4 = vcmp.eq.s32.totalorder %v11561_v53, 0  ;;  %v11584_v9 = vpack.c.bf16 %v6612_v41, %v6596_v50 }
 0x255   : > { %v1797_v11 = vadd.f32 0.041655596, %v1796_v0  ;;  %v1804_v33 = vadd.f32 0.008332121, %v1803_v1  ;;  %v1610_v36 = vadd.s32 %v1609_v18, %v1605_v55  ;;  %v11580_v1 = vpack.c.bf16 %v6610_v38, %v6594_v15  ;;  %v11600_v29 = vpop.f32.mrf.mxu3 }
 0x256   : > { %14647 = vst [vmem:[#allocation16_spill] sm:$0xff] %v11584_v9  ;;  %v11586_v31 = vpack.c.bf16 %v6613_v59, %v6597_v56  ;;  %v11589_v55 = vsub.s32 32, %v11571_v52  ;;  %vm1817_vm8 = vcmp.eq.s32.totalorder %v11561_v53, 2  ;;  %vm4283_vm7 = vcmp.lt.s32.totalorder %v11565_v51, 2 }
 0x257   : > { %v1798_v5 = vmul.f32 %v1797_v11, %v1795_v34  ;;  %v1805_v7 = vmul.f32 %v1804_v33, %v1795_v34  ;;  %v1611_v0 = vadd.s32 536870912, %v1610_v36  ;;  %14646 = vst [vmem:[#allocation15_spill] sm:$0xff] %v11580_v1  ;;  %vm4284_vm10 = vcmp.eq.s32.totalorder %v11565_v51, 0 }
 0x258   : > { %14648 = vst [vmem:[#allocation17_spill] sm:$0xff] %v11586_v31  ;;  %vm4287_vm11 = vcmp.eq.s32.totalorder %v11565_v51, 2  ;;  %v2140_v15 = vor.u32 8388608, %v2139_v23  ;;  %vm1514_vm12 = vcmp.lt.s32.totalorder %v11121_v58, 0  ;;  %v11598_v18 = vadd.s32 %v11543_v13, %v11541_v54 }
 0x259   : > { %v1799_v35 = vadd.f32 -0.4999988, %v1798_v5  ;;  %v1806_v26 = vadd.f32 -0.16666654, %v1805_v7  ;;  %v1612_v11 = vshrl.u32 %v1611_v0, 30  ;;  %v2149_v47 = vshll.u32 %v14585_v30, %v11571_v52 }
 0x25a   : > { %v2150_v5 = vshrl.u32 %v14619_v62, %v11589_v55  ;;  %v2152_v23 = vshll.u32 %v14619_v62, %v11571_v52  ;;  %v2153_v7 = vshrl.u32 %v14587_v24, %v11589_v55  ;;  %v11613_v50 = vshrl.u32 %v2144_v6, 5 }
 0x25b   : > { %v1800_v57 = vmul.f32 %v1799_v35, %v1795_v34  ;;  %v1807_v22 = vmul.f32 %v1806_v26, %v1795_v34  ;;  %v1613_v56 = vshll.u32 %v1612_v11, 30  ;;  %v5895_v34 = vpop.f32.mrf.mxu2  ;;  %v5799_v41 = vpop.f32.mrf.mxu0  ;;  %v9325_v35 = vld [vmem:[%s14434_s1 + $0x30] sm:$0xff]  ;;  %v11621_v26 = vshrl.u32 %v14585_v30, %v11589_v55 }
 0x25c   : > { %v5848_v59 = vpop.f32.mrf.mxu1  ;;  %9072 = vmatmul.msk.bf16.gmra.mxu0 %vm5704_vm9, %v9325_v35  ;;  %v11627_v6 = vshll.u32 %v2140_v15, 8  ;;  %9080 = vmatmul.msk.bf16.gmra.mxu1 %vm5704_vm9, %v9325_v35  ;;  %v1636_v44 = vsub.s32 4, %v1612_v11  ;;  %v11642_v31 = vor.u32 %v2150_v5, %v2149_v47  ;;  %v11644_v9 = vor.u32 %v2153_v7, %v2152_v23 }
 0x25d   : > { %v1801_v33 = vadd.f32 1.0, %v1800_v57  ;;  %v1808_v3 = vadd.f32 1.0, %v1807_v22  ;;  %v11611_v13 = vsub.s32 %v1610_v36, %v1613_v56  ;;  %v2156_v36 = vshrl.u32 %v14588_v28, %v11589_v55 }
 0x25e   : > { %v2159_v4 = vshrl.u32 %v14589_v46, %v11589_v55  ;;  %v6627_v12 = vmax.f32 %v11577_v45, 0.0  ;;  %v1637_v51 = vsel %vm1514_vm12, %v1636_v44, %v1612_v11  ;;  %vm2164_vm15 = vcmp.lt.s32.totalorder %v11613_v50, 1 }
 0x25f   : > { %v1809_v38 = vmul.f32 %v1808_v3, %v11548_v43  ;;  %v1818_v54 = vxor.u32 2147483648, %v1801_v33  ;;  %v2155_v43 = vshll.u32 %v14587_v24, %v11571_v52  ;;  %v14649_v3 = vand.u32 2147483647, %v11121_v58 }
 0x260   : > { %vm1615_vm14 = vcmp.lt.s32.totalorder %v11611_v13, 0  ;;  %v1616_v15 = vsub.s32 0, %v11611_v13  ;;  %v6642_v45 = vmax.f32 %v5799_v41, 0.0  ;;  %v2162_v41 = vshrl.u32 %v14590_v2, %v11589_v55 }
 0x261   : > { %v1815_v0 = vxor.u32 2147483648, %v1809_v38  ;;  %v1819_v57 = vsel %vm1817_vm8, %v1818_v54, %v1809_v38  ;;  %v4289_v22 = vsel %vm4287_vm11, %v1818_v54, %v1809_v38  ;;  %vm11635_vm13 = vcmp.le.f32.partialorder %v14649_v3, 0.7853982 }
 0x262   : > { %v2158_v3 = vshll.u32 %v14588_v28, %v11571_v52  ;;  %v1617_v5 = vsel %vm1615_vm14, %v1616_v15, %v11611_v13  ;;  %v11659_v23 = vor.u32 %v2156_v36, %v2155_v43  ;;  %v6643_v43 = vmax.f32 %v5848_v59, 0.0 }
 0x263   : > { %v1816_v38 = vsel %vm1814_vm4, %v1801_v33, %v1815_v0  ;;  %v4286_v54 = vsel %vm4284_vm10, %v1801_v33, %v1815_v0  ;;  %v1618_v0 = vclz %v1617_v5  ;;  %v5897_v36 = vpop.f32.mrf.mxu2  ;;  %9088 = vmatmul.msk.bf16.gmra.mxu2 %vm5704_vm9, %v9325_v35  ;;  %vm2165_vm1 = vcmp.lt.s32.totalorder %v11613_v50, 2 }
 0x264   : > { %v1820_v1 = vsel %vm1813_vm5, %v1816_v38, %v1819_v57  ;;  %v4290_v47 = vsel %vm4283_vm7, %v4286_v54, %v4289_v22  ;;  %v6628_v57 = vmax.f32 %v5895_v34, 0.0  ;;  %v5946_v22 = vpop.f32.mrf.mxu3  ;;  %9096 = vmatmul.msk.bf16.gmra.mxu3 %vm5704_vm9, %v9325_v35  ;;  %v6644_v15 = vmax.f32 %v5897_v36, 0.0  ;;  %v11686_v34 = vpop.f32.mrf.mxu0 }
 0x265   : > { %v11663_v7 = vsel %vm1810_vm3, nan, %v1820_v1  ;;  %v11667_v33 = vsel %vm1810_vm3, nan, %v4290_v47  ;;  %v8931_v8 = vadd.s32 4294967294, %v1618_v0  ;;  %v6626_v1 = vmax.f32 %v11575_v49, 0.0  ;;  %v11688_v59 = vpop.f32.mrf.mxu1 }
 0x266   : > { %14652 = vst [vmem:[#allocation18_spill] sm:$0xff] %v11663_v7  ;;  %v5225_v53 = vadd.f32 %v11663_v7, %v11663_v7  ;;  %v11684_v11 = vpack.c.bf16 %v6643_v43, %v6627_v12  ;;  %v2161_v35 = vshll.u32 %v14589_v46, %v11571_v52  ;;  %v11694_v49 = vpack.c.bf16 %v6644_v15, %v6628_v57 }
 0x267   : > { %vm8932_vm0 = vcmp.lt.s32.totalorder %v8931_v8, 0  ;;  %v11692_v54 = vpack.c.bf16 %v6642_v45, %v6626_v1  ;;  %v11703_v0 = vsel %vm11635_vm13, 0, %v1637_v51  ;;  %v6645_v43 = vmax.f32 %v5946_v22, 0.0 }
 0x268   : > { %v11679_v38 = vmul.f32 %v5225_v53, %v11667_v33  ;;  %v11682_v44 = vmul.f32 %v5225_v53, %v11663_v7  ;;  %14653 = vst [vmem:[#allocation19_spill] sm:$0xff] %v11684_v11  ;;  %v1621_v5 = vsel %vm8932_vm0, 0, %v8931_v8  ;;  %v6629_v8 = vmax.f32 %v11600_v29, 0.0 }
 0x269   : > { %14654 = vst [vmem:[#allocation20_spill] sm:$0xff] %v11692_v54  ;;  %v1622_v52 = vsub.s32 32, %v1621_v5  ;;  %v1623_v53 = vshll.u32 %v11611_v13, %v1621_v5  ;;  %v1626_v57 = vsub.s32 4294967266, %v1621_v5  ;;  %vm2167_vm2 = vcmp.lt.s32.totalorder %v11613_v50, 4 }
 0x26a   : > { %14655 = vst [vmem:[#allocation21_spill] sm:$0xff] %v11694_v49  ;;  %v14498_v47 = vsub.f32 1.0, %v11682_v44  ;;  %v5289_v12 = vadd.f32 %v11679_v38, %v11679_v38  ;;  %v1656_v45 = vadd.s32 3, %v11703_v0  ;;  %v2169_v13 = vsel %vm2167_vm2, %v11659_v23, 2102212464 }
 0x26b   : > { %v1624_v51 = vshrl.u32 %v11598_v18, %v1622_v52  ;;  %v1627_v1 = vadd.s32 127, %v1626_v57  ;;  %v5900_v5 = vpop.f32.mrf.mxu2  ;;  %v2163_v18 = vor.u32 %v2162_v41, %v2161_v35  ;;  %vm2166_vm5 = vcmp.lt.s32.totalorder %v11613_v50, 3 }
 0x26c   : > { %v11709_v55 = vmul.f32 %v5289_v12, %v14498_v47  ;;  %v11712_v36 = vmul.f32 %v5289_v12, %v11679_v38  ;;  %v11724_v12 = vpack.c.bf16 %v6645_v43, %v6629_v8  ;;  %v5949_v29 = vpop.f32.mrf.mxu3  ;;  %v2160_v47 = vor.u32 %v2159_v4, %v2158_v3  ;;  %v5804_v54 = vpop.f32.mrf.mxu0  ;;  %v9326_v3 = vld [vmem:[%s14434_s1 + $0x38] sm:$0xff] }
 0x26d   : > { %v1625_v49 = vor.u32 %v1624_v51, %v1623_v53  ;;  %v1628_v11 = vshll.u32 %v1627_v1, 23  ;;  %v5853_v2 = vpop.f32.mrf.mxu1  ;;  %v11738_v43 = vsel %vm2164_vm15, %v11621_v26, %v11642_v31  ;;  %v11743_v4 = vsel %vm2166_vm5, %v11644_v9, %v2169_v13  ;;  %9073 = vmatmul.msk.bf16.gmra.mxu0 %vm5704_vm9, %v9326_v3  ;;  %9081 = vmatmul.msk.bf16.gmra.mxu1 %vm5704_vm9, %v9326_v3 }
 0x26e   : > { %14656 = vst [vmem:[#allocation22_spill] sm:$0xff] %v11709_v55  ;;  %v14500_v22 = vsub.f32 1.0, %v11712_v36  ;;  %v5353_v15 = vadd.f32 %v11709_v55, %v11709_v55  ;;  %v11749_v53 = vand.u32 3, %v1656_v45  ;;  %v2172_v26 = vsel %vm2164_vm15, %v11642_v31, %v11644_v9 }
 0x26f   : > { %14657 = vst [vmem:[#allocation23_spill] sm:$0xff] %v11724_v12  ;;  %v1629_v35 = vor.u32 4788187, %v1628_v11  ;;  %v1632_v41 = vcvt.s32.f32 %v1625_v49  ;;  %v6661_v1 = vmax.f32 %v5949_v29, 0.0  ;;  %v2173_v11 = vsel %vm2167_vm2, %v2160_v47, 920167782 }
 0x270   : > { %v11729_v52 = vmul.f32 %v5353_v15, %v14500_v22  ;;  %v11732_v57 = vmul.f32 %v5353_v15, %v11709_v55  ;;  %v6660_v45 = vmax.f32 %v5900_v5, 0.0  ;;  %v2176_v13 = vsel %vm2164_vm15, %v11644_v9, %v11659_v23 }
 0x271   : > { %v1630_v49 = vand.u32 2147483647, %v1629_v35  ;;  %v2177_v31 = vsel %vm2167_vm2, %v2163_v18, 1326507024  ;;  %v2174_v29 = vsel %vm2166_vm5, %v11659_v23, %v2173_v11  ;;  %v2181_v35 = vand.u32 65535, %v11627_v6 }
 0x272   : > { %v14501_v8 = vsub.f32 1.0, %v11732_v57  ;;  %v11759_v51 = vadd.f32 %v11729_v52, %v11729_v52  ;;  %v2178_v5 = vsel %vm2166_vm5, %v2160_v47, %v2177_v31  ;;  %v6659_v9 = vmax.f32 %v11688_v59, 0.0 }
 0x273   : > { %v1633_v22 = vmul.f32 %v1632_v41, %v1630_v49  ;;  %v6675_v12 = vmax.f32 %v5853_v2, 0.0  ;;  %v2179_v18 = vsel %vm2165_vm1, %v2176_v13, %v2178_v5  ;;  %v5902_v46 = vpop.f32.mrf.mxu2  ;;  %v11788_v23 = vshrl.u32 %v11627_v6, 16  ;;  %9089 = vmatmul.msk.bf16.gmra.mxu2 %vm5704_vm9, %v9326_v3 }
 0x274   : > { %v11772_v15 = vmul.f32 %v11759_v51, %v14501_v8  ;;  %v5951_v28 = vpop.f32.mrf.mxu3  ;;  %v2183_v11 = vand.u32 65535, %v2179_v18  ;;  %v2184_v47 = vshrl.u32 %v2179_v18, 16  ;;  %9097 = vmatmul.msk.bf16.gmra.mxu3 %vm5704_vm9, %v9326_v3  ;;  %v6658_v59 = vmax.f32 %v11686_v34, 0.0  ;;  %v11797_v24 = vpop.f32.mrf.mxu0 }
 0x275   : > { %v1634_v2 = vxor.u32 2147483648, %v1633_v22  ;;  %v6674_v41 = vmax.f32 %v5804_v54, 0.0  ;;  %v11793_v49 = vpack.c.bf16 %v6675_v12, %v6659_v9  ;;  %v6676_v31 = vmax.f32 %v5902_v46, 0.0  ;;  %v11799_v62 = vpop.f32.mrf.mxu1  ;;  %v11811_v12 = vld [vmem:[%s9422_s27 + $0x40] sm:$0xff] }
 0x276   : > { %v11785_v8 = vadd.f32 %v11772_v15, %v11772_v15  ;;  %v6677_v5 = vmax.f32 %v5951_v28, 0.0  ;;  %v2185_v18 = vmul.u32 %v2183_v11, %v2181_v35  ;;  %v11805_v7 = vmul.u32 %v2184_v47, %v2181_v35 }
 0x277   : > { %14658 = vst [vmem:[#allocation24_spill] sm:$0xff] %v11793_v49  ;;  %v1635_v3 = vsel %vm1514_vm12, %v1634_v2, %v1633_v22  ;;  %v11803_v30 = vpack.c.bf16 %v6674_v41, %v6658_v59  ;;  %v11808_v34 = vmul.u32 %v2183_v11, %v11788_v23  ;;  %v11818_v46 = vpack.c.bf16 %v6676_v31, %v6660_v45 }
 0x278   : > { %v5513_v13 = vmul.f32 %v11785_v8, %v11772_v15  ;;  %v11816_v28 = vsel %vm11635_vm13, %v11811_v12, %v1635_v3  ;;  %v11820_v9 = vpack.c.bf16 %v6677_v5, %v6661_v1  ;;  %v2175_v22 = vsel %vm2165_vm1, %v2172_v26, %v2174_v29 }
 0x279   : > { %14659 = vst [vmem:[#allocation25_spill] sm:$0xff] %v11803_v30  ;;  %v1640_v58 = vmul.f32 %v11816_v28, %v11816_v28  ;;  %v2188_v11 = vmul.u32 %v2184_v47, %v11788_v23  ;;  %v2189_v2 = vshll.u32 %v11805_v7, 16  ;;  %v11829_v41 = vand.u32 3, %v11703_v0 }
 0x27a   : > { %v5529_v54 = vsub.f32 1.0, %v5513_v13  ;;  %14660 = vst [vmem:[#allocation26_spill] sm:$0xff] %v11818_v46  ;;  %v2191_v56 = vshll.u32 %v11808_v34, 16  ;;  %v2205_v45 = vand.u32 65535, %v2175_v22  ;;  %v2206_v47 = vshrl.u32 %v2175_v22, 16 }
 0x27b   : > { %14661 = vst [vmem:[#allocation27_spill] sm:$0xff] %v11820_v9  ;;  %v1641_v13 = vmul.f32 -0.001358992, %v1640_v58  ;;  %v1648_v1 = vmul.f32 -0.00019511016, %v1640_v58  ;;  %vm2193_vm3 = vc.u32 %v2185_v18, %v2189_v2  ;;  %v2195_v31 = vadd.s32 %v2189_v2, %v2185_v18  ;;  %v11833_v3 = vpop.f32.mrf.mxu2 }
 0x27c   : > { %v5641_v59 = vpack.c.bf16 %v5529_v54, %v5529_v54  ;;  %v11835_v26 = vpop.f32.mrf.mxu3  ;;  %v2194_v29 = vsel %vm2193_vm3, 1, %v14602_v32  ;;  %v11842_v9 = vsel %vm2165_vm1, %v11738_v43, %v11743_v4  ;;  %vm1662_vm4 = vcmp.eq.s32.totalorder %v11749_v53, 2 }
 0x27d   : > { %v1642_v54 = vadd.f32 0.041655596, %v1641_v13  ;;  %v1649_v0 = vadd.f32 0.008332121, %v1648_v1  ;;  %v2196_v46 = vadd.s32 %v2194_v29, %v2188_v11  ;;  %vm2197_vm8 = vc.u32 %v2195_v31, %v2191_v56  ;;  %v5809_v13 = vpop.f32.mrf.mxu0  ;;  %v5858_v1 = vpop.f32.mrf.mxu1 }
 0x27e   : > { %v5758_v5 = vsel %vm5729_vm6, %v5641_v59, 0  ;;  %v2207_v18 = vmul.u32 %v2205_v45, %v2181_v35  ;;  %v11845_v2 = vmul.u32 %v2206_v47, %v2181_v35  ;;  %v11848_v59 = vmul.u32 %v2205_v45, %v11788_v23 }
 0x27f   : > { %6220 = vmatpush.bf16.msra.mxu1 %v5758_v5  ;;  %v1643_v22 = vmul.f32 %v1642_v54, %v1640_v58  ;;  %v1650_v5 = vmul.f32 %v1649_v0, %v1640_v58  ;;  %vm4133_vm7 = vcmp.eq.s32.totalorder %v11829_v41, 2  ;;  %v2198_v50 = vsel %vm2197_vm8, 1, %v14602_v32 }
 0x280   : > { %vm1659_vm10 = vcmp.eq.s32.totalorder %v11749_v53, 0  ;;  %vm4130_vm11 = vcmp.eq.s32.totalorder %v11829_v41, 0  ;;  %v2190_v43 = vshrl.u32 %v11805_v7, 16  ;;  %v2200_v4 = vadd.s32 %v2198_v50, %v2196_v46 }
 0x281   : > { %v2211_v35 = vshll.u32 %v11845_v2, 16  ;;  %v1644_v56 = vadd.f32 -0.4999988, %v1643_v22  ;;  %v1651_v45 = vadd.f32 -0.16666654, %v1650_v5  ;;  %vm1658_vm12 = vcmp.lt.s32.totalorder %v11749_v53, 2 }
 0x282   : > { %vm4129_vm13 = vcmp.lt.s32.totalorder %v11829_v41, 2  ;;  %v6693_v31 = vmax.f32 %v11835_v26, 0.0  ;;  %v2192_v29 = vshrl.u32 %v11808_v34, 16  ;;  %vm1655_vm14 = vweird.f32 %v11811_v12 }
 0x283   : > { %v6692_v54 = vmax.f32 %v11833_v3, 0.0  ;;  %v2210_v7 = vmul.u32 %v2206_v47, %v11788_v23  ;;  %vm2215_vm15 = vc.u32 %v2207_v18, %v2211_v35  ;;  %v2217_v46 = vadd.s32 %v2211_v35, %v2207_v18  ;;  %v5907_v11 = vpop.f32.mrf.mxu2 }
 0x284   : > { %v1645_v0 = vmul.f32 %v1644_v56, %v1640_v58  ;;  %v1652_v50 = vmul.f32 %v1651_v45, %v1640_v58  ;;  %v6691_v22 = vmax.f32 %v11799_v62, 0.0  ;;  %v6707_v5 = vmax.f32 %v5858_v1, 0.0  ;;  %v5956_v49 = vpop.f32.mrf.mxu3 }
 0x285   : > { %v2201_v30 = vadd.s32 %v2200_v4, %v2190_v43  ;;  %v2216_v34 = vsel %vm2215_vm15, 1, %v14602_v32  ;;  %v14662_v55 = vshll.u32 %v11848_v59, 16  ;;  %v5451_v58 = vmul.f32 %v11345_v16, %v11336_v39 }
 0x286   : > { %v1646_v23 = vadd.f32 1.0, %v1645_v0  ;;  %v1653_v47 = vadd.f32 1.0, %v1652_v50  ;;  %v5450_v62 = vmul.f32 %v11466_v60, %v11450_v19  ;;  %v5449_v18 = vmul.f32 %v11759_v51, %v11729_v52 }
 0x287   : > { %vm11869_vm0 = vc.u32 %v2217_v46, %v14662_v55  ;;  %v6690_v1 = vmax.f32 %v11797_v24, 0.0  ;;  %v6706_v43 = vmax.f32 %v5809_v13, 0.0  ;;  %v11880_v4 = vpack.c.bf16 %v6707_v5, %v6691_v22  ;;  %v11893_v5 = vpop.f32.mrf.mxu1 }
 0x288   : > { %v1654_v55 = vmul.f32 %v1653_v47, %v11816_v28  ;;  %v1663_v35 = vxor.u32 2147483648, %v1646_v23  ;;  %v5467_v56 = vsub.f32 1.0, %v5451_v58  ;;  %v5466_v45 = vsub.f32 1.0, %v5450_v62  ;;  %v11891_v28 = vpop.f32.mrf.mxu0 }
 0x289   : > { %14665 = vst [vmem:[#allocation28_spill] sm:$0xff] %v11880_v4  ;;  %v5465_v0 = vsub.f32 1.0, %v5449_v18  ;;  %v11883_v50 = vpack.c.bf16 %v6706_v43, %v6690_v1  ;;  %v6708_v16 = vmax.f32 %v5907_v11, 0.0  ;;  %v6709_v26 = vmax.f32 %v5956_v49, 0.0 }
 0x28a   : > { %v1660_v60 = vxor.u32 2147483648, %v1654_v55  ;;  %v1664_v51 = vsel %vm1662_vm4, %v1663_v35, %v1654_v55  ;;  %v4135_v24 = vsel %vm4133_vm7, %v1663_v35, %v1654_v55  ;;  %v14667_v13 = vsub.f32 1.0, %v11339_v42 }
 0x28b   : > { %14666 = vst [vmem:[#allocation29_spill] sm:$0xff] %v11883_v50  ;;  %v14668_v47 = vsub.f32 1.0, %v11453_v48  ;;  %v14669_v49 = vsub.f32 1.0, %v11732_v57  ;;  %v11899_v62 = vpack.c.bf16 %v6708_v16, %v6692_v54  ;;  %v11901_v18 = vpack.c.bf16 %v6709_v26, %v6693_v31  ;;  %v11916_v16 = vld [vmem:[%s9422_s27 + $0x68] sm:$0xff] }
 0x28c   : > { %v5627_v22 = vpack.c.bf16 %v5467_v56, %v14667_v13  ;;  %v1661_v1 = vsel %vm1659_vm10, %v1646_v23, %v1660_v60  ;;  %v4132_v42 = vsel %vm4130_vm11, %v1646_v23, %v1660_v60  ;;  %v14672_v43 = vsub.f32 1.0, %v11292_v27  ;;  %v5910_v60 = vpop.f32.mrf.mxu2 }
 0x28d   : > { %v5626_v58 = vpack.c.bf16 %v5466_v45, %v14668_v47  ;;  %v5625_v11 = vpack.c.bf16 %v5465_v0, %v14669_v49  ;;  %14670 = vst [vmem:[#allocation30_spill] sm:$0xff] %v11899_v62  ;;  %v14673_v55 = vsub.f32 1.0, %v11320_v10  ;;  %v14674_v35 = vsub.f32 1.0, %v11407_v20  ;;  %v5959_v20 = vpop.f32.mrf.mxu3 }
 0x28e   : > { %14671 = vst [vmem:[#allocation31_spill] sm:$0xff] %v11901_v18  ;;  %6319 = vmatpush.bf16.msra.mxu3 %v5627_v22  ;;  %v14675_v57 = vsub.f32 1.0, %v11434_v14  ;;  %v1665_v31 = vsel %vm1658_vm12, %v1661_v1, %v1664_v51  ;;  %v4136_v26 = vsel %vm4129_vm13, %v4132_v42, %v4135_v24  ;;  %v14676_v27 = vsub.f32 1.0, %v11682_v44 }
 0x28f   : > { %v5611_v48 = vpack.c.bf16 %v14673_v55, %v14672_v43  ;;  %6270 = vmatpush.bf16.msra.mxu2 %v5626_v58  ;;  %6221 = vmatpush.bf16.msra.mxu1 %v5625_v11  ;;  %v14677_v10 = vsub.f32 1.0, %v11712_v36  ;;  %v2214_v14 = vshrl.u32 %v11848_v59, 16  ;;  %v11929_v13 = vsel %vm1655_vm14, nan, %v1665_v31  ;;  %v5863_v55 = vpop.f32.mrf.mxu1 }
 0x290   : > { %v5610_v54 = vpack.c.bf16 %v14675_v57, %v14674_v35  ;;  %v11933_v53 = vsel %vm1655_vm14, nan, %v4136_v26  ;;  %v2218_v41 = vadd.s32 %v2216_v34, %v2210_v7  ;;  %v2220_v44 = vsel %vm11869_vm0, 1, %v14602_v32  ;;  %v5814_v43 = vpop.f32.mrf.mxu0 }
 0x291   : > { %v5609_v23 = vpack.c.bf16 %v14677_v10, %v14676_v27  ;;  %v5224_v36 = vadd.f32 %v11929_v13, %v11929_v13  ;;  %v11940_v51 = vadd.s32 %v2201_v30, %v2192_v29  ;;  %v14678_v24 = vshll.u32 %v11848_v59, 16 }
 0x292   : > { %v2290_v47 = vand.u32 2139095040, %v11916_v16  ;;  %6320 = vmatpush.bf16.msra.mxu3 %v5611_v48  ;;  %v5499_v58 = vmul.f32 %v11362_v37, %v5467_v56  ;;  %v5498_v7 = vmul.f32 %v11489_v61, %v5466_v45  ;;  %v5497_v34 = vmul.f32 %v11785_v8, %v5465_v0 }
 0x293   : > { %v11944_v22 = vadd.s32 %v2217_v46, %v14678_v24  ;;  %v6725_v3 = vmax.f32 %v5959_v20, 0.0  ;;  %v11951_v49 = vmul.f32 %v5224_v36, %v11933_v53  ;;  %v11954_v30 = vmul.f32 %v5224_v36, %v11929_v13  ;;  %6271 = vmatpush.bf16.msra.mxu2 %v5610_v54  ;;  %6222 = vmatpush.bf16.msra.mxu1 %v5609_v23 }
 0x294   : > { %v2222_v59 = vadd.s32 %v2220_v44, %v2218_v41  ;;  %v2291_v29 = vshrl.u32 %v2290_v47, 23  ;;  %v5595_v46 = vpack.c.bf16 %v11276_v17, %v5499_v58  ;;  %v5594_v11 = vpack.c.bf16 %v11397_v63, %v5498_v7  ;;  %v14684_v41 = vld [vmem:[#allocation11_spill] sm:$0xff]  ;;  %v14685_v44 = vld [vmem:[#allocation12_spill] sm:$0xff] }
 0x295   : > { %v5593_v37 = vpack.c.bf16 %v11667_v33, %v5497_v34  ;;  %v6724_v61 = vmax.f32 %v5910_v60, 0.0  ;;  %v5272_v8 = vsub.f32 1.0, %v11954_v30  ;;  %v5288_v56 = vadd.f32 %v11951_v49, %v11951_v49  ;;  %v5961_v57 = vpop.f32.mrf.mxu3  ;;  %v14683_v60 = vld [vmem:[#allocation8_spill] sm:$0xff] }
 0x296   : > { %v14679_v45 = vshrl.u32 %v11845_v2, 16  ;;  %v8945_v1 = vadd.s32 4294967169, %v2291_v29  ;;  %6321 = vmatpush.bf16.msra.mxu3 %v5595_v46  ;;  %v5579_v42 = vpack.c.bf16 %v11352_v21, %v11336_v39  ;;  %v5578_v17 = vpack.c.bf16 %v11479_v40, %v11450_v19  ;;  %v5912_v21 = vpop.f32.mrf.mxu2  ;;  %v9328_v29 = vld [vmem:[%s9422_s27 + $0x48] sm:$0xff]  ;;  %v14687_v46 = vld [vmem:[#allocation18_spill] sm:$0xff] }
 0x297   : > { %v6722_v63 = vmax.f32 %v11891_v28, 0.0  ;;  %v6723_v33 = vmax.f32 %v11893_v5, 0.0  ;;  %v11972_v48 = vmul.f32 %v5288_v56, %v5272_v8  ;;  %v11975_v2 = vmul.f32 %v5288_v56, %v11951_v49  ;;  %6272 = vmatpush.bf16.msra.mxu2 %v5594_v11  ;;  %6223 = vmatpush.bf16.msra.mxu1 %v5593_v37  ;;  %v14688_v37 = vld [vmem:[#allocation10_spill] sm:$0xff] }
 0x298   : > { %v2223_v0 = vadd.s32 %v2222_v59, %v14679_v45  ;;  %v6738_v35 = vmax.f32 %v5814_v43, 0.0  ;;  %v6739_v39 = vmax.f32 %v5863_v55, 0.0  ;;  %v5577_v19 = vpack.c.bf16 %v11772_v15, %v11729_v52  ;;  %v9330_v45 = vld [vmem:[%s9422_s27 + $0x58] sm:$0xff] }
 0x299   : > { %v6740_v40 = vmax.f32 %v5912_v21, 0.0  ;;  %v6741_v28 = vmax.f32 %v5961_v57, 0.0  ;;  %v5336_v54 = vsub.f32 1.0, %v11975_v2  ;;  %v5352_v31 = vadd.f32 %v11972_v48, %v11972_v48  ;;  %v12087_v2 = vld [vmem:[%s9422_s27 + $0x70] sm:$0xff] }
 0x29a   : > { %v2224_v5 = vadd.s32 %v2223_v0, %v2214_v14  ;;  %v11982_v26 = vpack.c.bf16 %v6738_v35, %v6722_v63  ;;  %v11984_v27 = vpack.c.bf16 %v6739_v39, %v6723_v33  ;;  %6322 = vmatpush.bf16.msra.mxu3 %v5579_v42  ;;  %v5563_v52 = vpack.c.bf16 %v14683_v60, %v11289_v25  ;;  %v14686_v25 = vld [vmem:[#allocation22_spill] sm:$0xff]  ;;  %v14689_v0 = vld [vmem:[#allocation7_spill] sm:$0xff] }
 0x29b   : > { %v11986_v10 = vpack.c.bf16 %v6740_v40, %v6724_v61  ;;  %v11988_v23 = vpack.c.bf16 %v6741_v28, %v6725_v3  ;;  %v2225_v15 = vmul.u32 %v11627_v6, %v11842_v9  ;;  %v11996_v20 = vmul.f32 %v5352_v31, %v5336_v54  ;;  %6273 = vmatpush.bf16.msra.mxu2 %v5578_v17 }
 0x29c   : > { %14680 = vst [vmem:[#allocation32_spill] sm:$0xff] %v11984_v27  ;;  %v5384_v14 = vmul.f32 %v5352_v31, %v11972_v48  ;;  %6224 = vmatpush.bf16.msra.mxu1 %v5577_v19  ;;  %vm2227_vm1 = vc.u32 %v11940_v51, %v11944_v22  ;;  %v5562_v36 = vpack.c.bf16 %v14685_v44, %v14684_v41  ;;  %v2228_v6 = vadd.s32 1, %v2224_v5  ;;  %v12028_v19 = vld [vmem:[%s14434_s1] sm:$0xff] }
 0x29d   : > { %14681 = vst [vmem:[#allocation33_spill] sm:$0xff] %v11986_v10  ;;  %v5561_v24 = vpack.c.bf16 %v14686_v25, %v11679_v38  ;;  %v5416_v47 = vadd.f32 %v11996_v20, %v11996_v20  ;;  %v2297_v58 = vadd.s32 1, %v8945_v1  ;;  %v5545_v11 = vpack.c.bf16 %v14687_v46, %v9328_v29  ;;  %v9329_v38 = vld [vmem:[%s9422_s27 + $0x50] sm:$0xff] }
 0x29e   : > { %14682 = vst [vmem:[#allocation34_spill] sm:$0xff] %v11988_v23  ;;  %v5400_v9 = vsub.f32 1.0, %v5384_v14  ;;  %6323 = vmatpush.bf16.msra.mxu3 %v5563_v52  ;;  %v2229_v7 = vsel %vm2227_vm1, %v2228_v6, %v2224_v5  ;;  %v5546_v61 = vpack.c.bf16 %v14688_v37, %v9329_v38  ;;  %v5547_v1 = vpack.c.bf16 %v14689_v0, %v9330_v45 }
 0x29f   : > { %v5448_v3 = vmul.f32 %v5416_v47, %v11996_v20  ;;  %6274 = vmatpush.bf16.msra.mxu2 %v5562_v36  ;;  %v2230_v59 = vadd.s32 %v2229_v7, %v2225_v15  ;;  %vm2298_vm2 = vcmp.gt.s32.totalorder %v2297_v58, 0  ;;  %v2287_v17 = vand.u32 2147483647, %v11916_v16  ;;  %v14694_v7 = vld [vmem:[#allocation13_spill] sm:$0xff] }
 0x2a0   : > { %v12007_v34 = vmul.f32 %v5416_v47, %v5400_v9  ;;  %6225 = vmatpush.bf16.msra.mxu1 %v5561_v24  ;;  %v2299_v55 = vsel %vm2298_vm2, %v2297_v58, 0  ;;  %v2226_v5 = vadd.s32 %v11944_v22, %v11940_v51  ;;  %v14690_v52 = vmov 683565275  }
 0x2a1   : > { %v2231_v42 = vadd.s32 536870912, %v2230_v59  ;;  %v5464_v33 = vsub.f32 1.0, %v5448_v3  ;;  %v2301_v39 = vand.u32 31, %v2299_v55  ;;  %v2294_v57 = vand.u32 8388607, %v2287_v17 }
 0x2a2   : > { %v5480_v56 = vadd.f32 %v12007_v34, %v12007_v34  ;;  %6324 = vmatpush.bf16.msra.mxu3 %v5547_v1  ;;  %v14691_v14 = vmov 2475754826   ;;  %v14692_v44 = vmov 2131351028   ;;  %v12046_v24 = vshrl.u32 %v2299_v55, 5 }
 0x2a3   : > { %6275 = vmatpush.bf16.msra.mxu2 %v5546_v61  ;;  %v12020_v43 = vshrl.u32 %v2231_v42, 30  ;;  %v5624_v28 = vpack.c.bf16 %v5464_v33, %v5400_v9  ;;  %v12036_v31 = vsub.s32 32, %v2301_v39  ;;  %v2304_v15 = vshll.u32 %v14690_v52, %v2301_v39 }
 0x2a4   : > { %v5512_v63 = vmul.f32 %v5480_v56, %v12007_v34  ;;  %6226 = vmatpush.bf16.msra.mxu1 %v5545_v11  ;;  %v2307_v41 = vshll.u32 %v14691_v14, %v2301_v39  ;;  %v2310_v36 = vshll.u32 %v14692_v44, %v2301_v39  ;;  %v14693_v22 = vmov 2102212464  }
 0x2a5   : > { %v2233_v21 = vshll.u32 %v12020_v43, 30  ;;  %9122 = vmatmul.msk.bf16.vlgmr.msra.gmra.mxu3 %vm5704_vm9, %v12028_v19  ;;  %v2305_v51 = vshrl.u32 %v14691_v14, %v12036_v31  ;;  %v2313_v6 = vshll.u32 %v14693_v22, %v2301_v39  ;;  %v2308_v47 = vshrl.u32 %v14692_v44, %v12036_v31 }
 0x2a6   : > { %v5528_v35 = vsub.f32 1.0, %v5512_v63  ;;  %9114 = vmatmul.msk.bf16.vlgmr.msra.gmra.mxu2 %vm5704_vm9, %v12028_v19  ;;  %v2311_v58 = vshrl.u32 %v14693_v22, %v12036_v31  ;;  %vm2134_vm3 = vcmp.lt.s32.totalorder %v14694_v7, 0  ;;  %v2295_v3 = vor.u32 8388608, %v2294_v57 }
 0x2a7   : > { %9106 = vmatmul.msk.bf16.vlgmr.msra.gmra.mxu1 %vm5704_vm9, %v12028_v19  ;;  %v12040_v60 = vsub.s32 %v2230_v59, %v2233_v21  ;;  %v14695_v59 = vmov 920167782   ;;  %v14696_v11 = vmov 1326507024   ;;  %v12064_v61 = vor.u32 %v2305_v51, %v2304_v15 }
 0x2a8   : > { %v5640_v40 = vpack.c.bf16 %v5528_v35, %v5528_v35  ;;  %v2314_v29 = vshrl.u32 %v14695_v59, %v12036_v31  ;;  %v2316_v46 = vshll.u32 %v14695_v59, %v2301_v39  ;;  %v2317_v38 = vshrl.u32 %v14696_v11, %v12036_v31 }
 0x2a9   : > { %vm2235_vm5 = vcmp.lt.s32.totalorder %v12040_v60, 0  ;;  %v2236_v9 = vsub.s32 0, %v12040_v60  ;;  %v12066_v45 = vor.u32 %v2308_v47, %v2307_v41  ;;  %v2312_v0 = vor.u32 %v2311_v58, %v2310_v36 }
 0x2aa   : > { %v5755_v25 = vsel %vm5729_vm6, %v5640_v40, 0  ;;  %v2315_v42 = vor.u32 %v2314_v29, %v2313_v6  ;;  %v2318_v63 = vor.u32 %v2317_v38, %v2316_v46  ;;  %vm2319_vm4 = vcmp.lt.s32.totalorder %v12046_v24, 1 }
 0x2ab   : > { %6171 = vmatpush.bf16.msra.mxu0 %v5755_v25  ;;  %v2237_v37 = vsel %vm2235_vm5, %v2236_v9, %v12040_v60  ;;  %v5608_v55 = vpack.c.bf16 %v5336_v54, %v5272_v8  ;;  %v5496_v35 = vmul.f32 %v5480_v56, %v5464_v33  ;;  %v14697_v39 = vand.u32 2147483647, %v14694_v7 }
 0x2ac   : > { %v2238_v1 = vclz %v2237_v37  ;;  %vm2321_vm7 = vcmp.lt.s32.totalorder %v12046_v24, 3  ;;  %vm2322_vm10 = vcmp.lt.s32.totalorder %v12046_v24, 4  ;;  %v5560_v57 = vpack.c.bf16 %v11972_v48, %v11951_v49 }
 0x2ad   : > { %vm12075_vm8 = vcmp.le.f32.partialorder %v14697_v39, 0.7853982  ;;  %v2256_v30 = vsub.s32 4, %v12020_v43  ;;  %v2328_v8 = vsel %vm2322_vm10, %v2315_v42, 920167782  ;;  %vm2320_vm11 = vcmp.lt.s32.totalorder %v12046_v24, 2 }
 0x2ae   : > { %v8943_v40 = vadd.s32 4294967294, %v2238_v1  ;;  %v2331_v54 = vsel %vm2319_vm4, %v12066_v45, %v2312_v0  ;;  %v2332_v56 = vsel %vm2322_vm10, %v2318_v63, 1326507024  ;;  %v12095_v33 = vshll.u32 %v2295_v3, 8  ;;  %v12127_v39 = vld [vmem:[%s14434_s1 + $0x8] sm:$0xff] }
 0x2af   : > { %6172 = vmatpush.bf16.msra.mxu0 %v5624_v28  ;;  %v5544_v28 = vpack.c.bf16 %v11929_v13, %v11811_v12  ;;  %v2327_v15 = vsel %vm2319_vm4, %v12064_v61, %v12066_v45  ;;  %v2329_v41 = vsel %vm2321_vm7, %v2312_v0, %v2328_v8  ;;  %v5592_v36 = vpack.c.bf16 %v11933_v53, %v5496_v35 }
 0x2b0   : > { %vm8944_vm12 = vcmp.lt.s32.totalorder %v8943_v40, 0  ;;  %v2333_v51 = vsel %vm2321_vm7, %v2315_v42, %v2332_v56  ;;  %v2445_v6 = vand.u32 2139095040, %v12087_v2  ;;  %v2257_v29 = vsel %vm2134_vm3, %v2256_v30, %v12020_v43 }
 0x2b1   : > { %v2241_v25 = vsel %vm8944_vm12, 0, %v8943_v40  ;;  %v2334_v3 = vsel %vm2320_vm11, %v2331_v54, %v2333_v51  ;;  %v2330_v53 = vsel %vm2320_vm11, %v2327_v15, %v2329_v41  ;;  %v2336_v46 = vand.u32 65535, %v12095_v33 }
 0x2b2   : > { %v2242_v9 = vsub.s32 32, %v2241_v25  ;;  %v2243_v47 = vshll.u32 %v12040_v60, %v2241_v25  ;;  %v2246_v58 = vsub.s32 4294967266, %v2241_v25  ;;  %v14512_v38 = vand.u32 2147483647, %v12087_v2 }
 0x2b3   : > { %6173 = vmatpush.bf16.msra.mxu0 %v5608_v55  ;;  %v2337_v42 = vshrl.u32 %v12095_v33, 16  ;;  %v2338_v60 = vand.u32 65535, %v2334_v3  ;;  %v5576_v63 = vpack.c.bf16 %v12007_v34, %v11996_v20  ;;  %v2303_v55 = vshrl.u32 %v14690_v52, %v12036_v31 }
 0x2b4   : > { %v2244_v37 = vshrl.u32 %v2226_v5, %v2242_v9  ;;  %v2247_v1 = vadd.s32 127, %v2246_v58  ;;  %v2339_v43 = vshrl.u32 %v2334_v3, 16  ;;  %v2360_v35 = vand.u32 65535, %v2330_v53 }
 0x2b5   : > { %v12133_v30 = vsel %vm12075_vm8, 0, %v2257_v29  ;;  %v2446_v20 = vshrl.u32 %v2445_v6, 23  ;;  %9123 = vmatmul.msk.bf16.gmra.mxu3 %vm5704_vm9, %v12127_v39  ;;  %v2340_v34 = vmul.u32 %v2338_v60, %v2336_v46  ;;  %v2342_v8 = vmul.u32 %v2338_v60, %v2337_v42 }
 0x2b6   : > { %v2245_v5 = vor.u32 %v2244_v37, %v2243_v47  ;;  %v2248_v40 = vshll.u32 %v2247_v1, 23  ;;  %9115 = vmatmul.msk.bf16.gmra.mxu2 %vm5704_vm9, %v12127_v39  ;;  %v2341_v31 = vmul.u32 %v2339_v43, %v2336_v46  ;;  %v2361_v54 = vshrl.u32 %v2330_v53, 16  ;;  %v12147_v53 = vpop.f32.mrf.mxu1 }
 0x2b7   : > { %6174 = vmatpush.bf16.msra.mxu0 %v5592_v36  ;;  %9107 = vmatmul.msk.bf16.gmra.mxu1 %vm5704_vm9, %v12127_v39  ;;  %v2324_v41 = vsel %vm2322_vm10, %v2312_v0, 2102212464  ;;  %v12141_v36 = vmul.u32 %v2360_v35, %v2337_v42  ;;  %v2323_v25 = vsel %vm2319_vm4, %v2303_v55, %v12064_v61  ;;  %v2343_v51 = vmul.u32 %v2339_v43, %v2337_v42 }
 0x2b8   : > { %v2249_v56 = vor.u32 4788187, %v2248_v40  ;;  %v2252_v15 = vcvt.s32.f32 %v2245_v5  ;;  %v2344_v6 = vshll.u32 %v2341_v31, 16  ;;  %v2346_v9 = vshll.u32 %v2342_v8, 16 }
 0x2b9   : > { %v2276_v58 = vadd.s32 3, %v12133_v30  ;;  %v2362_v3 = vmul.u32 %v2360_v35, %v2336_v46  ;;  %v2363_v29 = vmul.u32 %v2361_v54, %v2336_v46  ;;  %v2325_v0 = vsel %vm2321_vm7, %v12066_v45, %v2324_v41 }
 0x2ba   : > { %v2250_v47 = vand.u32 2147483647, %v2249_v56  ;;  %vm2348_vm13 = vc.u32 %v2340_v34, %v2344_v6  ;;  %v2350_v37 = vadd.s32 %v2344_v6, %v2340_v34  ;;  %v2365_v1 = vmul.u32 %v2361_v54, %v2337_v42 }
 0x2bb   : > { %6175 = vmatpush.bf16.msra.mxu0 %v5576_v63  ;;  %v2349_v61 = vsel %vm2348_vm13, 1, %v14602_v32  ;;  %v2366_v63 = vshll.u32 %v2363_v29, 16  ;;  %v2368_v55 = vshll.u32 %v12141_v36, 16  ;;  %v2345_v46 = vshrl.u32 %v2341_v31, 16 }
 0x2bc   : > { %v2253_v60 = vmul.f32 %v2252_v15, %v2250_v47  ;;  %v2351_v43 = vadd.s32 %v2349_v61, %v2343_v51  ;;  %vm2352_vm14 = vc.u32 %v2350_v37, %v2346_v9  ;;  %v8948_v35 = vadd.s32 4294967169, %v2446_v20 }
 0x2bd   : > { %v2353_v45 = vsel %vm2352_vm14, 1, %v14602_v32  ;;  %vm2370_vm15 = vc.u32 %v2362_v3, %v2366_v63  ;;  %v2372_v42 = vadd.s32 %v2366_v63, %v2362_v3  ;;  %v2347_v40 = vshrl.u32 %v2342_v8, 16 }
 0x2be   : > { %v2254_v5 = vxor.u32 2147483648, %v2253_v60  ;;  %v2355_v34 = vadd.s32 %v2353_v45, %v2351_v43  ;;  %v2371_v54 = vsel %vm2370_vm15, 1, %v14602_v32  ;;  %v2452_v56 = vadd.s32 1, %v8948_v35  ;;  %v12186_v37 = vpop.f32.mrf.mxu1 }
 0x2bf   : > { %6176 = vmatpush.bf16.msra.mxu0 %v5560_v57  ;;  %v2367_v49 = vshrl.u32 %v2363_v29, 16  ;;  %v2373_v48 = vadd.s32 %v2371_v54, %v2365_v1  ;;  %vm2374_vm0 = vc.u32 %v2372_v42, %v2368_v55  ;;  %v12165_v57 = vld [vmem:[%s9422_s27 + $0x60] sm:$0xff]  ;;  %v2369_v41 = vshrl.u32 %v12141_v36, 16 }
 0x2c0   : > { %v2255_v15 = vsel %vm2134_vm3, %v2254_v5, %v2253_v60  ;;  %v2356_v31 = vadd.s32 %v2355_v34, %v2345_v46  ;;  %v2375_v8 = vsel %vm2374_vm0, 1, %v14602_v32  ;;  %vm2453_vm1 = vcmp.gt.s32.totalorder %v2452_v56, 0 }
 0x2c1   : > { %v12170_v20 = vsel %vm12075_vm8, %v12165_v57, %v2255_v15  ;;  %v2377_v51 = vadd.s32 %v2375_v8, %v2373_v48  ;;  %v2454_v6 = vsel %vm2453_vm1, %v2452_v56, 0  ;;  %v2326_v12 = vsel %vm2320_vm11, %v2323_v25, %v2325_v0  ;;  %v12196_v25 = vld [vmem:[%s14434_s1 + $0x10] sm:$0xff] }
 0x2c2   : > { %v2260_v7 = vmul.f32 %v12170_v20, %v12170_v20  ;;  %v12178_v13 = vadd.s32 %v2356_v31, %v2347_v40  ;;  %v2456_v21 = vand.u32 31, %v2454_v6  ;;  %v12182_v3 = vand.u32 3, %v2276_v58 }
 0x2c3   : > { %6177 = vmatpush.bf16.msra.mxu0 %v5544_v28  ;;  %v12180_v28 = vadd.s32 %v2372_v42, %v2368_v55  ;;  %v2378_v29 = vadd.s32 %v2377_v51, %v2367_v49  ;;  %v12189_v36 = vand.u32 3, %v12133_v30  ;;  %v2449_v24 = vand.u32 8388607, %v14512_v38 }
 0x2c4   : > { %v2261_v9 = vmul.f32 -0.001358992, %v2260_v7  ;;  %v2268_v47 = vmul.f32 -0.00019511016, %v2260_v7  ;;  %v2380_v60 = vmul.u32 %v12095_v33, %v2326_v12  ;;  %vm2282_vm5 = vcmp.eq.s32.totalorder %v12182_v3, 2 }
 0x2c5   : > { %v2379_v1 = vadd.s32 %v2378_v29, %v2369_v41  ;;  %vm2382_vm2 = vc.u32 %v12178_v13, %v12180_v28  ;;  %vm2279_vm3 = vcmp.eq.s32.totalorder %v12182_v3, 0  ;;  %vm4746_vm4 = vcmp.eq.s32.totalorder %v12189_v36, 0 }
 0x2c6   : > { %9098 = vmatmul.msk.bf16.vlgmr.msra.gmra.mxu0 %vm5704_vm9, %v12028_v19  ;;  %v2262_v58 = vadd.f32 0.041655596, %v2261_v9  ;;  %v2269_v0 = vadd.f32 0.008332121, %v2268_v47  ;;  %v12200_v19 = vsub.s32 32, %v2456_v21  ;;  %vm4749_vm8 = vcmp.eq.s32.totalorder %v12189_v36, 2 }
 0x2c7   : > { %9108 = vmatmul.msk.bf16.gmra.mxu1 %vm5704_vm9, %v12196_v25  ;;  %v2383_v63 = vadd.s32 1, %v2379_v1  ;;  %v2450_v55 = vor.u32 8388608, %v2449_v24  ;;  %v2462_v46 = vshll.u32 %v14691_v14, %v2456_v21  ;;  %vm2278_vm7 = vcmp.lt.s32.totalorder %v12182_v3, 2 }
 0x2c8   : > { %v2263_v30 = vmul.f32 %v2262_v58, %v2260_v7  ;;  %v2270_v61 = vmul.f32 %v2269_v0, %v2260_v7  ;;  %v2463_v5 = vshrl.u32 %v14692_v44, %v12200_v19  ;;  %vm2275_vm10 = vweird.f32 %v12165_v57 }
 0x2c9   : > { %v2384_v33 = vsel %vm2382_vm2, %v2383_v63, %v2379_v1  ;;  %v2465_v42 = vshll.u32 %v14692_v44, %v2456_v21  ;;  %v2466_v40 = vshrl.u32 %v14693_v22, %v12200_v19  ;;  %v2471_v34 = vshll.u32 %v14695_v59, %v2456_v21 }
 0x2ca   : > { %v2264_v43 = vadd.f32 -0.4999988, %v2263_v30  ;;  %v2271_v35 = vadd.f32 -0.16666654, %v2270_v61  ;;  %v2385_v45 = vadd.s32 %v2384_v33, %v2380_v60  ;;  %v12218_v15 = vshrl.u32 %v2454_v6, 5 }
 0x2cb   : > { %v2472_v49 = vshrl.u32 %v14696_v11, %v12200_v19  ;;  %v2459_v31 = vshll.u32 %v14690_v52, %v2456_v21  ;;  %v2460_v8 = vshrl.u32 %v14691_v14, %v12200_v19  ;;  %v12225_v41 = vshll.u32 %v2450_v55, 8 }
 0x2cc   : > { %v2265_v54 = vmul.f32 %v2264_v43, %v2260_v7  ;;  %v2272_v56 = vmul.f32 %v2271_v35, %v2260_v7  ;;  %v2386_v48 = vadd.s32 536870912, %v2385_v45  ;;  %v2468_v9 = vshll.u32 %v14693_v22, %v2456_v21 }
 0x2cd   : > { %v2469_v7 = vshrl.u32 %v14695_v59, %v12200_v19  ;;  %v12232_v47 = vor.u32 %v2463_v5, %v2462_v46  ;;  %v2467_v29 = vor.u32 %v2466_v40, %v2465_v42  ;;  %v2473_v24 = vor.u32 %v2472_v49, %v2471_v34 }
 0x2ce   : > { %v2266_v51 = vadd.f32 1.0, %v2265_v54  ;;  %v2273_v12 = vadd.f32 1.0, %v2272_v56  ;;  %v12230_v6 = vshrl.u32 %v2386_v48, 30  ;;  %vm2474_vm11 = vcmp.lt.s32.totalorder %v12218_v15, 1 }
 0x2cf   : > { %vm2477_vm12 = vcmp.lt.s32.totalorder %v12218_v15, 4  ;;  %vm4745_vm13 = vcmp.lt.s32.totalorder %v12189_v36, 2  ;;  %vm2476_vm14 = vcmp.lt.s32.totalorder %v12218_v15, 3  ;;  %v12241_v1 = vand.u32 65535, %v12225_v41 }
 0x2d0   : > { %v2274_v58 = vmul.f32 %v2273_v12, %v12170_v20  ;;  %v2283_v0 = vxor.u32 2147483648, %v2266_v51  ;;  %v2388_v21 = vshll.u32 %v12230_v6, 30  ;;  %v2470_v61 = vor.u32 %v2469_v7, %v2468_v9 }
 0x2d1   : > { %vm2475_vm15 = vcmp.lt.s32.totalorder %v12218_v15, 2  ;;  %v2486_v55 = vsel %vm2474_vm11, %v12232_v47, %v2467_v29  ;;  %v2487_v46 = vsel %vm2477_vm12, %v2473_v24, 1326507024  ;;  %v2461_v33 = vor.u32 %v2460_v8, %v2459_v31  ;;  %v12304_v24 = vld [vmem:[%s9422_s27 + $0x78] sm:$0xff] }
 0x2d2   : > { %v2280_v60 = vxor.u32 2147483648, %v2274_v58  ;;  %v2284_v30 = vsel %vm2282_vm5, %v2283_v0, %v2274_v58  ;;  %v4751_v20 = vsel %vm4749_vm8, %v2283_v0, %v2274_v58  ;;  %v12247_v63 = vsub.s32 %v2385_v45, %v2388_v21  ;;  %v12306_v58 = vpop.f32.mrf.mxu0 }
 0x2d3   : > { %v2488_v5 = vsel %vm2476_vm14, %v2470_v61, %v2487_v46  ;;  %v2458_v49 = vshrl.u32 %v14690_v52, %v12200_v19  ;;  %v2482_v57 = vsel %vm2474_vm11, %v2461_v33, %v12232_v47  ;;  %v12290_v8 = vshrl.u32 %v12225_v41, 16 }
 0x2d4   : > { %v2281_v43 = vsel %vm2279_vm3, %v2266_v51, %v2280_v60  ;;  %v4748_v35 = vsel %vm4746_vm4, %v2266_v51, %v2280_v60  ;;  %vm2390_vm0 = vcmp.lt.s32.totalorder %v12247_v63, 0  ;;  %v2391_v40 = vsub.s32 0, %v12247_v63 }
 0x2d5   : > { %v2285_v45 = vsel %vm2278_vm7, %v2281_v43, %v2284_v30  ;;  %v4752_v42 = vsel %vm4745_vm13, %v4748_v35, %v4751_v20  ;;  %v2489_v3 = vsel %vm2475_vm15, %v2486_v55, %v2488_v5  ;;  %vm2289_vm1 = vcmp.lt.s32.totalorder %v11916_v16, 0 }
 0x2d6   : > { %9099 = vmatmul.msk.bf16.gmra.mxu0 %vm5704_vm9, %v12127_v39  ;;  %v12271_v34 = vsel %vm2275_vm10, nan, %v2285_v45  ;;  %v12275_v54 = vsel %vm2275_vm10, nan, %v4752_v42  ;;  %v2483_v39 = vsel %vm2477_vm12, %v2470_v61, 920167782  ;;  %v2392_v56 = vsel %vm2390_vm0, %v2391_v40, %v12247_v63 }
 0x2d7   : > { %v5228_v36 = vadd.f32 %v12271_v34, %v12271_v34  ;;  %v2494_v48 = vshrl.u32 %v2489_v3, 16  ;;  %v2393_v31 = vclz %v2392_v56  ;;  %v2493_v51 = vand.u32 65535, %v2489_v3 }
 0x2d8   : > { %v2484_v7 = vsel %vm2476_vm14, %v2467_v29, %v2483_v39  ;;  %v2381_v0 = vadd.s32 %v12180_v28, %v12178_v13  ;;  %v2478_v61 = vsel %vm2474_vm11, %v2458_v49, %v2461_v33  ;;  %v2479_v55 = vsel %vm2477_vm12, %v2467_v29, 2102212464 }
 0x2d9   : > { %v12293_v12 = vmul.f32 %v5228_v36, %v12275_v54  ;;  %v12296_v9 = vmul.f32 %v5228_v36, %v12271_v34  ;;  %v12301_v19 = vmul.u32 %v2494_v48, %v12241_v1  ;;  %v8946_v21 = vadd.s32 4294967294, %v2393_v31 }
 0x2da   : > { %v2485_v46 = vsel %vm2475_vm15, %v2482_v57, %v2484_v7  ;;  %v2495_v13 = vmul.u32 %v2493_v51, %v12241_v1  ;;  %v12323_v28 = vmul.u32 %v2493_v51, %v12290_v8  ;;  %v2411_v40 = vsub.s32 4, %v12230_v6 }
 0x2db   : > { %v14510_v30 = vsub.f32 1.0, %v12296_v9  ;;  %v5292_v20 = vadd.f32 %v12293_v12, %v12293_v12  ;;  %vm8947_vm2 = vcmp.lt.s32.totalorder %v8946_v21, 0  ;;  %v2499_v5 = vshll.u32 %v12301_v19, 16 }
 0x2dc   : > { %v2396_v33 = vsel %vm8947_vm2, 0, %v8946_v21  ;;  %vm12340_vm5 = vcmp.le.f32.partialorder %v2287_v17, 0.7853982  ;;  %v2515_v56 = vand.u32 65535, %v2485_v46  ;;  %v2516_v49 = vshrl.u32 %v2485_v46, 16 }
 0x2dd   : > { %v12327_v43 = vmul.f32 %v5292_v20, %v14510_v30  ;;  %v12330_v35 = vmul.f32 %v5292_v20, %v12293_v12  ;;  %v2397_v29 = vsub.s32 32, %v2396_v33  ;;  %v2398_v45 = vshll.u32 %v12247_v63, %v2396_v33 }
 0x2de   : > { %v2401_v42 = vsub.s32 4294967266, %v2396_v33  ;;  %v2498_v63 = vmul.u32 %v2494_v48, %v12290_v8  ;;  %v2501_v51 = vshll.u32 %v12323_v28, 16  ;;  %vm2503_vm3 = vc.u32 %v2495_v13, %v2499_v5 }
 0x2df   : > { %v14509_v39 = vsub.f32 1.0, %v12330_v35  ;;  %v5356_v3 = vadd.f32 %v12327_v43, %v12327_v43  ;;  %v2399_v31 = vshrl.u32 %v2381_v0, %v2397_v29  ;;  %v2505_v17 = vadd.s32 %v2499_v5, %v2495_v13  ;;  %v12366_v5 = vpop.f32.mrf.mxu0 }
 0x2e0   : > { %v2402_v57 = vadd.s32 127, %v2401_v42  ;;  %v2412_v0 = vsel %vm2289_vm1, %v2411_v40, %v12230_v6  ;;  %v2480_v48 = vsel %vm2476_vm14, %v12232_v47, %v2479_v55  ;;  %v2504_v42 = vsel %vm2503_vm3, 1, %v14602_v32 }
 0x2e1   : > { %v12348_v7 = vmul.f32 %v5356_v3, %v14509_v39  ;;  %v12351_v21 = vmul.f32 %v5356_v3, %v12327_v43  ;;  %v2400_v20 = vor.u32 %v2399_v31, %v2398_v45  ;;  %v2517_v13 = vmul.u32 %v2515_v56, %v12241_v1 }
 0x2e2   : > { %v2403_v33 = vshll.u32 %v2402_v57, 23  ;;  %v2506_v31 = vadd.s32 %v2504_v42, %v2498_v63  ;;  %vm2507_vm4 = vc.u32 %v2505_v17, %v2501_v51  ;;  %v2518_v55 = vmul.u32 %v2516_v49, %v12241_v1 }
 0x2e3   : > { %v14511_v46 = vsub.f32 1.0, %v12351_v21  ;;  %v12362_v29 = vadd.f32 %v12348_v7, %v12348_v7  ;;  %v2407_v3 = vcvt.s32.f32 %v2400_v20  ;;  %v2508_v47 = vsel %vm2507_vm4, 1, %v14602_v32 }
 0x2e4   : > { %v2404_v45 = vor.u32 4788187, %v2403_v33  ;;  %v2519_v40 = vmul.u32 %v2515_v56, %v12290_v8  ;;  %v2500_v33 = vshrl.u32 %v12301_v19, 16  ;;  %v2510_v20 = vadd.s32 %v2508_v47, %v2506_v31 }
 0x2e5   : > { %v12373_v6 = vmul.f32 %v12362_v29, %v14511_v46  ;;  %v2600_v63 = vand.u32 2139095040, %v12304_v24  ;;  %v2520_v17 = vmul.u32 %v2516_v49, %v12290_v8  ;;  %v2521_v42 = vshll.u32 %v2518_v55, 16 }
 0x2e6   : > { %9100 = vmatmul.msk.bf16.gmra.mxu0 %vm5704_vm9, %v12196_v25  ;;  %v2405_v57 = vand.u32 2147483647, %v2404_v45  ;;  %v2523_v39 = vshll.u32 %v2519_v40, 16  ;;  %v2414_v1 = vsel %vm12340_vm5, 0, %v2412_v0  ;;  %v2481_v56 = vsel %vm2475_vm15, %v2478_v61, %v2480_v48 }
 0x2e7   : > { %v12382_v51 = vadd.f32 %v12373_v6, %v12373_v6  ;;  %v2601_v45 = vshrl.u32 %v2600_v63, 23  ;;  %v2502_v31 = vshrl.u32 %v12323_v28, 16  ;;  %vm2525_vm8 = vc.u32 %v2517_v13, %v2521_v42 }
 0x2e8   : > { %v2408_v30 = vmul.f32 %v2407_v3, %v2405_v57  ;;  %v2527_v47 = vadd.s32 %v2521_v42, %v2517_v13  ;;  %v2511_v38 = vadd.s32 %v2510_v20, %v2500_v33  ;;  %v2526_v8 = vsel %vm2525_vm8, 1, %v14602_v32 }
 0x2e9   : > { %v5516_v19 = vmul.f32 %v12382_v51, %v12373_v6  ;;  %v8951_v49 = vadd.s32 4294967169, %v2601_v45  ;;  %v2522_v57 = vshrl.u32 %v2518_v55, 16  ;;  %v2528_v60 = vadd.s32 %v2526_v8, %v2520_v17 }
 0x2ea   : > { %v2409_v46 = vxor.u32 2147483648, %v2408_v30  ;;  %vm2529_vm7 = vc.u32 %v2527_v47, %v2523_v39  ;;  %v2431_v61 = vadd.s32 3, %v2414_v1  ;;  %v2524_v13 = vshrl.u32 %v2519_v40, 16 }
 0x2eb   : > { %v5532_v3 = vsub.f32 1.0, %v5516_v19  ;;  %v2530_v0 = vsel %vm2529_vm7, 1, %v14602_v32  ;;  %v2607_v48 = vadd.s32 1, %v8951_v49  ;;  %v12399_v42 = vadd.s32 %v2511_v38, %v2502_v31 }
 0x2ec   : > { %v2410_v15 = vsel %vm2289_vm1, %v2409_v46, %v2408_v30  ;;  %v2532_v33 = vadd.s32 %v2530_v0, %v2528_v60  ;;  %v12401_v55 = vadd.s32 %v2527_v47, %v2523_v39  ;;  %v12404_v8 = vand.u32 3, %v2431_v61 }
 0x2ed   : > { %v5644_v63 = vpack.c.bf16 %v5532_v3, %v5532_v3  ;;  %v2413_v28 = vsel %vm12340_vm5, %v11916_v16, %v2410_v15  ;;  %vm2608_vm10 = vcmp.gt.s32.totalorder %v2607_v48, 0  ;;  %v12406_v36 = vand.u32 3, %v2414_v1 }
 0x2ee   : > { %v2415_v20 = vmul.f32 %v2413_v28, %v2413_v28  ;;  %v2533_v30 = vadd.s32 %v2532_v33, %v2522_v57  ;;  %v2609_v46 = vsel %vm2608_vm10, %v2607_v48, 0  ;;  %v2535_v60 = vmul.u32 %v12225_v41, %v2481_v56 }
 0x2ef   : > { %v5767_v17 = vsel %vm5729_vm6, %v5644_v63, 0  ;;  %v2611_v49 = vand.u32 31, %v2609_v46  ;;  %v14702_v38 = vand.u32 2147483647, %v12304_v24  ;;  %vm2537_vm11 = vc.u32 %v12399_v42, %v12401_v55 }
 0x2f0   : > { %6367 = vmatpush.bf16.msrb.mxu0 %v5767_v17  ;;  %v2416_v45 = vmul.f32 -0.001358992, %v2415_v20  ;;  %v2423_v19 = vmul.f32 -0.00019511016, %v2415_v20  ;;  %v2534_v40 = vadd.s32 %v2533_v30, %v2524_v13  ;;  %vm2437_vm12 = vcmp.eq.s32.totalorder %v12404_v8, 2 }
 0x2f1   : > { %v2604_v39 = vand.u32 8388607, %v14702_v38  ;;  %v12413_v3 = vsub.s32 32, %v2611_v49  ;;  %vm2434_vm13 = vcmp.eq.s32.totalorder %v12404_v8, 0  ;;  %vm4903_vm14 = vcmp.eq.s32.totalorder %v12406_v36, 2 }
 0x2f2   : > { %v2417_v31 = vadd.f32 0.041655596, %v2416_v45  ;;  %v2424_v47 = vadd.f32 0.008332121, %v2423_v19  ;;  %v2538_v57 = vadd.s32 1, %v2534_v40  ;;  %v2617_v56 = vshll.u32 %v14691_v14, %v2611_v49 }
 0x2f3   : > { %v2605_v1 = vor.u32 8388608, %v2604_v39  ;;  %vm2433_vm15 = vcmp.lt.s32.totalorder %v12404_v8, 2  ;;  %vm4899_vm0 = vcmp.lt.s32.totalorder %v12406_v36, 2  ;;  %v2618_v13 = vshrl.u32 %v14692_v44, %v12413_v3 }
 0x2f4   : > { %v2418_v15 = vmul.f32 %v2417_v31, %v2415_v20  ;;  %v2425_v61 = vmul.f32 %v2424_v47, %v2415_v20  ;;  %v2539_v41 = vsel %vm2537_vm11, %v2538_v57, %v2534_v40  ;;  %vm2430_vm1 = vweird.f32 %v11916_v16 }
 0x2f5   : > { %v2540_v63 = vadd.s32 %v2539_v41, %v2535_v60  ;;  %v12424_v33 = vshrl.u32 %v2609_v46, 5  ;;  %v2614_v17 = vshll.u32 %v14690_v52, %v2611_v49  ;;  %v2620_v30 = vshll.u32 %v14692_v44, %v2611_v49 }
 0x2f6   : > { %v2419_v0 = vadd.f32 -0.4999988, %v2418_v15  ;;  %v2426_v48 = vadd.f32 -0.16666654, %v2425_v61  ;;  %v2621_v45 = vshrl.u32 %v14693_v22, %v12413_v3  ;;  %v2623_v39 = vshll.u32 %v14693_v22, %v2611_v49 }
 0x2f7   : > { %v2541_v38 = vadd.s32 536870912, %v2540_v63  ;;  %v2615_v60 = vshrl.u32 %v14691_v14, %v12413_v3  ;;  %v2624_v31 = vshrl.u32 %v14695_v59, %v12413_v3  ;;  %v2626_v46 = vshll.u32 %v14695_v59, %v2611_v49 }
 0x2f8   : > { %v2420_v19 = vmul.f32 %v2419_v0, %v2415_v20  ;;  %v2427_v40 = vmul.f32 %v2426_v48, %v2415_v20  ;;  %v2627_v47 = vshrl.u32 %v14696_v11, %v12413_v3  ;;  %v12440_v61 = vor.u32 %v2618_v13, %v2617_v56 }
 0x2f9   : > { %v12438_v15 = vshrl.u32 %v2541_v38, 30  ;;  %v12442_v20 = vor.u32 %v2621_v45, %v2620_v30  ;;  %vm2629_vm2 = vcmp.lt.s32.totalorder %v12424_v33, 1  ;;  %vm2632_vm5 = vcmp.lt.s32.totalorder %v12424_v33, 4 }
 0x2fa   : > { %v2421_v44 = vadd.f32 1.0, %v2420_v19  ;;  %v2428_v57 = vadd.f32 1.0, %v2427_v40  ;;  %v2628_v22 = vor.u32 %v2627_v47, %v2626_v46  ;;  %vm2631_vm3 = vcmp.lt.s32.totalorder %v12424_v33, 3 }
 0x2fb   : > { %v2543_v59 = vshll.u32 %v12438_v15, 30  ;;  %vm4900_vm4 = vcmp.eq.s32.totalorder %v12406_v36, 0  ;;  %v2625_v11 = vor.u32 %v2624_v31, %v2623_v39  ;;  %v12451_v56 = vshll.u32 %v2605_v1, 8 }
 0x2fc   : > { %v2429_v14 = vmul.f32 %v2428_v57, %v2413_v28  ;;  %v2438_v41 = vxor.u32 2147483648, %v2421_v44  ;;  %v2642_v49 = vsel %vm2632_vm5, %v2628_v22, 1326507024  ;;  %v12457_v30 = vor.u32 %v2615_v60, %v2614_v17 }
 0x2fd   : > { %v2544_v13 = vsub.s32 %v2540_v63, %v2543_v59  ;;  %vm2630_vm8 = vcmp.lt.s32.totalorder %v12424_v33, 2  ;;  %v2641_v45 = vsel %vm2629_vm2, %v12440_v61, %v12442_v20  ;;  %v2643_v1 = vsel %vm2631_vm3, %v2625_v11, %v2642_v49 }
 0x2fe   : > { %v2435_v0 = vxor.u32 2147483648, %v2429_v14  ;;  %v2439_v48 = vsel %vm2437_vm12, %v2438_v41, %v2429_v14  ;;  %v4905_v28 = vsel %vm4903_vm14, %v2438_v41, %v2429_v14  ;;  %v2638_v39 = vsel %vm2632_vm5, %v2625_v11, 920167782 }
 0x2ff   : > { %vm2545_vm7 = vcmp.lt.s32.totalorder %v2544_v13, 0  ;;  %v2546_v38 = vsub.s32 0, %v2544_v13  ;;  %v2646_v47 = vand.u32 65535, %v12451_v56  ;;  %v2644_v36 = vsel %vm2630_vm8, %v2641_v45, %v2643_v1 }
 0x300   : > { %v2436_v19 = vsel %vm2434_vm13, %v2421_v44, %v2435_v0  ;;  %v4902_v40 = vsel %vm4900_vm4, %v2421_v44, %v2435_v0  ;;  %v2637_v57 = vsel %vm2629_vm2, %v12457_v30, %v12440_v61  ;;  %v2639_v16 = vsel %vm2631_vm3, %v12442_v20, %v2638_v39 }
 0x301   : > { %v2440_v63 = vsel %vm2433_vm15, %v2436_v19, %v2439_v48  ;;  %v4906_v17 = vsel %vm4899_vm0, %v4902_v40, %v4905_v28  ;;  %v2547_v46 = vsel %vm2545_vm7, %v2546_v38, %v2544_v13  ;;  %v2649_v22 = vshrl.u32 %v2644_v36, 16 }
 0x302   : > { %v12476_v60 = vsel %vm2430_vm1, nan, %v2440_v63  ;;  %v12480_v31 = vsel %vm2430_vm1, nan, %v4906_v17  ;;  %v2548_v44 = vclz %v2547_v46  ;;  %v2536_v11 = vadd.s32 %v12401_v55, %v12399_v42 }
 0x303   : > { %v5229_v8 = vadd.f32 %v12476_v60, %v12476_v60  ;;  %v2647_v49 = vshrl.u32 %v12451_v56, 16  ;;  %v2648_v0 = vand.u32 65535, %v2644_v36  ;;  %v2651_v48 = vmul.u32 %v2649_v22, %v2646_v47 }
 0x304   : > { %v8949_v59 = vadd.s32 4294967294, %v2548_v44  ;;  %v2640_v1 = vsel %vm2630_vm8, %v2637_v57, %v2639_v16  ;;  %vm2444_vm11 = vcmp.lt.s32.totalorder %v12087_v2, 0  ;;  %v2566_v23 = vsub.s32 4, %v12438_v15 }
 0x305   : > { %v12495_v14 = vmul.f32 %v5229_v8, %v12480_v31  ;;  %v12498_v41 = vmul.f32 %v5229_v8, %v12476_v60  ;;  %v2670_v40 = vand.u32 65535, %v2640_v1  ;;  %v2650_v39 = vmul.u32 %v2648_v0, %v2646_v47 }
 0x306   : > { %vm8950_vm10 = vcmp.lt.s32.totalorder %v8949_v59, 0  ;;  %v2652_v46 = vmul.u32 %v2648_v0, %v2647_v49  ;;  %v2654_v8 = vshll.u32 %v2651_v48, 16  ;;  %v2671_v18 = vshrl.u32 %v2640_v1, 16 }
 0x307   : > { %v14513_v28 = vsub.f32 1.0, %v12498_v41  ;;  %v5293_v45 = vadd.f32 %v12495_v14, %v12495_v14  ;;  %v2551_v19 = vsel %vm8950_vm10, 0, %v8949_v59  ;;  %v2653_v59 = vmul.u32 %v2649_v22, %v2647_v49 }
 0x308   : > { %v2552_v55 = vsub.s32 32, %v2551_v19  ;;  %v2553_v63 = vshll.u32 %v2544_v13, %v2551_v19  ;;  %v2556_v17 = vsub.s32 4294967266, %v2551_v19  ;;  %v2613_v0 = vshrl.u32 %v14690_v52, %v12413_v3 }
 0x309   : > { %v12510_v38 = vmul.f32 %v5293_v45, %v14513_v28  ;;  %v12513_v42 = vmul.f32 %v5293_v45, %v12495_v14  ;;  %v14703_v19 = vand.u32 2147483647, %v12087_v2  ;;  %v2656_v1 = vshll.u32 %v2652_v46, 16 }
 0x30a   : > { %v2554_v57 = vshrl.u32 %v2536_v11, %v2552_v55  ;;  %v2557_v16 = vadd.s32 127, %v2556_v17  ;;  %vm2658_vm13 = vc.u32 %v2650_v39, %v2654_v8  ;;  %v2672_v55 = vmul.u32 %v2670_v40, %v2646_v47 }
 0x30b   : > { %v14514_v44 = vsub.f32 1.0, %v12513_v42  ;;  %v5357_v36 = vadd.f32 %v12510_v38, %v12510_v38  ;;  %vm12530_vm12 = vcmp.le.f32.partialorder %v14703_v19, 0.7853982  ;;  %v2660_v3 = vadd.s32 %v2654_v8, %v2650_v39 }
 0x30c   : > { %v2555_v13 = vor.u32 %v2554_v57, %v2553_v63  ;;  %v2558_v22 = vshll.u32 %v2557_v16, 23  ;;  %v2659_v57 = vsel %vm2658_vm13, 1, %v14602_v32  ;;  %v2673_v19 = vmul.u32 %v2671_v18, %v2646_v47 }
 0x30d   : > { %v12520_v28 = vmul.f32 %v5357_v36, %v14514_v44  ;;  %v12523_v45 = vmul.f32 %v5357_v36, %v12510_v38  ;;  %v2661_v44 = vadd.s32 %v2659_v57, %v2653_v59  ;;  %v2655_v62 = vshrl.u32 %v2651_v48, 16 }
 0x30e   : > { %v2562_v63 = vcvt.s32.f32 %v2555_v13  ;;  %v2559_v52 = vor.u32 4788187, %v2558_v22  ;;  %v2674_v4 = vmul.u32 %v2670_v40, %v2647_v49  ;;  %vm2662_vm14 = vc.u32 %v2660_v3, %v2656_v1 }
 0x30f   : > { %v14515_v17 = vsub.f32 1.0, %v12523_v45  ;;  %v12537_v36 = vadd.f32 %v12520_v28, %v12520_v28  ;;  %v2675_v10 = vmul.u32 %v2671_v18, %v2647_v49  ;;  %v2676_v27 = vshll.u32 %v2673_v19, 16 }
 0x310   : > { %v2560_v50 = vand.u32 2147483647, %v2559_v52  ;;  %v2634_v47 = vsel %vm2632_vm5, %v12442_v20, 2102212464  ;;  %v2663_v39 = vsel %vm2662_vm14, 1, %v14602_v32  ;;  %v2678_v8 = vshll.u32 %v2674_v4, 16 }
 0x311   : > { %v12543_v16 = vmul.f32 %v12537_v36, %v14515_v17  ;;  %v2665_v22 = vadd.s32 %v2663_v39, %v2661_v44  ;;  %vm2680_vm15 = vc.u32 %v2672_v55, %v2676_v27  ;;  %v2682_v48 = vadd.s32 %v2676_v27, %v2672_v55 }
 0x312   : > { %v2563_v59 = vmul.f32 %v2562_v63, %v2560_v50  ;;  %v2657_v18 = vshrl.u32 %v2652_v46, 16  ;;  %v2677_v49 = vshrl.u32 %v2673_v19, 16  ;;  %v2681_v1 = vsel %vm2680_vm15, 1, %v14602_v32 }
 0x313   : > { %v12548_v13 = vadd.f32 %v12543_v16, %v12543_v16  ;;  %v2666_v52 = vadd.s32 %v2665_v22, %v2655_v62  ;;  %v2683_v3 = vadd.s32 %v2681_v1, %v2675_v10  ;;  %vm2684_vm0 = vc.u32 %v2682_v48, %v2678_v8 }
 0x314   : > { %v2564_v57 = vxor.u32 2147483648, %v2563_v59  ;;  %v2633_v20 = vsel %vm2629_vm2, %v2613_v0, %v12457_v30  ;;  %v2635_v50 = vsel %vm2631_vm3, %v12440_v61, %v2634_v47  ;;  %v2685_v27 = vsel %vm2684_vm0, 1, %v14602_v32 }
 0x315   : > { %v5517_v40 = vmul.f32 %v12548_v13, %v12543_v16  ;;  %v2567_v62 = vsel %vm2444_vm11, %v2566_v23, %v12438_v15  ;;  %v2679_v10 = vshrl.u32 %v2674_v4, 16  ;;  %v2687_v44 = vadd.s32 %v2685_v27, %v2683_v3 }
 0x316   : > { %v2565_v46 = vsel %vm2444_vm11, %v2564_v57, %v2563_v59  ;;  %v2667_v0 = vadd.s32 %v2666_v52, %v2657_v18  ;;  %v2686_v63 = vadd.s32 %v2682_v48, %v2678_v8  ;;  %v2636_v32 = vsel %vm2630_vm8, %v2633_v20, %v2635_v50 }
 0x317   : > { %v5533_v17 = vsub.f32 1.0, %v5517_v40  ;;  %v2568_v30 = vsel %vm12530_vm12, %v12087_v2, %v2565_v46  ;;  %v2688_v61 = vadd.s32 %v2687_v44, %v2677_v49  ;;  %v2569_v23 = vsel %vm12530_vm12, 0, %v2567_v62 }
 0x318   : > { %v2570_v19 = vmul.f32 %v2568_v30, %v2568_v30  ;;  %v2690_v39 = vmul.u32 %v12451_v56, %v2636_v32  ;;  %vm2692_vm1 = vc.u32 %v2667_v0, %v2686_v63  ;;  %v2586_v48 = vadd.s32 3, %v2569_v23 }
 0x319   : > { %v5645_v55 = vpack.c.bf16 %v5533_v17, %v5533_v17  ;;  %v2689_v17 = vadd.s32 %v2688_v61, %v2679_v10  ;;  %v5052_v3 = vand.u32 3, %v2569_v23  ;;  %vm2585_vm10 = vweird.f32 %v12087_v2 }
 0x31a   : > { %v2571_v4 = vmul.f32 -0.001358992, %v2570_v19  ;;  %v2578_v15 = vmul.f32 -0.00019511016, %v2570_v19  ;;  %v2587_v52 = vand.u32 3, %v2586_v48  ;;  %vm2599_vm13 = vcmp.lt.s32.totalorder %v12304_v24, 0 }
 0x31b   : > { %v5770_v47 = vsel %vm5729_vm6, %v5645_v55, 0  ;;  %v2693_v8 = vadd.s32 1, %v2689_v17  ;;  %vm5057_vm5 = vcmp.eq.s32.totalorder %v5052_v3, 2  ;;  %vm5054_vm8 = vcmp.eq.s32.totalorder %v5052_v3, 0 }
 0x31c   : > { %6416 = vmatpush.bf16.msrb.mxu1 %v5770_v47  ;;  %v2572_v59 = vadd.f32 0.041655596, %v2571_v4  ;;  %v2579_v22 = vadd.f32 0.008332121, %v2578_v15  ;;  %vm2592_vm2 = vcmp.eq.s32.totalorder %v2587_v52, 2  ;;  %vm2588_vm3 = vcmp.lt.s32.totalorder %v2587_v52, 2 }
 0x31d   : > { %v2694_v18 = vsel %vm2692_vm1, %v2693_v8, %v2689_v17  ;;  %vm2589_vm4 = vcmp.eq.s32.totalorder %v2587_v52, 0  ;;  %vm5053_vm7 = vcmp.lt.s32.totalorder %v5052_v3, 2 }
 0x31e   : > { %v2573_v40 = vmul.f32 %v2572_v59, %v2570_v19  ;;  %v2580_v33 = vmul.f32 %v2579_v22, %v2570_v19  ;;  %v2695_v49 = vadd.s32 %v2694_v18, %v2690_v39 }
 0x320   : > { %v2574_v1 = vadd.f32 -0.4999988, %v2573_v40  ;;  %v2581_v57 = vadd.f32 -0.16666654, %v2580_v33  ;;  %v2696_v11 = vadd.s32 536870912, %v2695_v49  ;;  %v2691_v33 = vadd.s32 %v2686_v63, %v2667_v0 }
 0x322   : > { %v2575_v20 = vmul.f32 %v2574_v1, %v2570_v19  ;;  %v2582_v50 = vmul.f32 %v2581_v57, %v2570_v19  ;;  %v12578_v27 = vshrl.u32 %v2696_v11, 30 }
 0x324   : > { %v2576_v46 = vadd.f32 1.0, %v2575_v20  ;;  %v2583_v56 = vadd.f32 1.0, %v2582_v50  ;;  %v2698_v62 = vshll.u32 %v12578_v27, 30 }
 0x326   : > { %v2584_v10 = vmul.f32 %v2583_v56, %v2568_v30  ;;  %v2593_v44 = vxor.u32 2147483648, %v2576_v46  ;;  %v2699_v55 = vsub.s32 %v2695_v49, %v2698_v62 }
 0x328   : > { %v2590_v32 = vxor.u32 2147483648, %v2584_v10  ;;  %v2594_v61 = vsel %vm2592_vm2, %v2593_v44, %v2584_v10  ;;  %v5059_v47 = vsel %vm5057_vm5, %v2593_v44, %v2584_v10  ;;  %vm2700_vm11 = vcmp.lt.s32.totalorder %v2699_v55, 0 }
 0x329   : > { %v2701_v19 = vsub.s32 0, %v2699_v55 }
 0x32a   : > { %v2591_v23 = vsel %vm2589_vm4, %v2576_v46, %v2590_v32  ;;  %v5056_v4 = vsel %vm5054_vm8, %v2576_v46, %v2590_v32  ;;  %vm2740_vm4 = vweird.f32 %v12304_v24 }
 0x32b   : > { %v2595_v15 = vsel %vm2588_vm3, %v2591_v23, %v2594_v61  ;;  %v5060_v17 = vsel %vm5053_vm7, %v5056_v4, %v5059_v47  ;;  %v2702_v39 = vsel %vm2700_vm11, %v2701_v19, %v2699_v55 }
 0x32c   : > { %v12582_v59 = vsel %vm2585_vm10, nan, %v2595_v15  ;;  %v12584_v30 = vsel %vm2585_vm10, nan, %v5060_v17  ;;  %v2703_v22 = vclz %v2702_v39  ;;  %v2721_v17 = vsub.s32 4, %v12578_v27 }
 0x32d   : > { %v5230_v8 = vadd.f32 %v12582_v59, %v12582_v59  ;;  %v14706_v39 = vand.u32 2147483647, %v12304_v24 }
 0x32e   : > { %v8952_v48 = vadd.s32 4294967294, %v2703_v22 }
 0x32f   : > { %v12589_v40 = vmul.f32 %v5230_v8, %v12584_v30  ;;  %v12592_v2 = vmul.f32 %v5230_v8, %v12582_v59  ;;  %vm2598_vm14 = vcmp.le.f32.partialorder %v14706_v39, 0.7853982 }
 0x330   : > { %vm8953_vm12 = vcmp.lt.s32.totalorder %v8952_v48, 0 }
 0x331   : > { %v5278_v18 = vsub.f32 1.0, %v12592_v2  ;;  %v5294_v49 = vadd.f32 %v12589_v40, %v12589_v40  ;;  %v2706_v1 = vsel %vm8953_vm12, 0, %v8952_v48 }
 0x332   : > { %v2707_v57 = vsub.s32 32, %v2706_v1  ;;  %v2708_v52 = vshll.u32 %v2699_v55, %v2706_v1  ;;  %v2711_v3 = vsub.s32 4294967266, %v2706_v1 }
 0x333   : > { %v12599_v11 = vmul.f32 %v5294_v49, %v5278_v18  ;;  %v12602_v20 = vmul.f32 %v5294_v49, %v12589_v40  ;;  %v2722_v49 = vsel %vm2599_vm13, %v2721_v17, %v12578_v27 }
 0x334   : > { %v2709_v50 = vshrl.u32 %v2691_v33, %v2707_v57  ;;  %v2712_v46 = vadd.s32 127, %v2711_v3  ;;  %v2724_v3 = vsel %vm2598_vm14, 0, %v2722_v49 }
 0x335   : > { %v14516_v0 = vsub.f32 1.0, %v12602_v20  ;;  %v5358_v63 = vadd.f32 %v12599_v11, %v12599_v11 }
 0x336   : > { %v2710_v56 = vor.u32 %v2709_v50, %v2708_v52  ;;  %v2713_v62 = vshll.u32 %v2712_v46, 23 }
 0x337   : > { %v12609_v10 = vmul.f32 %v5358_v63, %v14516_v0  ;;  %v12612_v44 = vmul.f32 %v5358_v63, %v12599_v11  ;;  %v5453_v0 = vmul.f32 %v12537_v36, %v12520_v28 }
 0x338   : > { %v2714_v55 = vor.u32 4788187, %v2713_v62  ;;  %v2717_v32 = vcvt.s32.f32 %v2710_v56  ;;  %v12632_v56 = vpop.f32.mrf.mxu2  ;;  %v12634_v62 = vpop.f32.mrf.mxu3 }
 0x339   : > { %v5406_v61 = vsub.f32 1.0, %v12612_v44  ;;  %v5422_v47 = vadd.f32 %v12609_v10, %v12609_v10 }
 0x33a   : > { %v2715_v19 = vand.u32 2147483647, %v2714_v55 }
 0x33b   : > { %v12617_v23 = vmul.f32 %v5422_v47, %v5406_v61 }
 0x33c   : > { %v2718_v4 = vmul.f32 %v2717_v32, %v2715_v19  ;;  %v2741_v32 = vadd.s32 3, %v2724_v3 }
 0x33d   : > { %v12621_v15 = vadd.f32 %v12617_v23, %v12617_v23 }
 0x33e   : > { %v2719_v22 = vxor.u32 2147483648, %v2718_v4  ;;  %v2742_v39 = vand.u32 3, %v2741_v32  ;;  %v14707_v32 = vsub.f32 1.0, %v12351_v21 }
 0x33f   : > { %v5518_v8 = vmul.f32 %v12621_v15, %v12617_v23 }
 0x340   : > { %v2720_v48 = vsel %vm2599_vm13, %v2719_v22, %v2718_v4  ;;  %v5206_v22 = vand.u32 3, %v2724_v3  ;;  %vm2743_vm15 = vcmp.lt.s32.totalorder %v2742_v39, 2  ;;  %vm2747_vm0 = vcmp.eq.s32.totalorder %v2742_v39, 2  ;;  %v12643_v3 = vpop.f32.mrf.mxu3  ;;  %9124 = vmatmul.msk.bf16.gmra.mxu3 %vm5704_vm9, %v12196_v25 }
 0x341   : > { %v5534_v33 = vsub.f32 1.0, %v5518_v8  ;;  %v2723_v1 = vsel %vm2598_vm14, %v12304_v24, %v2720_v48  ;;  %vm2744_vm2 = vcmp.eq.s32.totalorder %v2742_v39, 0 }
 0x342   : > { %v2725_v57 = vmul.f32 %v2723_v1, %v2723_v1  ;;  %vm5211_vm1 = vcmp.eq.s32.totalorder %v5206_v22, 2  ;;  %vm5207_vm5 = vcmp.lt.s32.totalorder %v5206_v22, 2  ;;  %vm5208_vm3 = vcmp.eq.s32.totalorder %v5206_v22, 0 }
 0x343   : > { %v5646_v52 = vpack.c.bf16 %v5534_v33, %v5534_v33 }
 0x344   : > { %v2726_v50 = vmul.f32 -0.001358992, %v2725_v57  ;;  %v2733_v46 = vmul.f32 -0.00019511016, %v2725_v57 }
 0x345   : > { %v5773_v63 = vsel %vm5729_vm6, %v5646_v52, 0  ;;  %v5452_v52 = vmul.f32 %v12362_v29, %v12348_v7 }
 0x346   : > { %6465 = vmatpush.bf16.msrb.mxu2 %v5773_v63  ;;  %v2727_v44 = vadd.f32 0.041655596, %v2726_v50  ;;  %v2734_v55 = vadd.f32 0.008332121, %v2733_v46  ;;  %v5454_v50 = vmul.f32 %v5422_v47, %v12609_v10 }
 0x348   : > { %v2728_v19 = vmul.f32 %v2727_v44, %v2725_v57  ;;  %v2735_v4 = vmul.f32 %v2734_v55, %v2725_v57  ;;  %v12641_v44 = vpop.f32.mrf.mxu2  ;;  %v5469_v55 = vsub.f32 1.0, %v5453_v0  ;;  %9116 = vmatmul.msk.bf16.gmra.mxu2 %vm5704_vm9, %v12196_v25  ;;  %v5470_v29 = vsub.f32 1.0, %v5454_v50 }
 0x349   : > { %v14708_v0 = vsub.f32 1.0, %v12523_v45  ;;  %v14711_v45 = vsub.f32 1.0, %v12498_v41 }
 0x34a   : > { %v2729_v27 = vadd.f32 -0.4999988, %v2728_v19  ;;  %v2736_v17 = vadd.f32 -0.16666654, %v2735_v4 }
 0x34b   : > { %v5629_v4 = vpack.c.bf16 %v5469_v55, %v14708_v0  ;;  %v5564_v0 = vpack.c.bf16 %v12327_v43, %v12293_v12 }
 0x34c   : > { %v2730_v8 = vmul.f32 %v2729_v27, %v2725_v57  ;;  %v2737_v48 = vmul.f32 %v2736_v17, %v2725_v57  ;;  %v5468_v57 = vsub.f32 1.0, %v5452_v52  ;;  %v5630_v27 = vpack.c.bf16 %v5470_v29, %v5406_v61 }
 0x34d   : > { %v14710_v52 = vsub.f32 1.0, %v12330_v35  ;;  %6417 = vmatpush.bf16.msrb.mxu1 %v5629_v4  ;;  %v14712_v61 = vsub.f32 1.0, %v12513_v42  ;;  %v5501_v42 = vmul.f32 %v12548_v13, %v5469_v55  ;;  %v5580_v55 = vpack.c.bf16 %v12373_v6, %v12348_v7 }
 0x34e   : > { %v2731_v33 = vadd.f32 1.0, %v2730_v8  ;;  %v2738_v49 = vadd.f32 1.0, %v2737_v48  ;;  %v5628_v19 = vpack.c.bf16 %v5468_v57, %v14707_v32  ;;  %v12656_v8 = vpop.f32.mrf.mxu0  ;;  %v12658_v48 = vpop.f32.mrf.mxu1  ;;  %6466 = vmatpush.bf16.msrb.mxu2 %v5630_v27  ;;  %v5500_v41 = vmul.f32 %v12382_v51, %v5468_v57 }
 0x34f   : > { %v5582_v7 = vpack.c.bf16 %v12617_v23, %v12609_v10  ;;  %v5565_v4 = vpack.c.bf16 %v12510_v38, %v12495_v14  ;;  %v5566_v27 = vpack.c.bf16 %v12599_v11, %v12589_v40  ;;  %v6787_v38 = vmax.f32 %v12658_v48, 0.0 }
 0x350   : > { %v2739_v46 = vmul.f32 %v2738_v49, %v2723_v1  ;;  %v2748_v63 = vxor.u32 2147483648, %v2731_v33  ;;  %6368 = vmatpush.bf16.msrb.mxu0 %v5628_v19  ;;  %v14709_v49 = vsub.f32 1.0, %v12296_v9  ;;  %v14713_v9 = vsub.f32 1.0, %v12602_v20  ;;  %v12680_v22 = vpop.f32.mrf.mxu2 }
 0x351   : > { %v5597_v20 = vpack.c.bf16 %v12480_v31, %v5501_v42 }
 0x352   : > { %v2745_v36 = vxor.u32 2147483648, %v2739_v46  ;;  %v2749_v47 = vsel %vm2747_vm0, %v2748_v63, %v2739_v46  ;;  %v5213_v1 = vsel %vm5211_vm1, %v2748_v63, %v2739_v46  ;;  %v5612_v50 = vpack.c.bf16 %v14710_v52, %v14709_v49  ;;  %v9336_v49 = vld [vmem:[%s9422_s27 + $0x60] sm:$0xff] }
 0x353   : > { %v5614_v35 = vpack.c.bf16 %v14713_v9, %v5278_v18  ;;  %v5596_v18 = vpack.c.bf16 %v12275_v54, %v5500_v41  ;;  %v12706_v54 = vld [vmem:[%s14434_s1 + $0x18] sm:$0xff]  ;;  %v5548_v52 = vpack.c.bf16 %v12271_v34, %v9336_v49  ;;  %v6754_v9 = vmax.f32 %v12306_v58, 0.0 }
 0x354   : > { %v2746_v17 = vsel %vm2744_vm2, %v2731_v33, %v2745_v36  ;;  %v5210_v25 = vsel %vm5208_vm3, %v2731_v33, %v2745_v36  ;;  %v5613_v33 = vpack.c.bf16 %v14712_v61, %v14711_v45  ;;  %6369 = vmatpush.bf16.msrb.mxu0 %v5612_v50  ;;  %v12682_v36 = vpop.f32.mrf.mxu3  ;;  %v9338_v61 = vld [vmem:[%s9422_s27 + $0x70] sm:$0xff]  ;;  %v6755_v41 = vmax.f32 %v12147_v53, 0.0 }
 0x355   : > { %v2750_v21 = vsel %vm2743_vm15, %v2746_v17, %v2749_v47  ;;  %v5214_v24 = vsel %vm5207_vm5, %v5210_v25, %v5213_v1  ;;  %v5502_v47 = vmul.f32 %v12621_v15, %v5470_v29  ;;  %6467 = vmatpush.bf16.msrb.mxu2 %v5614_v35  ;;  %v5581_v29 = vpack.c.bf16 %v12543_v16, %v12520_v28 }
 0x356   : > { %v12670_v46 = vsel %vm2740_vm4, nan, %v2750_v21  ;;  %v12672_v63 = vsel %vm2740_vm4, nan, %v5214_v24  ;;  %6418 = vmatpush.bf16.msrb.mxu1 %v5613_v33  ;;  %v5824_v15 = vpop.f32.mrf.mxu0  ;;  %v5873_v57 = vpop.f32.mrf.mxu1  ;;  %9101 = vmatmul.msk.bf16.gmra.mxu0 %vm5704_vm9, %v12706_v54  ;;  %v6786_v17 = vmax.f32 %v12656_v8, 0.0  ;;  %v6788_v21 = vmax.f32 %v12680_v22, 0.0  ;;  %v9337_v24 = vld [vmem:[%s9422_s27 + $0x68] sm:$0xff] }
 0x357   : > { %v5231_v39 = vadd.f32 %v12670_v46, %v12670_v46  ;;  %v5598_v32 = vpack.c.bf16 %v12584_v30, %v5502_v47  ;;  %9109 = vmatmul.msk.bf16.gmra.mxu1 %vm5704_vm9, %v12706_v54  ;;  %v6802_v25 = vmax.f32 %v5824_v15, 0.0  ;;  %v6803_v40 = vmax.f32 %v5873_v57, 0.0 }
 0x358   : > { %6370 = vmatpush.bf16.msrb.mxu0 %v5596_v18  ;;  %v5922_v16 = vpop.f32.mrf.mxu2  ;;  %9117 = vmatmul.msk.bf16.gmra.mxu2 %vm5704_vm9, %v12706_v54  ;;  %v5549_v45 = vpack.c.bf16 %v12476_v60, %v9337_v24  ;;  %v5550_v33 = vpack.c.bf16 %v12582_v59, %v9338_v61  ;;  %v6770_v35 = vmax.f32 %v12366_v5, 0.0  ;;  %v6771_v22 = vmax.f32 %v12186_v37, 0.0  ;;  %v14719_v61 = vld [vmem:[#allocation25_spill] sm:$0xff] }
 0x359   : > { %v12688_v1 = vmul.f32 %v5231_v39, %v12672_v63  ;;  %v12691_v2 = vmul.f32 %v5231_v39, %v12670_v46  ;;  %6468 = vmatpush.bf16.msrb.mxu2 %v5598_v32  ;;  %v6804_v14 = vmax.f32 %v5922_v16, 0.0  ;;  %v6930_v48 = vpack.c.bf16 %v6802_v25, %v6786_v17 }
 0x35a   : > { %6419 = vmatpush.bf16.msrb.mxu1 %v5597_v20  ;;  %v6931_v47 = vpack.c.bf16 %v6803_v40, %v6787_v38  ;;  %v6772_v59 = vmax.f32 %v12641_v44, 0.0  ;;  %v6756_v18 = vmax.f32 %v12632_v56, 0.0  ;;  %v6914_v20 = vpack.c.bf16 %v6770_v35, %v6754_v9  ;;  %v12770_v44 = vld [vmem:[%s14434_s1 + $0x20] sm:$0xff] }
 0x35b   : > { %v5279_v51 = vsub.f32 1.0, %v12691_v2  ;;  %v5295_v13 = vadd.f32 %v12688_v1, %v12688_v1  ;;  %v6932_v39 = vpack.c.bf16 %v6804_v14, %v6788_v21  ;;  %v6915_v37 = vpack.c.bf16 %v6771_v22, %v6755_v41  ;;  %v14714_v14 = vld [vmem:[#allocation32_spill] sm:$0xff]  ;;  %v14716_v2 = vld [vmem:[#allocation29_spill] sm:$0xff] }
 0x35c   : > { %6371 = vmatpush.bf16.msrb.mxu0 %v5580_v55  ;;  %v12724_v19 = vpop.f32.mrf.mxu3  ;;  %9125 = vmatmul.msk.bf16.gmra.mxu3 %vm5704_vm9, %v12706_v54  ;;  %v6916_v55 = vpack.c.bf16 %v6772_v59, %v6756_v18  ;;  %v14722_v22 = vld [vmem:[#allocation20_spill] sm:$0xff]  ;;  %v14724_v59 = vld [vmem:[#allocation21_spill] sm:$0xff] }
 0x35d   : > { %v12712_v31 = vmul.f32 %v5295_v13, %v5279_v51  ;;  %v12715_v30 = vmul.f32 %v5295_v13, %v12688_v1  ;;  %6469 = vmatpush.bf16.msrb.mxu2 %v5582_v7 }
 0x35e   : > { %6420 = vmatpush.bf16.msrb.mxu1 %v5581_v29  ;;  %v5983_v11 = vpop.f32.mrf.mxu0  ;;  %v6032_v8 = vpop.f32.mrf.mxu1 }
 0x35f   : > { %v5343_v6 = vsub.f32 1.0, %v12715_v30  ;;  %v5359_v28 = vadd.f32 %v12712_v31, %v12712_v31  ;;  %v6566_v13 = vmax.f32 %v5983_v11, 0.0  ;;  %v6567_v15 = vmax.f32 %v6032_v8, 0.0  ;;  %v14717_v30 = vld [vmem:[#allocation28_spill] sm:$0xff] }
 0x360   : > { %6372 = vmatpush.bf16.msrb.mxu0 %v5564_v0  ;;  %v6081_v58 = vpop.f32.mrf.mxu2 }
 0x361   : > { %v12732_v10 = vmul.f32 %v5359_v28, %v5343_v6  ;;  %v12735_v23 = vmul.f32 %v5359_v28, %v12712_v31  ;;  %6470 = vmatpush.bf16.msrb.mxu2 %v5566_v27  ;;  %v6568_v25 = vmax.f32 %v6081_v58, 0.0  ;;  %v5615_v11 = vpack.c.bf16 %v5343_v6, %v5279_v51  ;;  %v14718_v51 = vld [vmem:[#allocation30_spill] sm:$0xff] }
 0x362   : > { %6421 = vmatpush.bf16.msrb.mxu1 %v5565_v4 }
 0x363   : > { %v5407_v12 = vsub.f32 1.0, %v12735_v23  ;;  %v5423_v43 = vadd.f32 %v12732_v10, %v12732_v10 }
 0x364   : > { %6373 = vmatpush.bf16.msrb.mxu0 %v5548_v52  ;;  %v6130_v5 = vpop.f32.mrf.mxu3 }
 0x365   : > { %v12750_v50 = vmul.f32 %v5423_v43, %v5407_v12  ;;  %v5455_v42 = vmul.f32 %v5423_v43, %v12732_v10  ;;  %6471 = vmatpush.bf16.msrb.mxu2 %v5550_v33  ;;  %v6569_v43 = vmax.f32 %v6130_v5, 0.0  ;;  %v14720_v33 = vld [vmem:[#allocation24_spill] sm:$0xff]  ;;  %v14725_v5 = vld [vmem:[#allocation6_spill] sm:$0xff] }
 0x366   : > { %6422 = vmatpush.bf16.msrb.mxu1 %v5549_v45  ;;  %v5985_v29 = vpop.f32.mrf.mxu0  ;;  %v6034_v7 = vpop.f32.mrf.mxu1  ;;  %9102 = vmatmul.msk.bf16.gmra.mxu0 %vm5704_vm9, %v12770_v44  ;;  %v6580_v18 = vmax.f32 %v14725_v5, 0.0 }
 0x367   : > { %v5487_v34 = vadd.f32 %v12750_v50, %v12750_v50  ;;  %v5471_v32 = vsub.f32 1.0, %v5455_v42  ;;  %9110 = vmatmul.msk.bf16.gmra.mxu1 %vm5704_vm9, %v12770_v44  ;;  %v6582_v56 = vmax.f32 %v5985_v29, 0.0  ;;  %v6583_v28 = vmax.f32 %v6034_v7, 0.0  ;;  %v14723_v42 = vld [vmem:[#allocation19_spill] sm:$0xff] }
 0x368   : > { %7106 = vmatpush.bf16.msra.mxu0 %v6930_v48  ;;  %v6083_v27 = vpop.f32.mrf.mxu2  ;;  %9118 = vmatmul.msk.bf16.gmra.mxu2 %vm5704_vm9, %v12770_v44  ;;  %v14721_v48 = vld [vmem:[#allocation26_spill] sm:$0xff]  ;;  %v5583_v9 = vpack.c.bf16 %v12750_v50, %v12732_v10  ;;  %v5567_v10 = vpack.c.bf16 %v12712_v31, %v12688_v1  ;;  %v14728_v1 = vld [vmem:[#allocation4_spill] sm:$0xff]  ;;  %v6789_v7 = vmax.f32 %v12682_v36, 0.0 }
 0x369   : > { %v5519_v60 = vmul.f32 %v5487_v34, %v12750_v50  ;;  %7204 = vmatpush.bf16.msra.mxu2 %v6932_v39  ;;  %v5631_v0 = vpack.c.bf16 %v5471_v32, %v5407_v12  ;;  %v12777_v4 = vpack.c.bf16 %v6582_v56, %v6566_v13  ;;  %v12779_v23 = vpack.c.bf16 %v6583_v28, %v6567_v15  ;;  %v14715_v12 = vld [vmem:[#allocation33_spill] sm:$0xff]  ;;  %v14726_v15 = vld [vmem:[#allocation15_spill] sm:$0xff]  ;;  %v14729_v56 = vld [vmem:[#allocation16_spill] sm:$0xff] }
 0x36a   : > { %7155 = vmatpush.bf16.msra.mxu1 %v6931_v47  ;;  %v6584_v38 = vmax.f32 %v6083_v27, 0.0  ;;  %v5503_v8 = vmul.f32 %v5487_v34, %v5471_v32  ;;  %v6564_v31 = vmax.f32 %v14728_v1, 0.0  ;;  %v14738_v1 = vld [vmem:[#allocation3_spill] sm:$0xff] }
 0x36b   : > { %v5535_v53 = vsub.f32 1.0, %v5519_v60 }
 0x36c   : > { %7107 = vmatpush.bf16.msra.mxu0 %v6914_v20  ;;  %v6132_v17 = vpop.f32.mrf.mxu3  ;;  %9126 = vmatmul.msk.bf16.gmra.mxu3 %vm5704_vm9, %v12770_v44  ;;  %v12790_v49 = vpack.c.bf16 %v6584_v38, %v6568_v25  ;;  %v5599_v6 = vpack.c.bf16 %v12672_v63, %v5503_v8  ;;  %v12808_v63 = vld [vmem:[%s14434_s1 + $0x28] sm:$0xff]  ;;  %v6805_v20 = vmax.f32 %v12724_v19, 0.0  ;;  %v9341_v19 = vld [vmem:[%s9422_s27 + $0x78] sm:$0xff]  ;;  %v6820_v27 = vpack.c.bf16 %v6580_v18, %v6564_v31 }
 0x36d   : > { %v5647_v57 = vpack.c.bf16 %v5535_v53, %v5535_v53  ;;  %7205 = vmatpush.bf16.msra.mxu2 %v6916_v55  ;;  %v6585_v40 = vmax.f32 %v6132_v17, 0.0  ;;  %v5551_v28 = vpack.c.bf16 %v12670_v46, %v9341_v19  ;;  %v6773_v38 = vmax.f32 %v12643_v3, 0.0  ;;  %v14735_v18 = vld [vmem:[#allocation23_spill] sm:$0xff] }
 0x36e   : > { %7156 = vmatpush.bf16.msra.mxu1 %v6915_v37  ;;  %v6037_v21 = vpop.f32.mrf.mxu1  ;;  %v6933_v17 = vpack.c.bf16 %v6805_v20, %v6789_v7  ;;  %v6757_v46 = vmax.f32 %v12634_v62, 0.0  ;;  %v6565_v31 = vmax.f32 %v14738_v1, 0.0  ;;  %v14739_v7 = vld [vmem:[#allocation17_spill] sm:$0xff] }
 0x36f   : > { %v5776_v16 = vsel %vm5729_vm6, %v5647_v57, 0  ;;  %v12792_v52 = vpack.c.bf16 %v6585_v40, %v6569_v43  ;;  %v6599_v34 = vmax.f32 %v6037_v21, 0.0  ;;  %v14727_v57 = vld [vmem:[#allocation14_spill] sm:$0xff]  ;;  %v14730_v43 = vld [vmem:[#allocation5_spill] sm:$0xff] }
 0x370   : > { %6514 = vmatpush.bf16.msrb.mxu3 %v5776_v16  ;;  %7108 = vmatpush.bf16.msra.mxu0 %v11982_v26  ;;  %v5988_v26 = vpop.f32.mrf.mxu0  ;;  %v6086_v24 = vpop.f32.mrf.mxu2 }
 0x371   : > { %7206 = vmatpush.bf16.msra.mxu2 %v14715_v12  ;;  %v6598_v35 = vmax.f32 %v5988_v26, 0.0  ;;  %v6600_v32 = vmax.f32 %v6086_v24, 0.0  ;;  %v6917_v12 = vpack.c.bf16 %v6773_v38, %v6757_v46  ;;  %v14732_v24 = vld [vmem:[#allocation34_spill] sm:$0xff] }
 0x372   : > { %7157 = vmatpush.bf16.msra.mxu1 %v14714_v14  ;;  %v14731_v14 = vld [vmem:[#allocation2_spill] sm:$0xff] }
 0x374   : > { %6515 = vmatpush.bf16.msrb.mxu3 %v5631_v0  ;;  %7109 = vmatpush.bf16.msra.mxu0 %v14716_v2  ;;  %v6135_v45 = vpop.f32.mrf.mxu3 }
 0x375   : > { %7207 = vmatpush.bf16.msra.mxu2 %v14718_v51  ;;  %v6601_v13 = vmax.f32 %v6135_v45, 0.0 }
 0x376   : > { %7158 = vmatpush.bf16.msra.mxu1 %v14717_v30  ;;  %v6039_v41 = vpop.f32.mrf.mxu1  ;;  %v12847_v30 = vld [vmem:[%s14434_s1 + $0x30] sm:$0xff] }
 0x377   : > { %9111 = vmatmul.msk.bf16.gmra.mxu1 %vm5704_vm9, %v12808_v63  ;;  %v6615_v60 = vmax.f32 %v6039_v41, 0.0  ;;  %v14733_v41 = vld [vmem:[#allocation31_spill] sm:$0xff] }
 0x378   : > { %6516 = vmatpush.bf16.msrb.mxu3 %v5615_v11  ;;  %7110 = vmatpush.bf16.msra.mxu0 %v14719_v61  ;;  %v5990_v39 = vpop.f32.mrf.mxu0  ;;  %v6088_v53 = vpop.f32.mrf.mxu2 }
 0x379   : > { %7208 = vmatpush.bf16.msra.mxu2 %v14721_v48  ;;  %v6614_v47 = vmax.f32 %v5990_v39, 0.0  ;;  %9103 = vmatmul.msk.bf16.gmra.mxu0 %vm5704_vm9, %v12808_v63  ;;  %v12821_v58 = vpack.c.bf16 %v6615_v60, %v6599_v34  ;;  %v6616_v55 = vmax.f32 %v6088_v53, 0.0 }
 0x37a   : > { %7159 = vmatpush.bf16.msra.mxu1 %v14720_v33  ;;  %9119 = vmatmul.msk.bf16.gmra.mxu2 %vm5704_vm9, %v12808_v63 }
 0x37b   : > { %v12819_v50 = vpack.c.bf16 %v6614_v47, %v6598_v35  ;;  %v12834_v16 = vpack.c.bf16 %v6616_v55, %v6600_v32  ;;  %v14734_v47 = vld [vmem:[#allocation27_spill] sm:$0xff] }
 0x37c   : > { %6517 = vmatpush.bf16.msrb.mxu3 %v5599_v6  ;;  %7111 = vmatpush.bf16.msra.mxu0 %v14722_v22  ;;  %v6137_v37 = vpop.f32.mrf.mxu3 }
 0x37d   : > { %7209 = vmatpush.bf16.msra.mxu2 %v14724_v59  ;;  %v6617_v29 = vmax.f32 %v6137_v37, 0.0  ;;  %9127 = vmatmul.msk.bf16.gmra.mxu3 %vm5704_vm9, %v12808_v63  ;;  %v12872_v37 = vld [vmem:[%s14434_s1 + $0x38] sm:$0xff] }
 0x37e   : > { %7160 = vmatpush.bf16.msra.mxu1 %v14723_v42  ;;  %v6042_v36 = vpop.f32.mrf.mxu1  ;;  %14736 = vst [vmem:[#allocation8_spill] sm:$0xff] %v12872_v37 }
 0x37f   : > { %v12836_v0 = vpack.c.bf16 %v6617_v29, %v6601_v13  ;;  %v6631_v26 = vmax.f32 %v6042_v36, 0.0 }
 0x380   : > { %6518 = vmatpush.bf16.msrb.mxu3 %v5583_v9  ;;  %7112 = vmatpush.bf16.msra.mxu0 %v14726_v15  ;;  %v5993_v25 = vpop.f32.mrf.mxu0  ;;  %v6091_v40 = vpop.f32.mrf.mxu2  ;;  %v14737_v15 = vld [vmem:[#allocation9_spill] sm:$0xff] }
 0x381   : > { %7210 = vmatpush.bf16.msra.mxu2 %v14729_v56  ;;  %v6630_v8 = vmax.f32 %v5993_v25, 0.0  ;;  %v6632_v33 = vmax.f32 %v6091_v40, 0.0 }
 0x382   : > { %7161 = vmatpush.bf16.msra.mxu1 %v14727_v57  ;;  %v6581_v57 = vmax.f32 %v14737_v15, 0.0 }
 0x384   : > { %6519 = vmatpush.bf16.msrb.mxu3 %v5567_v10  ;;  %7113 = vmatpush.bf16.msra.mxu0 %v14730_v43  ;;  %v6140_v11 = vpop.f32.mrf.mxu3  ;;  %v6821_v36 = vpack.c.bf16 %v6581_v57, %v6565_v31 }
 0x385   : > { %7211 = vmatpush.bf16.msra.mxu2 %v6820_v27  ;;  %v6633_v48 = vmax.f32 %v6140_v11, 0.0 }
 0x386   : > { %7162 = vmatpush.bf16.msra.mxu1 %v14731_v14  ;;  %v6044_v2 = vpop.f32.mrf.mxu1 }
 0x387   : > { %9112 = vmatmul.msk.bf16.gmra.mxu1 %vm5704_vm9, %v12847_v30  ;;  %v6647_v51 = vmax.f32 %v6044_v2, 0.0 }
 0x388   : > { %6520 = vmatpush.bf16.msrb.mxu3 %v5551_v28  ;;  %v5995_v21 = vpop.f32.mrf.mxu0  ;;  %v6093_v45 = vpop.f32.mrf.mxu2 }
 0x389   : > { %v6646_v3 = vmax.f32 %v5995_v21, 0.0  ;;  %9104 = vmatmul.msk.bf16.gmra.mxu0 %vm5704_vm9, %v12847_v30  ;;  %v12855_v6 = vpack.c.bf16 %v6647_v51, %v6631_v26  ;;  %v6648_v9 = vmax.f32 %v6093_v45, 0.0  ;;  %v9344_v26 = vld [vmem:[%s14434_s1] sm:$0xff] }
 0x38a   : > { %9120 = vmatmul.msk.bf16.gmra.mxu2 %vm5704_vm9, %v12847_v30 }
 0x38b   : > { %v12853_v62 = vpack.c.bf16 %v6646_v3, %v6630_v8  ;;  %v12860_v34 = vpack.c.bf16 %v6648_v9, %v6632_v33 }
 0x38c   : > { %7253 = vmatpush.bf16.msra.mxu3 %v6933_v17  ;;  %v6142_v61 = vpop.f32.mrf.mxu3 }
 0x38d   : > { %v6649_v35 = vmax.f32 %v6142_v61, 0.0  ;;  %9128 = vmatmul.msk.bf16.gmra.mxu3 %vm5704_vm9, %v12847_v30 }
 0x38e   : > { %v6047_v42 = vpop.f32.mrf.mxu1 }
 0x38f   : > { %v12862_v39 = vpack.c.bf16 %v6649_v35, %v6633_v48  ;;  %v6663_v5 = vmax.f32 %v6047_v42, 0.0  ;;  %v9345_v48 = vld [vmem:[%s14434_s1 + $0x8] sm:$0xff] }
 0x390   : > { %7254 = vmatpush.bf16.msra.mxu3 %v6917_v12  ;;  %v5998_v22 = vpop.f32.mrf.mxu0  ;;  %v6096_v60 = vpop.f32.mrf.mxu2 }
 0x391   : > { %v6662_v10 = vmax.f32 %v5998_v22, 0.0  ;;  %v6664_v28 = vmax.f32 %v6096_v60, 0.0 }
 0x394   : > { %7255 = vmatpush.bf16.msra.mxu3 %v14732_v24  ;;  %v6145_v59 = vpop.f32.mrf.mxu3 }
 0x395   : > { %v6665_v27 = vmax.f32 %v6145_v59, 0.0 }
 0x396   : > { %v6049_v53 = vpop.f32.mrf.mxu1 }
 0x397   : > { %9113 = vmatmul.msk.bf16.gmra.mxu1 %vm5704_vm9, %v12872_v37  ;;  %v6679_v13 = vmax.f32 %v6049_v53, 0.0 }
 0x398   : > { %7256 = vmatpush.bf16.msra.mxu3 %v14733_v41  ;;  %v6000_v20 = vpop.f32.mrf.mxu0  ;;  %v6098_v56 = vpop.f32.mrf.mxu2 }
 0x399   : > { %v6678_v32 = vmax.f32 %v6000_v20, 0.0  ;;  %9105 = vmatmul.msk.bf16.gmra.mxu0 %vm5704_vm9, %v12872_v37  ;;  %v12881_v29 = vpack.c.bf16 %v6679_v13, %v6663_v5  ;;  %v6680_v17 = vmax.f32 %v6098_v56, 0.0 }
 0x39a   : > { %9121 = vmatmul.msk.bf16.gmra.mxu2 %vm5704_vm9, %v12872_v37 }
 0x39b   : > { %v12879_v55 = vpack.c.bf16 %v6678_v32, %v6662_v10  ;;  %v12887_v43 = vpack.c.bf16 %v6680_v17, %v6664_v28  ;;  %v9346_v10 = vld [vmem:[%s14434_s1 + $0x10] sm:$0xff] }
 0x39c   : > { %7257 = vmatpush.bf16.msra.mxu3 %v14734_v47  ;;  %v6147_v19 = vpop.f32.mrf.mxu3 }
 0x39d   : > { %v6681_v25 = vmax.f32 %v6147_v19, 0.0  ;;  %9129 = vmatmul.msk.bf16.gmra.mxu3 %vm5704_vm9, %v12872_v37 }
 0x39e   : > { %v12895_v46 = vpop.f32.mrf.mxu1 }
 0x39f   : > { %v12889_v14 = vpack.c.bf16 %v6681_v25, %v6665_v27 }
 0x3a0   : > { %7258 = vmatpush.bf16.msra.mxu3 %v14735_v18  ;;  %v12893_v38 = vpop.f32.mrf.mxu0  ;;  %v12897_v40 = vpop.f32.mrf.mxu2 }
 0x3a4   : > { %7259 = vmatpush.bf16.msra.mxu3 %v14739_v7  ;;  %v12899_v11 = vpop.f32.mrf.mxu3 }
 0x3a6   : > { %v12903_v8 = vpop.f32.mrf.mxu1 }
 0x3a7   : > { %9138 = vmatmul.msk.bf16.vlgmr.msrb.gmra.mxu1 %vm5704_vm9, %v9344_v26 }
 0x3a8   : > { %7260 = vmatpush.bf16.msra.mxu3 %v6821_v36  ;;  %v12901_v12 = vpop.f32.mrf.mxu0  ;;  %v12910_v21 = vpop.f32.mrf.mxu2 }
 0x3a9   : > { %9130 = vmatmul.msk.bf16.vlgmr.msrb.gmra.mxu0 %vm5704_vm9, %v9344_v26 }
 0x3aa   : > { %9146 = vmatmul.msk.bf16.vlgmr.msrb.gmra.mxu2 %vm5704_vm9, %v9344_v26 }
 0x3ac   : > { %v12912_v2 = vpop.f32.mrf.mxu3 }
 0x3ad   : > { %9154 = vmatmul.msk.bf16.vlgmr.msrb.gmra.mxu3 %vm5704_vm9, %v9344_v26 }
 0x3ae   : > { %v12918_v51 = vpop.f32.mrf.mxu1 }
 0x3b0   : > { %v12916_v3 = vpop.f32.mrf.mxu0  ;;  %v12920_v24 = vpop.f32.mrf.mxu2 }
 0x3b4   : > { %v12922_v45 = vpop.f32.mrf.mxu3 }
 0x3b6   : > { %v12926_v33 = vpop.f32.mrf.mxu1 }
 0x3b7   : > { %9139 = vmatmul.msk.bf16.gmra.mxu1 %vm5704_vm9, %v9345_v48 }
 0x3b8   : > { %v12924_v61 = vpop.f32.mrf.mxu0  ;;  %v12933_v9 = vpop.f32.mrf.mxu2 }
 0x3b9   : > { %9131 = vmatmul.msk.bf16.gmra.mxu0 %vm5704_vm9, %v9345_v48 }
 0x3ba   : > { %9147 = vmatmul.msk.bf16.gmra.mxu2 %vm5704_vm9, %v9345_v48 }
 0x3bc   : > { %v12935_v35 = vpop.f32.mrf.mxu3 }
 0x3bd   : > { %9155 = vmatmul.msk.bf16.gmra.mxu3 %vm5704_vm9, %v9345_v48 }
 0x3be   : > { %v6062_v22 = vpop.f32.mrf.mxu1 }
 0x3bf   : > { %v6759_v17 = vmax.f32 %v6062_v22, 0.0 }
 0x3c0   : > { %v6013_v41 = vpop.f32.mrf.mxu0  ;;  %v6111_v42 = vpop.f32.mrf.mxu2 }
 0x3c1   : > { %v6758_v27 = vmax.f32 %v6013_v41, 0.0 }
 0x3c4   : > { %v6160_v47 = vpop.f32.mrf.mxu3 }
 0x3c6   : > { %v6064_v59 = vpop.f32.mrf.mxu1 }
 0x3c7   : > { %9140 = vmatmul.msk.bf16.gmra.mxu1 %vm5704_vm9, %v9346_v10  ;;  %v6775_v36 = vmax.f32 %v6064_v59, 0.0  ;;  %v6742_v59 = vmax.f32 %v12924_v61, 0.0 }
 0x3c8   : > { %v6015_v60 = vpop.f32.mrf.mxu0  ;;  %v6113_v5 = vpop.f32.mrf.mxu2 }
 0x3c9   : > { %9132 = vmatmul.msk.bf16.gmra.mxu0 %vm5704_vm9, %v9346_v10  ;;  %v6774_v25 = vmax.f32 %v6015_v60, 0.0 }
 0x3ca   : > { %9148 = vmatmul.msk.bf16.gmra.mxu2 %vm5704_vm9, %v9346_v10 }
 0x3cc   : > { %v6162_v18 = vpop.f32.mrf.mxu3 }
 0x3cd   : > { %9156 = vmatmul.msk.bf16.gmra.mxu3 %vm5704_vm9, %v9346_v10  ;;  %v6777_v41 = vmax.f32 %v6162_v18, 0.0  ;;  %v6695_v18 = vmax.f32 %v12895_v46, 0.0  ;;  %v6729_v46 = vmax.f32 %v12922_v45, 0.0  ;;  %v6697_v45 = vmax.f32 %v12899_v11, 0.0 }
 0x3ce   : > { %v6067_v53 = vpop.f32.mrf.mxu1 }
 0x3cf   : > { %v6791_v57 = vmax.f32 %v6067_v53, 0.0 }
 0x3d0   : > { %v6018_v20 = vpop.f32.mrf.mxu0  ;;  %v6116_v32 = vpop.f32.mrf.mxu2 }
 0x3d1   : > { %v6790_v15 = vmax.f32 %v6018_v20, 0.0  ;;  %v6792_v10 = vmax.f32 %v6116_v32, 0.0  ;;  %v6743_v32 = vmax.f32 %v12926_v33, 0.0 }
 0x3d4   : > { %v6165_v13 = vpop.f32.mrf.mxu3 }
 0x3d5   : > { %v6793_v20 = vmax.f32 %v6165_v13, 0.0  ;;  %v6918_v13 = vpack.c.bf16 %v6774_v25, %v6758_v27 }
 0x3d6   : > { %v6069_v31 = vpop.f32.mrf.mxu1 }
 0x3d7   : > { %9141 = vmatmul.msk.bf16.gmra.mxu1 %vm5704_vm9, %v12706_v54  ;;  %v6807_v56 = vmax.f32 %v6069_v31, 0.0  ;;  %v6727_v31 = vmax.f32 %v12918_v51, 0.0  ;;  %v6761_v51 = vmax.f32 %v6160_v47, 0.0 }
 0x3d8   : > { %v6020_v1 = vpop.f32.mrf.mxu0  ;;  %v6118_v26 = vpop.f32.mrf.mxu2 }
 0x3d9   : > { %v6806_v7 = vmax.f32 %v6020_v1, 0.0  ;;  %9133 = vmatmul.msk.bf16.gmra.mxu0 %vm5704_vm9, %v12706_v54  ;;  %v6935_v28 = vpack.c.bf16 %v6807_v56, %v6791_v57  ;;  %v6808_v53 = vmax.f32 %v6118_v26, 0.0  ;;  %v6726_v1 = vmax.f32 %v12916_v3, 0.0 }
 0x3da   : > { %9149 = vmatmul.msk.bf16.gmra.mxu2 %vm5704_vm9, %v12706_v54  ;;  %v6919_v57 = vpack.c.bf16 %v6775_v36, %v6759_v17  ;;  %v6760_v56 = vmax.f32 %v6111_v42, 0.0  ;;  %v6921_v33 = vpack.c.bf16 %v6777_v41, %v6761_v51  ;;  %v6903_v47 = vpack.c.bf16 %v6743_v32, %v6727_v31 }
 0x3db   : > { %v6934_v19 = vpack.c.bf16 %v6806_v7, %v6790_v15  ;;  %7351 = vmatpush.bf16.msrb.mxu1 %v6935_v28  ;;  %v6776_v15 = vmax.f32 %v6113_v5, 0.0  ;;  %v6936_v22 = vpack.c.bf16 %v6808_v53, %v6792_v10  ;;  %v6694_v5 = vmax.f32 %v12893_v38, 0.0 }
 0x3dc   : > { %v6167_v48 = vpop.f32.mrf.mxu3  ;;  %v6711_v28 = vmax.f32 %v12903_v8, 0.0  ;;  %v6902_v42 = vpack.c.bf16 %v6742_v59, %v6726_v1  ;;  %v6728_v38 = vmax.f32 %v12920_v24, 0.0  ;;  %v6696_v24 = vmax.f32 %v12897_v40, 0.0 }
 0x3dd   : > { %v6809_v37 = vmax.f32 %v6167_v48, 0.0  ;;  %7302 = vmatpush.bf16.msrb.mxu0 %v6934_v19  ;;  %9157 = vmatmul.msk.bf16.gmra.mxu3 %vm5704_vm9, %v12706_v54  ;;  %v6744_v54 = vmax.f32 %v12933_v9, 0.0  ;;  %v6920_v61 = vpack.c.bf16 %v6776_v15, %v6760_v56  ;;  %v6710_v19 = vmax.f32 %v12901_v12, 0.0 }
 0x3de   : > { %v6228_v3 = vpop.f32.mrf.mxu1  ;;  %7400 = vmatpush.bf16.msrb.mxu2 %v6936_v22  ;;  %v6712_v9 = vmax.f32 %v12910_v21, 0.0  ;;  %v6887_v48 = vpack.c.bf16 %v6711_v28, %v6695_v18 }
 0x3df   : > { %v6937_v60 = vpack.c.bf16 %v6809_v37, %v6793_v20  ;;  %7352 = vmatpush.bf16.msrb.mxu1 %v6919_v57  ;;  %v6745_v37 = vmax.f32 %v12935_v35, 0.0  ;;  %v6713_v35 = vmax.f32 %v12912_v2, 0.0  ;;  %v6904_v25 = vpack.c.bf16 %v6744_v54, %v6728_v38 }
 0x3e0   : > { %v6179_v7 = vpop.f32.mrf.mxu0  ;;  %v6277_v27 = vpop.f32.mrf.mxu2  ;;  %v6571_v8 = vmax.f32 %v6228_v3, 0.0  ;;  %v6886_v26 = vpack.c.bf16 %v6710_v19, %v6694_v5  ;;  %v6888_v2 = vpack.c.bf16 %v6712_v9, %v6696_v24 }
 0x3e1   : > { %7449 = vmatpush.bf16.msrb.mxu3 %v6937_v60  ;;  %7303 = vmatpush.bf16.msrb.mxu0 %v6918_v13  ;;  %v6905_v12 = vpack.c.bf16 %v6745_v37, %v6729_v46  ;;  %v6570_v36 = vmax.f32 %v6179_v7, 0.0  ;;  %v6889_v1 = vpack.c.bf16 %v6713_v35, %v6697_v45  ;;  %v6572_v40 = vmax.f32 %v6277_v27, 0.0  ;;  %v14740_v45 = vld [vmem:[#allocation8_spill] sm:$0xff] }
 0x3e2   : > { %7401 = vmatpush.bf16.msrb.mxu2 %v6920_v61 }
 0x3e3   : > { %7353 = vmatpush.bf16.msrb.mxu1 %v6903_v47 }
 0x3e4   : > { %v6326_v17 = vpop.f32.mrf.mxu3 }
 0x3e5   : > { %7450 = vmatpush.bf16.msrb.mxu3 %v6921_v33  ;;  %7304 = vmatpush.bf16.msrb.mxu0 %v6902_v42  ;;  %v6573_v60 = vmax.f32 %v6326_v17, 0.0 }
 0x3e6   : > { %v6230_v20 = vpop.f32.mrf.mxu1  ;;  %7402 = vmatpush.bf16.msrb.mxu2 %v6904_v25 }
 0x3e7   : > { %9142 = vmatmul.msk.bf16.gmra.mxu1 %vm5704_vm9, %v12770_v44  ;;  %v6587_v53 = vmax.f32 %v6230_v20, 0.0 }
 0x3e8   : > { %v6181_v10 = vpop.f32.mrf.mxu0  ;;  %7354 = vmatpush.bf16.msrb.mxu1 %v6887_v48  ;;  %v6279_v41 = vpop.f32.mrf.mxu2 }
 0x3e9   : > { %v6586_v21 = vmax.f32 %v6181_v10, 0.0  ;;  %7451 = vmatpush.bf16.msrb.mxu3 %v6905_v12  ;;  %7305 = vmatpush.bf16.msrb.mxu0 %v6886_v26  ;;  %v12974_v15 = vpack.c.bf16 %v6587_v53, %v6571_v8  ;;  %v6588_v11 = vmax.f32 %v6279_v41, 0.0 }
 0x3ea   : > { %9134 = vmatmul.msk.bf16.gmra.mxu0 %vm5704_vm9, %v12770_v44  ;;  %7403 = vmatpush.bf16.msrb.mxu2 %v6888_v2 }
 0x3eb   : > { %v12972_v31 = vpack.c.bf16 %v6586_v21, %v6570_v36  ;;  %v12980_v32 = vpack.c.bf16 %v6588_v11, %v6572_v40  ;;  %9150 = vmatmul.msk.bf16.gmra.mxu2 %vm5704_vm9, %v12770_v44 }
 0x3ec   : > { %v6328_v22 = vpop.f32.mrf.mxu3  ;;  %7355 = vmatpush.bf16.msrb.mxu1 %v12881_v29 }
 0x3ed   : > { %v6589_v59 = vmax.f32 %v6328_v22, 0.0  ;;  %7452 = vmatpush.bf16.msrb.mxu3 %v6889_v1  ;;  %7306 = vmatpush.bf16.msrb.mxu0 %v12879_v55 }
 0x3ee   : > { %9158 = vmatmul.msk.bf16.gmra.mxu3 %vm5704_vm9, %v12770_v44  ;;  %v6233_v7 = vpop.f32.mrf.mxu1  ;;  %7404 = vmatpush.bf16.msrb.mxu2 %v12887_v43 }
 0x3ef   : > { %v12982_v13 = vpack.c.bf16 %v6589_v59, %v6573_v60  ;;  %v6603_v3 = vmax.f32 %v6233_v7, 0.0 }
 0x3f0   : > { %v6184_v57 = vpop.f32.mrf.mxu0  ;;  %7356 = vmatpush.bf16.msrb.mxu1 %v12855_v6  ;;  %v6282_v55 = vpop.f32.mrf.mxu2 }
 0x3f1   : > { %7453 = vmatpush.bf16.msrb.mxu3 %v12889_v14  ;;  %7307 = vmatpush.bf16.msrb.mxu0 %v12853_v62  ;;  %v6602_v44 = vmax.f32 %v6184_v57, 0.0 }
 0x3f2   : > { %7405 = vmatpush.bf16.msrb.mxu2 %v12860_v34 }
 0x3f4   : > { %v6331_v29 = vpop.f32.mrf.mxu3  ;;  %7357 = vmatpush.bf16.msrb.mxu1 %v12821_v58 }
 0x3f5   : > { %7454 = vmatpush.bf16.msrb.mxu3 %v12862_v39  ;;  %7308 = vmatpush.bf16.msrb.mxu0 %v12819_v50  ;;  %v6604_v39 = vmax.f32 %v6282_v55, 0.0  ;;  %v6605_v51 = vmax.f32 %v6331_v29, 0.0 }
 0x3f6   : > { %v6235_v43 = vpop.f32.mrf.mxu1  ;;  %7406 = vmatpush.bf16.msrb.mxu2 %v12834_v16 }
 0x3f7   : > { %9143 = vmatmul.msk.bf16.gmra.mxu1 %vm5704_vm9, %v12808_v63  ;;  %v6619_v14 = vmax.f32 %v6235_v43, 0.0 }
 0x3f8   : > { %v6186_v56 = vpop.f32.mrf.mxu0  ;;  %7358 = vmatpush.bf16.msrb.mxu1 %v12779_v23  ;;  %v6284_v6 = vpop.f32.mrf.mxu2 }
 0x3f9   : > { %v6618_v62 = vmax.f32 %v6186_v56, 0.0  ;;  %7455 = vmatpush.bf16.msrb.mxu3 %v12836_v0  ;;  %7309 = vmatpush.bf16.msrb.mxu0 %v12777_v4  ;;  %v13004_v58 = vpack.c.bf16 %v6619_v14, %v6603_v3  ;;  %v6620_v5 = vmax.f32 %v6284_v6, 0.0 }
 0x3fa   : > { %9135 = vmatmul.msk.bf16.gmra.mxu0 %vm5704_vm9, %v12808_v63  ;;  %7407 = vmatpush.bf16.msrb.mxu2 %v12790_v49 }
 0x3fb   : > { %v13002_v50 = vpack.c.bf16 %v6618_v62, %v6602_v44  ;;  %v13010_v4 = vpack.c.bf16 %v6620_v5, %v6604_v39  ;;  %9151 = vmatmul.msk.bf16.gmra.mxu2 %vm5704_vm9, %v12808_v63 }
 0x3fc   : > { %v6333_v34 = vpop.f32.mrf.mxu3 }
 0x3fd   : > { %v6621_v18 = vmax.f32 %v6333_v34, 0.0  ;;  %7456 = vmatpush.bf16.msrb.mxu3 %v12792_v52  ;;  %v6976_v34 = vld [vmem:[%s14436_s3 + $0x70] sm:$0xff] }
 0x3fe   : > { %9159 = vmatmul.msk.bf16.gmra.mxu3 %vm5704_vm9, %v12808_v63  ;;  %v6238_v0 = vpop.f32.mrf.mxu1  ;;  %7050 = vperm.xlu0 %9243, %v6976_v34   ;;  %v6963_v34 = vld [vmem:[%s14436_s3 + $0x8] sm:$0xff] }
 0x3ff   : > { %v13012_v23 = vpack.c.bf16 %v6621_v18, %v6605_v51  ;;  %v6635_v33 = vmax.f32 %v6238_v0, 0.0 }
 0x400   : > { %v6189_v16 = vpop.f32.mrf.mxu0  ;;  %v6287_v54 = vpop.f32.mrf.mxu2 }
 0x401   : > { %v6634_v61 = vmax.f32 %v6189_v16, 0.0  ;;  %v6636_v17 = vmax.f32 %v6287_v54, 0.0  ;;  %v6977_v16 = vld [vmem:[%s14436_s3 + $0x78] sm:$0xff] }
 0x404   : > { %v6336_v37 = vpop.f32.mrf.mxu3 }
 0x405   : > { %v6637_v38 = vmax.f32 %v6336_v37, 0.0 }
 0x406   : > { %v6240_v49 = vpop.f32.mrf.mxu1  ;;  %7055 = vperm.xlu0 %9243, %v6977_v16   ;;  %v6968_v16 = vld [vmem:[%s14436_s3 + $0x30] sm:$0xff] }
 0x407   : > { %9144 = vmatmul.msk.bf16.gmra.mxu1 %vm5704_vm9, %v12847_v30  ;;  %v6651_v28 = vmax.f32 %v6240_v49, 0.0 }
 0x408   : > { %v6191_v19 = vpop.f32.mrf.mxu0  ;;  %v6289_v63 = vpop.f32.mrf.mxu2 }
 0x409   : > { %v6650_v52 = vmax.f32 %v6191_v19, 0.0  ;;  %v13022_v47 = vpack.c.bf16 %v6651_v28, %v6635_v33  ;;  %v6652_v46 = vmax.f32 %v6289_v63, 0.0  ;;  %v6970_v33 = vld [vmem:[%s14436_s3 + $0x40] sm:$0xff] }
 0x40a   : > { %9136 = vmatmul.msk.bf16.gmra.mxu0 %vm5704_vm9, %v12847_v30  ;;  %v13098_v19 = vld [vmem:[%s14435_s2] sm:$0xff] }
 0x40b   : > { %v13020_v42 = vpack.c.bf16 %v6650_v52, %v6634_v61  ;;  %v13026_v35 = vpack.c.bf16 %v6652_v46, %v6636_v17  ;;  %9152 = vmatmul.msk.bf16.gmra.mxu2 %vm5704_vm9, %v12847_v30  ;;  %v6969_v17 = vld [vmem:[%s14436_s3 + $0x38] sm:$0xff] }
 0x40c   : > { %v6338_v27 = vpop.f32.mrf.mxu3 }
 0x40d   : > { %v6653_v9 = vmax.f32 %v6338_v27, 0.0  ;;  %v6974_v27 = vld [vmem:[%s14436_s3 + $0x60] sm:$0xff] }
 0x40e   : > { %9160 = vmatmul.msk.bf16.gmra.mxu3 %vm5704_vm9, %v12847_v30  ;;  %v6243_v36 = vpop.f32.mrf.mxu1  ;;  %7020 = vperm.xlu0 %9243, %v6970_v33  }
 0x40f   : > { %v13028_v25 = vpack.c.bf16 %v6653_v9, %v6637_v38  ;;  %v6667_v10 = vmax.f32 %v6243_v36, 0.0  ;;  %v6972_v38 = vld [vmem:[%s14436_s3 + $0x50] sm:$0xff]  ;;  %7040 = vperm.xlu1 %9244, %v6974_v27  }
 0x410   : > { %v6194_v12 = vpop.f32.mrf.mxu0  ;;  %v6292_v8 = vpop.f32.mrf.mxu2  ;;  %7030 = vperm.xlu2 %9245, %v6972_v38  }
 0x411   : > { %v6666_v48 = vmax.f32 %v6194_v12, 0.0  ;;  %v6668_v22 = vmax.f32 %v6292_v8, 0.0  ;;  %v6975_v8 = vld [vmem:[%s14436_s3 + $0x68] sm:$0xff] }
 0x414   : > { %v6341_v26 = vpop.f32.mrf.mxu3 }
 0x415   : > { %v6669_v40 = vmax.f32 %v6341_v26, 0.0  ;;  %v6964_v26 = vld [vmem:[%s14436_s3 + $0x10] sm:$0xff] }
 0x416   : > { %v6245_v24 = vpop.f32.mrf.mxu1  ;;  %7015 = vperm.xlu0 %9243, %v6969_v17  }
 0x417   : > { %9145 = vmatmul.msk.bf16.gmra.mxu1 %vm5704_vm9, %v14740_v45  ;;  %v6683_v53 = vmax.f32 %v6245_v24, 0.0  ;;  %7045 = vperm.xlu1 %9244, %v6975_v8  }
 0x418   : > { %v6196_v20 = vpop.f32.mrf.mxu0  ;;  %v6294_v30 = vpop.f32.mrf.mxu2 }
 0x419   : > { %v6682_v21 = vmax.f32 %v6196_v20, 0.0  ;;  %v13038_v1 = vpack.c.bf16 %v6683_v53, %v6667_v10  ;;  %v6684_v60 = vmax.f32 %v6294_v30, 0.0  ;;  %v6973_v10 = vld [vmem:[%s14436_s3 + $0x58] sm:$0xff] }
 0x41a   : > { %9137 = vmatmul.msk.bf16.gmra.mxu0 %vm5704_vm9, %v14740_v45  ;;  %7035 = vperm.xlu2 %9245, %v6973_v10  }
 0x41b   : > { %v13036_v2 = vpack.c.bf16 %v6682_v21, %v6666_v48  ;;  %v13042_v59 = vpack.c.bf16 %v6684_v60, %v6668_v22  ;;  %9153 = vmatmul.msk.bf16.gmra.mxu2 %vm5704_vm9, %v14740_v45  ;;  %v13130_v48 = vld [vmem:[%s14435_s2 + $0x8] sm:$0xff] }
 0x41c   : > { %v6343_v41 = vpop.f32.mrf.mxu3 }
 0x41d   : > { %v6685_v11 = vmax.f32 %v6343_v41, 0.0 }
 0x41e   : > { %9161 = vmatmul.msk.bf16.gmra.mxu3 %vm5704_vm9, %v14740_v45  ;;  %v13052_v55 = vpop.f32.mrf.mxu1  ;;  %6990 = vperm.xlu0 %9243, %v6964_v26  }
 0x41f   : > { %v13044_v57 = vpack.c.bf16 %v6685_v11, %v6669_v40  ;;  %v6971_v11 = vld [vmem:[%s14436_s3 + $0x48] sm:$0xff] }
 0x420   : > { %v13050_v7 = vpop.f32.mrf.mxu0  ;;  %v13054_v29 = vpop.f32.mrf.mxu2  ;;  %7025 = vperm.xlu1 %9244, %v6971_v11  }
 0x422   : > { %7010 = vperm.xlu2 %9245, %v6968_v16  }
 0x424   : > { %v13056_v44 = vpop.f32.mrf.mxu3 }
 0x426   : > { %v13060_v56 = vpop.f32.mrf.mxu1  ;;  %6985 = vperm.xlu0 %9243, %v6963_v34  }
 0x427   : > { %7163 = vmatmul.bf16.vlgmr.msra.gmra.mxu1 %v13098_v19  ;;  %v6715_v16 = vmax.f32 %v13060_v56, 0.0 }
 0x428   : > { %v13058_v3 = vpop.f32.mrf.mxu0  ;;  %v13062_v43 = vpop.f32.mrf.mxu2 }
 0x429   : > { %v6714_v34 = vmax.f32 %v13058_v3, 0.0 }
 0x42a   : > { %7114 = vmatmul.bf16.vlgmr.msra.gmra.mxu0 %v13098_v19 }
 0x42b   : > { %7212 = vmatmul.bf16.vlgmr.msra.gmra.mxu2 %v13098_v19 }
 0x42c   : > { %v13064_v62 = vpop.f32.mrf.mxu3 }
 0x42d   : > { %v6717_v3 = vmax.f32 %v13064_v62, 0.0 }
 0x42e   : > { %v13068_v6 = vpop.f32.mrf.mxu1  ;;  %7261 = vmatmul.bf16.vlgmr.msra.gmra.mxu3 %v13098_v19 }
 0x430   : > { %v13066_v14 = vpop.f32.mrf.mxu0  ;;  %v13073_v39 = vpop.f32.mrf.mxu2 }
 0x434   : > { %v13075_v51 = vpop.f32.mrf.mxu3 }
 0x436   : > { %v13079_v18 = vpop.f32.mrf.mxu1 }
 0x437   : > { %7168 = vmatmul.bf16.gmra.mxu1 %v13130_v48 }
 0x438   : > { %v13077_v5 = vpop.f32.mrf.mxu0  ;;  %v13084_v0 = vpop.f32.mrf.mxu2 }
 0x43a   : > { %7119 = vmatmul.bf16.gmra.mxu0 %v13130_v48 }
 0x43b   : > { %7217 = vmatmul.bf16.gmra.mxu2 %v13130_v48 }
 0x43c   : > { %v13086_v54 = vpop.f32.mrf.mxu3 }
 0x43e   : > { %v13090_v61 = vpop.f32.mrf.mxu1  ;;  %7266 = vmatmul.bf16.gmra.mxu3 %v13130_v48 }
 0x43f   : > { %v6763_v27 = vmax.f32 %v13090_v61, 0.0 }
 0x440   : > { %v13088_v37 = vpop.f32.mrf.mxu0  ;;  %v13102_v49 = vpop.f32.mrf.mxu2 }
 0x441   : > { %v6762_v33 = vmax.f32 %v13088_v37, 0.0 }
 0x444   : > { %v13104_v52 = vpop.f32.mrf.mxu3 }
 0x446   : > { %v6260_v63 = vpop.f32.mrf.mxu1 }
 0x447   : > { %v6779_v38 = vmax.f32 %v6260_v63, 0.0 }
 0x448   : > { %v6211_v28 = vpop.f32.mrf.mxu0  ;;  %v13117_v46 = vpop.f32.mrf.mxu2 }
 0x449   : > { %v6778_v17 = vmax.f32 %v6211_v28, 0.0  ;;  %v6780_v37 = vmax.f32 %v13117_v46, 0.0  ;;  %v6699_v46 = vmax.f32 %v13052_v55, 0.0 }
 0x44c   : > { %v13119_v9 = vpop.f32.mrf.mxu3 }
 0x44d   : > { %v6781_v61 = vmax.f32 %v13119_v9, 0.0 }
 0x44e   : > { %v6263_v36 = vpop.f32.mrf.mxu1 }
 0x44f   : > { %v6795_v21 = vmax.f32 %v6263_v36, 0.0 }
 0x450   : > { %v6214_v12 = vpop.f32.mrf.mxu0  ;;  %v6312_v20 = vpop.f32.mrf.mxu2 }
 0x451   : > { %v6794_v45 = vmax.f32 %v6214_v12, 0.0  ;;  %v6796_v8 = vmax.f32 %v6312_v20, 0.0  ;;  %v6747_v20 = vmax.f32 %v13079_v18, 0.0  ;;  %v6698_v18 = vmax.f32 %v13050_v7, 0.0 }
 0x454   : > { %v6361_v24 = vpop.f32.mrf.mxu3 }
 0x455   : > { %v6797_v26 = vmax.f32 %v6361_v24, 0.0  ;;  %v6922_v24 = vpack.c.bf16 %v6778_v17, %v6762_v33  ;;  %v6732_v17 = vmax.f32 %v13073_v39, 0.0  ;;  %v6890_v39 = vpack.c.bf16 %v6714_v34, %v6698_v18  ;;  %v13206_v18 = vld [vmem:[%s14435_s2 + $0x18] sm:$0xff] }
 0x456   : > { %v6265_v30 = vpop.f32.mrf.mxu1 }
 0x457   : > { %v6811_v22 = vmax.f32 %v6265_v30, 0.0  ;;  %v6746_v30 = vmax.f32 %v13077_v5, 0.0  ;;  %v13164_v5 = vld [vmem:[%s14435_s2 + $0x10] sm:$0xff] }
 0x458   : > { %v6216_v53 = vpop.f32.mrf.mxu0  ;;  %v6314_v12 = vpop.f32.mrf.mxu2  ;;  %7124 = vmatmul.bf16.gmra.mxu0 %v13164_v5  ;;  %7173 = vmatmul.bf16.gmra.mxu1 %v13164_v5 }
 0x459   : > { %v6810_v41 = vmax.f32 %v6216_v53, 0.0  ;;  %v6939_v60 = vpack.c.bf16 %v6811_v22, %v6795_v21  ;;  %v6812_v10 = vmax.f32 %v6314_v12, 0.0  ;;  %v6730_v21 = vmax.f32 %v13066_v14, 0.0  ;;  %7222 = vmatmul.bf16.gmra.mxu2 %v13164_v5  ;;  %7271 = vmatmul.bf16.gmra.mxu3 %v13164_v5 }
 0x45a   : > { %v6731_v53 = vmax.f32 %v13068_v6, 0.0  ;;  %v6765_v14 = vmax.f32 %v13104_v52, 0.0  ;;  %v6966_v6 = vld [vmem:[%s14436_s3 + $0x20] sm:$0xff]  ;;  %v6749_v52 = vmax.f32 %v13086_v54, 0.0  ;;  %v6967_v54 = vld [vmem:[%s14436_s3 + $0x28] sm:$0xff] }
 0x45b   : > { %v6938_v40 = vpack.c.bf16 %v6810_v41, %v6794_v45  ;;  %7547 = vmatpush.bf16.msra.mxu1 %v6939_v60  ;;  %v6940_v28 = vpack.c.bf16 %v6812_v10, %v6796_v8  ;;  %v6923_v41 = vpack.c.bf16 %v6779_v38, %v6763_v27  ;;  %v6764_v60 = vmax.f32 %v13102_v49, 0.0  ;;  %7000 = vperm.xlu1 %9244, %v6966_v6  }
 0x45c   : > { %v6363_v36 = vpop.f32.mrf.mxu3  ;;  %v6748_v49 = vmax.f32 %v13084_v0, 0.0  ;;  %v6925_v11 = vpack.c.bf16 %v6781_v61, %v6765_v14  ;;  %v6906_v33 = vpack.c.bf16 %v6746_v30, %v6730_v21  ;;  %v6907_v7 = vpack.c.bf16 %v6747_v20, %v6731_v53  ;;  %7005 = vperm.xlu2 %9245, %v6967_v54  }
 0x45d   : > { %v6813_v45 = vmax.f32 %v6363_v36, 0.0  ;;  %7498 = vmatpush.bf16.msra.mxu0 %v6938_v40  ;;  %7596 = vmatpush.bf16.msra.mxu2 %v6940_v28  ;;  %v6924_v9 = vpack.c.bf16 %v6780_v37, %v6764_v60  ;;  %v6733_v0 = vmax.f32 %v13075_v51, 0.0  ;;  %v6716_v38 = vmax.f32 %v13062_v43, 0.0 }
 0x45e   : > { %v6424_v40 = vpop.f32.mrf.mxu1  ;;  %v6908_v56 = vpack.c.bf16 %v6748_v49, %v6732_v17  ;;  %v6891_v51 = vpack.c.bf16 %v6715_v16, %v6699_v46  ;;  %v6701_v43 = vmax.f32 %v13056_v44, 0.0  ;;  %v13235_v16 = vld [vmem:[%s14435_s2 + $0x20] sm:$0xff] }
 0x45f   : > { %v6941_v63 = vpack.c.bf16 %v6813_v45, %v6797_v26  ;;  %7548 = vmatpush.bf16.msra.mxu1 %v6923_v41  ;;  %v6909_v12 = vpack.c.bf16 %v6749_v52, %v6733_v0  ;;  %v6575_v8 = vmax.f32 %v6424_v40, 0.0  ;;  %v6700_v45 = vmax.f32 %v13054_v29, 0.0  ;;  %14741 = vst [vmem:[#allocation11_spill] sm:$0xff] %v13235_v16 }
 0x460   : > { %v6375_v22 = vpop.f32.mrf.mxu0  ;;  %v6473_v27 = vpop.f32.mrf.mxu2  ;;  %v6893_v37 = vpack.c.bf16 %v6717_v3, %v6701_v43  ;;  %v13252_v43 = vld [vmem:[%s14435_s2 + $0x28] sm:$0xff] }
 0x461   : > { %7645 = vmatpush.bf16.msra.mxu3 %v6941_v63  ;;  %7499 = vmatpush.bf16.msra.mxu0 %v6922_v24  ;;  %v6574_v36 = vmax.f32 %v6375_v22, 0.0  ;;  %v6892_v53 = vpack.c.bf16 %v6716_v38, %v6700_v45  ;;  %v6965_v63 = vld [vmem:[%s14436_s3 + $0x18] sm:$0xff]  ;;  %v6576_v44 = vmax.f32 %v6473_v27, 0.0  ;;  %v6962_v22 = vld [vmem:[%s14436_s3] sm:$0xff]  ;;  %14742 = vst [vmem:[#allocation12_spill] sm:$0xff] %v13252_v43 }
 0x462   : > { %7597 = vmatpush.bf16.msra.mxu2 %v6924_v9 }
 0x463   : > { %7549 = vmatpush.bf16.msra.mxu1 %v6907_v7  ;;  %6995 = vperm.xlu1 %9244, %v6965_v63  }
 0x464   : > { %v6522_v55 = vpop.f32.mrf.mxu3  ;;  %6980 = vperm.xlu2 %9245, %v6962_v22  }
 0x465   : > { %7646 = vmatpush.bf16.msra.mxu3 %v6925_v11  ;;  %7500 = vmatpush.bf16.msra.mxu0 %v6906_v33  ;;  %v6577_v20 = vmax.f32 %v6522_v55, 0.0 }
 0x466   : > { %v6426_v10 = vpop.f32.mrf.mxu1  ;;  %7598 = vmatpush.bf16.msra.mxu2 %v6908_v56 }
 0x467   : > { %v6591_v21 = vmax.f32 %v6426_v10, 0.0  ;;  %7550 = vmatpush.bf16.msra.mxu1 %v6891_v51 }
 0x468   : > { %v6377_v26 = vpop.f32.mrf.mxu0  ;;  %v6475_v30 = vpop.f32.mrf.mxu2  ;;  %7129 = vmatmul.bf16.gmra.mxu0 %v13206_v18  ;;  %7178 = vmatmul.bf16.gmra.mxu1 %v13206_v18 }
 0x469   : > { %v6590_v62 = vmax.f32 %v6377_v26, 0.0  ;;  %7647 = vmatpush.bf16.msra.mxu3 %v6909_v12  ;;  %7501 = vmatpush.bf16.msra.mxu0 %v6890_v39  ;;  %v13187_v28 = vpack.c.bf16 %v6591_v21, %v6575_v8  ;;  %v6592_v24 = vmax.f32 %v6475_v30, 0.0 }
 0x46a   : > { %7599 = vmatpush.bf16.msra.mxu2 %v6892_v53  ;;  %7276 = vmatmul.bf16.gmra.mxu3 %v13206_v18 }
 0x46b   : > { %v13185_v61 = vpack.c.bf16 %v6590_v62, %v6574_v36  ;;  %7551 = vmatpush.bf16.msra.mxu1 %v13038_v1  ;;  %v13197_v40 = vpack.c.bf16 %v6592_v24, %v6576_v44  ;;  %7227 = vmatmul.bf16.gmra.mxu2 %v13206_v18 }
 0x46c   : > { %v6524_v29 = vpop.f32.mrf.mxu3 }
 0x46d   : > { %v6593_v41 = vmax.f32 %v6524_v29, 0.0  ;;  %7648 = vmatpush.bf16.msra.mxu3 %v6893_v37  ;;  %7502 = vmatpush.bf16.msra.mxu0 %v13036_v2 }
 0x46e   : > { %v6429_v6 = vpop.f32.mrf.mxu1  ;;  %7600 = vmatpush.bf16.msra.mxu2 %v13042_v59 }
 0x46f   : > { %v13199_v60 = vpack.c.bf16 %v6593_v41, %v6577_v20  ;;  %7552 = vmatpush.bf16.msra.mxu1 %v13022_v47 }
 0x470   : > { %v6380_v14 = vpop.f32.mrf.mxu0  ;;  %v6478_v2 = vpop.f32.mrf.mxu2 }
 0x471   : > { %7649 = vmatpush.bf16.msra.mxu3 %v13044_v57  ;;  %7503 = vmatpush.bf16.msra.mxu0 %v13020_v42  ;;  %v6606_v59 = vmax.f32 %v6380_v14, 0.0  ;;  %v6607_v57 = vmax.f32 %v6429_v6, 0.0  ;;  %v6608_v52 = vmax.f32 %v6478_v2, 0.0 }
 0x472   : > { %7601 = vmatpush.bf16.msra.mxu2 %v13026_v35 }
 0x473   : > { %7553 = vmatpush.bf16.msra.mxu1 %v13004_v58 }
 0x474   : > { %v6527_v1 = vpop.f32.mrf.mxu3 }
 0x475   : > { %7650 = vmatpush.bf16.msra.mxu3 %v13028_v25  ;;  %7504 = vmatpush.bf16.msra.mxu0 %v13002_v50  ;;  %v6609_v9 = vmax.f32 %v6527_v1, 0.0 }
 0x476   : > { %v6431_v47 = vpop.f32.mrf.mxu1  ;;  %7602 = vmatpush.bf16.msra.mxu2 %v13010_v4 }
 0x477   : > { %v6623_v49 = vmax.f32 %v6431_v47, 0.0  ;;  %7554 = vmatpush.bf16.msra.mxu1 %v12974_v15 }
 0x478   : > { %v6382_v42 = vpop.f32.mrf.mxu0  ;;  %v6480_v35 = vpop.f32.mrf.mxu2  ;;  %7134 = vmatmul.bf16.gmra.mxu0 %v13235_v16  ;;  %7183 = vmatmul.bf16.gmra.mxu1 %v13235_v16 }
 0x479   : > { %v6622_v46 = vmax.f32 %v6382_v42, 0.0  ;;  %7651 = vmatpush.bf16.msra.mxu3 %v13012_v23  ;;  %7505 = vmatpush.bf16.msra.mxu0 %v12972_v31  ;;  %v13224_v58 = vpack.c.bf16 %v6623_v49, %v6607_v57  ;;  %v6624_v11 = vmax.f32 %v6480_v35, 0.0 }
 0x47a   : > { %7603 = vmatpush.bf16.msra.mxu2 %v12980_v32  ;;  %7281 = vmatmul.bf16.gmra.mxu3 %v13235_v16 }
 0x47b   : > { %v13222_v50 = vpack.c.bf16 %v6622_v46, %v6606_v59  ;;  %v13228_v4 = vpack.c.bf16 %v6624_v11, %v6608_v52  ;;  %7232 = vmatmul.bf16.gmra.mxu2 %v13235_v16  ;;  %v13273_v46 = vld [vmem:[%s14435_s2 + $0x30] sm:$0xff] }
 0x47c   : > { %v6529_v25 = vpop.f32.mrf.mxu3  ;;  %14743 = vst [vmem:[#allocation22_spill] sm:$0xff] %v13273_v46 }
 0x47d   : > { %v6625_v34 = vmax.f32 %v6529_v25, 0.0  ;;  %7652 = vmatpush.bf16.msra.mxu3 %v12982_v13 }
 0x47e   : > { %v6434_v15 = vpop.f32.mrf.mxu1 }
 0x47f   : > { %v13230_v23 = vpack.c.bf16 %v6625_v34, %v6609_v9  ;;  %v6639_v27 = vmax.f32 %v6434_v15, 0.0  ;;  %v13298_v15 = vld [vmem:[%s14435_s2 + $0x38] sm:$0xff] }
 0x480   : > { %v6385_v31 = vpop.f32.mrf.mxu0  ;;  %v6483_v33 = vpop.f32.mrf.mxu2  ;;  %14744 = vst [vmem:[#allocation18_spill] sm:$0xff] %v13298_v15 }
 0x481   : > { %v6638_v32 = vmax.f32 %v6385_v31, 0.0  ;;  %v6640_v12 = vmax.f32 %v6483_v33, 0.0 }
 0x484   : > { %v6532_v7 = vpop.f32.mrf.mxu3 }
 0x485   : > { %v6641_v36 = vmax.f32 %v6532_v7, 0.0 }
 0x486   : > { %v6436_v55 = vpop.f32.mrf.mxu1 }
 0x487   : > { %v6655_v0 = vmax.f32 %v6436_v55, 0.0 }
 0x488   : > { %v6387_v13 = vpop.f32.mrf.mxu0  ;;  %v6485_v3 = vpop.f32.mrf.mxu2  ;;  %7139 = vmatmul.bf16.gmra.mxu0 %v13252_v43  ;;  %7188 = vmatmul.bf16.gmra.mxu1 %v13252_v43 }
 0x489   : > { %v6654_v17 = vmax.f32 %v6387_v13, 0.0  ;;  %v13243_v38 = vpack.c.bf16 %v6655_v0, %v6639_v27  ;;  %v6656_v8 = vmax.f32 %v6485_v3, 0.0  ;;  %v13312_v13 = vpop.permute.xlu0 %7050 }
 0x48a   : > { %7286 = vmatmul.bf16.gmra.mxu3 %v13252_v43  ;;  %14745 = vst [vmem:[#allocation10_spill] sm:$0xff] %v13312_v13 }
 0x48b   : > { %v13241_v54 = vpack.c.bf16 %v6654_v17, %v6638_v32  ;;  %v13245_v51 = vpack.c.bf16 %v6656_v8, %v6640_v12  ;;  %7237 = vmatmul.bf16.gmra.mxu2 %v13252_v43 }
 0x48c   : > { %v6534_v56 = vpop.f32.mrf.mxu3 }
 0x48d   : > { %v6657_v39 = vmax.f32 %v6534_v56, 0.0  ;;  %v13318_v56 = vpop.permute.xlu2 %7030 }
 0x48e   : > { %v6439_v45 = vpop.f32.mrf.mxu1  ;;  %14746 = vst [vmem:[#allocation7_spill] sm:$0xff] %v13318_v56 }
 0x48f   : > { %v13247_v26 = vpack.c.bf16 %v6657_v39, %v6641_v36  ;;  %v6671_v37 = vmax.f32 %v6439_v45, 0.0 }
 0x490   : > { %v6390_v10 = vpop.f32.mrf.mxu0  ;;  %v6488_v62 = vpop.f32.mrf.mxu2 }
 0x491   : > { %v6670_v53 = vmax.f32 %v6390_v10, 0.0  ;;  %v6672_v14 = vmax.f32 %v6488_v62, 0.0  ;;  %v13320_v12 = vpop.permute.xlu0 %7055 }
 0x492   : > { %14747 = vst [vmem:[#allocation13_spill] sm:$0xff] %v13320_v12 }
 0x494   : > { %v6537_v21 = vpop.f32.mrf.mxu3 }
 0x495   : > { %v6673_v6 = vmax.f32 %v6537_v21, 0.0  ;;  %v13330_v21 = vpop.permute.xlu2 %7035 }
 0x496   : > { %v6441_v30 = vpop.f32.mrf.mxu1  ;;  %14748 = vst [vmem:[#allocation32_spill] sm:$0xff] %v13330_v21 }
 0x497   : > { %v6687_v44 = vmax.f32 %v6441_v30, 0.0  ;;  %v13334_v30 = vpop.permute.xlu1 %7040 }
 0x498   : > { %v6392_v63 = vpop.f32.mrf.mxu0  ;;  %v6490_v41 = vpop.f32.mrf.mxu2  ;;  %7144 = vmatmul.bf16.gmra.mxu0 %v13273_v46  ;;  %7193 = vmatmul.bf16.gmra.mxu1 %v13273_v46  ;;  %14750 = vst [vmem:[#allocation29_spill] sm:$0xff] %v13334_v30 }
 0x499   : > { %v6686_v29 = vmax.f32 %v6392_v63, 0.0  ;;  %v13260_v24 = vpack.c.bf16 %v6687_v44, %v6671_v37  ;;  %v6688_v2 = vmax.f32 %v6490_v41, 0.0 }
 0x49a   : > { %7291 = vmatmul.bf16.gmra.mxu3 %v13273_v46 }
 0x49b   : > { %v13258_v20 = vpack.c.bf16 %v6686_v29, %v6670_v53  ;;  %v13262_v59 = vpack.c.bf16 %v6688_v2, %v6672_v14  ;;  %7242 = vmatmul.bf16.gmra.mxu2 %v13273_v46  ;;  %v13332_v53 = vpop.permute.xlu0 %7020 }
 0x49c   : > { %v6539_v22 = vpop.f32.mrf.mxu3  ;;  %14749 = vst [vmem:[#allocation33_spill] sm:$0xff] %v13332_v53 }
 0x49d   : > { %v6689_v1 = vmax.f32 %v6539_v22, 0.0  ;;  %v13338_v22 = vpop.permute.xlu2 %7010 }
 0x49e   : > { %v13268_v47 = vpop.f32.mrf.mxu1  ;;  %14751 = vst [vmem:[#allocation28_spill] sm:$0xff] %v13338_v22 }
 0x49f   : > { %v13264_v57 = vpack.c.bf16 %v6689_v1, %v6673_v6  ;;  %v13344_v16 = vpop.permute.xlu1 %7045 }
 0x4a0   : > { %v13266_v42 = vpop.f32.mrf.mxu0  ;;  %v13277_v49 = vpop.f32.mrf.mxu2 }
 0x4a3   : > { %v13340_v14 = vpop.permute.xlu0 %7015 }
 0x4a4   : > { %v13279_v35 = vpop.f32.mrf.mxu3  ;;  %14752 = vst [vmem:[#allocation30_spill] sm:$0xff] %v13340_v14 }
 0x4a6   : > { %v13285_v52 = vpop.f32.mrf.mxu1 }
 0x4a8   : > { %v13283_v25 = vpop.f32.mrf.mxu0  ;;  %v13287_v9 = vpop.f32.mrf.mxu2  ;;  %7149 = vmatmul.bf16.gmra.mxu0 %v13298_v15  ;;  %7198 = vmatmul.bf16.gmra.mxu1 %v13298_v15 }
 0x4aa   : > { %7296 = vmatmul.bf16.gmra.mxu3 %v13298_v15 }
 0x4ab   : > { %7247 = vmatmul.bf16.gmra.mxu2 %v13298_v15 }
 0x4ac   : > { %v13289_v11 = vpop.f32.mrf.mxu3 }
 0x4ae   : > { %v13293_v31 = vpop.f32.mrf.mxu1 }
 0x4b0   : > { %v13291_v34 = vpop.f32.mrf.mxu0  ;;  %v13302_v33 = vpop.f32.mrf.mxu2 }
 0x4b4   : > { %v13304_v7 = vpop.f32.mrf.mxu3 }
 0x4b6   : > { %v13310_v27 = vpop.f32.mrf.mxu1 }
 0x4b8   : > { %v13308_v32 = vpop.f32.mrf.mxu0  ;;  %v13314_v55 = vpop.f32.mrf.mxu2  ;;  %7310 = vmatmul.bf16.vlgmr.msrb.gmra.mxu0 %v13098_v19  ;;  %7359 = vmatmul.bf16.vlgmr.msrb.gmra.mxu1 %v13098_v19 }
 0x4ba   : > { %7457 = vmatmul.bf16.vlgmr.msrb.gmra.mxu3 %v13098_v19 }
 0x4bb   : > { %7408 = vmatmul.bf16.vlgmr.msrb.gmra.mxu2 %v13098_v19 }
 0x4bc   : > { %v13316_v17 = vpop.f32.mrf.mxu3 }
 0x4be   : > { %v6454_v3 = vpop.f32.mrf.mxu1 }
 0x4bf   : > { %v6767_v53 = vmax.f32 %v6454_v3, 0.0 }
 0x4c0   : > { %v6405_v0 = vpop.f32.mrf.mxu0  ;;  %v13324_v36 = vpop.f32.mrf.mxu2 }
 0x4c1   : > { %v6766_v56 = vmax.f32 %v6405_v0, 0.0 }
 0x4c4   : > { %v13326_v8 = vpop.f32.mrf.mxu3 }
 0x4c6   : > { %v6456_v10 = vpop.f32.mrf.mxu1 }
 0x4c7   : > { %v6783_v15 = vmax.f32 %v6456_v10, 0.0  ;;  %v6751_v10 = vmax.f32 %v13310_v27, 0.0 }
 0x4c8   : > { %v6407_v39 = vpop.f32.mrf.mxu0  ;;  %v6505_v45 = vpop.f32.mrf.mxu2  ;;  %7315 = vmatmul.bf16.gmra.mxu0 %v13130_v48  ;;  %7364 = vmatmul.bf16.gmra.mxu1 %v13130_v48 }
 0x4c9   : > { %v6782_v13 = vmax.f32 %v6407_v39, 0.0  ;;  %v6750_v39 = vmax.f32 %v13308_v32, 0.0  ;;  %v6753_v32 = vmax.f32 %v13316_v17, 0.0  ;;  %v6720_v17 = vmax.f32 %v13287_v9, 0.0 }
 0x4ca   : > { %7462 = vmatmul.bf16.gmra.mxu3 %v13130_v48 }
 0x4cb   : > { %7413 = vmatmul.bf16.gmra.mxu2 %v13130_v48  ;;  %v6734_v48 = vmax.f32 %v13291_v34, 0.0  ;;  %v13354_v34 = vpop.permute.xlu2 %7005 }
 0x4cc   : > { %v6554_v62 = vpop.f32.mrf.mxu3  ;;  %14753 = vst [vmem:[#allocation25_spill] sm:$0xff] %v13354_v34 }
 0x4ce   : > { %v6459_v63 = vpop.f32.mrf.mxu1 }
 0x4cf   : > { %v6799_v19 = vmax.f32 %v6459_v63, 0.0 }
 0x4d0   : > { %v6410_v37 = vpop.f32.mrf.mxu0  ;;  %v6508_v29 = vpop.f32.mrf.mxu2 }
 0x4d1   : > { %v6798_v41 = vmax.f32 %v6410_v37, 0.0  ;;  %v6800_v46 = vmax.f32 %v6508_v29, 0.0  ;;  %v6926_v29 = vpack.c.bf16 %v6782_v13, %v6766_v56  ;;  %v6718_v56 = vmax.f32 %v13283_v25, 0.0 }
 0x4d4   : > { %v6557_v44 = vpop.f32.mrf.mxu3 }
 0x4d5   : > { %v6801_v22 = vmax.f32 %v6557_v44, 0.0  ;;  %v6927_v44 = vpack.c.bf16 %v6783_v15, %v6767_v53  ;;  %v6752_v15 = vmax.f32 %v13314_v55, 0.0  ;;  %v6737_v55 = vmax.f32 %v13304_v7, 0.0 }
 0x4d6   : > { %v6461_v2 = vpop.f32.mrf.mxu1  ;;  %v6721_v53 = vmax.f32 %v13289_v11, 0.0 }
 0x4d7   : > { %v6815_v21 = vmax.f32 %v6461_v2, 0.0  ;;  %v6769_v2 = vmax.f32 %v13326_v8, 0.0  ;;  %v6910_v8 = vpack.c.bf16 %v6750_v39, %v6734_v48  ;;  %v6913_v25 = vpack.c.bf16 %v6753_v32, %v6737_v55  ;;  %v13376_v48 = vpop.permute.xlu2 %6980 }
 0x4d8   : > { %v6412_v6 = vpop.f32.mrf.mxu0  ;;  %v6510_v37 = vpop.f32.mrf.mxu2  ;;  %7320 = vmatmul.bf16.gmra.mxu0 %v13164_v5  ;;  %7369 = vmatmul.bf16.gmra.mxu1 %v13164_v5 }
 0x4d9   : > { %v6814_v1 = vmax.f32 %v6412_v6, 0.0  ;;  %v6943_v30 = vpack.c.bf16 %v6815_v21, %v6799_v19  ;;  %v6816_v43 = vmax.f32 %v6510_v37, 0.0  ;;  %v6735_v6 = vmax.f32 %v13293_v31, 0.0  ;;  %v13356_v31 = vpop.permute.xlu0 %6990 }
 0x4da   : > { %v6785_v21 = vmax.f32 %v6554_v62, 0.0  ;;  %14754 = vst [vmem:[#allocation24_spill] sm:$0xff] %v13356_v31  ;;  %v6736_v62 = vmax.f32 %v13302_v33, 0.0  ;;  %7467 = vmatmul.bf16.gmra.mxu3 %v13164_v5  ;;  %v6704_v37 = vmax.f32 %v13277_v49, 0.0 }
 0x4db   : > { %v6942_v12 = vpack.c.bf16 %v6814_v1, %v6798_v41  ;;  %7743 = vmatpush.bf16.msrb.mxu1 %v6943_v30  ;;  %v6784_v41 = vmax.f32 %v6505_v45, 0.0  ;;  %v6944_v0 = vpack.c.bf16 %v6816_v43, %v6800_v46  ;;  %v6768_v30 = vmax.f32 %v13324_v36, 0.0  ;;  %7418 = vmatmul.bf16.gmra.mxu2 %v13164_v5 }
 0x4dc   : > { %v6559_v63 = vpop.f32.mrf.mxu3  ;;  %v6702_v43 = vmax.f32 %v13266_v42, 0.0  ;;  %v6703_v46 = vmax.f32 %v13268_v47, 0.0  ;;  %v6929_v13 = vpack.c.bf16 %v6785_v21, %v6769_v2  ;;  %v6719_v36 = vmax.f32 %v13285_v52, 0.0 }
 0x4dd   : > { %v6817_v14 = vmax.f32 %v6559_v63, 0.0  ;;  %7694 = vmatpush.bf16.msrb.mxu0 %v6942_v12  ;;  %7792 = vmatpush.bf16.msrb.mxu2 %v6944_v0  ;;  %v6928_v27 = vpack.c.bf16 %v6784_v41, %v6768_v30  ;;  %v6911_v42 = vpack.c.bf16 %v6751_v10, %v6735_v6  ;;  %v6705_v63 = vmax.f32 %v13279_v35, 0.0 }
 0x4de   : > { %v7164_v12 = vpop.f32.mrf.mxu1  ;;  %v6894_v52 = vpack.c.bf16 %v6718_v56, %v6702_v43  ;;  %v6895_v33 = vpack.c.bf16 %v6719_v36, %v6703_v46  ;;  %v6896_v9 = vpack.c.bf16 %v6720_v17, %v6704_v37 }
 0x4df   : > { %v6945_v3 = vpack.c.bf16 %v6817_v14, %v6801_v22  ;;  %7744 = vmatpush.bf16.msrb.mxu1 %v6927_v44  ;;  %v6912_v22 = vpack.c.bf16 %v6752_v15, %v6736_v62  ;;  %v13370_v14 = vpop.permute.xlu1 %7025  ;;  %v6897_v11 = vpack.c.bf16 %v6721_v53, %v6705_v63 }
 0x4e0   : > { %v13350_v19 = vpop.f32.mrf.mxu0  ;;  %v7213_v45 = vpop.f32.mrf.mxu2 }
 0x4e1   : > { %7841 = vmatpush.bf16.msrb.mxu3 %v6945_v3  ;;  %7695 = vmatpush.bf16.msrb.mxu0 %v6926_v29  ;;  %v13378_v6 = vpop.permute.xlu0 %6985  ;;  %v7214_v21 = vadd.f32 %v7213_v45, %v13376_v48  ;;  %v7165_v3 = vadd.f32 %v7164_v12, %v13376_v48  ;;  %v7116_v2 = vadd.f32 %v13350_v19, %v13376_v48 }
 0x4e2   : > { %7793 = vmatpush.bf16.msrb.mxu2 %v6928_v27 }
 0x4e3   : > { %7745 = vmatpush.bf16.msrb.mxu1 %v6911_v42  ;;  %v7891_v46 = vmax.f32 %v7165_v3, 0.0  ;;  %v7892_v32 = vmax.f32 %v7214_v21, 0.0  ;;  %v7890_v12 = vmax.f32 %v7116_v2, 0.0 }
 0x4e4   : > { %v7262_v47 = vpop.f32.mrf.mxu3 }
 0x4e5   : > { %7842 = vmatpush.bf16.msrb.mxu3 %v6929_v13  ;;  %7696 = vmatpush.bf16.msrb.mxu0 %v6910_v8  ;;  %v7263_v35 = vadd.f32 %v7262_v47, %v13376_v48 }
 0x4e6   : > { %v7166_v7 = vpop.f32.mrf.mxu1  ;;  %7794 = vmatpush.bf16.msrb.mxu2 %v6912_v22 }
 0x4e7   : > { %7746 = vmatpush.bf16.msrb.mxu1 %v6895_v33  ;;  %v7167_v39 = vadd.f32 %v7166_v7, %v13378_v6 }
 0x4e8   : > { %v7117_v1 = vpop.f32.mrf.mxu0  ;;  %v7215_v41 = vpop.f32.mrf.mxu2  ;;  %7325 = vmatmul.bf16.gmra.mxu0 %v13206_v18  ;;  %7374 = vmatmul.bf16.gmra.mxu1 %v13206_v18 }
 0x4e9   : > { %7843 = vmatpush.bf16.msrb.mxu3 %v6913_v25  ;;  %7697 = vmatpush.bf16.msrb.mxu0 %v6894_v52  ;;  %v7216_v0 = vadd.f32 %v7215_v41, %v13378_v6  ;;  %v7118_v43 = vadd.f32 %v7117_v1, %v13378_v6  ;;  %v7907_v15 = vmax.f32 %v7167_v39, 0.0 }
 0x4ea   : > { %7795 = vmatpush.bf16.msrb.mxu2 %v6896_v9  ;;  %7472 = vmatmul.bf16.gmra.mxu3 %v13206_v18 }
 0x4eb   : > { %7747 = vmatpush.bf16.msrb.mxu1 %v13260_v24  ;;  %v7908_v10 = vmax.f32 %v7216_v0, 0.0  ;;  %v7893_v24 = vmax.f32 %v7263_v35, 0.0  ;;  %v7906_v27 = vmax.f32 %v7118_v43, 0.0  ;;  %v13397_v13 = vpack.c.bf16 %v7907_v15, %v7891_v46  ;;  %7423 = vmatmul.bf16.gmra.mxu2 %v13206_v18 }
 0x4ec   : > { %v7264_v5 = vpop.f32.mrf.mxu3 }
 0x4ed   : > { %v7265_v49 = vadd.f32 %v7264_v5, %v13378_v6  ;;  %7844 = vmatpush.bf16.msrb.mxu3 %v6897_v11  ;;  %7698 = vmatpush.bf16.msrb.mxu0 %v13258_v20  ;;  %v13393_v20 = vpop.permute.xlu1 %7000  ;;  %14756 = vst [vmem:[#allocation20_spill] sm:$0xff] %v13397_v13  ;;  %v14776_v13 = vld [vmem:[#allocation32_spill] sm:$0xff] }
 0x4ee   : > { %v7169_v30 = vpop.f32.mrf.mxu1  ;;  %7796 = vmatpush.bf16.msrb.mxu2 %v13262_v59  ;;  %14755 = vst [vmem:[#allocation26_spill] sm:$0xff] %v13393_v20  ;;  %v13401_v59 = vpack.c.bf16 %v7906_v27, %v7890_v12 }
 0x4ef   : > { %v7909_v29 = vmax.f32 %v7265_v49, 0.0  ;;  %7748 = vmatpush.bf16.msrb.mxu1 %v13243_v38  ;;  %v7170_v8 = vadd.f32 %v7169_v30, %v13356_v31 }
 0x4f0   : > { %v7120_v44 = vpop.f32.mrf.mxu0  ;;  %v7218_v19 = vpop.f32.mrf.mxu2  ;;  %14757 = vst [vmem:[#allocation19_spill] sm:$0xff] %v13401_v59 }
 0x4f1   : > { %7845 = vmatpush.bf16.msrb.mxu3 %v13264_v57  ;;  %7699 = vmatpush.bf16.msrb.mxu0 %v13241_v54  ;;  %v13403_v57 = vpack.c.bf16 %v7908_v10, %v7892_v32  ;;  %v13405_v36 = vpack.c.bf16 %v7909_v29, %v7893_v24 }
 0x4f2   : > { %7797 = vmatpush.bf16.msrb.mxu2 %v13245_v51 }
 0x4f3   : > { %14758 = vst [vmem:[#allocation21_spill] sm:$0xff] %v13403_v57  ;;  %7749 = vmatpush.bf16.msrb.mxu1 %v13224_v58 }
 0x4f4   : > { %v7267_v56 = vpop.f32.mrf.mxu3  ;;  %14759 = vst [vmem:[#allocation6_spill] sm:$0xff] %v13405_v36 }
 0x4f5   : > { %7846 = vmatpush.bf16.msrb.mxu3 %v13247_v26  ;;  %7700 = vmatpush.bf16.msrb.mxu0 %v13222_v50  ;;  %v7121_v50 = vadd.f32 %v7120_v44, %v13356_v31  ;;  %v13419_v51 = vpop.permute.xlu1 %6995 }
 0x4f6   : > { %v7171_v38 = vpop.f32.mrf.mxu1  ;;  %7798 = vmatpush.bf16.msrb.mxu2 %v13228_v4  ;;  %14760 = vst [vmem:[#allocation15_spill] sm:$0xff] %v13419_v51  ;;  %v7923_v4 = vmax.f32 %v7170_v8, 0.0 }
 0x4f7   : > { %7750 = vmatpush.bf16.msrb.mxu1 %v13187_v28  ;;  %v7172_v28 = vadd.f32 %v7171_v38, %v13419_v51  ;;  %v7922_v45 = vmax.f32 %v7121_v50, 0.0 }
 0x4f8   : > { %v7122_v54 = vpop.f32.mrf.mxu0  ;;  %v7220_v58 = vpop.f32.mrf.mxu2 }
 0x4f9   : > { %7847 = vmatpush.bf16.msrb.mxu3 %v13230_v23  ;;  %7701 = vmatpush.bf16.msrb.mxu0 %v13185_v61  ;;  %v7221_v18 = vadd.f32 %v7220_v58, %v13419_v51  ;;  %v7219_v23 = vadd.f32 %v7218_v19, %v13356_v31  ;;  %v7268_v61 = vadd.f32 %v7267_v56, %v13356_v31  ;;  %v7939_v22 = vmax.f32 %v7172_v28, 0.0 }
 0x4fa   : > { %7799 = vmatpush.bf16.msrb.mxu2 %v13197_v40  ;;  %v7123_v53 = vadd.f32 %v7122_v54, %v13419_v51  ;;  %v14764_v54 = vld [vmem:[#allocation12_spill] sm:$0xff] }
 0x4fb   : > { %v7940_v47 = vmax.f32 %v7221_v18, 0.0  ;;  %v7924_v25 = vmax.f32 %v7219_v23, 0.0  ;;  %v7925_v52 = vmax.f32 %v7268_v61, 0.0  ;;  %v13429_v33 = vpack.c.bf16 %v7939_v22, %v7923_v4  ;;  %v14765_v4 = vld [vmem:[#allocation28_spill] sm:$0xff]  ;;  %v14766_v61 = vld [vmem:[#allocation30_spill] sm:$0xff] }
 0x4fc   : > { %v7269_v26 = vpop.f32.mrf.mxu3  ;;  %v7938_v40 = vmax.f32 %v7123_v53, 0.0 }
 0x4fd   : > { %v7270_v42 = vadd.f32 %v7269_v26, %v13419_v51  ;;  %7848 = vmatpush.bf16.msrb.mxu3 %v13199_v60  ;;  %v14761_v60 = vld [vmem:[#allocation11_spill] sm:$0xff]  ;;  %v13435_v63 = vpack.c.bf16 %v7940_v47, %v7924_v25 }
 0x4fe   : > { %v7174_v17 = vpop.f32.mrf.mxu1  ;;  %7330 = vmatmul.bf16.gmra.mxu0 %v14761_v60  ;;  %7379 = vmatmul.bf16.gmra.mxu1 %v14761_v60  ;;  %v13433_v37 = vpack.c.bf16 %v7938_v40, %v7922_v45 }
 0x4ff   : > { %v7941_v62 = vmax.f32 %v7270_v42, 0.0  ;;  %14762 = vst [vmem:[#allocation14_spill] sm:$0xff] %v13435_v63  ;;  %7428 = vmatmul.bf16.gmra.mxu2 %v14761_v60  ;;  %7477 = vmatmul.bf16.gmra.mxu3 %v14761_v60  ;;  %v7175_v5 = vadd.f32 %v7174_v17, %v13393_v20 }
 0x500   : > { %v7125_v55 = vpop.f32.mrf.mxu0  ;;  %v7223_v1 = vpop.f32.mrf.mxu2 }
 0x501   : > { %v13437_v9 = vpack.c.bf16 %v7941_v62, %v7925_v52  ;;  %v7126_v0 = vadd.f32 %v7125_v55, %v13393_v20  ;;  %v7955_v29 = vmax.f32 %v7175_v5, 0.0  ;;  %v7224_v44 = vadd.f32 %v7223_v1, %v13393_v20 }
 0x503   : > { %14763 = vst [vmem:[#allocation4_spill] sm:$0xff] %v13437_v9  ;;  %v7954_v43 = vmax.f32 %v7126_v0, 0.0  ;;  %v7956_v27 = vmax.f32 %v7224_v44, 0.0 }
 0x504   : > { %v7272_v7 = vpop.f32.mrf.mxu3 }
 0x505   : > { %v7273_v30 = vadd.f32 %v7272_v7, %v13393_v20 }
 0x506   : > { %v7176_v41 = vpop.f32.mrf.mxu1 }
 0x507   : > { %v7177_v21 = vadd.f32 %v7176_v41, %v13354_v34  ;;  %v7957_v19 = vmax.f32 %v7273_v30, 0.0 }
 0x508   : > { %v7127_v11 = vpop.f32.mrf.mxu0  ;;  %v7225_v35 = vpop.f32.mrf.mxu2 }
 0x509   : > { %v7128_v49 = vadd.f32 %v7127_v11, %v13354_v34  ;;  %v7226_v39 = vadd.f32 %v7225_v35, %v13354_v34  ;;  %v7971_v2 = vmax.f32 %v7177_v21, 0.0  ;;  %v14767_v35 = vld [vmem:[#allocation22_spill] sm:$0xff] }
 0x50b   : > { %v7970_v46 = vmax.f32 %v7128_v49, 0.0  ;;  %v7972_v15 = vmax.f32 %v7226_v39, 0.0  ;;  %v13449_v56 = vpack.c.bf16 %v7971_v2, %v7955_v29 }
 0x50c   : > { %v7274_v3 = vpop.f32.mrf.mxu3 }
 0x50d   : > { %v7275_v10 = vadd.f32 %v7274_v3, %v13354_v34  ;;  %v13453_v50 = vpack.c.bf16 %v7970_v46, %v7954_v43  ;;  %v13455_v58 = vpack.c.bf16 %v7972_v15, %v7956_v27 }
 0x50e   : > { %v7179_v12 = vpop.f32.mrf.mxu1  ;;  %7335 = vmatmul.bf16.gmra.mxu0 %v14764_v54  ;;  %7384 = vmatmul.bf16.gmra.mxu1 %v14764_v54 }
 0x50f   : > { %v7973_v32 = vmax.f32 %v7275_v10, 0.0  ;;  %7433 = vmatmul.bf16.gmra.mxu2 %v14764_v54  ;;  %7482 = vmatmul.bf16.gmra.mxu3 %v14764_v54  ;;  %v7180_v23 = vadd.f32 %v7179_v12, %v14765_v4 }
 0x510   : > { %v7130_v24 = vpop.f32.mrf.mxu0  ;;  %v7228_v38 = vpop.f32.mrf.mxu2 }
 0x511   : > { %v13457_v26 = vpack.c.bf16 %v7973_v32, %v7957_v19  ;;  %v7131_v45 = vadd.f32 %v7130_v24, %v14765_v4  ;;  %v7987_v22 = vmax.f32 %v7180_v23, 0.0  ;;  %v7229_v25 = vadd.f32 %v7228_v38, %v14765_v4  ;;  %v14768_v24 = vld [vmem:[#allocation18_spill] sm:$0xff] }
 0x512   : > { %v13504_v23 = vld [vmem:[%s14435_s2] sm:$0xff] }
 0x513   : > { %v7986_v60 = vmax.f32 %v7131_v45, 0.0  ;;  %v7988_v21 = vmax.f32 %v7229_v25, 0.0  ;;  %14769 = vst [vmem:[#allocation16_spill] sm:$0xff] %v13504_v23  ;;  %v13513_v25 = vld [vmem:[%s14435_s2 + $0x8] sm:$0xff] }
 0x514   : > { %v7277_v8 = vpop.f32.mrf.mxu3  ;;  %14770 = vst [vmem:[#allocation5_spill] sm:$0xff] %v13513_v25 }
 0x515   : > { %v7278_v52 = vadd.f32 %v7277_v8, %v14765_v4 }
 0x516   : > { %v7181_v42 = vpop.f32.mrf.mxu1 }
 0x517   : > { %v7182_v28 = vadd.f32 %v7181_v42, %v14766_v61  ;;  %v7989_v0 = vmax.f32 %v7278_v52, 0.0 }
 0x518   : > { %v7132_v18 = vpop.f32.mrf.mxu0  ;;  %v7230_v62 = vpop.f32.mrf.mxu2 }
 0x519   : > { %v7133_v47 = vadd.f32 %v7132_v18, %v14766_v61  ;;  %v7231_v17 = vadd.f32 %v7230_v62, %v14766_v61  ;;  %v8003_v40 = vmax.f32 %v7182_v28, 0.0 }
 0x51b   : > { %v8002_v1 = vmax.f32 %v7133_v47, 0.0  ;;  %v8004_v7 = vmax.f32 %v7231_v17, 0.0  ;;  %v13469_v49 = vpack.c.bf16 %v8003_v40, %v7987_v22 }
 0x51c   : > { %v7279_v55 = vpop.f32.mrf.mxu3 }
 0x51d   : > { %v7280_v53 = vadd.f32 %v7279_v55, %v14766_v61  ;;  %v13477_v10 = vpack.c.bf16 %v8002_v1, %v7986_v60  ;;  %v13479_v29 = vpack.c.bf16 %v8004_v7, %v7988_v21  ;;  %v14771_v60 = vld [vmem:[#allocation10_spill] sm:$0xff] }
 0x51e   : > { %v7184_v5 = vpop.f32.mrf.mxu1  ;;  %7340 = vmatmul.bf16.gmra.mxu0 %v14767_v35  ;;  %7389 = vmatmul.bf16.gmra.mxu1 %v14767_v35 }
 0x51f   : > { %v8005_v11 = vmax.f32 %v7280_v53, 0.0  ;;  %7438 = vmatmul.bf16.gmra.mxu2 %v14767_v35  ;;  %7487 = vmatmul.bf16.gmra.mxu3 %v14767_v35 }
 0x520   : > { %v7135_v41 = vpop.f32.mrf.mxu0  ;;  %v13473_v3 = vpop.f32.mrf.mxu2 }
 0x521   : > { %v13481_v44 = vpack.c.bf16 %v8005_v11, %v7989_v0  ;;  %v14772_v11 = vld [vmem:[#allocation33_spill] sm:$0xff] }
 0x522   : > { %v13520_v21 = vadd.f32 %v7135_v41, %v14772_v11  ;;  %v13523_v0 = vadd.f32 %v7184_v5, %v14772_v11  ;;  %v14774_v41 = vld [vmem:[#allocation29_spill] sm:$0xff] }
 0x524   : > { %v13475_v39 = vpop.f32.mrf.mxu3 }
 0x526   : > { %v7186_v2 = vpop.f32.mrf.mxu1 }
 0x528   : > { %v7137_v30 = vpop.f32.mrf.mxu0  ;;  %v13485_v43 = vpop.f32.mrf.mxu2 }
 0x529   : > { %v13526_v35 = vadd.f32 %v7137_v30, %v13370_v14 }
 0x52c   : > { %v13487_v46 = vpop.f32.mrf.mxu3 }
 0x52e   : > { %v7189_v32 = vpop.f32.mrf.mxu1  ;;  %7345 = vmatmul.bf16.gmra.mxu0 %v14768_v24  ;;  %7394 = vmatmul.bf16.gmra.mxu1 %v14768_v24 }
 0x52f   : > { %7443 = vmatmul.bf16.gmra.mxu2 %v14768_v24  ;;  %7492 = vmatmul.bf16.gmra.mxu3 %v14768_v24  ;;  %v13529_v24 = vadd.f32 %v7186_v2, %v13370_v14  ;;  %v14775_v2 = vld [vmem:[#allocation13_spill] sm:$0xff] }
 0x530   : > { %v7140_v15 = vpop.f32.mrf.mxu0  ;;  %v13491_v12 = vpop.f32.mrf.mxu2 }
 0x534   : > { %v13493_v27 = vpop.f32.mrf.mxu3 }
 0x536   : > { %v7191_v54 = vpop.f32.mrf.mxu1 }
 0x538   : > { %v7142_v19 = vpop.f32.mrf.mxu0  ;;  %v13497_v38 = vpop.f32.mrf.mxu2 }
 0x53c   : > { %v13499_v8 = vpop.f32.mrf.mxu3 }
 0x53e   : > { %v7194_v42 = vpop.f32.mrf.mxu1  ;;  %7506 = vmatmul.bf16.vlgmr.msra.gmra.mxu0 %v13504_v23  ;;  %7555 = vmatmul.bf16.vlgmr.msra.gmra.mxu1 %v13504_v23 }
 0x53f   : > { %7604 = vmatmul.bf16.vlgmr.msra.gmra.mxu2 %v13504_v23  ;;  %7653 = vmatmul.bf16.vlgmr.msra.gmra.mxu3 %v13504_v23  ;;  %v14773_v23 = vld [vmem:[#allocation7_spill] sm:$0xff]  ;;  %v7195_v5 = vadd.f32 %v7194_v42, %v14774_v41 }
 0x540   : > { %v7145_v18 = vpop.f32.mrf.mxu0  ;;  %v7243_v28 = vpop.f32.mrf.mxu2 }
 0x541   : > { %v7146_v61 = vadd.f32 %v7145_v18, %v14774_v41 }
 0x543   : > { %v8082_v9 = vmax.f32 %v7146_v61, 0.0 }
 0x544   : > { %v7292_v45 = vpop.f32.mrf.mxu3 }
 0x546   : > { %v7196_v62 = vpop.f32.mrf.mxu1 }
 0x547   : > { %v7197_v18 = vadd.f32 %v7196_v62, %v13344_v16 }
 0x548   : > { %v7147_v47 = vpop.f32.mrf.mxu0  ;;  %v7245_v55 = vpop.f32.mrf.mxu2 }
 0x54c   : > { %v7294_v17 = vpop.f32.mrf.mxu3 }
 0x54e   : > { %v7199_v22 = vpop.f32.mrf.mxu1  ;;  %7511 = vmatmul.bf16.gmra.mxu0 %v13513_v25  ;;  %7560 = vmatmul.bf16.gmra.mxu1 %v13513_v25 }
 0x54f   : > { %v7200_v7 = vadd.f32 %v7199_v22, %v14771_v60  ;;  %7609 = vmatmul.bf16.gmra.mxu2 %v13513_v25  ;;  %7658 = vmatmul.bf16.gmra.mxu3 %v13513_v25  ;;  %v13537_v22 = vadd.f32 %v7189_v32, %v14773_v23  ;;  %v13544_v25 = vadd.f32 %v7142_v19, %v14776_v13 }
 0x550   : > { %v7150_v53 = vpop.f32.mrf.mxu0  ;;  %v7248_v52 = vpop.f32.mrf.mxu2  ;;  %v7148_v32 = vadd.f32 %v7147_v47, %v13344_v16  ;;  %v7295_v19 = vadd.f32 %v7294_v17, %v13344_v16 }
 0x551   : > { %v7151_v1 = vadd.f32 %v7150_v53, %v14771_v60  ;;  %v13534_v53 = vadd.f32 %v7140_v15, %v14773_v23  ;;  %v8115_v20 = vmax.f32 %v7200_v7, 0.0  ;;  %v13547_v15 = vadd.f32 %v7191_v54, %v14776_v13 }
 0x552   : > { %v7249_v42 = vadd.f32 %v7248_v52, %v14771_v60  ;;  %v7244_v52 = vadd.f32 %v7243_v28, %v14774_v41 }
 0x553   : > { %v8114_v34 = vmax.f32 %v7151_v1, 0.0  ;;  %v8050_v17 = vmax.f32 %v13534_v53, 0.0 }
 0x554   : > { %v7297_v40 = vpop.f32.mrf.mxu3  ;;  %v8116_v61 = vmax.f32 %v7249_v42, 0.0  ;;  %v8066_v42 = vmax.f32 %v13544_v25, 0.0  ;;  %v7236_v25 = vadd.f32 %v13485_v43, %v13370_v14  ;;  %v8034_v43 = vmax.f32 %v13526_v35, 0.0 }
 0x555   : > { %v7298_v59 = vadd.f32 %v7297_v40, %v14771_v60  ;;  %v7293_v40 = vadd.f32 %v7292_v45, %v14774_v41 }
 0x556   : > { %v7201_v30 = vpop.f32.mrf.mxu1 }
 0x557   : > { %v7202_v57 = vadd.f32 %v7201_v30, %v14775_v2  ;;  %v7246_v30 = vadd.f32 %v7245_v55, %v13344_v16 }
 0x558   : > { %v7152_v4 = vpop.f32.mrf.mxu0  ;;  %v7250_v63 = vpop.f32.mrf.mxu2 }
 0x559   : > { %v7153_v36 = vadd.f32 %v7152_v4, %v14775_v2  ;;  %v8131_v7 = vmax.f32 %v7202_v57, 0.0  ;;  %v8083_v4 = vmax.f32 %v7195_v5, 0.0  ;;  %v7251_v47 = vadd.f32 %v7250_v63, %v14775_v2 }
 0x55a   : > { %v8099_v57 = vmax.f32 %v7197_v18, 0.0  ;;  %v8117_v5 = vmax.f32 %v7298_v59, 0.0  ;;  %v8100_v45 = vmax.f32 %v7246_v30, 0.0  ;;  %v8018_v30 = vmax.f32 %v13520_v21, 0.0  ;;  %v13580_v21 = vld [vmem:[%s14435_s2 + $0x10] sm:$0xff] }
 0x55b   : > { %v8130_v1 = vmax.f32 %v7153_v36, 0.0  ;;  %v8259_v31 = vpack.c.bf16 %v8131_v7, %v8115_v20  ;;  %v8098_v36 = vmax.f32 %v7148_v32, 0.0  ;;  %v8132_v60 = vmax.f32 %v7251_v47, 0.0 }
 0x55c   : > { %v7299_v51 = vpop.f32.mrf.mxu3  ;;  %v7241_v20 = vadd.f32 %v13497_v38, %v14776_v13  ;;  %v8101_v32 = vmax.f32 %v7295_v19, 0.0  ;;  %v8243_v53 = vpack.c.bf16 %v8099_v57, %v8083_v4  ;;  %v7288_v38 = vadd.f32 %v13493_v27, %v14773_v23 }
 0x55d   : > { %v8258_v54 = vpack.c.bf16 %v8130_v1, %v8114_v34  ;;  %v7300_v62 = vadd.f32 %v7299_v51, %v14775_v2  ;;  %8294 = vmatpush.bf16.msra.mxu1 %v8259_v31  ;;  %v8051_v34 = vmax.f32 %v13537_v22, 0.0  ;;  %v7290_v51 = vadd.f32 %v13499_v8, %v14776_v13 }
 0x55e   : > { %v7360_v28 = vpop.f32.mrf.mxu1  ;;  %v8260_v18 = vpack.c.bf16 %v8132_v60, %v8116_v61  ;;  %v8067_v31 = vmax.f32 %v13547_v15, 0.0  ;;  %v8242_v1 = vpack.c.bf16 %v8098_v36, %v8082_v9  ;;  %v7239_v22 = vadd.f32 %v13491_v12, %v14773_v23  ;;  %7516 = vmatmul.bf16.gmra.mxu0 %v13580_v21  ;;  %7565 = vmatmul.bf16.gmra.mxu1 %v13580_v21 }
 0x55f   : > { %v8133_v55 = vmax.f32 %v7300_v62, 0.0  ;;  %8281 = vmatpush.bf16.msra.mxu0 %v8258_v54  ;;  %v8084_v7 = vmax.f32 %v7244_v52, 0.0  ;;  %v8085_v8 = vmax.f32 %v7293_v40, 0.0  ;;  %v8019_v60 = vmax.f32 %v13523_v0, 0.0  ;;  %7614 = vmatmul.bf16.gmra.mxu2 %v13580_v21 }
 0x560   : > { %v7311_v63 = vpop.f32.mrf.mxu0  ;;  %8307 = vmatpush.bf16.msra.mxu2 %v8260_v18  ;;  %v7285_v9 = vadd.f32 %v13487_v46, %v13370_v14  ;;  %v7409_v15 = vpop.f32.mrf.mxu2  ;;  %v8068_v12 = vmax.f32 %v7241_v20, 0.0  ;;  %v8069_v27 = vmax.f32 %v7290_v51, 0.0  ;;  %v8035_v46 = vmax.f32 %v13529_v24, 0.0  ;;  %7663 = vmatmul.bf16.gmra.mxu3 %v13580_v21 }
 0x561   : > { %v8261_v59 = vpack.c.bf16 %v8133_v55, %v8117_v5  ;;  %8295 = vmatpush.bf16.msra.mxu1 %v8243_v53  ;;  %v8244_v19 = vpack.c.bf16 %v8100_v45, %v8084_v7  ;;  %v8245_v54 = vpack.c.bf16 %v8101_v32, %v8085_v8  ;;  %v8226_v0 = vpack.c.bf16 %v8066_v42, %v8050_v17 }
 0x562   : > { %v8227_v47 = vpack.c.bf16 %v8067_v31, %v8051_v34  ;;  %v7234_v62 = vadd.f32 %v13473_v3, %v14772_v11  ;;  %v7283_v52 = vadd.f32 %v13475_v39, %v14772_v11  ;;  %v8052_v40 = vmax.f32 %v7239_v22, 0.0 }
 0x563   : > { %8320 = vmatpush.bf16.msra.mxu3 %v8261_v59  ;;  %8282 = vmatpush.bf16.msra.mxu0 %v8242_v1  ;;  %v8053_v36 = vmax.f32 %v7288_v38, 0.0  ;;  %v8036_v5 = vmax.f32 %v7236_v25, 0.0  ;;  %v8037_v35 = vmax.f32 %v7285_v9, 0.0  ;;  %v7361_v3 = vadd.f32 %v7360_v28, %v13376_v48 }
 0x564   : > { %v7458_v4 = vpop.f32.mrf.mxu3  ;;  %8308 = vmatpush.bf16.msra.mxu2 %v8244_v19  ;;  %v8228_v55 = vpack.c.bf16 %v8068_v12, %v8052_v40  ;;  %v8210_v17 = vpack.c.bf16 %v8034_v43, %v8018_v30  ;;  %v8211_v34 = vpack.c.bf16 %v8035_v46, %v8019_v60  ;;  %v8020_v20 = vmax.f32 %v7234_v62, 0.0  ;;  %v14782_v46 = vld [vmem:[#allocation15_spill] sm:$0xff]  ;;  %v14784_v62 = vld [vmem:[#allocation4_spill] sm:$0xff] }
 0x565   : > { %8296 = vmatpush.bf16.msra.mxu1 %v8227_v47  ;;  %v8229_v24 = vpack.c.bf16 %v8069_v27, %v8053_v36  ;;  %v8021_v51 = vmax.f32 %v7283_v52, 0.0  ;;  %v7312_v45 = vadd.f32 %v7311_v63, %v13376_v48  ;;  %v7895_v53 = vmax.f32 %v7361_v3, 0.0  ;;  %v14783_v47 = vld [vmem:[#allocation14_spill] sm:$0xff]  ;;  %v14785_v40 = vld [vmem:[#allocation19_spill] sm:$0xff] }
 0x566   : > { %v7362_v61 = vpop.f32.mrf.mxu1  ;;  %v8212_v31 = vpack.c.bf16 %v8036_v5, %v8020_v20  ;;  %v7410_v22 = vadd.f32 %v7409_v15, %v13376_v48  ;;  %v7459_v38 = vadd.f32 %v7458_v4, %v13376_v48  ;;  %v14788_v3 = vld [vmem:[#allocation6_spill] sm:$0xff] }
 0x567   : > { %8321 = vmatpush.bf16.msra.mxu3 %v8245_v54  ;;  %8283 = vmatpush.bf16.msra.mxu0 %v8226_v0  ;;  %v7363_v39 = vadd.f32 %v7362_v61, %v13378_v6  ;;  %v8213_v1 = vpack.c.bf16 %v8037_v35, %v8021_v51  ;;  %v7894_v63 = vmax.f32 %v7312_v45, 0.0 }
 0x568   : > { %v7313_v57 = vpop.f32.mrf.mxu0  ;;  %8309 = vmatpush.bf16.msra.mxu2 %v8228_v55  ;;  %v7411_v18 = vpop.f32.mrf.mxu2  ;;  %v7896_v12 = vmax.f32 %v7410_v22, 0.0  ;;  %v7897_v27 = vmax.f32 %v7459_v38, 0.0  ;;  %v13652_v22 = vld [vmem:[%s14435_s2 + $0x20] sm:$0xff] }
 0x569   : > { %v7314_v32 = vadd.f32 %v7313_v57, %v13378_v6  ;;  %8297 = vmatpush.bf16.msra.mxu1 %v8211_v34  ;;  %v7412_v42 = vadd.f32 %v7411_v18, %v13378_v6  ;;  %v7911_v7 = vmax.f32 %v7363_v39, 0.0  ;;  %14793 = vst [vmem:[#allocation8_spill] sm:$0xff] %v13652_v22 }
 0x56b   : > { %8322 = vmatpush.bf16.msra.mxu3 %v8229_v24  ;;  %8284 = vmatpush.bf16.msra.mxu0 %v8210_v17  ;;  %v7910_v8 = vmax.f32 %v7314_v32, 0.0  ;;  %v7912_v30 = vmax.f32 %v7412_v42, 0.0  ;;  %v13602_v19 = vpack.c.bf16 %v7911_v7, %v7895_v53  ;;  %v14787_v24 = vld [vmem:[#allocation21_spill] sm:$0xff] }
 0x56c   : > { %v7460_v59 = vpop.f32.mrf.mxu3  ;;  %8310 = vmatpush.bf16.msra.mxu2 %v8212_v31 }
 0x56d   : > { %v7461_v28 = vadd.f32 %v7460_v59, %v13378_v6  ;;  %8298 = vmatpush.bf16.msra.mxu1 %v13469_v49  ;;  %14777 = vst [vmem:[#allocation2_spill] sm:$0xff] %v13602_v19  ;;  %v13608_v54 = vpack.c.bf16 %v7910_v8, %v7894_v63  ;;  %v13610_v43 = vpack.c.bf16 %v7912_v30, %v7896_v12  ;;  %v13617_v49 = vld [vmem:[%s14435_s2 + $0x18] sm:$0xff]  ;;  %v14794_v63 = vld [vmem:[#allocation26_spill] sm:$0xff] }
 0x56e   : > { %v7365_v9 = vpop.f32.mrf.mxu1  ;;  %7521 = vmatmul.bf16.gmra.mxu0 %v13617_v49  ;;  %7570 = vmatmul.bf16.gmra.mxu1 %v13617_v49  ;;  %v14795_v30 = vld [vmem:[#allocation25_spill] sm:$0xff] }
 0x56f   : > { %8323 = vmatpush.bf16.msra.mxu3 %v8213_v1  ;;  %v7913_v60 = vmax.f32 %v7461_v28, 0.0  ;;  %8285 = vmatpush.bf16.msra.mxu0 %v13477_v10  ;;  %14778 = vst [vmem:[#allocation34_spill] sm:$0xff] %v13608_v54 }
 0x570   : > { %v7316_v25 = vpop.f32.mrf.mxu0  ;;  %8311 = vmatpush.bf16.msra.mxu2 %v13479_v29  ;;  %v7414_v15 = vpop.f32.mrf.mxu2  ;;  %14779 = vst [vmem:[#allocation31_spill] sm:$0xff] %v13610_v43  ;;  %7668 = vmatmul.bf16.gmra.mxu3 %v13617_v49  ;;  %v14781_v29 = vld [vmem:[#allocation24_spill] sm:$0xff] }
 0x571   : > { %8299 = vmatpush.bf16.msra.mxu1 %v13449_v56  ;;  %v13612_v10 = vpack.c.bf16 %v7913_v60, %v7897_v27  ;;  %7619 = vmatmul.bf16.gmra.mxu2 %v13617_v49  ;;  %v7415_v5 = vadd.f32 %v7414_v15, %v14781_v29 }
 0x573   : > { %8324 = vmatpush.bf16.msra.mxu3 %v13481_v44  ;;  %8286 = vmatpush.bf16.msra.mxu0 %v13453_v50  ;;  %14780 = vst [vmem:[#allocation27_spill] sm:$0xff] %v13612_v10  ;;  %v7366_v44 = vadd.f32 %v7365_v9, %v14781_v29  ;;  %v7928_v32 = vmax.f32 %v7415_v5, 0.0 }
 0x574   : > { %v7463_v4 = vpop.f32.mrf.mxu3  ;;  %8312 = vmatpush.bf16.msra.mxu2 %v13455_v58  ;;  %v7317_v58 = vadd.f32 %v7316_v25, %v14781_v29 }
 0x575   : > { %8300 = vmatpush.bf16.msra.mxu1 %v13429_v33  ;;  %v14786_v33 = vld [vmem:[#allocation20_spill] sm:$0xff]  ;;  %v7927_v61 = vmax.f32 %v7366_v44, 0.0  ;;  %v7464_v35 = vadd.f32 %v7463_v4, %v14781_v29 }
 0x576   : > { %v7367_v50 = vpop.f32.mrf.mxu1  ;;  %v7926_v39 = vmax.f32 %v7317_v58, 0.0 }
 0x577   : > { %8325 = vmatpush.bf16.msra.mxu3 %v13457_v26  ;;  %8287 = vmatpush.bf16.msra.mxu0 %v13433_v37  ;;  %v7368_v0 = vadd.f32 %v7367_v50, %v14782_v46  ;;  %v7929_v18 = vmax.f32 %v7464_v35, 0.0 }
 0x578   : > { %v7318_v56 = vpop.f32.mrf.mxu0  ;;  %8313 = vmatpush.bf16.msra.mxu2 %v14783_v47  ;;  %v7416_v52 = vpop.f32.mrf.mxu2 }
 0x579   : > { %v7319_v26 = vadd.f32 %v7318_v56, %v14782_v46  ;;  %8301 = vmatpush.bf16.msra.mxu1 %v14786_v33  ;;  %v7417_v36 = vadd.f32 %v7416_v52, %v14782_v46  ;;  %v7943_v55 = vmax.f32 %v7368_v0, 0.0 }
 0x57b   : > { %8326 = vmatpush.bf16.msra.mxu3 %v14784_v62  ;;  %8288 = vmatpush.bf16.msra.mxu0 %v14785_v40  ;;  %v7942_v17 = vmax.f32 %v7319_v26, 0.0  ;;  %v7944_v34 = vmax.f32 %v7417_v36, 0.0  ;;  %v13641_v59 = vpack.c.bf16 %v7943_v55, %v7927_v61 }
 0x57c   : > { %v7465_v37 = vpop.f32.mrf.mxu3  ;;  %8314 = vmatpush.bf16.msra.mxu2 %v14787_v24  ;;  %v13677_v24 = vld [vmem:[%s14435_s2 + $0x28] sm:$0xff] }
 0x57d   : > { %v7466_v57 = vadd.f32 %v7465_v37, %v14782_v46  ;;  %14789 = vst [vmem:[#allocation23_spill] sm:$0xff] %v13641_v59  ;;  %v13643_v31 = vpack.c.bf16 %v7942_v17, %v7926_v39  ;;  %v13645_v1 = vpack.c.bf16 %v7944_v34, %v7928_v32  ;;  %v14797_v17 = vld [vmem:[#allocation28_spill] sm:$0xff] }
 0x57e   : > { %v7370_v45 = vpop.f32.mrf.mxu1  ;;  %7526 = vmatmul.bf16.gmra.mxu0 %v13652_v22  ;;  %7575 = vmatmul.bf16.gmra.mxu1 %v13652_v22  ;;  %14796 = vst [vmem:[#allocation11_spill] sm:$0xff] %v13677_v24 }
 0x57f   : > { %8327 = vmatpush.bf16.msra.mxu3 %v14788_v3  ;;  %v7945_v20 = vmax.f32 %v7466_v57, 0.0  ;;  %14790 = vst [vmem:[#allocation9_spill] sm:$0xff] %v13643_v31  ;;  %v7371_v8 = vadd.f32 %v7370_v45, %v14794_v63 }
 0x580   : > { %v7321_v51 = vpop.f32.mrf.mxu0  ;;  %v7419_v42 = vpop.f32.mrf.mxu2  ;;  %14791 = vst [vmem:[#allocation3_spill] sm:$0xff] %v13645_v1  ;;  %7673 = vmatmul.bf16.gmra.mxu3 %v13652_v22 }
 0x581   : > { %v13647_v53 = vpack.c.bf16 %v7945_v20, %v7929_v18  ;;  %7624 = vmatmul.bf16.gmra.mxu2 %v13652_v22  ;;  %v7322_v25 = vadd.f32 %v7321_v51, %v14794_v63  ;;  %v7959_v56 = vmax.f32 %v7371_v8, 0.0  ;;  %v7420_v50 = vadd.f32 %v7419_v42, %v14794_v63  ;;  %v14798_v20 = vld [vmem:[#allocation30_spill] sm:$0xff] }
 0x583   : > { %14792 = vst [vmem:[#allocation17_spill] sm:$0xff] %v13647_v53  ;;  %v7958_v47 = vmax.f32 %v7322_v25, 0.0  ;;  %v7960_v40 = vmax.f32 %v7420_v50, 0.0 }
 0x584   : > { %v7468_v28 = vpop.f32.mrf.mxu3 }
 0x585   : > { %v7469_v44 = vadd.f32 %v7468_v28, %v14794_v63 }
 0x586   : > { %v7372_v7 = vpop.f32.mrf.mxu1 }
 0x587   : > { %v7373_v60 = vadd.f32 %v7372_v7, %v14795_v30  ;;  %v7961_v33 = vmax.f32 %v7469_v44, 0.0 }
 0x588   : > { %v7323_v38 = vpop.f32.mrf.mxu0  ;;  %v7421_v12 = vpop.f32.mrf.mxu2 }
 0x589   : > { %v7324_v9 = vadd.f32 %v7323_v38, %v14795_v30  ;;  %v7422_v15 = vadd.f32 %v7421_v12, %v14795_v30  ;;  %v7975_v0 = vmax.f32 %v7373_v60, 0.0 }
 0x58b   : > { %v7974_v62 = vmax.f32 %v7324_v9, 0.0  ;;  %v7976_v58 = vmax.f32 %v7422_v15, 0.0  ;;  %v13666_v36 = vpack.c.bf16 %v7975_v0, %v7959_v56 }
 0x58c   : > { %v7470_v27 = vpop.f32.mrf.mxu3 }
 0x58d   : > { %v7471_v4 = vadd.f32 %v7470_v27, %v14795_v30  ;;  %v13668_v5 = vpack.c.bf16 %v7974_v62, %v7958_v47  ;;  %v13670_v35 = vpack.c.bf16 %v7976_v58, %v7960_v40  ;;  %v14803_v30 = vld [vmem:[#allocation5_spill] sm:$0xff] }
 0x58e   : > { %v7375_v37 = vpop.f32.mrf.mxu1  ;;  %7531 = vmatmul.bf16.gmra.mxu0 %v13677_v24  ;;  %7580 = vmatmul.bf16.gmra.mxu1 %v13677_v24 }
 0x58f   : > { %v7977_v26 = vmax.f32 %v7471_v4, 0.0  ;;  %v7376_v34 = vadd.f32 %v7375_v37, %v14797_v17  ;;  %v13706_v37 = vld [vmem:[%s14435_s2 + $0x30] sm:$0xff] }
 0x590   : > { %v7326_v52 = vpop.f32.mrf.mxu0  ;;  %v7424_v57 = vpop.f32.mrf.mxu2  ;;  %7678 = vmatmul.bf16.gmra.mxu3 %v13677_v24  ;;  %14799 = vst [vmem:[#allocation12_spill] sm:$0xff] %v13706_v37 }
 0x591   : > { %v13672_v55 = vpack.c.bf16 %v7977_v26, %v7961_v33  ;;  %7629 = vmatmul.bf16.gmra.mxu2 %v13677_v24  ;;  %v7327_v45 = vadd.f32 %v7326_v52, %v14797_v17  ;;  %v7991_v7 = vmax.f32 %v7376_v34, 0.0  ;;  %v7425_v8 = vadd.f32 %v7424_v57, %v14797_v17 }
 0x593   : > { %v7990_v9 = vmax.f32 %v7327_v45, 0.0  ;;  %v7992_v50 = vmax.f32 %v7425_v8, 0.0  ;;  %v13723_v45 = vld [vmem:[%s14435_s2 + $0x38] sm:$0xff]  ;;  %v8275_v8 = vld [vmem:[%s14438_s5] sm:$0xff] }
 0x594   : > { %v7473_v61 = vpop.f32.mrf.mxu3  ;;  %14800 = vst [vmem:[#allocation22_spill] sm:$0xff] %v13723_v45  ;;  %8278 = vperm.xlu1 %9244, %v8275_v8  }
 0x595   : > { %v7474_v60 = vadd.f32 %v7473_v61, %v14797_v17  ;;  %v14802_v17 = vld [vmem:[#allocation10_spill] sm:$0xff] }
 0x596   : > { %v7377_v39 = vpop.f32.mrf.mxu1 }
 0x597   : > { %v7378_v51 = vadd.f32 %v7377_v39, %v14798_v20  ;;  %v7993_v44 = vmax.f32 %v7474_v60, 0.0 }
 0x598   : > { %v7328_v3 = vpop.f32.mrf.mxu0  ;;  %v7426_v18 = vpop.f32.mrf.mxu2 }
 0x599   : > { %v7329_v32 = vadd.f32 %v7328_v3, %v14798_v20  ;;  %v7427_v28 = vadd.f32 %v7426_v18, %v14798_v20  ;;  %v8007_v25 = vmax.f32 %v7378_v51, 0.0 }
 0x59b   : > { %v8006_v12 = vmax.f32 %v7329_v32, 0.0  ;;  %v8008_v27 = vmax.f32 %v7427_v28, 0.0  ;;  %v13691_v0 = vpack.c.bf16 %v8007_v25, %v7991_v7 }
 0x59c   : > { %v7475_v42 = vpop.f32.mrf.mxu3 }
 0x59d   : > { %v7476_v38 = vadd.f32 %v7475_v42, %v14798_v20  ;;  %v13697_v58 = vpack.c.bf16 %v8006_v12, %v7990_v9  ;;  %v13699_v26 = vpack.c.bf16 %v8008_v27, %v7992_v50  ;;  %v14801_v9 = vld [vmem:[#allocation16_spill] sm:$0xff] }
 0x59e   : > { %v7380_v56 = vpop.f32.mrf.mxu1  ;;  %7536 = vmatmul.bf16.gmra.mxu0 %v13706_v37  ;;  %7585 = vmatmul.bf16.gmra.mxu1 %v13706_v37 }
 0x59f   : > { %v8009_v15 = vmax.f32 %v7476_v38, 0.0  ;;  %v13748_v22 = vadd.f32 %v7380_v56, %v14772_v11 }
 0x5a0   : > { %v7331_v4 = vpop.f32.mrf.mxu0  ;;  %v13693_v47 = vpop.f32.mrf.mxu2  ;;  %7683 = vmatmul.bf16.gmra.mxu3 %v13706_v37 }
 0x5a1   : > { %v13701_v52 = vpack.c.bf16 %v8009_v15, %v7993_v44  ;;  %7634 = vmatmul.bf16.gmra.mxu2 %v13706_v37  ;;  %v13745_v63 = vadd.f32 %v7331_v4, %v14772_v11 }
 0x5a4   : > { %v13695_v62 = vpop.f32.mrf.mxu3 }
 0x5a6   : > { %v7382_v33 = vpop.f32.mrf.mxu1 }
 0x5a7   : > { %v13754_v10 = vadd.f32 %v7382_v33, %v13370_v14 }
 0x5a8   : > { %v7333_v40 = vpop.f32.mrf.mxu0  ;;  %v13712_v57 = vpop.f32.mrf.mxu2 }
 0x5ac   : > { %v13714_v61 = vpop.f32.mrf.mxu3 }
 0x5ae   : > { %v7385_v39 = vpop.f32.mrf.mxu1  ;;  %7541 = vmatmul.bf16.gmra.mxu0 %v13723_v45  ;;  %7590 = vmatmul.bf16.gmra.mxu1 %v13723_v45 }
 0x5b0   : > { %v7336_v3 = vpop.f32.mrf.mxu0  ;;  %v13716_v34 = vpop.f32.mrf.mxu2  ;;  %7688 = vmatmul.bf16.gmra.mxu3 %v13723_v45 }
 0x5b1   : > { %7639 = vmatmul.bf16.gmra.mxu2 %v13723_v45 }
 0x5b4   : > { %v13718_v51 = vpop.f32.mrf.mxu3 }
 0x5b6   : > { %v7387_v18 = vpop.f32.mrf.mxu1 }
 0x5b8   : > { %v7338_v32 = vpop.f32.mrf.mxu0  ;;  %v13729_v42 = vpop.f32.mrf.mxu2 }
 0x5b9   : > { %v13769_v33 = vadd.f32 %v7338_v32, %v14776_v13 }
 0x5bc   : > { %v13731_v28 = vpop.f32.mrf.mxu3 }
 0x5be   : > { %v7390_v7 = vpop.f32.mrf.mxu1  ;;  %7702 = vmatmul.bf16.vlgmr.msrb.gmra.mxu0 %v14801_v9  ;;  %7751 = vmatmul.bf16.vlgmr.msrb.gmra.mxu1 %v14801_v9 }
 0x5bf   : > { %v7391_v4 = vadd.f32 %v7390_v7, %v14774_v41 }
 0x5c0   : > { %v7341_v38 = vpop.f32.mrf.mxu0  ;;  %v7439_v60 = vpop.f32.mrf.mxu2  ;;  %7849 = vmatmul.bf16.vlgmr.msrb.gmra.mxu3 %v14801_v9 }
 0x5c1   : > { %7800 = vmatmul.bf16.vlgmr.msrb.gmra.mxu2 %v14801_v9  ;;  %v13751_v9 = vadd.f32 %v7333_v40, %v13370_v14  ;;  %v7342_v43 = vadd.f32 %v7341_v38, %v14774_v41  ;;  %v8087_v46 = vmax.f32 %v7391_v4, 0.0 }
 0x5c4   : > { %v7488_v25 = vpop.f32.mrf.mxu3 }
 0x5c6   : > { %v7392_v27 = vpop.f32.mrf.mxu1 }
 0x5c7   : > { %v7393_v38 = vadd.f32 %v7392_v27, %v13344_v16 }
 0x5c8   : > { %v7343_v12 = vpop.f32.mrf.mxu0  ;;  %v7441_v15 = vpop.f32.mrf.mxu2 }
 0x5cc   : > { %v7490_v50 = vpop.f32.mrf.mxu3 }
 0x5cd   : > { %v7491_v32 = vadd.f32 %v7490_v50, %v13344_v16 }
 0x5ce   : > { %v7395_v45 = vpop.f32.mrf.mxu1  ;;  %7707 = vmatmul.bf16.gmra.mxu0 %v14803_v30  ;;  %7756 = vmatmul.bf16.gmra.mxu1 %v14803_v30 }
 0x5cf   : > { %v7396_v8 = vadd.f32 %v7395_v45, %v14802_v17  ;;  %v13760_v45 = vadd.f32 %v7385_v39, %v14773_v23  ;;  %v7344_v39 = vadd.f32 %v7343_v12, %v13344_v16 }
 0x5d0   : > { %v7346_v44 = vpop.f32.mrf.mxu0  ;;  %v7444_v37 = vpop.f32.mrf.mxu2  ;;  %7854 = vmatmul.bf16.gmra.mxu3 %v14803_v30 }
 0x5d1   : > { %v7347_v24 = vadd.f32 %v7346_v44, %v14802_v17  ;;  %v13757_v44 = vadd.f32 %v7336_v3, %v14773_v23  ;;  %v8119_v53 = vmax.f32 %v7396_v8, 0.0  ;;  %7805 = vmatmul.bf16.gmra.mxu2 %v14803_v30  ;;  %v13772_v3 = vadd.f32 %v7387_v18, %v14776_v13 }
 0x5d2   : > { %v8086_v8 = vmax.f32 %v7342_v43, 0.0  ;;  %v7442_v30 = vadd.f32 %v7441_v15, %v13344_v16 }
 0x5d3   : > { %v8118_v56 = vmax.f32 %v7347_v24, 0.0  ;;  %v7445_v24 = vadd.f32 %v7444_v37, %v14802_v17  ;;  %v7440_v37 = vadd.f32 %v7439_v60, %v14774_v41  ;;  %v8054_v50 = vmax.f32 %v13757_v44, 0.0 }
 0x5d4   : > { %v7493_v20 = vpop.f32.mrf.mxu3 }
 0x5d5   : > { %v8120_v43 = vmax.f32 %v7445_v24, 0.0 }
 0x5d6   : > { %v7397_v54 = vpop.f32.mrf.mxu1 }
 0x5d7   : > { %v7398_v1 = vadd.f32 %v7397_v54, %v14775_v2 }
 0x5d8   : > { %v7348_v19 = vpop.f32.mrf.mxu0  ;;  %v7446_v29 = vpop.f32.mrf.mxu2 }
 0x5d9   : > { %v7349_v40 = vadd.f32 %v7348_v19, %v14775_v2  ;;  %v7494_v19 = vadd.f32 %v7493_v20, %v14802_v17  ;;  %v8135_v54 = vmax.f32 %v7398_v1, 0.0  ;;  %v7447_v12 = vadd.f32 %v7446_v29, %v14775_v2 }
 0x5da   : > { %v7489_v20 = vadd.f32 %v7488_v25, %v14774_v41  ;;  %v8103_v1 = vmax.f32 %v7393_v38, 0.0  ;;  %v7437_v29 = vadd.f32 %v13729_v42, %v14776_v13  ;;  %v7484_v42 = vadd.f32 %v13718_v51, %v14773_v23 }
 0x5db   : > { %v8134_v7 = vmax.f32 %v7349_v40, 0.0  ;;  %v8263_v31 = vpack.c.bf16 %v8135_v54, %v8119_v53  ;;  %v8102_v40 = vmax.f32 %v7344_v39, 0.0  ;;  %v8121_v4 = vmax.f32 %v7494_v19, 0.0 }
 0x5dc   : > { %v7495_v59 = vpop.f32.mrf.mxu3  ;;  %v8136_v17 = vmax.f32 %v7447_v12, 0.0  ;;  %v8055_v53 = vmax.f32 %v13760_v45, 0.0  ;;  %v8105_v39 = vmax.f32 %v7491_v32, 0.0  ;;  %v8070_v19 = vmax.f32 %v13769_v33, 0.0 }
 0x5dd   : > { %v8262_v18 = vpack.c.bf16 %v8134_v7, %v8118_v56  ;;  %v7496_v27 = vadd.f32 %v7495_v59, %v14775_v2  ;;  %8346 = vmatpush.bf16.msrb.mxu1 %v8263_v31  ;;  %v7486_v59 = vadd.f32 %v13731_v28, %v14776_v13  ;;  %v8104_v56 = vmax.f32 %v7442_v30, 0.0 }
 0x5de   : > { %v7556_v25 = vpop.f32.mrf.mxu1  ;;  %v8264_v38 = vpack.c.bf16 %v8136_v17, %v8120_v43  ;;  %v8071_v31 = vmax.f32 %v13772_v3, 0.0  ;;  %v8246_v7 = vpack.c.bf16 %v8102_v40, %v8086_v8  ;;  %v8247_v44 = vpack.c.bf16 %v8103_v1, %v8087_v46  ;;  %7712 = vmatmul.bf16.gmra.mxu0 %v13580_v21  ;;  %7761 = vmatmul.bf16.gmra.mxu1 %v13580_v21 }
 0x5df   : > { %v8137_v15 = vmax.f32 %v7496_v27, 0.0  ;;  %8333 = vmatpush.bf16.msrb.mxu0 %v8262_v18  ;;  %v7435_v45 = vadd.f32 %v13716_v34, %v14773_v23  ;;  %v8088_v54 = vmax.f32 %v7440_v37, 0.0  ;;  %v8089_v28 = vmax.f32 %v7489_v20, 0.0 }
 0x5e0   : > { %v7507_v60 = vpop.f32.mrf.mxu0  ;;  %8359 = vmatpush.bf16.msrb.mxu2 %v8264_v38  ;;  %v8022_v30 = vmax.f32 %v13745_v63, 0.0  ;;  %v8023_v17 = vmax.f32 %v13748_v22, 0.0  ;;  %v7432_v33 = vadd.f32 %v13712_v57, %v13370_v14  ;;  %v7481_v46 = vadd.f32 %v13714_v61, %v13370_v14  ;;  %v7605_v3 = vpop.f32.mrf.mxu2  ;;  %7859 = vmatmul.bf16.gmra.mxu3 %v13580_v21 }
 0x5e1   : > { %v8265_v24 = vpack.c.bf16 %v8137_v15, %v8121_v4  ;;  %8347 = vmatpush.bf16.msrb.mxu1 %v8247_v44  ;;  %v8072_v34 = vmax.f32 %v7437_v29, 0.0  ;;  %v8073_v51 = vmax.f32 %v7486_v59, 0.0  ;;  %v8248_v32 = vpack.c.bf16 %v8104_v56, %v8088_v54  ;;  %7810 = vmatmul.bf16.gmra.mxu2 %v13580_v21 }
 0x5e2   : > { %v8249_v18 = vpack.c.bf16 %v8105_v39, %v8089_v28  ;;  %v8038_v22 = vmax.f32 %v13751_v9, 0.0  ;;  %v8039_v63 = vmax.f32 %v13754_v10, 0.0  ;;  %v8230_v57 = vpack.c.bf16 %v8070_v19, %v8054_v50 }
 0x5e3   : > { %8372 = vmatpush.bf16.msrb.mxu3 %v8265_v24  ;;  %8334 = vmatpush.bf16.msrb.mxu0 %v8246_v7  ;;  %v8231_v12 = vpack.c.bf16 %v8071_v31, %v8055_v53  ;;  %v7430_v61 = vadd.f32 %v13693_v47, %v14772_v11  ;;  %v7479_v27 = vadd.f32 %v13695_v62, %v14772_v11  ;;  %v8056_v37 = vmax.f32 %v7435_v45, 0.0 }
 0x5e4   : > { %v7654_v8 = vpop.f32.mrf.mxu3  ;;  %v8057_v20 = vmax.f32 %v7484_v42, 0.0  ;;  %8360 = vmatpush.bf16.msrb.mxu2 %v8248_v32  ;;  %v8040_v43 = vmax.f32 %v7432_v33, 0.0  ;;  %v8041_v9 = vmax.f32 %v7481_v46, 0.0  ;;  %v7557_v47 = vadd.f32 %v7556_v25, %v13376_v48 }
 0x5e5   : > { %8348 = vmatpush.bf16.msrb.mxu1 %v8231_v12  ;;  %v8232_v4 = vpack.c.bf16 %v8072_v34, %v8056_v37  ;;  %v8214_v15 = vpack.c.bf16 %v8038_v22, %v8022_v30  ;;  %v8215_v50 = vpack.c.bf16 %v8039_v63, %v8023_v17  ;;  %v8024_v53 = vmax.f32 %v7430_v61, 0.0  ;;  %v14811_v22 = vld [vmem:[#allocation15_spill] sm:$0xff]  ;;  %v14813_v12 = vld [vmem:[#allocation17_spill] sm:$0xff]  ;;  %v14814_v37 = vld [vmem:[#allocation34_spill] sm:$0xff] }
 0x5e6   : > { %v7558_v1 = vpop.f32.mrf.mxu1  ;;  %v8233_v10 = vpack.c.bf16 %v8073_v51, %v8057_v20  ;;  %v8025_v29 = vmax.f32 %v7479_v27, 0.0  ;;  %v7508_v59 = vadd.f32 %v7507_v60, %v13376_v48  ;;  %v7899_v31 = vmax.f32 %v7557_v47, 0.0  ;;  %v14815_v20 = vld [vmem:[#allocation2_spill] sm:$0xff]  ;;  %v14817_v47 = vld [vmem:[#allocation27_spill] sm:$0xff] }
 0x5e7   : > { %8373 = vmatpush.bf16.msrb.mxu3 %v8249_v18  ;;  %8335 = vmatpush.bf16.msrb.mxu0 %v8230_v57  ;;  %v7559_v62 = vadd.f32 %v7558_v1, %v13378_v6  ;;  %v8216_v24 = vpack.c.bf16 %v8040_v43, %v8024_v53  ;;  %v7606_v7 = vadd.f32 %v7605_v3, %v13376_v48  ;;  %v14812_v57 = vld [vmem:[#allocation3_spill] sm:$0xff] }
 0x5e8   : > { %v7509_v40 = vpop.f32.mrf.mxu0  ;;  %8361 = vmatpush.bf16.msrb.mxu2 %v8232_v4  ;;  %v7607_v39 = vpop.f32.mrf.mxu2  ;;  %v8217_v19 = vpack.c.bf16 %v8041_v9, %v8025_v29  ;;  %v7655_v44 = vadd.f32 %v7654_v8, %v13376_v48  ;;  %v7898_v60 = vmax.f32 %v7508_v59, 0.0 }
 0x5e9   : > { %v7510_v56 = vadd.f32 %v7509_v40, %v13378_v6  ;;  %8349 = vmatpush.bf16.msrb.mxu1 %v8215_v50  ;;  %v7608_v21 = vadd.f32 %v7607_v39, %v13378_v6  ;;  %v7915_v45 = vmax.f32 %v7559_v62, 0.0  ;;  %v7900_v33 = vmax.f32 %v7606_v7, 0.0  ;;  %v14820_v7 = vld [vmem:[#allocation8_spill] sm:$0xff] }
 0x5ea   : > { %v7901_v46 = vmax.f32 %v7655_v44, 0.0 }
 0x5eb   : > { %8374 = vmatpush.bf16.msrb.mxu3 %v8233_v10  ;;  %8336 = vmatpush.bf16.msrb.mxu0 %v8214_v15  ;;  %v7914_v42 = vmax.f32 %v7510_v56, 0.0  ;;  %v7916_v54 = vmax.f32 %v7608_v21, 0.0  ;;  %v13822_v34 = vpack.c.bf16 %v7915_v45, %v7899_v31  ;;  %v14816_v10 = vld [vmem:[#allocation31_spill] sm:$0xff] }
 0x5ec   : > { %v7656_v38 = vpop.f32.mrf.mxu3  ;;  %8362 = vmatpush.bf16.msrb.mxu2 %v8216_v24 }
 0x5ed   : > { %v7657_v25 = vadd.f32 %v7656_v38, %v13378_v6  ;;  %8350 = vmatpush.bf16.msrb.mxu1 %v13691_v0  ;;  %14804 = vst [vmem:[#allocation18_spill] sm:$0xff] %v13822_v34  ;;  %v13828_v51 = vpack.c.bf16 %v7914_v42, %v7898_v60  ;;  %v13830_v32 = vpack.c.bf16 %v7916_v54, %v7900_v33  ;;  %v14821_v60 = vld [vmem:[#allocation26_spill] sm:$0xff]  ;;  %v14822_v54 = vld [vmem:[#allocation25_spill] sm:$0xff] }
 0x5ee   : > { %v7561_v17 = vpop.f32.mrf.mxu1  ;;  %7717 = vmatmul.bf16.gmra.mxu0 %v13617_v49  ;;  %7766 = vmatmul.bf16.gmra.mxu1 %v13617_v49 }
 0x5ef   : > { %8375 = vmatpush.bf16.msrb.mxu3 %v8217_v19  ;;  %v7917_v28 = vmax.f32 %v7657_v25, 0.0  ;;  %8337 = vmatpush.bf16.msrb.mxu0 %v13697_v58  ;;  %14805 = vst [vmem:[#allocation7_spill] sm:$0xff] %v13828_v51 }
 0x5f0   : > { %v7512_v30 = vpop.f32.mrf.mxu0  ;;  %8363 = vmatpush.bf16.msrb.mxu2 %v13699_v26  ;;  %v7610_v3 = vpop.f32.mrf.mxu2  ;;  %14806 = vst [vmem:[#allocation29_spill] sm:$0xff] %v13830_v32  ;;  %7864 = vmatmul.bf16.gmra.mxu3 %v13617_v49 }
 0x5f1   : > { %8351 = vmatpush.bf16.msrb.mxu1 %v13666_v36  ;;  %v13832_v58 = vpack.c.bf16 %v7917_v28, %v7901_v46  ;;  %7815 = vmatmul.bf16.gmra.mxu2 %v13617_v49  ;;  %v14810_v36 = vld [vmem:[#allocation24_spill] sm:$0xff] }
 0x5f2   : > { %v7562_v18 = vadd.f32 %v7561_v17, %v14810_v36  ;;  %v7611_v43 = vadd.f32 %v7610_v3, %v14810_v36 }
 0x5f3   : > { %8376 = vmatpush.bf16.msrb.mxu3 %v13701_v52  ;;  %8338 = vmatpush.bf16.msrb.mxu0 %v13668_v5  ;;  %14807 = vst [vmem:[#allocation13_spill] sm:$0xff] %v13832_v58  ;;  %v14808_v52 = vld [vmem:[#allocation9_spill] sm:$0xff]  ;;  %v14809_v5 = vld [vmem:[#allocation23_spill] sm:$0xff] }
 0x5f4   : > { %v7659_v8 = vpop.f32.mrf.mxu3  ;;  %8364 = vmatpush.bf16.msrb.mxu2 %v13670_v35  ;;  %v7513_v35 = vadd.f32 %v7512_v30, %v14810_v36  ;;  %v7931_v1 = vmax.f32 %v7562_v18, 0.0  ;;  %v7932_v56 = vmax.f32 %v7611_v43, 0.0 }
 0x5f5   : > { %8352 = vmatpush.bf16.msrb.mxu1 %v14809_v5  ;;  %v7660_v9 = vadd.f32 %v7659_v8, %v14810_v36 }
 0x5f6   : > { %v7563_v26 = vpop.f32.mrf.mxu1  ;;  %v7930_v62 = vmax.f32 %v7513_v35, 0.0 }
 0x5f7   : > { %8377 = vmatpush.bf16.msrb.mxu3 %v13672_v55  ;;  %8339 = vmatpush.bf16.msrb.mxu0 %v14808_v52  ;;  %v7564_v63 = vadd.f32 %v7563_v26, %v14811_v22  ;;  %v7933_v39 = vmax.f32 %v7660_v9, 0.0  ;;  %v14823_v9 = vld [vmem:[#allocation11_spill] sm:$0xff] }
 0x5f8   : > { %v7514_v0 = vpop.f32.mrf.mxu0  ;;  %8365 = vmatpush.bf16.msrb.mxu2 %v14812_v57  ;;  %v7612_v61 = vpop.f32.mrf.mxu2 }
 0x5f9   : > { %v7515_v55 = vadd.f32 %v7514_v0, %v14811_v22  ;;  %8353 = vmatpush.bf16.msrb.mxu1 %v14815_v20  ;;  %v7613_v49 = vadd.f32 %v7612_v61, %v14811_v22  ;;  %v7947_v4 = vmax.f32 %v7564_v63, 0.0 }
 0x5fb   : > { %8378 = vmatpush.bf16.msrb.mxu3 %v14813_v12  ;;  %8340 = vmatpush.bf16.msrb.mxu0 %v14814_v37  ;;  %v7946_v15 = vmax.f32 %v7515_v55, 0.0  ;;  %v7948_v50 = vmax.f32 %v7613_v49, 0.0  ;;  %v13856_v38 = vpack.c.bf16 %v7947_v4, %v7931_v1 }
 0x5fc   : > { %v7661_v27 = vpop.f32.mrf.mxu3  ;;  %8366 = vmatpush.bf16.msrb.mxu2 %v14816_v10 }
 0x5fd   : > { %v7662_v40 = vadd.f32 %v7661_v27, %v14811_v22  ;;  %v13858_v24 = vpack.c.bf16 %v7946_v15, %v7930_v62  ;;  %v13860_v19 = vpack.c.bf16 %v7948_v50, %v7932_v56  ;;  %v14825_v15 = vld [vmem:[#allocation30_spill] sm:$0xff] }
 0x5fe   : > { %v7566_v59 = vpop.f32.mrf.mxu1  ;;  %7722 = vmatmul.bf16.gmra.mxu0 %v14820_v7  ;;  %7771 = vmatmul.bf16.gmra.mxu1 %v14820_v7 }
 0x5ff   : > { %8379 = vmatpush.bf16.msrb.mxu3 %v14817_v47  ;;  %v7949_v53 = vmax.f32 %v7662_v40, 0.0  ;;  %14818 = vst [vmem:[#allocation32_spill] sm:$0xff] %v13860_v19  ;;  %v7567_v42 = vadd.f32 %v7566_v59, %v14821_v60  ;;  %v14824_v47 = vld [vmem:[#allocation28_spill] sm:$0xff] }
 0x600   : > { %v7517_v29 = vpop.f32.mrf.mxu0  ;;  %v7615_v21 = vpop.f32.mrf.mxu2  ;;  %7869 = vmatmul.bf16.gmra.mxu3 %v14820_v7 }
 0x601   : > { %v13862_v31 = vpack.c.bf16 %v7949_v53, %v7933_v39  ;;  %7820 = vmatmul.bf16.gmra.mxu2 %v14820_v7  ;;  %v7518_v30 = vadd.f32 %v7517_v29, %v14821_v60  ;;  %v7963_v0 = vmax.f32 %v7567_v42, 0.0  ;;  %v7616_v26 = vadd.f32 %v7615_v21, %v14821_v60 }
 0x603   : > { %14819 = vst [vmem:[#allocation14_spill] sm:$0xff] %v13862_v31  ;;  %v7962_v18 = vmax.f32 %v7518_v30, 0.0  ;;  %v7964_v61 = vmax.f32 %v7616_v26, 0.0 }
 0x604   : > { %v7664_v25 = vpop.f32.mrf.mxu3 }
 0x605   : > { %v7665_v52 = vadd.f32 %v7664_v25, %v14821_v60 }
 0x606   : > { %v7568_v45 = vpop.f32.mrf.mxu1 }
 0x607   : > { %v7569_v28 = vadd.f32 %v7568_v45, %v14822_v54  ;;  %v7965_v27 = vmax.f32 %v7665_v52, 0.0 }
 0x608   : > { %v7519_v44 = vpop.f32.mrf.mxu0  ;;  %v7617_v33 = vpop.f32.mrf.mxu2 }
 0x609   : > { %v7520_v17 = vadd.f32 %v7519_v44, %v14822_v54  ;;  %v7618_v3 = vadd.f32 %v7617_v33, %v14822_v54  ;;  %v7979_v5 = vmax.f32 %v7569_v28, 0.0 }
 0x60b   : > { %v7978_v63 = vmax.f32 %v7520_v17, 0.0  ;;  %v7980_v57 = vmax.f32 %v7618_v3, 0.0  ;;  %v13876_v37 = vpack.c.bf16 %v7979_v5, %v7963_v0 }
 0x60c   : > { %v7666_v46 = vpop.f32.mrf.mxu3 }
 0x60d   : > { %v7667_v8 = vadd.f32 %v7666_v46, %v14822_v54  ;;  %v13878_v40 = vpack.c.bf16 %v7978_v63, %v7962_v18  ;;  %v13880_v1 = vpack.c.bf16 %v7980_v57, %v7964_v61  ;;  %v14826_v57 = vld [vmem:[#allocation12_spill] sm:$0xff] }
 0x60e   : > { %v7571_v55 = vpop.f32.mrf.mxu1  ;;  %7727 = vmatmul.bf16.gmra.mxu0 %v14823_v9  ;;  %7776 = vmatmul.bf16.gmra.mxu1 %v14823_v9 }
 0x60f   : > { %v7981_v12 = vmax.f32 %v7667_v8, 0.0  ;;  %v7572_v62 = vadd.f32 %v7571_v55, %v14824_v47 }
 0x610   : > { %v7522_v35 = vpop.f32.mrf.mxu0  ;;  %v7620_v20 = vpop.f32.mrf.mxu2  ;;  %7874 = vmatmul.bf16.gmra.mxu3 %v14823_v9 }
 0x611   : > { %v13882_v43 = vpack.c.bf16 %v7981_v12, %v7965_v27  ;;  %7825 = vmatmul.bf16.gmra.mxu2 %v14823_v9  ;;  %v7523_v53 = vadd.f32 %v7522_v35, %v14824_v47  ;;  %v7995_v25 = vmax.f32 %v7572_v62, 0.0  ;;  %v7621_v7 = vadd.f32 %v7620_v20, %v14824_v47 }
 0x613   : > { %v7994_v42 = vmax.f32 %v7523_v53, 0.0  ;;  %v7996_v3 = vmax.f32 %v7621_v7, 0.0 }
 0x614   : > { %v7669_v49 = vpop.f32.mrf.mxu3 }
 0x615   : > { %v7670_v44 = vadd.f32 %v7669_v49, %v14824_v47 }
 0x616   : > { %v7573_v10 = vpop.f32.mrf.mxu1 }
 0x617   : > { %v7574_v50 = vadd.f32 %v7573_v10, %v14825_v15  ;;  %v7997_v8 = vmax.f32 %v7670_v44, 0.0 }
 0x618   : > { %v7524_v4 = vpop.f32.mrf.mxu0  ;;  %v7622_v59 = vpop.f32.mrf.mxu2 }
 0x619   : > { %v7525_v29 = vadd.f32 %v7524_v4, %v14825_v15  ;;  %v7623_v39 = vadd.f32 %v7622_v59, %v14825_v15  ;;  %v8011_v45 = vmax.f32 %v7574_v50, 0.0  ;;  %v14827_v4 = vld [vmem:[#allocation22_spill] sm:$0xff] }
 0x61b   : > { %v8010_v28 = vmax.f32 %v7525_v29, 0.0  ;;  %v8012_v30 = vmax.f32 %v7623_v39, 0.0  ;;  %v13896_v0 = vpack.c.bf16 %v8011_v45, %v7995_v25 }
 0x61c   : > { %v7671_v56 = vpop.f32.mrf.mxu3 }
 0x61d   : > { %v7672_v21 = vadd.f32 %v7671_v56, %v14825_v15  ;;  %v13898_v5 = vpack.c.bf16 %v8010_v28, %v7994_v42  ;;  %v13900_v18 = vpack.c.bf16 %v8012_v30, %v7996_v3  ;;  %v13927_v56 = vld [vmem:[%s14437_s4] sm:$0xf] }
 0x61e   : > { %v7576_v46 = vpop.f32.mrf.mxu1  ;;  %7732 = vmatmul.bf16.gmra.mxu0 %v14826_v57  ;;  %7781 = vmatmul.bf16.gmra.mxu1 %v14826_v57  ;;  %14828 = vst [vmem:[#allocation4_spill] sm:$0xff] %v13927_v56  ;;  %v14829_v15 = vld [vmem:[#allocation10_spill] sm:$0xff] }
 0x61f   : > { %v8013_v17 = vmax.f32 %v7672_v21, 0.0 }
 0x620   : > { %v7527_v33 = vpop.f32.mrf.mxu0  ;;  %v7625_v26 = vpop.f32.mrf.mxu2  ;;  %7879 = vmatmul.bf16.gmra.mxu3 %v14826_v57 }
 0x621   : > { %v13902_v63 = vpack.c.bf16 %v8013_v17, %v7997_v8  ;;  %7830 = vmatmul.bf16.gmra.mxu2 %v14826_v57  ;;  %v13934_v30 = vadd.f32 %v7527_v33, %v14772_v11  ;;  %v13937_v17 = vadd.f32 %v7576_v46, %v14772_v11 }
 0x624   : > { %v7674_v52 = vpop.f32.mrf.mxu3 }
 0x626   : > { %v7578_v35 = vpop.f32.mrf.mxu1 }
 0x628   : > { %v7529_v12 = vpop.f32.mrf.mxu0  ;;  %v13908_v55 = vpop.f32.mrf.mxu2 }
 0x629   : > { %v13958_v60 = vadd.f32 %v7529_v12, %v13370_v14 }
 0x62c   : > { %v13910_v61 = vpop.f32.mrf.mxu3 }
 0x62e   : > { %v7581_v20 = vpop.f32.mrf.mxu1  ;;  %7737 = vmatmul.bf16.gmra.mxu0 %v14827_v4  ;;  %7786 = vmatmul.bf16.gmra.mxu1 %v14827_v4 }
 0x62f   : > { %v13943_v8 = vadd.f32 %v7581_v20, %v14773_v23  ;;  %v13955_v20 = vadd.f32 %v7674_v52, %v14772_v11 }
 0x630   : > { %v7532_v27 = vpop.f32.mrf.mxu0  ;;  %v13912_v49 = vpop.f32.mrf.mxu2  ;;  %7884 = vmatmul.bf16.gmra.mxu3 %v14827_v4 }
 0x631   : > { %7835 = vmatmul.bf16.gmra.mxu2 %v14827_v4  ;;  %v13940_v3 = vadd.f32 %v7532_v27, %v14773_v23  ;;  %v13952_v27 = vadd.f32 %v7625_v26, %v14772_v11 }
 0x634   : > { %v13914_v9 = vpop.f32.mrf.mxu3 }
 0x636   : > { %v7583_v62 = vpop.f32.mrf.mxu1 }
 0x637   : > { %v13975_v58 = vadd.f32 %v7583_v62, %v14776_v13 }
 0x638   : > { %v7534_v10 = vpop.f32.mrf.mxu0  ;;  %v13920_v50 = vpop.f32.mrf.mxu2 }
 0x63c   : > { %v13922_v53 = vpop.f32.mrf.mxu3 }
 0x63e   : > { %v7586_v59 = vpop.f32.mrf.mxu1  ;;  %8289 = vmatmul.bf16.vlgmr.msra.gmra.mxu0 %v13927_v56  ;;  %8302 = vmatmul.bf16.vlgmr.msra.gmra.mxu1 %v13927_v56 }
 0x63f   : > { %v7587_v46 = vadd.f32 %v7586_v59, %v14774_v41 }
 0x640   : > { %v7537_v29 = vpop.f32.mrf.mxu0  ;;  %v7635_v39 = vpop.f32.mrf.mxu2  ;;  %8328 = vmatmul.bf16.vlgmr.msra.gmra.mxu3 %v13927_v56 }
 0x641   : > { %8315 = vmatmul.bf16.vlgmr.msra.gmra.mxu2 %v13927_v56  ;;  %v7538_v33 = vadd.f32 %v7537_v29, %v14774_v41  ;;  %v8091_v11 = vmax.f32 %v7587_v46, 0.0 }
 0x644   : > { %v7684_v21 = vpop.f32.mrf.mxu3 }
 0x646   : > { %v7588_v7 = vpop.f32.mrf.mxu1 }
 0x647   : > { %v7589_v59 = vadd.f32 %v7588_v7, %v13344_v16 }
 0x648   : > { %v7539_v25 = vpop.f32.mrf.mxu0  ;;  %v7637_v44 = vpop.f32.mrf.mxu2 }
 0x649   : > { %v7540_v29 = vadd.f32 %v7539_v25, %v13344_v16 }
 0x64c   : > { %v7686_v45 = vpop.f32.mrf.mxu3 }
 0x64e   : > { %v7591_v28 = vpop.f32.mrf.mxu1  ;;  %8341 = vmatmul.bf16.vlgmr.msrb.gmra.mxu0 %v13927_v56  ;;  %8354 = vmatmul.bf16.vlgmr.msrb.gmra.mxu1 %v13927_v56 }
 0x64f   : > { %v7592_v54 = vadd.f32 %v7591_v28, %v14829_v15  ;;  %v8090_v28 = vmax.f32 %v7538_v33, 0.0 }
 0x650   : > { %v7542_v42 = vpop.f32.mrf.mxu0  ;;  %v7640_v57 = vpop.f32.mrf.mxu2  ;;  %8380 = vmatmul.bf16.vlgmr.msrb.gmra.mxu3 %v13927_v56 }
 0x651   : > { %v7543_v47 = vadd.f32 %v7542_v42, %v14829_v15  ;;  %v13961_v42 = vadd.f32 %v7578_v35, %v13370_v14  ;;  %v8123_v51 = vmax.f32 %v7592_v54, 0.0  ;;  %8367 = vmatmul.bf16.vlgmr.msrb.gmra.mxu2 %v13927_v56  ;;  %v13972_v35 = vadd.f32 %v7534_v10, %v14776_v13 }
 0x652   : > { %v7641_v54 = vadd.f32 %v7640_v57, %v14829_v15  ;;  %v7638_v56 = vadd.f32 %v7637_v44, %v13344_v16  ;;  %v7687_v10 = vadd.f32 %v7686_v45, %v13344_v16  ;;  %v7636_v57 = vadd.f32 %v7635_v39, %v14774_v41 }
 0x653   : > { %v8122_v34 = vmax.f32 %v7543_v47, 0.0 }
 0x654   : > { %v7689_v4 = vpop.f32.mrf.mxu3  ;;  %v8124_v33 = vmax.f32 %v7641_v54, 0.0  ;;  %v8108_v45 = vmax.f32 %v7638_v56, 0.0 }
 0x656   : > { %v7593_v26 = vpop.f32.mrf.mxu1 }
 0x657   : > { %v7594_v12 = vadd.f32 %v7593_v26, %v14775_v2 }
 0x658   : > { %v7544_v32 = vpop.f32.mrf.mxu0  ;;  %v7642_v31 = vpop.f32.mrf.mxu2 }
 0x659   : > { %v7545_v52 = vadd.f32 %v7544_v32, %v14775_v2  ;;  %v7690_v32 = vadd.f32 %v7689_v4, %v14829_v15  ;;  %v8139_v26 = vmax.f32 %v7594_v12, 0.0  ;;  %v7643_v25 = vadd.f32 %v7642_v31, %v14775_v2 }
 0x65a   : > { %v7685_v4 = vadd.f32 %v7684_v21, %v14774_v41  ;;  %v8107_v12 = vmax.f32 %v7589_v59, 0.0  ;;  %v7682_v31 = vadd.f32 %v13922_v53, %v14776_v13  ;;  %v7628_v53 = vadd.f32 %v13908_v55, %v13370_v14 }
 0x65b   : > { %v8138_v47 = vmax.f32 %v7545_v52, 0.0  ;;  %v8267_v22 = vpack.c.bf16 %v8139_v26, %v8123_v51  ;;  %v8106_v52 = vmax.f32 %v7540_v29, 0.0  ;;  %v8125_v46 = vmax.f32 %v7690_v32, 0.0 }
 0x65c   : > { %v7691_v19 = vpop.f32.mrf.mxu3  ;;  %v8140_v15 = vmax.f32 %v7643_v25, 0.0  ;;  %v7680_v51 = vadd.f32 %v13914_v9, %v14773_v23  ;;  %v8109_v29 = vmax.f32 %v7687_v10, 0.0  ;;  %v8075_v32 = vmax.f32 %v13975_v58, 0.0 }
 0x65d   : > { %v8266_v62 = vpack.c.bf16 %v8138_v47, %v8122_v34  ;;  %v7692_v7 = vadd.f32 %v7691_v19, %v14775_v2  ;;  %8398 = vmatpush.bf16.msra.mxu1 %v8267_v22  ;;  %v7631_v34 = vadd.f32 %v13912_v49, %v14773_v23  ;;  %v7633_v19 = vadd.f32 %v13920_v50, %v14776_v13 }
 0x65e   : > { %v7752_v21 = vpop.f32.mrf.mxu1  ;;  %v8268_v59 = vpack.c.bf16 %v8140_v15, %v8124_v33  ;;  %v8074_v22 = vmax.f32 %v13972_v35, 0.0  ;;  %v8250_v49 = vpack.c.bf16 %v8106_v52, %v8090_v28  ;;  %v8251_v47 = vpack.c.bf16 %v8107_v12, %v8091_v11 }
 0x65f   : > { %v8141_v44 = vmax.f32 %v7692_v7, 0.0  ;;  %8385 = vmatpush.bf16.msra.mxu0 %v8266_v62  ;;  %v8042_v9 = vmax.f32 %v13958_v60, 0.0  ;;  %v8043_v26 = vmax.f32 %v13961_v42, 0.0  ;;  %v8092_v50 = vmax.f32 %v7636_v57, 0.0 }
 0x660   : > { %v7703_v39 = vpop.f32.mrf.mxu0  ;;  %v8093_v62 = vmax.f32 %v7685_v4, 0.0  ;;  %8411 = vmatpush.bf16.msra.mxu2 %v8268_v59  ;;  %v7677_v15 = vadd.f32 %v13910_v61, %v13370_v14  ;;  %v8076_v56 = vmax.f32 %v7633_v19, 0.0  ;;  %v8077_v35 = vmax.f32 %v7682_v31, 0.0  ;;  %v7801_v10 = vpop.f32.mrf.mxu2 }
 0x661   : > { %v8269_v54 = vpack.c.bf16 %v8141_v44, %v8125_v46  ;;  %8399 = vmatpush.bf16.msra.mxu1 %v8251_v47  ;;  %v7704_v11 = vadd.f32 %v7703_v39, %v13376_v48  ;;  %v7753_v60 = vadd.f32 %v7752_v21, %v13376_v48  ;;  %v8252_v42 = vpack.c.bf16 %v8108_v45, %v8092_v50 }
 0x662   : > { %v8253_v28 = vpack.c.bf16 %v8109_v29, %v8093_v62  ;;  %v8060_v25 = vmax.f32 %v7631_v34, 0.0  ;;  %v8061_v7 = vmax.f32 %v7680_v51, 0.0  ;;  %v14830_v57 = vmax.f32 %v13940_v3, 0.0 }
 0x663   : > { %8424 = vmatpush.bf16.msra.mxu3 %v8269_v54  ;;  %8386 = vmatpush.bf16.msra.mxu0 %v8250_v49  ;;  %v14831_v4 = vmax.f32 %v13943_v8, 0.0  ;;  %v8044_v52 = vmax.f32 %v7628_v53, 0.0  ;;  %v8045_v12 = vmax.f32 %v7677_v15, 0.0  ;;  %v7902_v31 = vmax.f32 %v7704_v11, 0.0 }
 0x664   : > { %v7850_v58 = vpop.f32.mrf.mxu3  ;;  %v8234_v55 = vpack.c.bf16 %v8074_v22, %v14830_v57  ;;  %8412 = vmatpush.bf16.msra.mxu2 %v8252_v42  ;;  %v8236_v44 = vpack.c.bf16 %v8076_v56, %v8060_v25  ;;  %v8237_v19 = vpack.c.bf16 %v8077_v35, %v8061_v7  ;;  %v7903_v39 = vmax.f32 %v7753_v60, 0.0 }
 0x665   : > { %v8235_v61 = vpack.c.bf16 %v8075_v32, %v14831_v4  ;;  %v8028_v51 = vmax.f32 %v13952_v27, 0.0  ;;  %v8029_v8 = vmax.f32 %v13955_v20, 0.0  ;;  %v14832_v21 = vmax.f32 %v13934_v30, 0.0 }
 0x666   : > { %v7754_v46 = vpop.f32.mrf.mxu1  ;;  %v14833_v29 = vmax.f32 %v13937_v17, 0.0  ;;  %v7802_v54 = vadd.f32 %v7801_v10, %v13376_v48  ;;  %v7851_v22 = vadd.f32 %v7850_v58, %v13376_v48 }
 0x667   : > { %8425 = vmatpush.bf16.msra.mxu3 %v8253_v28  ;;  %8387 = vmatpush.bf16.msra.mxu0 %v8234_v55  ;;  %v7755_v3 = vadd.f32 %v7754_v46, %v13378_v6  ;;  %v8218_v45 = vpack.c.bf16 %v8042_v9, %v14832_v21  ;;  %v8220_v27 = vpack.c.bf16 %v8044_v52, %v8028_v51  ;;  %v14836_v28 = vld [vmem:[#allocation15_spill] sm:$0xff]  ;;  %v14837_v55 = vld [vmem:[#allocation32_spill] sm:$0xff] }
 0x668   : > { %v7705_v33 = vpop.f32.mrf.mxu0  ;;  %8400 = vmatpush.bf16.msra.mxu1 %v8235_v61  ;;  %v8219_v59 = vpack.c.bf16 %v8043_v26, %v14833_v29  ;;  %8413 = vmatpush.bf16.msra.mxu2 %v8236_v44  ;;  %v7803_v47 = vpop.f32.mrf.mxu2  ;;  %v8221_v20 = vpack.c.bf16 %v8045_v12, %v8029_v8  ;;  %v7904_v26 = vmax.f32 %v7802_v54, 0.0  ;;  %v7905_v48 = vmax.f32 %v7851_v22, 0.0  ;;  %v14839_v61 = vld [vmem:[#allocation7_spill] sm:$0xff]  ;;  %v14843_v8 = vld [vmem:[#allocation4_spill] sm:$0xff]  ;;  %v14846_v54 = vld [vmem:[#allocation26_spill] sm:$0xff] }
 0x669   : > { %v7706_v34 = vadd.f32 %v7705_v33, %v13378_v6  ;;  %v7919_v49 = vmax.f32 %v7755_v3, 0.0  ;;  %v7804_v17 = vadd.f32 %v7803_v47, %v13378_v6 }
 0x66b   : > { %v7918_v32 = vmax.f32 %v7706_v34, 0.0  ;;  %8426 = vmatpush.bf16.msra.mxu3 %v8237_v19  ;;  %8388 = vmatpush.bf16.msra.mxu0 %v8218_v45  ;;  %v14021_v30 = vpack.c.bf16 %v7919_v49, %v7903_v39  ;;  %v7920_v53 = vmax.f32 %v7804_v17, 0.0  ;;  %v14841_v39 = vld [vmem:[#allocation29_spill] sm:$0xff] }
 0x66c   : > { %v7852_v50 = vpop.f32.mrf.mxu3  ;;  %8401 = vmatpush.bf16.msra.mxu1 %v8219_v59  ;;  %8414 = vmatpush.bf16.msra.mxu2 %v8220_v27  ;;  %v14842_v34 = vld [vmem:[#allocation13_spill] sm:$0xff] }
 0x66d   : > { %v14019_v62 = vpack.c.bf16 %v7918_v32, %v7902_v31  ;;  %v7853_v9 = vadd.f32 %v7852_v50, %v13378_v6  ;;  %v14027_v10 = vpack.c.bf16 %v7920_v53, %v7904_v26  ;;  %v14847_v50 = vld [vmem:[#allocation25_spill] sm:$0xff] }
 0x66e   : > { %v7757_v35 = vpop.f32.mrf.mxu1 }
 0x66f   : > { %v7921_v15 = vmax.f32 %v7853_v9, 0.0  ;;  %8427 = vmatpush.bf16.msra.mxu3 %v8221_v20  ;;  %8389 = vmatpush.bf16.msra.mxu0 %v13898_v5  ;;  %14834 = vst [vmem:[#allocation19_spill] sm:$0xff] %v14027_v10  ;;  %v7758_v5 = vadd.f32 %v7757_v35, %v14810_v36 }
 0x670   : > { %v7708_v56 = vpop.f32.mrf.mxu0  ;;  %8402 = vmatpush.bf16.msra.mxu1 %v13896_v0  ;;  %8415 = vmatpush.bf16.msra.mxu2 %v13900_v18  ;;  %v7806_v6 = vpop.f32.mrf.mxu2 }
 0x671   : > { %v14029_v58 = vpack.c.bf16 %v7921_v15, %v7905_v48  ;;  %v7709_v60 = vadd.f32 %v7708_v56, %v14810_v36  ;;  %v7807_v25 = vadd.f32 %v7806_v6, %v14810_v36 }
 0x673   : > { %14835 = vst [vmem:[#allocation20_spill] sm:$0xff] %v14029_v58  ;;  %8428 = vmatpush.bf16.msra.mxu3 %v13902_v63  ;;  %8390 = vmatpush.bf16.msra.mxu0 %v13878_v40  ;;  %v7934_v18 = vmax.f32 %v7709_v60, 0.0  ;;  %v7935_v63 = vmax.f32 %v7758_v5, 0.0  ;;  %v7936_v46 = vmax.f32 %v7807_v25, 0.0 }
 0x674   : > { %v7855_v11 = vpop.f32.mrf.mxu3  ;;  %8403 = vmatpush.bf16.msra.mxu1 %v13876_v37  ;;  %8416 = vmatpush.bf16.msra.mxu2 %v13880_v1 }
 0x675   : > { %v7856_v7 = vadd.f32 %v7855_v11, %v14810_v36 }
 0x676   : > { %v7759_v42 = vpop.f32.mrf.mxu1 }
 0x677   : > { %8429 = vmatpush.bf16.msra.mxu3 %v13882_v43  ;;  %8391 = vmatpush.bf16.msra.mxu0 %v13858_v24  ;;  %v7760_v37 = vadd.f32 %v7759_v42, %v14836_v28  ;;  %v14838_v43 = vld [vmem:[#allocation14_spill] sm:$0xff]  ;;  %v7937_v44 = vmax.f32 %v7856_v7, 0.0 }
 0x678   : > { %v7710_v0 = vpop.f32.mrf.mxu0  ;;  %8404 = vmatpush.bf16.msra.mxu1 %v13856_v38  ;;  %8417 = vmatpush.bf16.msra.mxu2 %v14837_v55  ;;  %v7808_v4 = vpop.f32.mrf.mxu2  ;;  %v14840_v38 = vld [vmem:[#allocation18_spill] sm:$0xff] }
 0x679   : > { %v7711_v40 = vadd.f32 %v7710_v0, %v14836_v28  ;;  %v7951_v1 = vmax.f32 %v7760_v37, 0.0  ;;  %v7809_v33 = vadd.f32 %v7808_v4, %v14836_v28 }
 0x67b   : > { %v7950_v57 = vmax.f32 %v7711_v40, 0.0  ;;  %8430 = vmatpush.bf16.msra.mxu3 %v14838_v43  ;;  %8392 = vmatpush.bf16.msra.mxu0 %v14839_v61  ;;  %v14051_v12 = vpack.c.bf16 %v7951_v1, %v7935_v63  ;;  %v7952_v19 = vmax.f32 %v7809_v33, 0.0  ;;  %v14848_v1 = vld [vmem:[#allocation28_spill] sm:$0xff]  ;;  %v14849_v61 = vld [vmem:[#allocation30_spill] sm:$0xff] }
 0x67c   : > { %v7857_v24 = vpop.f32.mrf.mxu3  ;;  %8405 = vmatpush.bf16.msra.mxu1 %v14840_v38  ;;  %8418 = vmatpush.bf16.msra.mxu2 %v14841_v39 }
 0x67d   : > { %v14049_v52 = vpack.c.bf16 %v7950_v57, %v7934_v18  ;;  %v7858_v36 = vadd.f32 %v7857_v24, %v14836_v28  ;;  %v14059_v21 = vpack.c.bf16 %v7952_v19, %v7936_v46 }
 0x67e   : > { %v7762_v51 = vpop.f32.mrf.mxu1  ;;  %8393 = vmatmul.bf16.vlgmr.msra.gmra.mxu0 %v14843_v8 }
 0x67f   : > { %v7953_v31 = vmax.f32 %v7858_v36, 0.0  ;;  %8431 = vmatpush.bf16.msra.mxu3 %v14842_v34  ;;  %8406 = vmatmul.bf16.vlgmr.msra.gmra.mxu1 %v14843_v8  ;;  %14844 = vst [vmem:[#allocation21_spill] sm:$0xff] %v14059_v21  ;;  %v7763_v32 = vadd.f32 %v7762_v51, %v14846_v54 }
 0x680   : > { %v7713_v3 = vpop.f32.mrf.mxu0  ;;  %8419 = vmatmul.bf16.vlgmr.msra.gmra.mxu2 %v14843_v8  ;;  %v7811_v29 = vpop.f32.mrf.mxu2 }
 0x681   : > { %v14061_v45 = vpack.c.bf16 %v7953_v31, %v7937_v44  ;;  %v7714_v22 = vadd.f32 %v7713_v3, %v14846_v54  ;;  %v7967_v9 = vmax.f32 %v7763_v32, 0.0  ;;  %v7812_v26 = vadd.f32 %v7811_v29, %v14846_v54 }
 0x682   : > { %8432 = vmatmul.bf16.vlgmr.msra.gmra.mxu3 %v14843_v8 }
 0x683   : > { %14845 = vst [vmem:[#allocation6_spill] sm:$0xff] %v14061_v45  ;;  %v7966_v17 = vmax.f32 %v7714_v22, 0.0  ;;  %v7968_v0 = vmax.f32 %v7812_v26, 0.0 }
 0x684   : > { %v7860_v59 = vpop.f32.mrf.mxu3 }
 0x685   : > { %v7861_v48 = vadd.f32 %v7860_v59, %v14846_v54 }
 0x686   : > { %v7764_v47 = vpop.f32.mrf.mxu1 }
 0x687   : > { %v7765_v20 = vadd.f32 %v7764_v47, %v14847_v50  ;;  %v7969_v42 = vmax.f32 %v7861_v48, 0.0 }
 0x688   : > { %v7715_v49 = vpop.f32.mrf.mxu0  ;;  %v7813_v56 = vpop.f32.mrf.mxu2 }
 0x689   : > { %v7716_v27 = vadd.f32 %v7715_v49, %v14847_v50  ;;  %v7983_v15 = vmax.f32 %v7765_v20, 0.0  ;;  %v7814_v60 = vadd.f32 %v7813_v56, %v14847_v50 }
 0x68b   : > { %v7982_v53 = vmax.f32 %v7716_v27, 0.0  ;;  %v14073_v11 = vpack.c.bf16 %v7983_v15, %v7967_v9  ;;  %v7984_v18 = vmax.f32 %v7814_v60, 0.0 }
 0x68c   : > { %v7862_v35 = vpop.f32.mrf.mxu3 }
 0x68d   : > { %v14071_v6 = vpack.c.bf16 %v7982_v53, %v7966_v17  ;;  %v7863_v5 = vadd.f32 %v7862_v35, %v14847_v50  ;;  %v14077_v37 = vpack.c.bf16 %v7984_v18, %v7968_v0 }
 0x68e   : > { %v7767_v40 = vpop.f32.mrf.mxu1 }
 0x68f   : > { %v7985_v63 = vmax.f32 %v7863_v5, 0.0  ;;  %v7768_v43 = vadd.f32 %v7767_v40, %v14848_v1 }
 0x690   : > { %v7718_v28 = vpop.f32.mrf.mxu0  ;;  %v7816_v7 = vpop.f32.mrf.mxu2 }
 0x691   : > { %v14079_v25 = vpack.c.bf16 %v7985_v63, %v7969_v42  ;;  %v7719_v55 = vadd.f32 %v7718_v28, %v14848_v1  ;;  %v7999_v46 = vmax.f32 %v7768_v43, 0.0  ;;  %v7817_v44 = vadd.f32 %v7816_v7, %v14848_v1 }
 0x693   : > { %v7998_v36 = vmax.f32 %v7719_v55, 0.0  ;;  %v8000_v22 = vmax.f32 %v7817_v44, 0.0 }
 0x694   : > { %v7865_v57 = vpop.f32.mrf.mxu3 }
 0x695   : > { %v7866_v19 = vadd.f32 %v7865_v57, %v14848_v1 }
 0x696   : > { %v7769_v24 = vpop.f32.mrf.mxu1 }
 0x697   : > { %v7770_v33 = vadd.f32 %v7769_v24, %v14849_v61  ;;  %v8001_v32 = vmax.f32 %v7866_v19, 0.0 }
 0x698   : > { %v7720_v4 = vpop.f32.mrf.mxu0  ;;  %v7818_v34 = vpop.f32.mrf.mxu2 }
 0x699   : > { %v7721_v38 = vadd.f32 %v7720_v4, %v14849_v61  ;;  %v8015_v39 = vmax.f32 %v7770_v33, 0.0  ;;  %v7819_v59 = vadd.f32 %v7818_v34, %v14849_v61 }
 0x69b   : > { %v8014_v31 = vmax.f32 %v7721_v38, 0.0  ;;  %v14089_v29 = vpack.c.bf16 %v8015_v39, %v7999_v46  ;;  %v8016_v49 = vmax.f32 %v7819_v59, 0.0  ;;  %v14850_v39 = vld [vmem:[#allocation33_spill] sm:$0xff]  ;;  %v14851_v59 = vld [vmem:[#allocation10_spill] sm:$0xff] }
 0x69c   : > { %v7867_v3 = vpop.f32.mrf.mxu3 }
 0x69d   : > { %v14087_v51 = vpack.c.bf16 %v8014_v31, %v7998_v36  ;;  %v7868_v54 = vadd.f32 %v7867_v3, %v14849_v61  ;;  %v14093_v20 = vpack.c.bf16 %v8016_v49, %v8000_v22 }
 0x69e   : > { %v7772_v27 = vpop.f32.mrf.mxu1 }
 0x69f   : > { %v8017_v47 = vmax.f32 %v7868_v54, 0.0  ;;  %v14123_v3 = vadd.f32 %v7772_v27, %v14850_v39 }
 0x6a0   : > { %v7723_v50 = vpop.f32.mrf.mxu0  ;;  %v14097_v9 = vpop.f32.mrf.mxu2 }
 0x6a1   : > { %v14095_v17 = vpack.c.bf16 %v8017_v47, %v8001_v32  ;;  %v14120_v34 = vadd.f32 %v7723_v50, %v14850_v39 }
 0x6a4   : > { %v14099_v26 = vpop.f32.mrf.mxu3 }
 0x6a6   : > { %v7774_v53 = vpop.f32.mrf.mxu1 }
 0x6a7   : > { %v14111_v36 = vadd.f32 %v7774_v53, %v13370_v14 }
 0x6a8   : > { %v7725_v48 = vpop.f32.mrf.mxu0  ;;  %v7823_v15 = vpop.f32.mrf.mxu2 }
 0x6a9   : > { %v14108_v33 = vadd.f32 %v7725_v48, %v13370_v14  ;;  %v14130_v47 = vadd.f32 %v7823_v15, %v13370_v14 }
 0x6ac   : > { %v7872_v56 = vpop.f32.mrf.mxu3 }
 0x6ad   : > { %v14133_v48 = vadd.f32 %v7872_v56, %v13370_v14 }
 0x6ae   : > { %v7777_v60 = vpop.f32.mrf.mxu1 }
 0x6af   : > { %v7778_v50 = vadd.f32 %v7777_v60, %v14773_v23 }
 0x6b0   : > { %v7728_v35 = vpop.f32.mrf.mxu0  ;;  %v14101_v5 = vpop.f32.mrf.mxu2 }
 0x6b1   : > { %v14114_v19 = vadd.f32 %v7728_v35, %v14773_v23 }
 0x6b4   : > { %v14103_v0 = vpop.f32.mrf.mxu3 }
 0x6b6   : > { %v7779_v18 = vpop.f32.mrf.mxu1 }
 0x6b7   : > { %v7780_v53 = vadd.f32 %v7779_v18, %v14776_v13 }
 0x6b8   : > { %v7730_v42 = vpop.f32.mrf.mxu0  ;;  %v7828_v63 = vpop.f32.mrf.mxu2 }
 0x6b9   : > { %v14117_v31 = vadd.f32 %v7730_v42, %v14776_v13  ;;  %v8079_v8 = vmax.f32 %v7780_v53, 0.0 }
 0x6bb   : > { %v8078_v49 = vmax.f32 %v14117_v31, 0.0 }
 0x6bc   : > { %v14105_v28 = vpop.f32.mrf.mxu3 }
 0x6be   : > { %v7782_v7 = vpop.f32.mrf.mxu1 }
 0x6bf   : > { %v7783_v56 = vadd.f32 %v7782_v7, %v14774_v41 }
 0x6c0   : > { %v7733_v40 = vpop.f32.mrf.mxu0  ;;  %v7831_v57 = vpop.f32.mrf.mxu2 }
 0x6c1   : > { %v7734_v14 = vadd.f32 %v7733_v40, %v14774_v41 }
 0x6c4   : > { %v7880_v1 = vpop.f32.mrf.mxu3 }
 0x6c6   : > { %v7784_v43 = vpop.f32.mrf.mxu1 }
 0x6c7   : > { %v7785_v35 = vadd.f32 %v7784_v43, %v13344_v16 }
 0x6c8   : > { %v7735_v55 = vpop.f32.mrf.mxu0  ;;  %v7833_v4 = vpop.f32.mrf.mxu2 }
 0x6c9   : > { %v7736_v27 = vadd.f32 %v7735_v55, %v13344_v16 }
 0x6cb   : > { %v8110_v31 = vmax.f32 %v7736_v27, 0.0 }
 0x6cc   : > { %v7882_v24 = vpop.f32.mrf.mxu3 }
 0x6ce   : > { %v7787_v38 = vpop.f32.mrf.mxu1 }
 0x6cf   : > { %v7788_v22 = vadd.f32 %v7787_v38, %v14851_v59  ;;  %v8062_v38 = vmax.f32 %v14114_v19, 0.0  ;;  %v14148_v19 = vadd.f32 %v7828_v63, %v14776_v13 }
 0x6d0   : > { %v7738_v61 = vpop.f32.mrf.mxu0  ;;  %v7836_v46 = vpop.f32.mrf.mxu2 }
 0x6d1   : > { %v7739_v54 = vadd.f32 %v7738_v61, %v14851_v59  ;;  %v8127_v18 = vmax.f32 %v7788_v22, 0.0  ;;  %v7837_v55 = vadd.f32 %v7836_v46, %v14851_v59  ;;  %v8094_v22 = vmax.f32 %v7734_v14, 0.0 }
 0x6d2   : > { %v8095_v46 = vmax.f32 %v7783_v56, 0.0 }
 0x6d3   : > { %v8126_v60 = vmax.f32 %v7739_v54, 0.0  ;;  %v8128_v63 = vmax.f32 %v7837_v55, 0.0 }
 0x6d4   : > { %v7885_v44 = vpop.f32.mrf.mxu3 }
 0x6d5   : > { %v7886_v43 = vadd.f32 %v7885_v44, %v14851_v59  ;;  %v7834_v44 = vadd.f32 %v7833_v4, %v13344_v16  ;;  %v7883_v59 = vadd.f32 %v7882_v24, %v13344_v16 }
 0x6d6   : > { %v7789_v61 = vpop.f32.mrf.mxu1 }
 0x6d7   : > { %v7790_v32 = vadd.f32 %v7789_v61, %v14775_v2  ;;  %v8129_v53 = vmax.f32 %v7886_v43, 0.0  ;;  %v8113_v55 = vmax.f32 %v7883_v59, 0.0 }
 0x6d8   : > { %v7740_v42 = vpop.f32.mrf.mxu0  ;;  %v7838_v45 = vpop.f32.mrf.mxu2 }
 0x6d9   : > { %v7741_v15 = vadd.f32 %v7740_v42, %v14775_v2  ;;  %v8143_v10 = vmax.f32 %v7790_v32, 0.0  ;;  %v8111_v42 = vmax.f32 %v7785_v35, 0.0  ;;  %v7839_v7 = vadd.f32 %v7838_v45, %v14775_v2  ;;  %v14154_v32 = vpop.permute.xlu1 %8278 }
 0x6da   : > { %v8254_v45 = vpack.c.bf16 %v8110_v31, %v8094_v22  ;;  %v8238_v31 = vpack.c.bf16 %v8078_v49, %v8062_v38  ;;  %v8030_v49 = vmax.f32 %v14120_v34, 0.0  ;;  %v14852_v34 = vmax.f32 %v14108_v33, 0.0 }
 0x6db   : > { %v8142_v58 = vmax.f32 %v7741_v15, 0.0  ;;  %v8271_v40 = vpack.c.bf16 %v8143_v10, %v8127_v18  ;;  %v8144_v27 = vmax.f32 %v7839_v7, 0.0  ;;  %v7832_v10 = vadd.f32 %v7831_v57, %v14774_v41 }
 0x6dc   : > { %v7887_v61 = vpop.f32.mrf.mxu3  ;;  %v7878_v18 = vadd.f32 %v14105_v28, %v14776_v13  ;;  %v7827_v57 = vadd.f32 %v14101_v5, %v14773_v23  ;;  %v8080_v28 = vmax.f32 %v14148_v19, 0.0  ;;  %v7822_v19 = vadd.f32 %v14097_v9, %v14850_v39 }
 0x6dd   : > { %v8270_v21 = vpack.c.bf16 %v8142_v58, %v8126_v60  ;;  %v7888_v54 = vadd.f32 %v7887_v61, %v14775_v2  ;;  %8450 = vmatpush.bf16.msrb.mxu1 %v8271_v40  ;;  %v7881_v58 = vadd.f32 %v7880_v1, %v14774_v41  ;;  %v8255_v2 = vpack.c.bf16 %v8111_v42, %v8095_v46 }
 0x6de   : > { %v8303_v14 = vpop.f32.mrf.mxu1  ;;  %v8272_v56 = vpack.c.bf16 %v8144_v27, %v8128_v63  ;;  %v8063_v60 = vmax.f32 %v7778_v50, 0.0  ;;  %v7876_v41 = vadd.f32 %v14103_v0, %v14773_v23  ;;  %v8096_v61 = vmax.f32 %v7832_v10, 0.0 }
 0x6df   : > { %v8145_v35 = vmax.f32 %v7888_v54, 0.0  ;;  %8437 = vmatpush.bf16.msrb.mxu0 %v8270_v21  ;;  %v8304_v24 = vadd.f32 %v8303_v14, %v14154_v32  ;;  %v8112_v21 = vmax.f32 %v7834_v44, 0.0  ;;  %v8097_v40 = vmax.f32 %v7881_v58, 0.0 }
 0x6e0   : > { %v8290_v15 = vpop.f32.mrf.mxu0  ;;  %v8239_v42 = vpack.c.bf16 %v8079_v8, %v8063_v60  ;;  %8463 = vmatpush.bf16.msrb.mxu2 %v8272_v56  ;;  %v8316_v50 = vpop.f32.mrf.mxu2  ;;  %v8081_v23 = vmax.f32 %v7878_v18, 0.0  ;;  %v8031_v8 = vmax.f32 %v14123_v3, 0.0  ;;  %v7871_v46 = vadd.f32 %v14099_v26, %v14850_v39 }
 0x6e1   : > { %v8273_v4 = vpack.c.bf16 %v8145_v35, %v8129_v53  ;;  %v8291_v16 = vadd.f32 %v8290_v15, %v14154_v32  ;;  %v9195_v43 = vmul.f32 -1.442695, %v8304_v24  ;;  %8451 = vmatpush.bf16.msrb.mxu1 %v8255_v2  ;;  %v8317_v5 = vadd.f32 %v8316_v50, %v14154_v32 }
 0x6e2   : > { %v8256_v0 = vpack.c.bf16 %v8112_v21, %v8096_v61  ;;  %v8257_v54 = vpack.c.bf16 %v8113_v55, %v8097_v40  ;;  %v8064_v44 = vmax.f32 %v7827_v57, 0.0  ;;  %v8065_v59 = vmax.f32 %v7876_v41, 0.0 }
 0x6e3   : > { %v9194_v1 = vmul.f32 -1.442695, %v8291_v16  ;;  %8438 = vmatpush.bf16.msrb.mxu0 %v8254_v45  ;;  %8476 = vmatpush.bf16.msrb.mxu3 %v8273_v4  ;;  %v9196_v38 = vmul.f32 -1.442695, %v8317_v5  ;;  %v8222_v27 = vpack.c.bf16 %v14852_v34, %v8030_v49  ;;  %v14853_v3 = vmax.f32 %v14111_v36, 0.0 }
 0x6e4   : > { %v8329_v13 = vpop.f32.mrf.mxu3  ;;  %8464 = vmatpush.bf16.msrb.mxu2 %v8256_v0  ;;  %v8048_v10 = vmax.f32 %v14130_v47, 0.0  ;;  %v8049_v9 = vmax.f32 %v14133_v48, 0.0  ;;  %v8240_v58 = vpack.c.bf16 %v8080_v28, %v8064_v44  ;;  %v8241_v45 = vpack.c.bf16 %v8081_v23, %v8065_v59 }
 0x6e5   : > { %9246 = vpow2.f32 %v9194_v1  ;;  %v8330_v7 = vadd.f32 %v8329_v13, %v14154_v32  ;;  %8452 = vmatpush.bf16.msrb.mxu1 %v8239_v42  ;;  %v8223_v35 = vpack.c.bf16 %v14853_v3, %v8031_v8  ;;  %v8032_v2 = vmax.f32 %v7822_v19, 0.0 }
 0x6e6   : > { %9248 = vpow2.f32 %v9195_v43  ;;  %v8305_v53 = vpop.f32.mrf.mxu1  ;;  %v8033_v15 = vmax.f32 %v7871_v46, 0.0 }
 0x6e7   : > { %v9197_v22 = vmul.f32 -1.442695, %v8330_v7  ;;  %8439 = vmatpush.bf16.msrb.mxu0 %v8238_v31  ;;  %8477 = vmatpush.bf16.msrb.mxu3 %v8257_v54  ;;  %9250 = vpow2.f32 %v9196_v38  ;;  %v8224_v47 = vpack.c.bf16 %v8048_v10, %v8032_v2  ;;  %v14861_v10 = vld [vmem:[#allocation6_spill] sm:$0xff] }
 0x6e8   : > { %v8292_v63 = vpop.f32.mrf.mxu0  ;;  %8465 = vmatpush.bf16.msrb.mxu2 %v8240_v58  ;;  %v8318_v33 = vpop.f32.mrf.mxu2  ;;  %v8225_v4 = vpack.c.bf16 %v8049_v9, %v8033_v15 }
 0x6e9   : > { %9252 = vpow2.f32 %v9197_v22  ;;  %8453 = vmatpush.bf16.msrb.mxu1 %v8223_v35  ;;  %v14860_v35 = vld [vmem:[#allocation21_spill] sm:$0xff] }
 0x6eb   : > { %v9247_v26 = vpop.eup %9246  ;;  %8440 = vmatpush.bf16.msrb.mxu0 %v8222_v27  ;;  %8478 = vmatpush.bf16.msrb.mxu3 %v8241_v45 }
 0x6ec   : > { %v9249_v39 = vpop.eup %9248  ;;  %v14181_v14 = vadd.f32 1.0, %v9247_v26  ;;  %v8331_v36 = vpop.f32.mrf.mxu3  ;;  %8466 = vmatpush.bf16.msrb.mxu2 %v8224_v47 }
 0x6ed   : > { %v14183_v56 = vadd.f32 1.0, %v9249_v39  ;;  %v9251_v48 = vpop.eup %9250  ;;  %8454 = vmatpush.bf16.msrb.mxu1 %v14089_v29  ;;  %v14862_v39 = vld [vmem:[#allocation4_spill] sm:$0xff] }
 0x6ee   : > { %9254 = vrcp.f32 %v14181_v14  ;;  %v14189_v24 = vadd.f32 1.0, %v9251_v48  ;;  %v8355_v18 = vpop.f32.mrf.mxu1  ;;  %v8564_v57 = vand.u32 2147483648, %v14181_v14  ;;  %v8562_v1 = vand.u32 2147483647, %v14181_v14 }
 0x6ef   : > { %9256 = vrcp.f32 %v14183_v56  ;;  %8441 = vmatpush.bf16.msrb.mxu0 %v14087_v51  ;;  %v9253_v16 = vpop.eup %9252  ;;  %8479 = vmatpush.bf16.msrb.mxu3 %v8225_v4  ;;  %v8577_v41 = vand.u32 2147483647, %v14183_v56  ;;  %v8579_v51 = vand.u32 2147483648, %v14183_v56  ;;  %v8356_v31 = vadd.f32 %v8355_v18, %v14154_v32  ;;  %v14866_v18 = vld [vmem:[#allocation20_spill] sm:$0xff] }
 0x6f0   : > { %v8342_v60 = vpop.f32.mrf.mxu0  ;;  %v14191_v21 = vadd.f32 1.0, %v9253_v16  ;;  %9258 = vrcp.f32 %v14189_v24  ;;  %8467 = vmatpush.bf16.msrb.mxu2 %v14093_v20  ;;  %vm8558_vm9 = vweird.f32 %v14181_v14  ;;  %vm8573_vm8 = vweird.f32 %v14183_v56  ;;  %v8368_v13 = vpop.f32.mrf.mxu2 }
 0x6f1   : > { %v8343_v55 = vadd.f32 %v8342_v60, %v14154_v32  ;;  %8455 = vmatpush.bf16.msrb.mxu1 %v14073_v11  ;;  %v9199_v11 = vmul.f32 -1.442695, %v8356_v31  ;;  %v14215_v50 = vor.u32 1.1754944e-38, %v8564_v57  ;;  %vm14217_vm7 = vcmp.eq.f32.partialorder %v8577_v41, 8.507059e+37  ;;  %v14865_v60 = vld [vmem:[#allocation19_spill] sm:$0xff] }
 0x6f2   : > { %9260 = vrcp.f32 %v14191_v21  ;;  %vm14225_vm10 = vcmp.eq.f32.partialorder %v8562_v1, 8.507059e+37  ;;  %v8369_v0 = vadd.f32 %v8368_v13, %v14154_v32  ;;  %vm8588_vm12 = vweird.f32 %v14189_v24 }
 0x6f3   : > { %8442 = vmatpush.bf16.msrb.mxu0 %v14071_v6  ;;  %v9198_v43 = vmul.f32 -1.442695, %v8343_v55  ;;  %8480 = vmatpush.bf16.msrb.mxu3 %v14095_v17  ;;  %v8580_v17 = vor.u32 1.1754944e-38, %v8579_v51  ;;  %v8607_v44 = vand.u32 2147483647, %v14191_v21  ;;  %v8609_v3 = vand.u32 2147483648, %v14191_v21 }
 0x6f4   : > { %v14201_v29 = vpop.eup %9254  ;;  %v8381_v28 = vpop.f32.mrf.mxu3  ;;  %8468 = vmatpush.bf16.msrb.mxu2 %v14077_v37  ;;  %v8592_v4 = vand.u32 2147483647, %v14189_v24  ;;  %vm8603_vm5 = vweird.f32 %v14191_v21 }
 0x6f5   : > { %v14207_v42 = vpop.eup %9256  ;;  %v8554_v61 = vmul.f32 %v14201_v29, %v14181_v14  ;;  %9262 = vpow2.f32 %v9198_v43  ;;  %8456 = vmatpush.bf16.msrb.mxu1 %v14051_v12  ;;  %v8382_v54 = vadd.f32 %v8381_v28, %v14154_v32  ;;  %vm8559_vm11 = vweird.f32 %v14201_v29 }
 0x6f6   : > { %v8569_v6 = vmul.f32 %v14207_v42, %v14183_v56  ;;  %v14223_v5 = vpop.eup %9258  ;;  %9264 = vpow2.f32 %v9199_v11  ;;  %v8357_v8 = vpop.f32.mrf.mxu1  ;;  %vm8574_vm13 = vweird.f32 %v14207_v42  ;;  %vm14250_vm14 = vmor %vm8558_vm9, %vm8559_vm11  ;;  %v8594_v14 = vand.u32 2147483648, %v14189_v24 }
 0x6f7   : > { %v8555_v40 = vsub.f32 1.0, %v8554_v61  ;;  %8443 = vmatpush.bf16.msrb.mxu0 %v14049_v52  ;;  %8481 = vmatpush.bf16.msrb.mxu3 %v14079_v25  ;;  %v8584_v38 = vmul.f32 %v14223_v5, %v14189_v24  ;;  %v9200_v25 = vmul.f32 -1.442695, %v8369_v0  ;;  %v9201_v59 = vmul.f32 -1.442695, %v8382_v54  ;;  %vm8575_vm15 = vmor %vm8573_vm8, %vm8574_vm13 }
 0x6f8   : > { %v8570_v23 = vsub.f32 1.0, %v8569_v6  ;;  %v8344_v49 = vpop.f32.mrf.mxu0  ;;  %v14233_v52 = vpop.eup %9260  ;;  %8469 = vmatpush.bf16.msrb.mxu2 %v14860_v35  ;;  %vm8589_vm0 = vweird.f32 %v14223_v5  ;;  %v8610_v57 = vor.u32 1.1754944e-38, %v8609_v3  ;;  %vm8608_vm4 = vcmp.eq.f32.partialorder %v8607_v44, 8.507059e+37  ;;  %v9355_v6 = vld [vmem:[%s14437_s4] sm:$0xf] }
 0x6f9   : > { %v8556_v12 = vmul.f32 %v14201_v29, %v8555_v40  ;;  %v8599_v37 = vmul.f32 %v14233_v52, %v14191_v21  ;;  %v8585_v46 = vsub.f32 1.0, %v8584_v38  ;;  %8457 = vmatpush.bf16.msrb.mxu1 %v14021_v30  ;;  %9266 = vpow2.f32 %v9200_v25  ;;  %v8370_v33 = vpop.f32.mrf.mxu2  ;;  %vm14289_vm2 = vmor %vm8588_vm12, %vm8589_vm0 }
 0x6fa   : > { %v8571_v22 = vmul.f32 %v14207_v42, %v8570_v23  ;;  %9268 = vpow2.f32 %v9201_v59  ;;  %vm8604_vm1 = vweird.f32 %v14233_v52  ;;  %vm8593_vm9 = vcmp.eq.f32.partialorder %v8592_v4, 8.507059e+37 }
 0x6fb   : > { %v8557_v19 = vadd.f32 %v14201_v29, %v8556_v12  ;;  %8444 = vmatpush.bf16.msrb.mxu0 %v14019_v62  ;;  %v9263_v63 = vpop.eup %9262  ;;  %v8600_v27 = vsub.f32 1.0, %v8599_v37  ;;  %8482 = vmatpush.bf16.msrb.mxu3 %v14861_v10  ;;  %v8586_v62 = vmul.f32 %v14223_v5, %v8585_v46  ;;  %vm8605_vm3 = vmor %vm8603_vm5, %vm8604_vm1 }
 0x6fc   : > { %v8572_v34 = vadd.f32 %v14207_v42, %v8571_v22  ;;  %v14265_v30 = vadd.f32 1.0, %v9263_v63  ;;  %v9265_v9 = vpop.eup %9264  ;;  %8458 = vmatmul.bf16.vlgmr.msrb.gmra.mxu1 %v14862_v39  ;;  %v8383_v36 = vpop.f32.mrf.mxu3  ;;  %8470 = vmatpush.bf16.msrb.mxu2 %v14865_v60 }
 0x6fd   : > { %v8561_v58 = vsel %vm14250_vm14, %v14201_v29, %v8557_v19  ;;  %v8601_v26 = vmul.f32 %v14233_v52, %v8600_v27  ;;  %v8587_v15 = vadd.f32 %v14223_v5, %v8586_v62  ;;  %v14303_v41 = vadd.f32 1.0, %v9265_v9 }
 0x6fe   : > { %v8576_v45 = vsel %vm8575_vm15, %v14207_v42, %v8572_v34  ;;  %8445 = vmatmul.bf16.vlgmr.msrb.gmra.mxu0 %v14862_v39  ;;  %9270 = vrcp.f32 %v14265_v30  ;;  %v8566_v55 = vsel %vm14225_vm10, %v14215_v50, %v8561_v58  ;;  %v8407_v51 = vpop.f32.mrf.mxu1  ;;  %v8595_v42 = vor.u32 1.1754944e-38, %v8594_v14 }
 0x6ff   : > { %v8581_v2 = vsel %vm14217_vm7, %v8580_v17, %v8576_v45  ;;  %v8602_v48 = vadd.f32 %v14233_v52, %v8601_v26  ;;  %8483 = vmatpush.bf16.msrb.mxu3 %v14866_v18  ;;  %v9267_v21 = vpop.eup %9266  ;;  %v8591_v1 = vsel %vm14289_vm2, %v14223_v5, %v8587_v15  ;;  %9272 = vrcp.f32 %v14303_v41  ;;  %8471 = vmatmul.bf16.vlgmr.msrb.gmra.mxu2 %v9355_v6 }
 0x700   : > { %v8809_v56 = vrot.slane %v8581_v2, 4  ;;  %v8394_v16 = vpop.f32.mrf.mxu0  ;;  %v9269_v31 = vpop.eup %9268  ;;  %v14316_v40 = vadd.f32 1.0, %v9267_v21  ;;  %v8596_v20 = vsel %vm8593_vm9, %v8595_v42, %v8591_v1  ;;  %v8408_v7 = vadd.f32 %v8407_v51, %v14154_v32 }
 0x701   : > { %v8395_v24 = vadd.f32 %v8394_v16, %v14154_v32  ;;  %v8606_v43 = vsel %vm8605_vm3, %v14233_v52, %v8602_v48  ;;  %v14320_v17 = vadd.f32 1.0, %v9269_v31  ;;  %v8622_v0 = vand.u32 2147483647, %v14265_v30 }
 0x702   : > { %v8817_v29 = vsel %vm5729_vm6, %v8566_v55, %v8809_v56  ;;  %v8611_v61 = vsel %vm8608_vm4, %v8610_v57, %v8606_v43  ;;  %8484 = vmatmul.bf16.vlgmr.msrb.gmra.mxu3 %v9355_v6  ;;  %9274 = vrcp.f32 %v14316_v40  ;;  %v8624_v54 = vand.u32 2147483648, %v14265_v30 }
 0x703   : > { %8833 = vst [vmem:[%s14283_s19] sm:$0x77] %v8817_v29  ;;  %v8810_v11 = vrot.slane %v8611_v61, 4  ;;  %v9202_v13 = vmul.f32 -1.442695, %v8395_v24  ;;  %9276 = vrcp.f32 %v14320_v17  ;;  %v8420_v49 = vpop.f32.mrf.mxu2  ;;  %v8637_v25 = vand.u32 2147483647, %v14303_v41 }
 0x704   : > { %v14318_v50 = vpop.eup %9270  ;;  %vm8618_vm8 = vweird.f32 %v14265_v30  ;;  %v8639_v19 = vand.u32 2147483648, %v14303_v41  ;;  %v9203_v46 = vmul.f32 -1.442695, %v8408_v7  ;;  %v8421_v44 = vadd.f32 %v8420_v49, %v14154_v32 }
 0x705   : > { %v8818_v28 = vsel %vm5729_vm6, %v8596_v20, %v8810_v11  ;;  %v8614_v5 = vmul.f32 %v14318_v50, %v14265_v30  ;;  %v8433_v8 = vpop.f32.mrf.mxu3  ;;  %v9273_v52 = vpop.eup %9272  ;;  %9278 = vpow2.f32 %v9202_v13  ;;  %vm14337_vm7 = vcmp.eq.f32.partialorder %v8622_v0, 8.507059e+37 }
 0x706   : > { %8834 = vst [vmem:[%s14283_s19 + $0x8] sm:$0x77] %v8818_v28  ;;  %v8409_v38 = vpop.f32.mrf.mxu1  ;;  %v8629_v37 = vmul.f32 %v9273_v52, %v14303_v41  ;;  %v8625_v63 = vor.u32 1.1754944e-38, %v8624_v54  ;;  %vm8633_vm10 = vweird.f32 %v14303_v41  ;;  %v8434_v34 = vadd.f32 %v8433_v8, %v14154_v32 }
 0x707   : > { %v8615_v23 = vsub.f32 1.0, %v8614_v5  ;;  %vm8619_vm11 = vweird.f32 %v14318_v50  ;;  %9280 = vpow2.f32 %v9203_v46  ;;  %v9204_v35 = vmul.f32 -1.442695, %v8421_v44 }
 0x708   : > { %v8396_v12 = vpop.f32.mrf.mxu0  ;;  %v8630_v53 = vsub.f32 1.0, %v8629_v37  ;;  %v14343_v27 = vpop.eup %9274  ;;  %vm8634_vm12 = vweird.f32 %v9273_v52  ;;  %vm14347_vm13 = vcmp.eq.f32.partialorder %v8637_v25, 8.507059e+37  ;;  %v8640_v26 = vor.u32 1.1754944e-38, %v8639_v19  ;;  %vm14357_vm15 = vmor %vm8618_vm8, %vm8619_vm11 }
 0x709   : > { %v8616_v22 = vmul.f32 %v14318_v50, %v8615_v23  ;;  %v9277_v10 = vpop.eup %9276  ;;  %v8644_v58 = vmul.f32 %v14343_v27, %v14316_v40  ;;  %vm8648_vm14 = vweird.f32 %v14316_v40  ;;  %9282 = vpow2.f32 %v9204_v35  ;;  %vm8635_vm0 = vmor %vm8633_vm10, %vm8634_vm12 }
 0x70a   : > { %v8631_v62 = vmul.f32 %v9273_v52, %v8630_v53  ;;  %v8659_v39 = vmul.f32 %v9277_v10, %v14320_v17  ;;  %v9205_v36 = vmul.f32 -1.442695, %v8434_v34  ;;  %v8654_v30 = vand.u32 2147483648, %v14316_v40 }
 0x70b   : > { %v8617_v3 = vadd.f32 %v14318_v50, %v8616_v22  ;;  %v9279_v45 = vpop.eup %9278  ;;  %v8645_v14 = vsub.f32 1.0, %v8644_v58  ;;  %v8422_v47 = vpop.f32.mrf.mxu2  ;;  %v8669_v16 = vand.u32 2147483648, %v14320_v17  ;;  %vm8649_vm1 = vweird.f32 %v14343_v27 }
 0x70c   : > { %v8632_v15 = vadd.f32 %v9273_v52, %v8631_v62  ;;  %v14361_v33 = vadd.f32 1.0, %v9279_v45  ;;  %v8660_v48 = vsub.f32 1.0, %v8659_v39  ;;  %vm8664_vm2 = vweird.f32 %v9277_v10  ;;  %vm14382_vm5 = vmor %vm8648_vm14, %vm8649_vm1 }
 0x70d   : > { %v8435_v56 = vpop.f32.mrf.mxu3  ;;  %v8621_v4 = vsel %vm14357_vm15, %v14318_v50, %v8617_v3  ;;  %v8646_v18 = vmul.f32 %v14343_v27, %v8645_v14  ;;  %v9281_v55 = vpop.eup %9280  ;;  %v8667_v41 = vand.u32 2147483647, %v14320_v17  ;;  %v8652_v42 = vand.u32 2147483647, %v14316_v40 }
 0x70e   : > { %v8636_v60 = vsel %vm8635_vm0, %v9273_v52, %v8632_v15  ;;  %9284 = vrcp.f32 %v14361_v33  ;;  %v8661_v24 = vmul.f32 %v9277_v10, %v8660_v48  ;;  %v8546_v29 = vadd.f32 1.0, %v9281_v55 }
 0x70f   : > { %v8641_v57 = vsel %vm14347_vm13, %v8640_v26, %v8636_v60  ;;  %v8647_v21 = vadd.f32 %v14343_v27, %v8646_v18  ;;  %9286 = vpow2.f32 %v9205_v36  ;;  %v9283_v1 = vpop.eup %9282  ;;  %v8626_v43 = vsel %vm14337_vm7, %v8625_v63, %v8621_v4 }
 0x710   : > { %v8811_v51 = vrot.slane %v8641_v57, 4  ;;  %v8662_v61 = vadd.f32 %v9277_v10, %v8661_v24  ;;  %vm8663_vm3 = vweird.f32 %v14320_v17  ;;  %v8670_v11 = vor.u32 1.1754944e-38, %v8669_v16 }
 0x711   : > { %vm8665_vm4 = vmor %vm8663_vm3, %vm8664_vm2  ;;  %9288 = vrcp.f32 %v8546_v29  ;;  %v8651_v50 = vsel %vm14382_vm5, %v14343_v27, %v8647_v21  ;;  %vm8668_vm9 = vcmp.eq.f32.partialorder %v8667_v41, 8.507059e+37  ;;  %v8655_v28 = vor.u32 1.1754944e-38, %v8654_v30 }
 0x712   : > { %v8819_v6 = vsel %vm5729_vm6, %v8626_v43, %v8811_v51  ;;  %v8666_v20 = vsel %vm8665_vm4, %v9277_v10, %v8662_v61  ;;  %v14393_v40 = vadd.f32 1.0, %v9283_v1  ;;  %vm8653_vm8 = vcmp.eq.f32.partialorder %v8652_v42, 8.507059e+37 }
 0x713   : > { %8835 = vst [vmem:[%s14283_s19 + $0x10] sm:$0x77] %v8819_v6  ;;  %v8671_v5 = vsel %vm8668_vm9, %v8670_v11, %v8666_v20  ;;  %v8656_v0 = vsel %vm8653_vm8, %v8655_v28, %v8651_v50  ;;  %v8697_v25 = vand.u32 2147483647, %v8546_v29  ;;  %v8699_v19 = vand.u32 2147483648, %v8546_v29 }
 0x714   : > { %v9285_v13 = vpop.eup %9284  ;;  %v8812_v17 = vrot.slane %v8671_v5, 4  ;;  %9290 = vrcp.f32 %v14393_v40  ;;  %vm8678_vm11 = vweird.f32 %v14361_v33  ;;  %v8684_v63 = vand.u32 2147483648, %v14361_v33 }
 0x715   : > { %v8674_v7 = vmul.f32 %v9285_v13, %v14361_v33  ;;  %v9287_v23 = vpop.eup %9286  ;;  %vm8679_vm7 = vweird.f32 %v9285_v13  ;;  %v8682_v34 = vand.u32 2147483647, %v14361_v33  ;;  %vm8693_vm13 = vweird.f32 %v8546_v29 }
 0x716   : > { %v8820_v54 = vsel %vm5729_vm6, %v8656_v0, %v8812_v17  ;;  %v8548_v8 = vadd.f32 1.0, %v9287_v23  ;;  %vm14402_vm12 = vmor %vm8678_vm11, %vm8679_vm7  ;;  %vm8698_vm15 = vcmp.eq.f32.partialorder %v8697_v25, 8.507059e+37  ;;  %v8700_v10 = vor.u32 1.1754944e-38, %v8699_v19 }
 0x717   : > { %v8675_v49 = vsub.f32 1.0, %v8674_v7  ;;  %v9289_v52 = vpop.eup %9288  ;;  %8836 = vst [vmem:[%s14283_s19 + $0x18] sm:$0x77] %v8820_v54  ;;  %v8685_v26 = vor.u32 1.1754944e-38, %v8684_v63  ;;  %vm8683_vm0 = vcmp.eq.f32.partialorder %v8682_v34, 8.507059e+37  ;;  %vm8708_vm5 = vweird.f32 %v14393_v40 }
 0x718   : > { %v8689_v38 = vmul.f32 %v9289_v52, %v8546_v29  ;;  %9292 = vrcp.f32 %v8548_v8  ;;  %vm8694_vm10 = vweird.f32 %v9289_v52  ;;  %v8727_v33 = vand.u32 2147483647, %v8548_v8 }
 0x719   : > { %v8676_v12 = vmul.f32 %v9285_v13, %v8675_v49  ;;  %vm8695_vm14 = vmor %vm8693_vm13, %vm8694_vm10  ;;  %v8729_v36 = vand.u32 2147483648, %v8548_v8  ;;  %v8714_v30 = vand.u32 2147483648, %v14393_v40  ;;  %v8712_v48 = vand.u32 2147483647, %v14393_v40 }
 0x71a   : > { %v8690_v22 = vsub.f32 1.0, %v8689_v38  ;;  %v9291_v37 = vpop.eup %9290  ;;  %vm8723_vm4 = vweird.f32 %v8548_v8  ;;  %vm8728_vm8 = vcmp.eq.f32.partialorder %v8727_v33, 8.507059e+37 }
 0x71b   : > { %v8677_v46 = vadd.f32 %v9285_v13, %v8676_v12  ;;  %v8704_v59 = vmul.f32 %v9291_v37, %v14393_v40  ;;  %vm8709_vm1 = vweird.f32 %v9291_v37  ;;  %v8730_v60 = vor.u32 1.1754944e-38, %v8729_v36 }
 0x71c   : > { %v8691_v44 = vmul.f32 %v9289_v52, %v8690_v22  ;;  %vm8710_vm3 = vmor %vm8708_vm5, %vm8709_vm1  ;;  %v8715_v57 = vor.u32 1.1754944e-38, %v8714_v30  ;;  %vm8713_vm7 = vcmp.eq.f32.partialorder %v8712_v48, 8.507059e+37 }
 0x71d   : > { %v8705_v3 = vsub.f32 1.0, %v8704_v59  ;;  %v8681_v62 = vsel %vm14402_vm12, %v9285_v13, %v8677_v46 }
 0x71e   : > { %v8692_v27 = vadd.f32 %v9289_v52, %v8691_v44  ;;  %v9293_v35 = vpop.eup %9292  ;;  %v8686_v14 = vsel %vm8683_vm0, %v8685_v26, %v8681_v62 }
 0x71f   : > { %v8706_v58 = vmul.f32 %v9291_v37, %v8705_v3  ;;  %v8719_v45 = vmul.f32 %v9293_v35, %v8548_v8  ;;  %vm8724_vm2 = vweird.f32 %v9293_v35 }
 0x720   : > { %v8696_v9 = vsel %vm8695_vm14, %v9289_v52, %v8692_v27  ;;  %vm8725_vm9 = vmor %vm8723_vm4, %vm8724_vm2 }
 0x721   : > { %v8701_v39 = vsel %vm8698_vm15, %v8700_v10, %v8696_v9  ;;  %v8720_v15 = vsub.f32 1.0, %v8719_v45  ;;  %v8707_v47 = vadd.f32 %v9291_v37, %v8706_v58 }
 0x722   : > { %v8813_v2 = vrot.slane %v8701_v39, 4 }
 0x723   : > { %v8721_v4 = vmul.f32 %v9293_v35, %v8720_v15  ;;  %v8711_v18 = vsel %vm8710_vm3, %v9291_v37, %v8707_v47 }
 0x724   : > { %v8821_v56 = vsel %vm5729_vm6, %v8686_v14, %v8813_v2  ;;  %v8716_v51 = vsel %vm8713_vm7, %v8715_v57, %v8711_v18 }
 0x725   : > { %8837 = vst [vmem:[%s14283_s19 + $0x20] sm:$0x77] %v8821_v56  ;;  %v8722_v16 = vadd.f32 %v9293_v35, %v8721_v4 }
 0x727   : > { %v8726_v55 = vsel %vm8725_vm9, %v9293_v35, %v8722_v16 }
 0x728   : > { %v8731_v24 = vsel %vm8728_vm8, %v8730_v60, %v8726_v55 }
 0x729   : > { %v8814_v41 = vrot.slane %v8731_v24, 4 }
 0x72b   : > { %v8822_v21 = vsel %vm5729_vm6, %v8716_v51, %v8814_v41 }
 0x72c   : > { %8838 = vst [vmem:[%s14283_s19 + $0x28] sm:$0x77] %v8822_v21 }
 0x779   : > { %v8459_v1 = vpop.f32.mrf.mxu1 }
 0x77a   : > { %v8460_v31 = vadd.f32 %v8459_v1, %v14154_v32 }
 0x77b   : > { %v8446_v29 = vpop.f32.mrf.mxu0 }
 0x77c   : > { %v8447_v43 = vadd.f32 %v8446_v29, %v14154_v32  ;;  %v9207_v61 = vmul.f32 -1.442695, %v8460_v31 }
 0x77e   : > { %v9206_v42 = vmul.f32 -1.442695, %v8447_v43 }
 0x780   : > { %9294 = vpow2.f32 %v9206_v42 }
 0x781   : > { %9296 = vpow2.f32 %v9207_v61  ;;  %v8461_v6 = vpop.f32.mrf.mxu1 }
 0x782   : > { %v8472_v20 = vpop.f32.mrf.mxu2 }
 0x783   : > { %v8448_v11 = vpop.f32.mrf.mxu0  ;;  %v8473_v40 = vadd.f32 %v8472_v20, %v14154_v32 }
 0x785   : > { %v8485_v13 = vpop.f32.mrf.mxu3  ;;  %v9208_v23 = vmul.f32 -1.442695, %v8473_v40 }
 0x786   : > { %v9295_v50 = vpop.eup %9294  ;;  %v8486_v17 = vadd.f32 %v8485_v13, %v14154_v32 }
 0x787   : > { %v9297_v28 = vpop.eup %9296  ;;  %v8549_v5 = vadd.f32 1.0, %v9295_v50 }
 0x788   : > { %v8550_v7 = vadd.f32 1.0, %v9297_v28  ;;  %v9209_v0 = vmul.f32 -1.442695, %v8486_v17 }
 0x789   : > { %9298 = vrcp.f32 %v8549_v5  ;;  %vm8738_vm12 = vweird.f32 %v8549_v5  ;;  %v8744_v27 = vand.u32 2147483648, %v8549_v5  ;;  %v8742_v35 = vand.u32 2147483647, %v8549_v5 }
 0x78a   : > { %9300 = vrcp.f32 %v8550_v7  ;;  %v8474_v54 = vpop.f32.mrf.mxu2  ;;  %v8759_v32 = vand.u32 2147483648, %v8550_v7  ;;  %v8757_v63 = vand.u32 2147483647, %v8550_v7  ;;  %vm8753_vm14 = vweird.f32 %v8550_v7 }
 0x78b   : > { %9302 = vpow2.f32 %v9208_v23  ;;  %v8745_v45 = vor.u32 1.1754944e-38, %v8744_v27  ;;  %vm8743_vm1 = vcmp.eq.f32.partialorder %v8742_v35, 8.507059e+37 }
 0x78c   : > { %9304 = vpow2.f32 %v9209_v0  ;;  %v8760_v62 = vor.u32 1.1754944e-38, %v8759_v32  ;;  %vm8758_vm0 = vcmp.eq.f32.partialorder %v8757_v63, 8.507059e+37 }
 0x78d   : > { %v8487_v49 = vpop.f32.mrf.mxu3 }
 0x78f   : > { %v9299_v8 = vpop.eup %9298 }
 0x790   : > { %v9301_v52 = vpop.eup %9300  ;;  %v8734_v12 = vmul.f32 %v9299_v8, %v8549_v5  ;;  %vm8739_vm10 = vweird.f32 %v9299_v8 }
 0x791   : > { %v8749_v38 = vmul.f32 %v9301_v52, %v8550_v7  ;;  %v9303_v37 = vpop.eup %9302  ;;  %vm8754_vm11 = vweird.f32 %v9301_v52  ;;  %vm14420_vm13 = vmor %vm8738_vm12, %vm8739_vm10 }
 0x792   : > { %v8735_v22 = vsub.f32 1.0, %v8734_v12  ;;  %v9305_v19 = vpop.eup %9304  ;;  %v8551_v44 = vadd.f32 1.0, %v9303_v37  ;;  %vm8755_vm15 = vmor %vm8753_vm14, %vm8754_vm11 }
 0x793   : > { %v8750_v25 = vsub.f32 1.0, %v8749_v38  ;;  %v8552_v53 = vadd.f32 1.0, %v9305_v19 }
 0x794   : > { %v8736_v46 = vmul.f32 %v9299_v8, %v8735_v22  ;;  %9306 = vrcp.f32 %v8551_v44  ;;  %vm8768_vm3 = vweird.f32 %v8551_v44  ;;  %v8774_v55 = vand.u32 2147483648, %v8551_v44 }
 0x795   : > { %v8751_v59 = vmul.f32 %v9301_v52, %v8750_v25  ;;  %9308 = vrcp.f32 %v8552_v53  ;;  %v8789_v48 = vand.u32 2147483648, %v8552_v53  ;;  %v8787_v60 = vand.u32 2147483647, %v8552_v53 }
 0x796   : > { %v8737_v34 = vadd.f32 %v9299_v8, %v8736_v46  ;;  %v8772_v57 = vand.u32 2147483647, %v8551_v44  ;;  %vm8783_vm9 = vweird.f32 %v8552_v53  ;;  %v8775_v29 = vor.u32 1.1754944e-38, %v8774_v55 }
 0x797   : > { %v8752_v10 = vadd.f32 %v9301_v52, %v8751_v59  ;;  %v8790_v41 = vor.u32 1.1754944e-38, %v8789_v48  ;;  %vm8788_vm7 = vcmp.eq.f32.partialorder %v8787_v60, 8.507059e+37 }
 0x798   : > { %v8741_v9 = vsel %vm14420_vm13, %v9299_v8, %v8737_v34  ;;  %vm8773_vm10 = vcmp.eq.f32.partialorder %v8772_v57, 8.507059e+37 }
 0x799   : > { %v8756_v58 = vsel %vm8755_vm15, %v9301_v52, %v8752_v10  ;;  %v8746_v15 = vsel %vm8743_vm1, %v8745_v45, %v8741_v9 }
 0x79a   : > { %v8761_v26 = vsel %vm8758_vm0, %v8760_v62, %v8756_v58  ;;  %v9307_v2 = vpop.eup %9306 }
 0x79b   : > { %v8815_v39 = vrot.slane %v8761_v26, 4  ;;  %v9309_v14 = vpop.eup %9308  ;;  %v8764_v36 = vmul.f32 %v9307_v2, %v8551_v44  ;;  %vm8769_vm2 = vweird.f32 %v9307_v2 }
 0x79c   : > { %v8779_v56 = vmul.f32 %v9309_v14, %v8552_v53  ;;  %vm8784_vm5 = vweird.f32 %v9309_v14  ;;  %vm8770_vm4 = vmor %vm8768_vm3, %vm8769_vm2 }
 0x79d   : > { %v8823_v33 = vsel %vm5729_vm6, %v8746_v15, %v8815_v39  ;;  %v8765_v47 = vsub.f32 1.0, %v8764_v36  ;;  %vm8785_vm8 = vmor %vm8783_vm9, %vm8784_vm5 }
 0x79e   : > { %8839 = vst [vmem:[%s14283_s19 + $0x30] sm:$0x77] %v8823_v33  ;;  %v8780_v4 = vsub.f32 1.0, %v8779_v56 }
 0x79f   : > { %v8766_v30 = vmul.f32 %v9307_v2, %v8765_v47 }
 0x7a0   : > { %v8781_v16 = vmul.f32 %v9309_v14, %v8780_v4 }
 0x7a1   : > { %v8767_v18 = vadd.f32 %v9307_v2, %v8766_v30 }
 0x7a2   : > { %v8782_v24 = vadd.f32 %v9309_v14, %v8781_v16 }
 0x7a3   : > { %v8771_v51 = vsel %vm8770_vm4, %v9307_v2, %v8767_v18 }
 0x7a4   : > { %v8786_v21 = vsel %vm8785_vm8, %v9309_v14, %v8782_v24  ;;  %v8776_v31 = vsel %vm8773_vm10, %v8775_v29, %v8771_v51 }
 0x7a5   : > { %v8791_v1 = vsel %vm8788_vm7, %v8790_v41, %v8786_v21 }
 0x7a6   : > { %v8816_v43 = vrot.slane %v8791_v1, 4 }
 0x7a8   : > { %v8824_v42 = vsel %vm5729_vm6, %v8776_v31, %v8816_v43 }
 0x7a9   : > { %8840 = vst [vmem:[%s14283_s19 + $0x38] sm:$0x77] %v8824_v42 }
 0x7aa PF: > { %s16_s21 = sadd.s32 1, %s9362_s21  }
 0x7ab   : > { %p13_p4 = scmp.ge.s32.totalorder %s16_s21, 4  }
 0x7ad   :  { %15 = sbr.rel (!%p13_p4) target bundleno = 1 (0x1), region = 74 }

</bundles_post_ra>
